<compile_context>
chip_gen: v6e
topology: v6e:2x2x1
jax: 0.10.0
libtpu: 0.0.40
codegen_flags: <defaults>
</compile_context>

<pallas_src>
import math
import functools

import jax
import jax.numpy as jnp
from jax.experimental import pallas as pl

# ---------------- model config ----------------
INPUT_DIM = 32      # src vocab size
OUTPUT_DIM = 32     # trg vocab size
HID_DIM = 32
N_LAYERS = 2
N_HEADS = 4
HEAD_DIM = HID_DIM // N_HEADS
PF_DIM = 64
MAX_LEN = 16
SRC_PAD_IDX = 0
TRG_PAD_IDX = 0
LN_EPS = 1e-5
NEG_INF = -1e10

# fixed ordering of per-layer (stacked over N_LAYERS) weights fed to the kernel
ENC_KEYS = ("wq", "bq", "wkv", "bkv", "wo", "bo",
            "ln1_g", "ln1_b", "fc1_w", "fc1_b", "fc2_w", "fc2_b",
            "ln2_g", "ln2_b")
DEC_KEYS = ("swq", "sbq", "swkv", "sbkv", "swo", "sbo",
            "cwq", "cbq", "cwkv", "cbkv", "cwo", "cbo",
            "ln1_g", "ln1_b", "ln2_g", "ln2_b", "ln3_g", "ln3_b",
            "fc1_w", "fc1_b", "fc2_w", "fc2_b")


# ---------------- fused Pallas kernel ----------------
def _fused_seq2seq_kernel(*args, batch, src_len, trg_len):
    n_in = 5 + len(ENC_KEYS) + len(DEC_KEYS) + 2
    in_refs = args[:n_in]
    out_ref, attn_ref = args[n_in:]

    src_ref, trg_ref, eb_ref, dsb_ref, dcb_ref = in_refs[:5]
    e = dict(zip(ENC_KEYS, in_refs[5:5 + len(ENC_KEYS)]))
    d = dict(zip(DEC_KEYS,
                 in_refs[5 + len(ENC_KEYS):5 + len(ENC_KEYS) + len(DEC_KEYS)]))
    fco_w_ref, fco_b_ref = in_refs[-2:]

    inv_scale = 1.0 / math.sqrt(HEAD_DIM)

    def layer_norm(x, g, b):
        mean = jnp.mean(x, axis=-1, keepdims=True)
        var = jnp.mean(jnp.square(x - mean), axis=-1, keepdims=True)
        return (x - mean) * jax.lax.rsqrt(var + LN_EPS) * g + b

    def mha(x_q, x_kv, lq, lk, wq, bq, wkv, bkv, wo, bo, bias, store_attn):
        # x_q: [batch*lq, HID], x_kv: [batch*lk, HID], bias: [batch*lq, lk]
        q = jnp.dot(x_q, wq, preferred_element_type=jnp.float32) + bq
        kv = jnp.dot(x_kv, wkv, preferred_element_type=jnp.float32) + bkv
        k = kv[:, :HID_DIM]
        v = kv[:, HID_DIM:]
        outs = []
        for b in range(batch):                       # static unroll (batch=2)
            q_b = q[b * lq:(b + 1) * lq, :]          # [lq, HID]
            k_b = k[b * lk:(b + 1) * lk, :]          # [lk, HID]
            v_b = v[b * lk:(b + 1) * lk, :]
            bias_b = bias[b * lq:(b + 1) * lq, :]    # [lq, lk]
            acc = jnp.zeros((lq, HID_DIM), jnp.float32)
            for h in range(N_HEADS):                 # static unroll (4 heads)
                lo = h * HEAD_DIM
                q_h = q_b[:, lo:lo + HEAD_DIM]       # [lq, HD]
                k_h = k_b[:, lo:lo + HEAD_DIM]       # [lk, HD]
                v_h = v_b[:, lo:lo + HEAD_DIM]
                # q_h @ k_h.T  (contract last dims) -- MXU-friendly form
                energy = jax.lax.dot_general(
                    q_h, k_h, (((1,), (1,)), ((), ())),
                    preferred_element_type=jnp.float32) * inv_scale + bias_b
                energy = energy - jnp.max(energy, axis=-1, keepdims=True)
                p = jnp.exp(energy)
                attn = p * pl.reciprocal(
                    jnp.sum(p, axis=-1, keepdims=True), approx=True)
                if store_attn:
                    attn_ref[b * N_HEADS + h] = attn.astype(attn_ref.dtype)
                o_h = jnp.dot(attn, v_h, preferred_element_type=jnp.float32)
                # fold the output projection in per-head (avoids concat of heads)
                acc = acc + jnp.dot(o_h, wo[lo:lo + HEAD_DIM, :],
                                    preferred_element_type=jnp.float32)
            outs.append(acc + bo)
        return jnp.concatenate(outs, axis=0)         # [batch*lq, HID]

    def ffn(x, w1, b1, w2, b2):
        h = jnp.maximum(
            jnp.dot(x, w1, preferred_element_type=jnp.float32) + b1, 0.0)
        return jnp.dot(h, w2, preferred_element_type=jnp.float32) + b2

    # ---------------- encoder ----------------
    x = src_ref[...]
    eb = eb_ref[...]
    for l in range(N_LAYERS):
        a = mha(x, x, src_len, src_len,
                e["wq"][l], e["bq"][l], e["wkv"][l], e["bkv"][l],
                e["wo"][l], e["bo"][l], eb, store_attn=False)
        x = layer_norm(x + a, e["ln1_g"][l], e["ln1_b"][l])
        f = ffn(x, e["fc1_w"][l], e["fc1_b"][l], e["fc2_w"][l], e["fc2_b"][l])
        x = layer_norm(x + f, e["ln2_g"][l], e["ln2_b"][l])
    enc_out = x

    # ---------------- decoder ----------------
    y = trg_ref[...]
    dsb = dsb_ref[...]
    dcb = dcb_ref[...]
    for l in range(N_LAYERS):
        a = mha(y, y, trg_len, trg_len,
                d["swq"][l], d["sbq"][l], d["swkv"][l], d["sbkv"][l],
                d["swo"][l], d["sbo"][l], dsb, store_attn=False)
        y = layer_norm(y + a, d["ln1_g"][l], d["ln1_b"][l])
        a = mha(y, enc_out, trg_len, src_len,
                d["cwq"][l], d["cbq"][l], d["cwkv"][l], d["cbkv"][l],
                d["cwo"][l], d["cbo"][l], dcb,
                store_attn=(l == N_LAYERS - 1))
        y = layer_norm(y + a, d["ln2_g"][l], d["ln2_b"][l])
        f = ffn(y, d["fc1_w"][l], d["fc1_b"][l], d["fc2_w"][l], d["fc2_b"][l])
        y = layer_norm(y + f, d["ln3_g"][l], d["ln3_b"][l])

    out_ref[...] = (jnp.dot(y, fco_w_ref[...],
                            preferred_element_type=jnp.float32)
                    + fco_b_ref[...]).astype(out_ref.dtype)


# ---------------- wrapper (glue: embeddings + additive masks) ----------------
def seq2seq_forward(params, src, trg):
    """Mirrors Seq2Seq.forward: returns (output, attention)."""
    B, Ls = src.shape
    _, Lt = trg.shape
    enc_p = params["encoder"]
    dec_p = params["decoder"]

    scale = math.sqrt(HID_DIM)
    src_x = (jnp.take(enc_p["tok_emb"], src, axis=0) * scale
             + enc_p["pos_emb"][None, :Ls, :]).reshape(B * Ls, HID_DIM)
    trg_x = (jnp.take(dec_p["tok_emb"], trg, axis=0) * scale
             + dec_p["pos_emb"][None, :Lt, :]).reshape(B * Lt, HID_DIM)

    neg = jnp.float32(NEG_INF)
    zero = jnp.float32(0.0)
    src_keep = (src != SRC_PAD_IDX)                       # [B, Ls]
    trg_keep = (trg != TRG_PAD_IDX)                       # [B, Lt]
    causal = jnp.tril(jnp.ones((Lt, Lt), dtype=bool))
    # additive biases (0 keep, -1e10 masked) in the row-flattened layout
    enc_bias = jnp.broadcast_to(
        jnp.where(src_keep[:, None, :], zero, neg),
        (B, Ls, Ls)).reshape(B * Ls, Ls)
    dself_bias = jnp.where(
        trg_keep[:, None, :] & causal[None, :, :], zero, neg).reshape(B * Lt, Lt)
    dcross_bias = jnp.broadcast_to(
        jnp.where(src_keep[:, None, :], zero, neg),
        (B, Lt, Ls)).reshape(B * Lt, Ls)

    args = [src_x, trg_x, enc_bias, dself_bias, dcross_bias]
    args += [enc_p[k] for k in ENC_KEYS]
    args += [dec_p[k] for k in DEC_KEYS]
    args += [dec_p["fc_out_w"], dec_p["fc_out_b"]]

    kernel = functools.partial(_fused_seq2seq_kernel,
                               batch=B, src_len=Ls, trg_len=Lt)
    out2d, attn3d = pl.pallas_call(
        kernel,
        out_shape=(
            jax.ShapeDtypeStruct((B * Lt, OUTPUT_DIM), jnp.float32),
            jax.ShapeDtypeStruct((B * N_HEADS, Lt, Ls), jnp.float32),
        ),
    )(*args)

    output = out2d.reshape(B, Lt, OUTPUT_DIM)
    attention = attn3d.reshape(B, N_HEADS, Lt, Ls)
    return output, attention


# ---------------- deterministic parameter init ----------------
def init_params(key):
    keys = iter(jax.random.split(key, 256))

    def xavier(shape):
        fan_in, fan_out = shape[-2], shape[-1]
        bound = math.sqrt(6.0 / (fan_in + fan_out))
        return jax.random.uniform(next(keys), shape, jnp.float32, -bound, bound)

    def stacked(shape):
        return jnp.stack([xavier(shape) for _ in range(N_LAYERS)])

    def stacked_kv():
        return jnp.stack([
            jnp.concatenate([xavier((HID_DIM, HID_DIM)),
                             xavier((HID_DIM, HID_DIM))], axis=1)
            for _ in range(N_LAYERS)])

    def zeros(*s):
        return jnp.zeros(s, jnp.float32)

    def ones(*s):
        return jnp.ones(s, jnp.float32)

    def attn_params(prefix):
        return {
            prefix + "wq": stacked((HID_DIM, HID_DIM)),
            prefix + "bq": zeros(N_LAYERS, 1, HID_DIM),
            prefix + "wkv": stacked_kv(),
            prefix + "bkv": zeros(N_LAYERS, 1, 2 * HID_DIM),
            prefix + "wo": stacked((HID_DIM, HID_DIM)),
            prefix + "bo": zeros(N_LAYERS, 1, HID_DIM),
        }

    def ffn_ln_params(n_ln):
        p = {
            "fc1_w": stacked((HID_DIM, PF_DIM)),
            "fc1_b": zeros(N_LAYERS, 1, PF_DIM),
            "fc2_w": stacked((PF_DIM, HID_DIM)),
            "fc2_b": zeros(N_LAYERS, 1, HID_DIM),
        }
        for i in range(1, n_ln + 1):
            p[f"ln{i}_g"] = ones(N_LAYERS, 1, HID_DIM)
            p[f"ln{i}_b"] = zeros(N_LAYERS, 1, HID_DIM)
        return p

    encoder = dict(tok_emb=xavier((INPUT_DIM, HID_DIM)),
                   pos_emb=xavier((MAX_LEN, HID_DIM)),
                   **attn_params(""), **ffn_ln_params(2))
    decoder = dict(tok_emb=xavier((OUTPUT_DIM, HID_DIM)),
                   pos_emb=xavier((MAX_LEN, HID_DIM)),
                   fc_out_w=xavier((HID_DIM, OUTPUT_DIM)),
                   fc_out_b=jnp.zeros((1, OUTPUT_DIM), jnp.float32),
                   **attn_params("s"), **attn_params("c"), **ffn_ln_params(3))
    return dict(encoder=encoder, decoder=decoder)


# ---------------- main ----------------
if __name__ == "__main__":
    B, SRC_LEN, TRG_LEN = 2, 8, 8
    root = jax.random.PRNGKey(0)
    k_params, k_src, k_trg = jax.random.split(root, 3)

    params = init_params(k_params)
    # token ids; pad index 0 may appear, exercising the masks
    src = jax.random.randint(k_src, (B, SRC_LEN), 0, INPUT_DIM, dtype=jnp.int32)
    trg = jax.random.randint(k_trg, (B, TRG_LEN), 0, OUTPUT_DIM, dtype=jnp.int32)

    output, attention = jax.jit(seq2seq_forward)(params, src, trg)
    jax.block_until_ready((output, attention))

    assert output.shape == (B, TRG_LEN, OUTPUT_DIM)
    assert attention.shape == (B, N_HEADS, TRG_LEN, SRC_LEN)
    assert bool(jnp.all(jnp.isfinite(output)))
    assert bool(jnp.all(jnp.isfinite(attention)))
    print("KERNEL_OK")
</pallas_src>

<mosaic_0001>
module attributes {stable_mosaic.version = 11 : i64} {
  func.func @_fused_seq2seq_kernel(%arg0: memref<16x32xf32, #tpu.memory_space<vmem>>, %arg1: memref<16x32xf32, #tpu.memory_space<vmem>>, %arg2: memref<16x8xf32, #tpu.memory_space<vmem>>, %arg3: memref<16x8xf32, #tpu.memory_space<vmem>>, %arg4: memref<16x8xf32, #tpu.memory_space<vmem>>, %arg5: memref<2x32x32xf32, #tpu.memory_space<vmem>>, %arg6: memref<2x1x32xf32, #tpu.memory_space<vmem>>, %arg7: memref<2x32x64xf32, #tpu.memory_space<vmem>>, %arg8: memref<2x1x64xf32, #tpu.memory_space<vmem>>, %arg9: memref<2x32x32xf32, #tpu.memory_space<vmem>>, %arg10: memref<2x1x32xf32, #tpu.memory_space<vmem>>, %arg11: memref<2x1x32xf32, #tpu.memory_space<vmem>>, %arg12: memref<2x1x32xf32, #tpu.memory_space<vmem>>, %arg13: memref<2x32x64xf32, #tpu.memory_space<vmem>>, %arg14: memref<2x1x64xf32, #tpu.memory_space<vmem>>, %arg15: memref<2x64x32xf32, #tpu.memory_space<vmem>>, %arg16: memref<2x1x32xf32, #tpu.memory_space<vmem>>, %arg17: memref<2x1x32xf32, #tpu.memory_space<vmem>>, %arg18: memref<2x1x32xf32, #tpu.memory_space<vmem>>, %arg19: memref<2x32x32xf32, #tpu.memory_space<vmem>>, %arg20: memref<2x1x32xf32, #tpu.memory_space<vmem>>, %arg21: memref<2x32x64xf32, #tpu.memory_space<vmem>>, %arg22: memref<2x1x64xf32, #tpu.memory_space<vmem>>, %arg23: memref<2x32x32xf32, #tpu.memory_space<vmem>>, %arg24: memref<2x1x32xf32, #tpu.memory_space<vmem>>, %arg25: memref<2x32x32xf32, #tpu.memory_space<vmem>>, %arg26: memref<2x1x32xf32, #tpu.memory_space<vmem>>, %arg27: memref<2x32x64xf32, #tpu.memory_space<vmem>>, %arg28: memref<2x1x64xf32, #tpu.memory_space<vmem>>, %arg29: memref<2x32x32xf32, #tpu.memory_space<vmem>>, %arg30: memref<2x1x32xf32, #tpu.memory_space<vmem>>, %arg31: memref<2x1x32xf32, #tpu.memory_space<vmem>>, %arg32: memref<2x1x32xf32, #tpu.memory_space<vmem>>, %arg33: memref<2x1x32xf32, #tpu.memory_space<vmem>>, %arg34: memref<2x1x32xf32, #tpu.memory_space<vmem>>, %arg35: memref<2x1x32xf32, #tpu.memory_space<vmem>>, %arg36: memref<2x1x32xf32, #tpu.memory_space<vmem>>, %arg37: memref<2x32x64xf32, #tpu.memory_space<vmem>>, %arg38: memref<2x1x64xf32, #tpu.memory_space<vmem>>, %arg39: memref<2x64x32xf32, #tpu.memory_space<vmem>>, %arg40: memref<2x1x32xf32, #tpu.memory_space<vmem>>, %arg41: memref<32x32xf32, #tpu.memory_space<vmem>>, %arg42: memref<1x32xf32, #tpu.memory_space<vmem>>, %arg43: memref<16x32xf32, #tpu.memory_space<vmem>>, %arg44: memref<8x8x8xf32, #tpu.memory_space<vmem>>) attributes {dimension_semantics = [], scalar_prefetch = 0 : i64, scratch_operands = 0 : i64, tpu.core_type = #tpu.core_type<tc>} {
    %c0 = arith.constant 0 : index
    %c0_0 = arith.constant 0 : index
    %0 = vector.load %arg0[%c0, %c0_0] : memref<16x32xf32, #tpu.memory_space<vmem>>, vector<16x32xf32>
    %c0_1 = arith.constant 0 : index
    %c0_2 = arith.constant 0 : index
    %1 = vector.load %arg2[%c0_1, %c0_2] : memref<16x8xf32, #tpu.memory_space<vmem>>, vector<16x8xf32>
    %c0_3 = arith.constant 0 : index
    %c0_4 = arith.constant 0 : index
    %c0_5 = arith.constant 0 : index
    %2 = vector.load %arg5[%c0_3, %c0_4, %c0_5] : memref<2x32x32xf32, #tpu.memory_space<vmem>>, vector<1x32x32xf32>
    %3 = vector.shape_cast %2 : vector<1x32x32xf32> to vector<32x32xf32>
    %c0_6 = arith.constant 0 : index
    %c0_7 = arith.constant 0 : index
    %c0_8 = arith.constant 0 : index
    %4 = vector.load %arg6[%c0_6, %c0_7, %c0_8] : memref<2x1x32xf32, #tpu.memory_space<vmem>>, vector<1x1x32xf32>
    %5 = vector.shape_cast %4 : vector<1x1x32xf32> to vector<1x32xf32>
    %c0_9 = arith.constant 0 : index
    %c0_10 = arith.constant 0 : index
    %c0_11 = arith.constant 0 : index
    %6 = vector.load %arg7[%c0_9, %c0_10, %c0_11] : memref<2x32x64xf32, #tpu.memory_space<vmem>>, vector<1x32x64xf32>
    %7 = vector.shape_cast %6 : vector<1x32x64xf32> to vector<32x64xf32>
    %c0_12 = arith.constant 0 : index
    %c0_13 = arith.constant 0 : index
    %c0_14 = arith.constant 0 : index
    %8 = vector.load %arg8[%c0_12, %c0_13, %c0_14] : memref<2x1x64xf32, #tpu.memory_space<vmem>>, vector<1x1x64xf32>
    %9 = vector.shape_cast %8 : vector<1x1x64xf32> to vector<1x64xf32>
    %c0_15 = arith.constant 0 : index
    %c0_16 = arith.constant 0 : index
    %c0_17 = arith.constant 0 : index
    %10 = vector.load %arg9[%c0_15, %c0_16, %c0_17] : memref<2x32x32xf32, #tpu.memory_space<vmem>>, vector<1x32x32xf32>
    %11 = vector.shape_cast %10 : vector<1x32x32xf32> to vector<32x32xf32>
    %c0_18 = arith.constant 0 : index
    %c0_19 = arith.constant 0 : index
    %c0_20 = arith.constant 0 : index
    %12 = vector.load %arg10[%c0_18, %c0_19, %c0_20] : memref<2x1x32xf32, #tpu.memory_space<vmem>>, vector<1x1x32xf32>
    %13 = vector.shape_cast %12 : vector<1x1x32xf32> to vector<1x32xf32>
    %cst = arith.constant dense<0.000000e+00> : vector<16x32xf32>
    %14 = tpu.matmul %0, %3, %cst {dimension_numbers = #tpu.dot_dimension_numbers<[1], [0], [0], [1], [0, 0, 1, 1], [], []>} : vector<16x32xf32>, vector<32x32xf32>, vector<16x32xf32> -> vector<16x32xf32>
    %15 = vector.broadcast %5 : vector<1x32xf32> to vector<16x32xf32>
    %16 = arith.addf %14, %15 : vector<16x32xf32>
    %cst_21 = arith.constant dense<0.000000e+00> : vector<16x64xf32>
    %17 = tpu.matmul %0, %7, %cst_21 {dimension_numbers = #tpu.dot_dimension_numbers<[1], [0], [0], [1], [0, 0, 1, 1], [], []>} : vector<16x32xf32>, vector<32x64xf32>, vector<16x64xf32> -> vector<16x64xf32>
    %18 = vector.broadcast %9 : vector<1x64xf32> to vector<16x64xf32>
    %19 = arith.addf %17, %18 : vector<16x64xf32>
    %20 = vector.extract_strided_slice %19 {offsets = [0, 0], sizes = [16, 32], strides = [1, 1]} : vector<16x64xf32> to vector<16x32xf32>
    %21 = vector.extract_strided_slice %19 {offsets = [0, 32], sizes = [16, 32], strides = [1, 1]} : vector<16x64xf32> to vector<16x32xf32>
    %22 = vector.extract_strided_slice %16 {offsets = [0, 0], sizes = [8, 32], strides = [1, 1]} : vector<16x32xf32> to vector<8x32xf32>
    %23 = vector.extract_strided_slice %20 {offsets = [0, 0], sizes = [8, 32], strides = [1, 1]} : vector<16x32xf32> to vector<8x32xf32>
    %24 = vector.extract_strided_slice %21 {offsets = [0, 0], sizes = [8, 32], strides = [1, 1]} : vector<16x32xf32> to vector<8x32xf32>
    %25 = vector.extract_strided_slice %1 {offsets = [0, 0], sizes = [8, 8], strides = [1, 1]} : vector<16x8xf32> to vector<8x8xf32>
    %cst_22 = arith.constant 0.000000e+00 : f32
    %26 = vector.broadcast %cst_22 : f32 to vector<8x32xf32>
    %27 = vector.extract_strided_slice %22 {offsets = [0, 0], sizes = [8, 8], strides = [1, 1]} : vector<8x32xf32> to vector<8x8xf32>
    %28 = vector.extract_strided_slice %23 {offsets = [0, 0], sizes = [8, 8], strides = [1, 1]} : vector<8x32xf32> to vector<8x8xf32>
    %29 = vector.extract_strided_slice %24 {offsets = [0, 0], sizes = [8, 8], strides = [1, 1]} : vector<8x32xf32> to vector<8x8xf32>
    %cst_23 = arith.constant dense<0.000000e+00> : vector<8x8xf32>
    %30 = tpu.matmul %27, %28, %cst_23 {dimension_numbers = #tpu.dot_dimension_numbers<[1], [1], [0], [0], [0, 0, 1, 0], [], []>} : vector<8x8xf32>, vector<8x8xf32>, vector<8x8xf32> -> vector<8x8xf32>
    %cst_24 = arith.constant 0.353553385 : f32
    %31 = vector.broadcast %cst_24 : f32 to vector<8x8xf32>
    %32 = arith.mulf %30, %31 : vector<8x8xf32>
    %33 = arith.addf %32, %25 : vector<8x8xf32>
    %cst_25 = arith.constant dense<0xFF800000> : vector<8xf32>
    %34 = vector.multi_reduction <maximumf>, %33, %cst_25 [1] : vector<8x8xf32> to vector<8xf32>
    %35 = vector.shape_cast %34 : vector<8xf32> to vector<8x1xf32>
    %36 = vector.broadcast %35 : vector<8x1xf32> to vector<8x8xf32>
    %37 = arith.subf %33, %36 : vector<8x8xf32>
    %38 = math.exp %37 : vector<8x8xf32>
    %cst_26 = arith.constant dense<0.000000e+00> : vector<8xf32>
    %39 = vector.multi_reduction <add>, %38, %cst_26 [1] : vector<8x8xf32> to vector<8xf32>
    %40 = vector.shape_cast %39 : vector<8xf32> to vector<8x1xf32>
    %41 = tpu.reciprocal %40 {approx = true} : vector<8x1xf32> -> vector<8x1xf32>
    %42 = vector.broadcast %41 : vector<8x1xf32> to vector<8x8xf32>
    %43 = arith.mulf %38, %42 : vector<8x8xf32>
    %cst_27 = arith.constant dense<0.000000e+00> : vector<8x8xf32>
    %44 = tpu.matmul %43, %29, %cst_27 {dimension_numbers = #tpu.dot_dimension_numbers<[1], [0], [0], [1], [0, 0, 1, 1], [], []>} : vector<8x8xf32>, vector<8x8xf32>, vector<8x8xf32> -> vector<8x8xf32>
    %45 = vector.extract_strided_slice %11 {offsets = [0, 0], sizes = [8, 32], strides = [1, 1]} : vector<32x32xf32> to vector<8x32xf32>
    %cst_28 = arith.constant dense<0.000000e+00> : vector<8x32xf32>
    %46 = tpu.matmul %44, %45, %cst_28 {dimension_numbers = #tpu.dot_dimension_numbers<[1], [0], [0], [1], [0, 0, 1, 1], [], []>} : vector<8x8xf32>, vector<8x32xf32>, vector<8x32xf32> -> vector<8x32xf32>
    %47 = arith.addf %26, %46 : vector<8x32xf32>
    %48 = vector.extract_strided_slice %22 {offsets = [0, 8], sizes = [8, 8], strides = [1, 1]} : vector<8x32xf32> to vector<8x8xf32>
    %49 = vector.extract_strided_slice %23 {offsets = [0, 8], sizes = [8, 8], strides = [1, 1]} : vector<8x32xf32> to vector<8x8xf32>
    %50 = vector.extract_strided_slice %24 {offsets = [0, 8], sizes = [8, 8], strides = [1, 1]} : vector<8x32xf32> to vector<8x8xf32>
    %cst_29 = arith.constant dense<0.000000e+00> : vector<8x8xf32>
    %51 = tpu.matmul %48, %49, %cst_29 {dimension_numbers = #tpu.dot_dimension_numbers<[1], [1], [0], [0], [0, 0, 1, 0], [], []>} : vector<8x8xf32>, vector<8x8xf32>, vector<8x8xf32> -> vector<8x8xf32>
    %cst_30 = arith.constant 0.353553385 : f32
    %52 = vector.broadcast %cst_30 : f32 to vector<8x8xf32>
    %53 = arith.mulf %51, %52 : vector<8x8xf32>
    %54 = arith.addf %53, %25 : vector<8x8xf32>
    %cst_31 = arith.constant dense<0xFF800000> : vector<8xf32>
    %55 = vector.multi_reduction <maximumf>, %54, %cst_31 [1] : vector<8x8xf32> to vector<8xf32>
    %56 = vector.shape_cast %55 : vector<8xf32> to vector<8x1xf32>
    %57 = vector.broadcast %56 : vector<8x1xf32> to vector<8x8xf32>
    %58 = arith.subf %54, %57 : vector<8x8xf32>
    %59 = math.exp %58 : vector<8x8xf32>
    %cst_32 = arith.constant dense<0.000000e+00> : vector<8xf32>
    %60 = vector.multi_reduction <add>, %59, %cst_32 [1] : vector<8x8xf32> to vector<8xf32>
    %61 = vector.shape_cast %60 : vector<8xf32> to vector<8x1xf32>
    %62 = tpu.reciprocal %61 {approx = true} : vector<8x1xf32> -> vector<8x1xf32>
    %63 = vector.broadcast %62 : vector<8x1xf32> to vector<8x8xf32>
    %64 = arith.mulf %59, %63 : vector<8x8xf32>
    %cst_33 = arith.constant dense<0.000000e+00> : vector<8x8xf32>
    %65 = tpu.matmul %64, %50, %cst_33 {dimension_numbers = #tpu.dot_dimension_numbers<[1], [0], [0], [1], [0, 0, 1, 1], [], []>} : vector<8x8xf32>, vector<8x8xf32>, vector<8x8xf32> -> vector<8x8xf32>
    %66 = vector.extract_strided_slice %11 {offsets = [8, 0], sizes = [8, 32], strides = [1, 1]} : vector<32x32xf32> to vector<8x32xf32>
    %cst_34 = arith.constant dense<0.000000e+00> : vector<8x32xf32>
    %67 = tpu.matmul %65, %66, %cst_34 {dimension_numbers = #tpu.dot_dimension_numbers<[1], [0], [0], [1], [0, 0, 1, 1], [], []>} : vector<8x8xf32>, vector<8x32xf32>, vector<8x32xf32> -> vector<8x32xf32>
    %68 = arith.addf %47, %67 : vector<8x32xf32>
    %69 = vector.extract_strided_slice %22 {offsets = [0, 16], sizes = [8, 8], strides = [1, 1]} : vector<8x32xf32> to vector<8x8xf32>
    %70 = vector.extract_strided_slice %23 {offsets = [0, 16], sizes = [8, 8], strides = [1, 1]} : vector<8x32xf32> to vector<8x8xf32>
    %71 = vector.extract_strided_slice %24 {offsets = [0, 16], sizes = [8, 8], strides = [1, 1]} : vector<8x32xf32> to vector<8x8xf32>
    %cst_35 = arith.constant dense<0.000000e+00> : vector<8x8xf32>
    %72 = tpu.matmul %69, %70, %cst_35 {dimension_numbers = #tpu.dot_dimension_numbers<[1], [1], [0], [0], [0, 0, 1, 0], [], []>} : vector<8x8xf32>, vector<8x8xf32>, vector<8x8xf32> -> vector<8x8xf32>
    %cst_36 = arith.constant 0.353553385 : f32
    %73 = vector.broadcast %cst_36 : f32 to vector<8x8xf32>
    %74 = arith.mulf %72, %73 : vector<8x8xf32>
    %75 = arith.addf %74, %25 : vector<8x8xf32>
    %cst_37 = arith.constant dense<0xFF800000> : vector<8xf32>
    %76 = vector.multi_reduction <maximumf>, %75, %cst_37 [1] : vector<8x8xf32> to vector<8xf32>
    %77 = vector.shape_cast %76 : vector<8xf32> to vector<8x1xf32>
    %78 = vector.broadcast %77 : vector<8x1xf32> to vector<8x8xf32>
    %79 = arith.subf %75, %78 : vector<8x8xf32>
    %80 = math.exp %79 : vector<8x8xf32>
    %cst_38 = arith.constant dense<0.000000e+00> : vector<8xf32>
    %81 = vector.multi_reduction <add>, %80, %cst_38 [1] : vector<8x8xf32> to vector<8xf32>
    %82 = vector.shape_cast %81 : vector<8xf32> to vector<8x1xf32>
    %83 = tpu.reciprocal %82 {approx = true} : vector<8x1xf32> -> vector<8x1xf32>
    %84 = vector.broadcast %83 : vector<8x1xf32> to vector<8x8xf32>
    %85 = arith.mulf %80, %84 : vector<8x8xf32>
    %cst_39 = arith.constant dense<0.000000e+00> : vector<8x8xf32>
    %86 = tpu.matmul %85, %71, %cst_39 {dimension_numbers = #tpu.dot_dimension_numbers<[1], [0], [0], [1], [0, 0, 1, 1], [], []>} : vector<8x8xf32>, vector<8x8xf32>, vector<8x8xf32> -> vector<8x8xf32>
    %87 = vector.extract_strided_slice %11 {offsets = [16, 0], sizes = [8, 32], strides = [1, 1]} : vector<32x32xf32> to vector<8x32xf32>
    %cst_40 = arith.constant dense<0.000000e+00> : vector<8x32xf32>
    %88 = tpu.matmul %86, %87, %cst_40 {dimension_numbers = #tpu.dot_dimension_numbers<[1], [0], [0], [1], [0, 0, 1, 1], [], []>} : vector<8x8xf32>, vector<8x32xf32>, vector<8x32xf32> -> vector<8x32xf32>
    %89 = arith.addf %68, %88 : vector<8x32xf32>
    %90 = vector.extract_strided_slice %22 {offsets = [0, 24], sizes = [8, 8], strides = [1, 1]} : vector<8x32xf32> to vector<8x8xf32>
    %91 = vector.extract_strided_slice %23 {offsets = [0, 24], sizes = [8, 8], strides = [1, 1]} : vector<8x32xf32> to vector<8x8xf32>
    %92 = vector.extract_strided_slice %24 {offsets = [0, 24], sizes = [8, 8], strides = [1, 1]} : vector<8x32xf32> to vector<8x8xf32>
    %cst_41 = arith.constant dense<0.000000e+00> : vector<8x8xf32>
    %93 = tpu.matmul %90, %91, %cst_41 {dimension_numbers = #tpu.dot_dimension_numbers<[1], [1], [0], [0], [0, 0, 1, 0], [], []>} : vector<8x8xf32>, vector<8x8xf32>, vector<8x8xf32> -> vector<8x8xf32>
    %cst_42 = arith.constant 0.353553385 : f32
    %94 = vector.broadcast %cst_42 : f32 to vector<8x8xf32>
    %95 = arith.mulf %93, %94 : vector<8x8xf32>
    %96 = arith.addf %95, %25 : vector<8x8xf32>
    %cst_43 = arith.constant dense<0xFF800000> : vector<8xf32>
    %97 = vector.multi_reduction <maximumf>, %96, %cst_43 [1] : vector<8x8xf32> to vector<8xf32>
    %98 = vector.shape_cast %97 : vector<8xf32> to vector<8x1xf32>
    %99 = vector.broadcast %98 : vector<8x1xf32> to vector<8x8xf32>
    %100 = arith.subf %96, %99 : vector<8x8xf32>
    %101 = math.exp %100 : vector<8x8xf32>
    %cst_44 = arith.constant dense<0.000000e+00> : vector<8xf32>
    %102 = vector.multi_reduction <add>, %101, %cst_44 [1] : vector<8x8xf32> to vector<8xf32>
    %103 = vector.shape_cast %102 : vector<8xf32> to vector<8x1xf32>
    %104 = tpu.reciprocal %103 {approx = true} : vector<8x1xf32> -> vector<8x1xf32>
    %105 = vector.broadcast %104 : vector<8x1xf32> to vector<8x8xf32>
    %106 = arith.mulf %101, %105 : vector<8x8xf32>
    %cst_45 = arith.constant dense<0.000000e+00> : vector<8x8xf32>
    %107 = tpu.matmul %106, %92, %cst_45 {dimension_numbers = #tpu.dot_dimension_numbers<[1], [0], [0], [1], [0, 0, 1, 1], [], []>} : vector<8x8xf32>, vector<8x8xf32>, vector<8x8xf32> -> vector<8x8xf32>
    %108 = vector.extract_strided_slice %11 {offsets = [24, 0], sizes = [8, 32], strides = [1, 1]} : vector<32x32xf32> to vector<8x32xf32>
    %cst_46 = arith.constant dense<0.000000e+00> : vector<8x32xf32>
    %109 = tpu.matmul %107, %108, %cst_46 {dimension_numbers = #tpu.dot_dimension_numbers<[1], [0], [0], [1], [0, 0, 1, 1], [], []>} : vector<8x8xf32>, vector<8x32xf32>, vector<8x32xf32> -> vector<8x32xf32>
    %110 = arith.addf %89, %109 : vector<8x32xf32>
    %111 = vector.broadcast %13 : vector<1x32xf32> to vector<8x32xf32>
    %112 = arith.addf %110, %111 : vector<8x32xf32>
    %113 = vector.extract_strided_slice %16 {offsets = [8, 0], sizes = [8, 32], strides = [1, 1]} : vector<16x32xf32> to vector<8x32xf32>
    %114 = vector.extract_strided_slice %20 {offsets = [8, 0], sizes = [8, 32], strides = [1, 1]} : vector<16x32xf32> to vector<8x32xf32>
    %115 = vector.extract_strided_slice %21 {offsets = [8, 0], sizes = [8, 32], strides = [1, 1]} : vector<16x32xf32> to vector<8x32xf32>
    %116 = vector.extract_strided_slice %1 {offsets = [8, 0], sizes = [8, 8], strides = [1, 1]} : vector<16x8xf32> to vector<8x8xf32>
    %cst_47 = arith.constant 0.000000e+00 : f32
    %117 = vector.broadcast %cst_47 : f32 to vector<8x32xf32>
    %118 = vector.extract_strided_slice %113 {offsets = [0, 0], sizes = [8, 8], strides = [1, 1]} : vector<8x32xf32> to vector<8x8xf32>
    %119 = vector.extract_strided_slice %114 {offsets = [0, 0], sizes = [8, 8], strides = [1, 1]} : vector<8x32xf32> to vector<8x8xf32>
    %120 = vector.extract_strided_slice %115 {offsets = [0, 0], sizes = [8, 8], strides = [1, 1]} : vector<8x32xf32> to vector<8x8xf32>
    %cst_48 = arith.constant dense<0.000000e+00> : vector<8x8xf32>
    %121 = tpu.matmul %118, %119, %cst_48 {dimension_numbers = #tpu.dot_dimension_numbers<[1], [1], [0], [0], [0, 0, 1, 0], [], []>} : vector<8x8xf32>, vector<8x8xf32>, vector<8x8xf32> -> vector<8x8xf32>
    %cst_49 = arith.constant 0.353553385 : f32
    %122 = vector.broadcast %cst_49 : f32 to vector<8x8xf32>
    %123 = arith.mulf %121, %122 : vector<8x8xf32>
    %124 = arith.addf %123, %116 : vector<8x8xf32>
    %cst_50 = arith.constant dense<0xFF800000> : vector<8xf32>
    %125 = vector.multi_reduction <maximumf>, %124, %cst_50 [1] : vector<8x8xf32> to vector<8xf32>
    %126 = vector.shape_cast %125 : vector<8xf32> to vector<8x1xf32>
    %127 = vector.broadcast %126 : vector<8x1xf32> to vector<8x8xf32>
    %128 = arith.subf %124, %127 : vector<8x8xf32>
    %129 = math.exp %128 : vector<8x8xf32>
    %cst_51 = arith.constant dense<0.000000e+00> : vector<8xf32>
    %130 = vector.multi_reduction <add>, %129, %cst_51 [1] : vector<8x8xf32> to vector<8xf32>
    %131 = vector.shape_cast %130 : vector<8xf32> to vector<8x1xf32>
    %132 = tpu.reciprocal %131 {approx = true} : vector<8x1xf32> -> vector<8x1xf32>
    %133 = vector.broadcast %132 : vector<8x1xf32> to vector<8x8xf32>
    %134 = arith.mulf %129, %133 : vector<8x8xf32>
    %cst_52 = arith.constant dense<0.000000e+00> : vector<8x8xf32>
    %135 = tpu.matmul %134, %120, %cst_52 {dimension_numbers = #tpu.dot_dimension_numbers<[1], [0], [0], [1], [0, 0, 1, 1], [], []>} : vector<8x8xf32>, vector<8x8xf32>, vector<8x8xf32> -> vector<8x8xf32>
    %136 = vector.extract_strided_slice %11 {offsets = [0, 0], sizes = [8, 32], strides = [1, 1]} : vector<32x32xf32> to vector<8x32xf32>
    %cst_53 = arith.constant dense<0.000000e+00> : vector<8x32xf32>
    %137 = tpu.matmul %135, %136, %cst_53 {dimension_numbers = #tpu.dot_dimension_numbers<[1], [0], [0], [1], [0, 0, 1, 1], [], []>} : vector<8x8xf32>, vector<8x32xf32>, vector<8x32xf32> -> vector<8x32xf32>
    %138 = arith.addf %117, %137 : vector<8x32xf32>
    %139 = vector.extract_strided_slice %113 {offsets = [0, 8], sizes = [8, 8], strides = [1, 1]} : vector<8x32xf32> to vector<8x8xf32>
    %140 = vector.extract_strided_slice %114 {offsets = [0, 8], sizes = [8, 8], strides = [1, 1]} : vector<8x32xf32> to vector<8x8xf32>
    %141 = vector.extract_strided_slice %115 {offsets = [0, 8], sizes = [8, 8], strides = [1, 1]} : vector<8x32xf32> to vector<8x8xf32>
    %cst_54 = arith.constant dense<0.000000e+00> : vector<8x8xf32>
    %142 = tpu.matmul %139, %140, %cst_54 {dimension_numbers = #tpu.dot_dimension_numbers<[1], [1], [0], [0], [0, 0, 1, 0], [], []>} : vector<8x8xf32>, vector<8x8xf32>, vector<8x8xf32> -> vector<8x8xf32>
    %cst_55 = arith.constant 0.353553385 : f32
    %143 = vector.broadcast %cst_55 : f32 to vector<8x8xf32>
    %144 = arith.mulf %142, %143 : vector<8x8xf32>
    %145 = arith.addf %144, %116 : vector<8x8xf32>
    %cst_56 = arith.constant dense<0xFF800000> : vector<8xf32>
    %146 = vector.multi_reduction <maximumf>, %145, %cst_56 [1] : vector<8x8xf32> to vector<8xf32>
    %147 = vector.shape_cast %146 : vector<8xf32> to vector<8x1xf32>
    %148 = vector.broadcast %147 : vector<8x1xf32> to vector<8x8xf32>
    %149 = arith.subf %145, %148 : vector<8x8xf32>
    %150 = math.exp %149 : vector<8x8xf32>
    %cst_57 = arith.constant dense<0.000000e+00> : vector<8xf32>
    %151 = vector.multi_reduction <add>, %150, %cst_57 [1] : vector<8x8xf32> to vector<8xf32>
    %152 = vector.shape_cast %151 : vector<8xf32> to vector<8x1xf32>
    %153 = tpu.reciprocal %152 {approx = true} : vector<8x1xf32> -> vector<8x1xf32>
    %154 = vector.broadcast %153 : vector<8x1xf32> to vector<8x8xf32>
    %155 = arith.mulf %150, %154 : vector<8x8xf32>
    %cst_58 = arith.constant dense<0.000000e+00> : vector<8x8xf32>
    %156 = tpu.matmul %155, %141, %cst_58 {dimension_numbers = #tpu.dot_dimension_numbers<[1], [0], [0], [1], [0, 0, 1, 1], [], []>} : vector<8x8xf32>, vector<8x8xf32>, vector<8x8xf32> -> vector<8x8xf32>
    %157 = vector.extract_strided_slice %11 {offsets = [8, 0], sizes = [8, 32], strides = [1, 1]} : vector<32x32xf32> to vector<8x32xf32>
    %cst_59 = arith.constant dense<0.000000e+00> : vector<8x32xf32>
    %158 = tpu.matmul %156, %157, %cst_59 {dimension_numbers = #tpu.dot_dimension_numbers<[1], [0], [0], [1], [0, 0, 1, 1], [], []>} : vector<8x8xf32>, vector<8x32xf32>, vector<8x32xf32> -> vector<8x32xf32>
    %159 = arith.addf %138, %158 : vector<8x32xf32>
    %160 = vector.extract_strided_slice %113 {offsets = [0, 16], sizes = [8, 8], strides = [1, 1]} : vector<8x32xf32> to vector<8x8xf32>
    %161 = vector.extract_strided_slice %114 {offsets = [0, 16], sizes = [8, 8], strides = [1, 1]} : vector<8x32xf32> to vector<8x8xf32>
    %162 = vector.extract_strided_slice %115 {offsets = [0, 16], sizes = [8, 8], strides = [1, 1]} : vector<8x32xf32> to vector<8x8xf32>
    %cst_60 = arith.constant dense<0.000000e+00> : vector<8x8xf32>
    %163 = tpu.matmul %160, %161, %cst_60 {dimension_numbers = #tpu.dot_dimension_numbers<[1], [1], [0], [0], [0, 0, 1, 0], [], []>} : vector<8x8xf32>, vector<8x8xf32>, vector<8x8xf32> -> vector<8x8xf32>
    %cst_61 = arith.constant 0.353553385 : f32
    %164 = vector.broadcast %cst_61 : f32 to vector<8x8xf32>
    %165 = arith.mulf %163, %164 : vector<8x8xf32>
    %166 = arith.addf %165, %116 : vector<8x8xf32>
    %cst_62 = arith.constant dense<0xFF800000> : vector<8xf32>
    %167 = vector.multi_reduction <maximumf>, %166, %cst_62 [1] : vector<8x8xf32> to vector<8xf32>
    %168 = vector.shape_cast %167 : vector<8xf32> to vector<8x1xf32>
    %169 = vector.broadcast %168 : vector<8x1xf32> to vector<8x8xf32>
    %170 = arith.subf %166, %169 : vector<8x8xf32>
    %171 = math.exp %170 : vector<8x8xf32>
    %cst_63 = arith.constant dense<0.000000e+00> : vector<8xf32>
    %172 = vector.multi_reduction <add>, %171, %cst_63 [1] : vector<8x8xf32> to vector<8xf32>
    %173 = vector.shape_cast %172 : vector<8xf32> to vector<8x1xf32>
    %174 = tpu.reciprocal %173 {approx = true} : vector<8x1xf32> -> vector<8x1xf32>
    %175 = vector.broadcast %174 : vector<8x1xf32> to vector<8x8xf32>
    %176 = arith.mulf %171, %175 : vector<8x8xf32>
    %cst_64 = arith.constant dense<0.000000e+00> : vector<8x8xf32>
    %177 = tpu.matmul %176, %162, %cst_64 {dimension_numbers = #tpu.dot_dimension_numbers<[1], [0], [0], [1], [0, 0, 1, 1], [], []>} : vector<8x8xf32>, vector<8x8xf32>, vector<8x8xf32> -> vector<8x8xf32>
    %178 = vector.extract_strided_slice %11 {offsets = [16, 0], sizes = [8, 32], strides = [1, 1]} : vector<32x32xf32> to vector<8x32xf32>
    %cst_65 = arith.constant dense<0.000000e+00> : vector<8x32xf32>
    %179 = tpu.matmul %177, %178, %cst_65 {dimension_numbers = #tpu.dot_dimension_numbers<[1], [0], [0], [1], [0, 0, 1, 1], [], []>} : vector<8x8xf32>, vector<8x32xf32>, vector<8x32xf32> -> vector<8x32xf32>
    %180 = arith.addf %159, %179 : vector<8x32xf32>
    %181 = vector.extract_strided_slice %113 {offsets = [0, 24], sizes = [8, 8], strides = [1, 1]} : vector<8x32xf32> to vector<8x8xf32>
    %182 = vector.extract_strided_slice %114 {offsets = [0, 24], sizes = [8, 8], strides = [1, 1]} : vector<8x32xf32> to vector<8x8xf32>
    %183 = vector.extract_strided_slice %115 {offsets = [0, 24], sizes = [8, 8], strides = [1, 1]} : vector<8x32xf32> to vector<8x8xf32>
    %cst_66 = arith.constant dense<0.000000e+00> : vector<8x8xf32>
    %184 = tpu.matmul %181, %182, %cst_66 {dimension_numbers = #tpu.dot_dimension_numbers<[1], [1], [0], [0], [0, 0, 1, 0], [], []>} : vector<8x8xf32>, vector<8x8xf32>, vector<8x8xf32> -> vector<8x8xf32>
    %cst_67 = arith.constant 0.353553385 : f32
    %185 = vector.broadcast %cst_67 : f32 to vector<8x8xf32>
    %186 = arith.mulf %184, %185 : vector<8x8xf32>
    %187 = arith.addf %186, %116 : vector<8x8xf32>
    %cst_68 = arith.constant dense<0xFF800000> : vector<8xf32>
    %188 = vector.multi_reduction <maximumf>, %187, %cst_68 [1] : vector<8x8xf32> to vector<8xf32>
    %189 = vector.shape_cast %188 : vector<8xf32> to vector<8x1xf32>
    %190 = vector.broadcast %189 : vector<8x1xf32> to vector<8x8xf32>
    %191 = arith.subf %187, %190 : vector<8x8xf32>
    %192 = math.exp %191 : vector<8x8xf32>
    %cst_69 = arith.constant dense<0.000000e+00> : vector<8xf32>
    %193 = vector.multi_reduction <add>, %192, %cst_69 [1] : vector<8x8xf32> to vector<8xf32>
    %194 = vector.shape_cast %193 : vector<8xf32> to vector<8x1xf32>
    %195 = tpu.reciprocal %194 {approx = true} : vector<8x1xf32> -> vector<8x1xf32>
    %196 = vector.broadcast %195 : vector<8x1xf32> to vector<8x8xf32>
    %197 = arith.mulf %192, %196 : vector<8x8xf32>
    %cst_70 = arith.constant dense<0.000000e+00> : vector<8x8xf32>
    %198 = tpu.matmul %197, %183, %cst_70 {dimension_numbers = #tpu.dot_dimension_numbers<[1], [0], [0], [1], [0, 0, 1, 1], [], []>} : vector<8x8xf32>, vector<8x8xf32>, vector<8x8xf32> -> vector<8x8xf32>
    %199 = vector.extract_strided_slice %11 {offsets = [24, 0], sizes = [8, 32], strides = [1, 1]} : vector<32x32xf32> to vector<8x32xf32>
    %cst_71 = arith.constant dense<0.000000e+00> : vector<8x32xf32>
    %200 = tpu.matmul %198, %199, %cst_71 {dimension_numbers = #tpu.dot_dimension_numbers<[1], [0], [0], [1], [0, 0, 1, 1], [], []>} : vector<8x8xf32>, vector<8x32xf32>, vector<8x32xf32> -> vector<8x32xf32>
    %201 = arith.addf %180, %200 : vector<8x32xf32>
    %202 = vector.broadcast %13 : vector<1x32xf32> to vector<8x32xf32>
    %203 = arith.addf %201, %202 : vector<8x32xf32>
    %204 = tpu.concatenate %112, %203 in 0 : vector<8x32xf32>, vector<8x32xf32> -> vector<16x32xf32>
    %205 = arith.addf %0, %204 : vector<16x32xf32>
    %c0_72 = arith.constant 0 : index
    %c0_73 = arith.constant 0 : index
    %c0_74 = arith.constant 0 : index
    %206 = vector.load %arg11[%c0_72, %c0_73, %c0_74] : memref<2x1x32xf32, #tpu.memory_space<vmem>>, vector<1x1x32xf32>
    %207 = vector.shape_cast %206 : vector<1x1x32xf32> to vector<1x32xf32>
    %c0_75 = arith.constant 0 : index
    %c0_76 = arith.constant 0 : index
    %c0_77 = arith.constant 0 : index
    %208 = vector.load %arg12[%c0_75, %c0_76, %c0_77] : memref<2x1x32xf32, #tpu.memory_space<vmem>>, vector<1x1x32xf32>
    %209 = vector.shape_cast %208 : vector<1x1x32xf32> to vector<1x32xf32>
    %cst_78 = arith.constant dense<0.000000e+00> : vector<16xf32>
    %210 = vector.multi_reduction <add>, %205, %cst_78 [1] : vector<16x32xf32> to vector<16xf32>
    %211 = vector.shape_cast %210 : vector<16xf32> to vector<16x1xf32>
    %cst_79 = arith.constant 3.200000e+01 : f32
    %212 = vector.broadcast %cst_79 : f32 to vector<16x1xf32>
    %213 = arith.divf %211, %212 : vector<16x1xf32>
    %214 = vector.broadcast %213 : vector<16x1xf32> to vector<16x32xf32>
    %215 = arith.subf %205, %214 : vector<16x32xf32>
    %216 = arith.mulf %215, %215 : vector<16x32xf32>
    %cst_80 = arith.constant dense<0.000000e+00> : vector<16xf32>
    %217 = vector.multi_reduction <add>, %216, %cst_80 [1] : vector<16x32xf32> to vector<16xf32>
    %218 = vector.shape_cast %217 : vector<16xf32> to vector<16x1xf32>
    %cst_81 = arith.constant 3.200000e+01 : f32
    %219 = vector.broadcast %cst_81 : f32 to vector<16x1xf32>
    %220 = arith.divf %218, %219 : vector<16x1xf32>
    %221 = vector.broadcast %213 : vector<16x1xf32> to vector<16x32xf32>
    %222 = arith.subf %205, %221 : vector<16x32xf32>
    %cst_82 = arith.constant 9.99999974E-6 : f32
    %223 = vector.broadcast %cst_82 : f32 to vector<16x1xf32>
    %224 = arith.addf %220, %223 : vector<16x1xf32>
    %225 = math.rsqrt %224 : vector<16x1xf32>
    %226 = vector.broadcast %225 : vector<16x1xf32> to vector<16x32xf32>
    %227 = arith.mulf %222, %226 : vector<16x32xf32>
    %228 = vector.broadcast %207 : vector<1x32xf32> to vector<16x32xf32>
    %229 = arith.mulf %227, %228 : vector<16x32xf32>
    %230 = vector.broadcast %209 : vector<1x32xf32> to vector<16x32xf32>
    %231 = arith.addf %229, %230 : vector<16x32xf32>
    %c0_83 = arith.constant 0 : index
    %c0_84 = arith.constant 0 : index
    %c0_85 = arith.constant 0 : index
    %232 = vector.load %arg13[%c0_83, %c0_84, %c0_85] : memref<2x32x64xf32, #tpu.memory_space<vmem>>, vector<1x32x64xf32>
    %233 = vector.shape_cast %232 : vector<1x32x64xf32> to vector<32x64xf32>
    %c0_86 = arith.constant 0 : index
    %c0_87 = arith.constant 0 : index
    %c0_88 = arith.constant 0 : index
    %234 = vector.load %arg14[%c0_86, %c0_87, %c0_88] : memref<2x1x64xf32, #tpu.memory_space<vmem>>, vector<1x1x64xf32>
    %235 = vector.shape_cast %234 : vector<1x1x64xf32> to vector<1x64xf32>
    %c0_89 = arith.constant 0 : index
    %c0_90 = arith.constant 0 : index
    %c0_91 = arith.constant 0 : index
    %236 = vector.load %arg15[%c0_89, %c0_90, %c0_91] : memref<2x64x32xf32, #tpu.memory_space<vmem>>, vector<1x64x32xf32>
    %237 = vector.shape_cast %236 : vector<1x64x32xf32> to vector<64x32xf32>
    %c0_92 = arith.constant 0 : index
    %c0_93 = arith.constant 0 : index
    %c0_94 = arith.constant 0 : index
    %238 = vector.load %arg16[%c0_92, %c0_93, %c0_94] : memref<2x1x32xf32, #tpu.memory_space<vmem>>, vector<1x1x32xf32>
    %239 = vector.shape_cast %238 : vector<1x1x32xf32> to vector<1x32xf32>
    %cst_95 = arith.constant dense<0.000000e+00> : vector<16x64xf32>
    %240 = tpu.matmul %231, %233, %cst_95 {dimension_numbers = #tpu.dot_dimension_numbers<[1], [0], [0], [1], [0, 0, 1, 1], [], []>} : vector<16x32xf32>, vector<32x64xf32>, vector<16x64xf32> -> vector<16x64xf32>
    %241 = vector.broadcast %235 : vector<1x64xf32> to vector<16x64xf32>
    %242 = arith.addf %240, %241 : vector<16x64xf32>
    %cst_96 = arith.constant 0.000000e+00 : f32
    %243 = vector.broadcast %cst_96 : f32 to vector<16x64xf32>
    %244 = arith.maximumf %242, %243 : vector<16x64xf32>
    %cst_97 = arith.constant dense<0.000000e+00> : vector<16x32xf32>
    %245 = tpu.matmul %244, %237, %cst_97 {dimension_numbers = #tpu.dot_dimension_numbers<[1], [0], [0], [1], [0, 0, 1, 1], [], []>} : vector<16x64xf32>, vector<64x32xf32>, vector<16x32xf32> -> vector<16x32xf32>
    %246 = vector.broadcast %239 : vector<1x32xf32> to vector<16x32xf32>
    %247 = arith.addf %245, %246 : vector<16x32xf32>
    %248 = arith.addf %231, %247 : vector<16x32xf32>
    %c0_98 = arith.constant 0 : index
    %c0_99 = arith.constant 0 : index
    %c0_100 = arith.constant 0 : index
    %249 = vector.load %arg17[%c0_98, %c0_99, %c0_100] : memref<2x1x32xf32, #tpu.memory_space<vmem>>, vector<1x1x32xf32>
    %250 = vector.shape_cast %249 : vector<1x1x32xf32> to vector<1x32xf32>
    %c0_101 = arith.constant 0 : index
    %c0_102 = arith.constant 0 : index
    %c0_103 = arith.constant 0 : index
    %251 = vector.load %arg18[%c0_101, %c0_102, %c0_103] : memref<2x1x32xf32, #tpu.memory_space<vmem>>, vector<1x1x32xf32>
    %252 = vector.shape_cast %251 : vector<1x1x32xf32> to vector<1x32xf32>
    %cst_104 = arith.constant dense<0.000000e+00> : vector<16xf32>
    %253 = vector.multi_reduction <add>, %248, %cst_104 [1] : vector<16x32xf32> to vector<16xf32>
    %254 = vector.shape_cast %253 : vector<16xf32> to vector<16x1xf32>
    %cst_105 = arith.constant 3.200000e+01 : f32
    %255 = vector.broadcast %cst_105 : f32 to vector<16x1xf32>
    %256 = arith.divf %254, %255 : vector<16x1xf32>
    %257 = vector.broadcast %256 : vector<16x1xf32> to vector<16x32xf32>
    %258 = arith.subf %248, %257 : vector<16x32xf32>
    %259 = arith.mulf %258, %258 : vector<16x32xf32>
    %cst_106 = arith.constant dense<0.000000e+00> : vector<16xf32>
    %260 = vector.multi_reduction <add>, %259, %cst_106 [1] : vector<16x32xf32> to vector<16xf32>
    %261 = vector.shape_cast %260 : vector<16xf32> to vector<16x1xf32>
    %cst_107 = arith.constant 3.200000e+01 : f32
    %262 = vector.broadcast %cst_107 : f32 to vector<16x1xf32>
    %263 = arith.divf %261, %262 : vector<16x1xf32>
    %264 = vector.broadcast %256 : vector<16x1xf32> to vector<16x32xf32>
    %265 = arith.subf %248, %264 : vector<16x32xf32>
    %cst_108 = arith.constant 9.99999974E-6 : f32
    %266 = vector.broadcast %cst_108 : f32 to vector<16x1xf32>
    %267 = arith.addf %263, %266 : vector<16x1xf32>
    %268 = math.rsqrt %267 : vector<16x1xf32>
    %269 = vector.broadcast %268 : vector<16x1xf32> to vector<16x32xf32>
    %270 = arith.mulf %265, %269 : vector<16x32xf32>
    %271 = vector.broadcast %250 : vector<1x32xf32> to vector<16x32xf32>
    %272 = arith.mulf %270, %271 : vector<16x32xf32>
    %273 = vector.broadcast %252 : vector<1x32xf32> to vector<16x32xf32>
    %274 = arith.addf %272, %273 : vector<16x32xf32>
    %c1 = arith.constant 1 : index
    %c0_109 = arith.constant 0 : index
    %c0_110 = arith.constant 0 : index
    %275 = vector.load %arg5[%c1, %c0_109, %c0_110] : memref<2x32x32xf32, #tpu.memory_space<vmem>>, vector<1x32x32xf32>
    %276 = vector.shape_cast %275 : vector<1x32x32xf32> to vector<32x32xf32>
    %c1_111 = arith.constant 1 : index
    %c0_112 = arith.constant 0 : index
    %c0_113 = arith.constant 0 : index
    %277 = vector.load %arg6[%c1_111, %c0_112, %c0_113] : memref<2x1x32xf32, #tpu.memory_space<vmem>>, vector<1x1x32xf32>
    %278 = vector.shape_cast %277 : vector<1x1x32xf32> to vector<1x32xf32>
    %c1_114 = arith.constant 1 : index
    %c0_115 = arith.constant 0 : index
    %c0_116 = arith.constant 0 : index
    %279 = vector.load %arg7[%c1_114, %c0_115, %c0_116] : memref<2x32x64xf32, #tpu.memory_space<vmem>>, vector<1x32x64xf32>
    %280 = vector.shape_cast %279 : vector<1x32x64xf32> to vector<32x64xf32>
    %c1_117 = arith.constant 1 : index
    %c0_118 = arith.constant 0 : index
    %c0_119 = arith.constant 0 : index
    %281 = vector.load %arg8[%c1_117, %c0_118, %c0_119] : memref<2x1x64xf32, #tpu.memory_space<vmem>>, vector<1x1x64xf32>
    %282 = vector.shape_cast %281 : vector<1x1x64xf32> to vector<1x64xf32>
    %c1_120 = arith.constant 1 : index
    %c0_121 = arith.constant 0 : index
    %c0_122 = arith.constant 0 : index
    %283 = vector.load %arg9[%c1_120, %c0_121, %c0_122] : memref<2x32x32xf32, #tpu.memory_space<vmem>>, vector<1x32x32xf32>
    %284 = vector.shape_cast %283 : vector<1x32x32xf32> to vector<32x32xf32>
    %c1_123 = arith.constant 1 : index
    %c0_124 = arith.constant 0 : index
    %c0_125 = arith.constant 0 : index
    %285 = vector.load %arg10[%c1_123, %c0_124, %c0_125] : memref<2x1x32xf32, #tpu.memory_space<vmem>>, vector<1x1x32xf32>
    %286 = vector.shape_cast %285 : vector<1x1x32xf32> to vector<1x32xf32>
    %cst_126 = arith.constant dense<0.000000e+00> : vector<16x32xf32>
    %287 = tpu.matmul %274, %276, %cst_126 {dimension_numbers = #tpu.dot_dimension_numbers<[1], [0], [0], [1], [0, 0, 1, 1], [], []>} : vector<16x32xf32>, vector<32x32xf32>, vector<16x32xf32> -> vector<16x32xf32>
    %288 = vector.broadcast %278 : vector<1x32xf32> to vector<16x32xf32>
    %289 = arith.addf %287, %288 : vector<16x32xf32>
    %cst_127 = arith.constant dense<0.000000e+00> : vector<16x64xf32>
    %290 = tpu.matmul %274, %280, %cst_127 {dimension_numbers = #tpu.dot_dimension_numbers<[1], [0], [0], [1], [0, 0, 1, 1], [], []>} : vector<16x32xf32>, vector<32x64xf32>, vector<16x64xf32> -> vector<16x64xf32>
    %291 = vector.broadcast %282 : vector<1x64xf32> to vector<16x64xf32>
    %292 = arith.addf %290, %291 : vector<16x64xf32>
    %293 = vector.extract_strided_slice %292 {offsets = [0, 0], sizes = [16, 32], strides = [1, 1]} : vector<16x64xf32> to vector<16x32xf32>
    %294 = vector.extract_strided_slice %292 {offsets = [0, 32], sizes = [16, 32], strides = [1, 1]} : vector<16x64xf32> to vector<16x32xf32>
    %295 = vector.extract_strided_slice %289 {offsets = [0, 0], sizes = [8, 32], strides = [1, 1]} : vector<16x32xf32> to vector<8x32xf32>
    %296 = vector.extract_strided_slice %293 {offsets = [0, 0], sizes = [8, 32], strides = [1, 1]} : vector<16x32xf32> to vector<8x32xf32>
    %297 = vector.extract_strided_slice %294 {offsets = [0, 0], sizes = [8, 32], strides = [1, 1]} : vector<16x32xf32> to vector<8x32xf32>
    %298 = vector.extract_strided_slice %1 {offsets = [0, 0], sizes = [8, 8], strides = [1, 1]} : vector<16x8xf32> to vector<8x8xf32>
    %cst_128 = arith.constant 0.000000e+00 : f32
    %299 = vector.broadcast %cst_128 : f32 to vector<8x32xf32>
    %300 = vector.extract_strided_slice %295 {offsets = [0, 0], sizes = [8, 8], strides = [1, 1]} : vector<8x32xf32> to vector<8x8xf32>
    %301 = vector.extract_strided_slice %296 {offsets = [0, 0], sizes = [8, 8], strides = [1, 1]} : vector<8x32xf32> to vector<8x8xf32>
    %302 = vector.extract_strided_slice %297 {offsets = [0, 0], sizes = [8, 8], strides = [1, 1]} : vector<8x32xf32> to vector<8x8xf32>
    %cst_129 = arith.constant dense<0.000000e+00> : vector<8x8xf32>
    %303 = tpu.matmul %300, %301, %cst_129 {dimension_numbers = #tpu.dot_dimension_numbers<[1], [1], [0], [0], [0, 0, 1, 0], [], []>} : vector<8x8xf32>, vector<8x8xf32>, vector<8x8xf32> -> vector<8x8xf32>
    %cst_130 = arith.constant 0.353553385 : f32
    %304 = vector.broadcast %cst_130 : f32 to vector<8x8xf32>
    %305 = arith.mulf %303, %304 : vector<8x8xf32>
    %306 = arith.addf %305, %298 : vector<8x8xf32>
    %cst_131 = arith.constant dense<0xFF800000> : vector<8xf32>
    %307 = vector.multi_reduction <maximumf>, %306, %cst_131 [1] : vector<8x8xf32> to vector<8xf32>
    %308 = vector.shape_cast %307 : vector<8xf32> to vector<8x1xf32>
    %309 = vector.broadcast %308 : vector<8x1xf32> to vector<8x8xf32>
    %310 = arith.subf %306, %309 : vector<8x8xf32>
    %311 = math.exp %310 : vector<8x8xf32>
    %cst_132 = arith.constant dense<0.000000e+00> : vector<8xf32>
    %312 = vector.multi_reduction <add>, %311, %cst_132 [1] : vector<8x8xf32> to vector<8xf32>
    %313 = vector.shape_cast %312 : vector<8xf32> to vector<8x1xf32>
    %314 = tpu.reciprocal %313 {approx = true} : vector<8x1xf32> -> vector<8x1xf32>
    %315 = vector.broadcast %314 : vector<8x1xf32> to vector<8x8xf32>
    %316 = arith.mulf %311, %315 : vector<8x8xf32>
    %cst_133 = arith.constant dense<0.000000e+00> : vector<8x8xf32>
    %317 = tpu.matmul %316, %302, %cst_133 {dimension_numbers = #tpu.dot_dimension_numbers<[1], [0], [0], [1], [0, 0, 1, 1], [], []>} : vector<8x8xf32>, vector<8x8xf32>, vector<8x8xf32> -> vector<8x8xf32>
    %318 = vector.extract_strided_slice %284 {offsets = [0, 0], sizes = [8, 32], strides = [1, 1]} : vector<32x32xf32> to vector<8x32xf32>
    %cst_134 = arith.constant dense<0.000000e+00> : vector<8x32xf32>
    %319 = tpu.matmul %317, %318, %cst_134 {dimension_numbers = #tpu.dot_dimension_numbers<[1], [0], [0], [1], [0, 0, 1, 1], [], []>} : vector<8x8xf32>, vector<8x32xf32>, vector<8x32xf32> -> vector<8x32xf32>
    %320 = arith.addf %299, %319 : vector<8x32xf32>
    %321 = vector.extract_strided_slice %295 {offsets = [0, 8], sizes = [8, 8], strides = [1, 1]} : vector<8x32xf32> to vector<8x8xf32>
    %322 = vector.extract_strided_slice %296 {offsets = [0, 8], sizes = [8, 8], strides = [1, 1]} : vector<8x32xf32> to vector<8x8xf32>
    %323 = vector.extract_strided_slice %297 {offsets = [0, 8], sizes = [8, 8], strides = [1, 1]} : vector<8x32xf32> to vector<8x8xf32>
    %cst_135 = arith.constant dense<0.000000e+00> : vector<8x8xf32>
    %324 = tpu.matmul %321, %322, %cst_135 {dimension_numbers = #tpu.dot_dimension_numbers<[1], [1], [0], [0], [0, 0, 1, 0], [], []>} : vector<8x8xf32>, vector<8x8xf32>, vector<8x8xf32> -> vector<8x8xf32>
    %cst_136 = arith.constant 0.353553385 : f32
    %325 = vector.broadcast %cst_136 : f32 to vector<8x8xf32>
    %326 = arith.mulf %324, %325 : vector<8x8xf32>
    %327 = arith.addf %326, %298 : vector<8x8xf32>
    %cst_137 = arith.constant dense<0xFF800000> : vector<8xf32>
    %328 = vector.multi_reduction <maximumf>, %327, %cst_137 [1] : vector<8x8xf32> to vector<8xf32>
    %329 = vector.shape_cast %328 : vector<8xf32> to vector<8x1xf32>
    %330 = vector.broadcast %329 : vector<8x1xf32> to vector<8x8xf32>
    %331 = arith.subf %327, %330 : vector<8x8xf32>
    %332 = math.exp %331 : vector<8x8xf32>
    %cst_138 = arith.constant dense<0.000000e+00> : vector<8xf32>
    %333 = vector.multi_reduction <add>, %332, %cst_138 [1] : vector<8x8xf32> to vector<8xf32>
    %334 = vector.shape_cast %333 : vector<8xf32> to vector<8x1xf32>
    %335 = tpu.reciprocal %334 {approx = true} : vector<8x1xf32> -> vector<8x1xf32>
    %336 = vector.broadcast %335 : vector<8x1xf32> to vector<8x8xf32>
    %337 = arith.mulf %332, %336 : vector<8x8xf32>
    %cst_139 = arith.constant dense<0.000000e+00> : vector<8x8xf32>
    %338 = tpu.matmul %337, %323, %cst_139 {dimension_numbers = #tpu.dot_dimension_numbers<[1], [0], [0], [1], [0, 0, 1, 1], [], []>} : vector<8x8xf32>, vector<8x8xf32>, vector<8x8xf32> -> vector<8x8xf32>
    %339 = vector.extract_strided_slice %284 {offsets = [8, 0], sizes = [8, 32], strides = [1, 1]} : vector<32x32xf32> to vector<8x32xf32>
    %cst_140 = arith.constant dense<0.000000e+00> : vector<8x32xf32>
    %340 = tpu.matmul %338, %339, %cst_140 {dimension_numbers = #tpu.dot_dimension_numbers<[1], [0], [0], [1], [0, 0, 1, 1], [], []>} : vector<8x8xf32>, vector<8x32xf32>, vector<8x32xf32> -> vector<8x32xf32>
    %341 = arith.addf %320, %340 : vector<8x32xf32>
    %342 = vector.extract_strided_slice %295 {offsets = [0, 16], sizes = [8, 8], strides = [1, 1]} : vector<8x32xf32> to vector<8x8xf32>
    %343 = vector.extract_strided_slice %296 {offsets = [0, 16], sizes = [8, 8], strides = [1, 1]} : vector<8x32xf32> to vector<8x8xf32>
    %344 = vector.extract_strided_slice %297 {offsets = [0, 16], sizes = [8, 8], strides = [1, 1]} : vector<8x32xf32> to vector<8x8xf32>
    %cst_141 = arith.constant dense<0.000000e+00> : vector<8x8xf32>
    %345 = tpu.matmul %342, %343, %cst_141 {dimension_numbers = #tpu.dot_dimension_numbers<[1], [1], [0], [0], [0, 0, 1, 0], [], []>} : vector<8x8xf32>, vector<8x8xf32>, vector<8x8xf32> -> vector<8x8xf32>
    %cst_142 = arith.constant 0.353553385 : f32
    %346 = vector.broadcast %cst_142 : f32 to vector<8x8xf32>
    %347 = arith.mulf %345, %346 : vector<8x8xf32>
    %348 = arith.addf %347, %298 : vector<8x8xf32>
    %cst_143 = arith.constant dense<0xFF800000> : vector<8xf32>
    %349 = vector.multi_reduction <maximumf>, %348, %cst_143 [1] : vector<8x8xf32> to vector<8xf32>
    %350 = vector.shape_cast %349 : vector<8xf32> to vector<8x1xf32>
    %351 = vector.broadcast %350 : vector<8x1xf32> to vector<8x8xf32>
    %352 = arith.subf %348, %351 : vector<8x8xf32>
    %353 = math.exp %352 : vector<8x8xf32>
    %cst_144 = arith.constant dense<0.000000e+00> : vector<8xf32>
    %354 = vector.multi_reduction <add>, %353, %cst_144 [1] : vector<8x8xf32> to vector<8xf32>
    %355 = vector.shape_cast %354 : vector<8xf32> to vector<8x1xf32>
    %356 = tpu.reciprocal %355 {approx = true} : vector<8x1xf32> -> vector<8x1xf32>
    %357 = vector.broadcast %356 : vector<8x1xf32> to vector<8x8xf32>
    %358 = arith.mulf %353, %357 : vector<8x8xf32>
    %cst_145 = arith.constant dense<0.000000e+00> : vector<8x8xf32>
    %359 = tpu.matmul %358, %344, %cst_145 {dimension_numbers = #tpu.dot_dimension_numbers<[1], [0], [0], [1], [0, 0, 1, 1], [], []>} : vector<8x8xf32>, vector<8x8xf32>, vector<8x8xf32> -> vector<8x8xf32>
    %360 = vector.extract_strided_slice %284 {offsets = [16, 0], sizes = [8, 32], strides = [1, 1]} : vector<32x32xf32> to vector<8x32xf32>
    %cst_146 = arith.constant dense<0.000000e+00> : vector<8x32xf32>
    %361 = tpu.matmul %359, %360, %cst_146 {dimension_numbers = #tpu.dot_dimension_numbers<[1], [0], [0], [1], [0, 0, 1, 1], [], []>} : vector<8x8xf32>, vector<8x32xf32>, vector<8x32xf32> -> vector<8x32xf32>
    %362 = arith.addf %341, %361 : vector<8x32xf32>
    %363 = vector.extract_strided_slice %295 {offsets = [0, 24], sizes = [8, 8], strides = [1, 1]} : vector<8x32xf32> to vector<8x8xf32>
    %364 = vector.extract_strided_slice %296 {offsets = [0, 24], sizes = [8, 8], strides = [1, 1]} : vector<8x32xf32> to vector<8x8xf32>
    %365 = vector.extract_strided_slice %297 {offsets = [0, 24], sizes = [8, 8], strides = [1, 1]} : vector<8x32xf32> to vector<8x8xf32>
    %cst_147 = arith.constant dense<0.000000e+00> : vector<8x8xf32>
    %366 = tpu.matmul %363, %364, %cst_147 {dimension_numbers = #tpu.dot_dimension_numbers<[1], [1], [0], [0], [0, 0, 1, 0], [], []>} : vector<8x8xf32>, vector<8x8xf32>, vector<8x8xf32> -> vector<8x8xf32>
    %cst_148 = arith.constant 0.353553385 : f32
    %367 = vector.broadcast %cst_148 : f32 to vector<8x8xf32>
    %368 = arith.mulf %366, %367 : vector<8x8xf32>
    %369 = arith.addf %368, %298 : vector<8x8xf32>
    %cst_149 = arith.constant dense<0xFF800000> : vector<8xf32>
    %370 = vector.multi_reduction <maximumf>, %369, %cst_149 [1] : vector<8x8xf32> to vector<8xf32>
    %371 = vector.shape_cast %370 : vector<8xf32> to vector<8x1xf32>
    %372 = vector.broadcast %371 : vector<8x1xf32> to vector<8x8xf32>
    %373 = arith.subf %369, %372 : vector<8x8xf32>
    %374 = math.exp %373 : vector<8x8xf32>
    %cst_150 = arith.constant dense<0.000000e+00> : vector<8xf32>
    %375 = vector.multi_reduction <add>, %374, %cst_150 [1] : vector<8x8xf32> to vector<8xf32>
    %376 = vector.shape_cast %375 : vector<8xf32> to vector<8x1xf32>
    %377 = tpu.reciprocal %376 {approx = true} : vector<8x1xf32> -> vector<8x1xf32>
    %378 = vector.broadcast %377 : vector<8x1xf32> to vector<8x8xf32>
    %379 = arith.mulf %374, %378 : vector<8x8xf32>
    %cst_151 = arith.constant dense<0.000000e+00> : vector<8x8xf32>
    %380 = tpu.matmul %379, %365, %cst_151 {dimension_numbers = #tpu.dot_dimension_numbers<[1], [0], [0], [1], [0, 0, 1, 1], [], []>} : vector<8x8xf32>, vector<8x8xf32>, vector<8x8xf32> -> vector<8x8xf32>
    %381 = vector.extract_strided_slice %284 {offsets = [24, 0], sizes = [8, 32], strides = [1, 1]} : vector<32x32xf32> to vector<8x32xf32>
    %cst_152 = arith.constant dense<0.000000e+00> : vector<8x32xf32>
    %382 = tpu.matmul %380, %381, %cst_152 {dimension_numbers = #tpu.dot_dimension_numbers<[1], [0], [0], [1], [0, 0, 1, 1], [], []>} : vector<8x8xf32>, vector<8x32xf32>, vector<8x32xf32> -> vector<8x32xf32>
    %383 = arith.addf %362, %382 : vector<8x32xf32>
    %384 = vector.broadcast %286 : vector<1x32xf32> to vector<8x32xf32>
    %385 = arith.addf %383, %384 : vector<8x32xf32>
    %386 = vector.extract_strided_slice %289 {offsets = [8, 0], sizes = [8, 32], strides = [1, 1]} : vector<16x32xf32> to vector<8x32xf32>
    %387 = vector.extract_strided_slice %293 {offsets = [8, 0], sizes = [8, 32], strides = [1, 1]} : vector<16x32xf32> to vector<8x32xf32>
    %388 = vector.extract_strided_slice %294 {offsets = [8, 0], sizes = [8, 32], strides = [1, 1]} : vector<16x32xf32> to vector<8x32xf32>
    %389 = vector.extract_strided_slice %1 {offsets = [8, 0], sizes = [8, 8], strides = [1, 1]} : vector<16x8xf32> to vector<8x8xf32>
    %cst_153 = arith.constant 0.000000e+00 : f32
    %390 = vector.broadcast %cst_153 : f32 to vector<8x32xf32>
    %391 = vector.extract_strided_slice %386 {offsets = [0, 0], sizes = [8, 8], strides = [1, 1]} : vector<8x32xf32> to vector<8x8xf32>
    %392 = vector.extract_strided_slice %387 {offsets = [0, 0], sizes = [8, 8], strides = [1, 1]} : vector<8x32xf32> to vector<8x8xf32>
    %393 = vector.extract_strided_slice %388 {offsets = [0, 0], sizes = [8, 8], strides = [1, 1]} : vector<8x32xf32> to vector<8x8xf32>
    %cst_154 = arith.constant dense<0.000000e+00> : vector<8x8xf32>
    %394 = tpu.matmul %391, %392, %cst_154 {dimension_numbers = #tpu.dot_dimension_numbers<[1], [1], [0], [0], [0, 0, 1, 0], [], []>} : vector<8x8xf32>, vector<8x8xf32>, vector<8x8xf32> -> vector<8x8xf32>
    %cst_155 = arith.constant 0.353553385 : f32
    %395 = vector.broadcast %cst_155 : f32 to vector<8x8xf32>
    %396 = arith.mulf %394, %395 : vector<8x8xf32>
    %397 = arith.addf %396, %389 : vector<8x8xf32>
    %cst_156 = arith.constant dense<0xFF800000> : vector<8xf32>
    %398 = vector.multi_reduction <maximumf>, %397, %cst_156 [1] : vector<8x8xf32> to vector<8xf32>
    %399 = vector.shape_cast %398 : vector<8xf32> to vector<8x1xf32>
    %400 = vector.broadcast %399 : vector<8x1xf32> to vector<8x8xf32>
    %401 = arith.subf %397, %400 : vector<8x8xf32>
    %402 = math.exp %401 : vector<8x8xf32>
    %cst_157 = arith.constant dense<0.000000e+00> : vector<8xf32>
    %403 = vector.multi_reduction <add>, %402, %cst_157 [1] : vector<8x8xf32> to vector<8xf32>
    %404 = vector.shape_cast %403 : vector<8xf32> to vector<8x1xf32>
    %405 = tpu.reciprocal %404 {approx = true} : vector<8x1xf32> -> vector<8x1xf32>
    %406 = vector.broadcast %405 : vector<8x1xf32> to vector<8x8xf32>
    %407 = arith.mulf %402, %406 : vector<8x8xf32>
    %cst_158 = arith.constant dense<0.000000e+00> : vector<8x8xf32>
    %408 = tpu.matmul %407, %393, %cst_158 {dimension_numbers = #tpu.dot_dimension_numbers<[1], [0], [0], [1], [0, 0, 1, 1], [], []>} : vector<8x8xf32>, vector<8x8xf32>, vector<8x8xf32> -> vector<8x8xf32>
    %409 = vector.extract_strided_slice %284 {offsets = [0, 0], sizes = [8, 32], strides = [1, 1]} : vector<32x32xf32> to vector<8x32xf32>
    %cst_159 = arith.constant dense<0.000000e+00> : vector<8x32xf32>
    %410 = tpu.matmul %408, %409, %cst_159 {dimension_numbers = #tpu.dot_dimension_numbers<[1], [0], [0], [1], [0, 0, 1, 1], [], []>} : vector<8x8xf32>, vector<8x32xf32>, vector<8x32xf32> -> vector<8x32xf32>
    %411 = arith.addf %390, %410 : vector<8x32xf32>
    %412 = vector.extract_strided_slice %386 {offsets = [0, 8], sizes = [8, 8], strides = [1, 1]} : vector<8x32xf32> to vector<8x8xf32>
    %413 = vector.extract_strided_slice %387 {offsets = [0, 8], sizes = [8, 8], strides = [1, 1]} : vector<8x32xf32> to vector<8x8xf32>
    %414 = vector.extract_strided_slice %388 {offsets = [0, 8], sizes = [8, 8], strides = [1, 1]} : vector<8x32xf32> to vector<8x8xf32>
    %cst_160 = arith.constant dense<0.000000e+00> : vector<8x8xf32>
    %415 = tpu.matmul %412, %413, %cst_160 {dimension_numbers = #tpu.dot_dimension_numbers<[1], [1], [0], [0], [0, 0, 1, 0], [], []>} : vector<8x8xf32>, vector<8x8xf32>, vector<8x8xf32> -> vector<8x8xf32>
    %cst_161 = arith.constant 0.353553385 : f32
    %416 = vector.broadcast %cst_161 : f32 to vector<8x8xf32>
    %417 = arith.mulf %415, %416 : vector<8x8xf32>
    %418 = arith.addf %417, %389 : vector<8x8xf32>
    %cst_162 = arith.constant dense<0xFF800000> : vector<8xf32>
    %419 = vector.multi_reduction <maximumf>, %418, %cst_162 [1] : vector<8x8xf32> to vector<8xf32>
    %420 = vector.shape_cast %419 : vector<8xf32> to vector<8x1xf32>
    %421 = vector.broadcast %420 : vector<8x1xf32> to vector<8x8xf32>
    %422 = arith.subf %418, %421 : vector<8x8xf32>
    %423 = math.exp %422 : vector<8x8xf32>
    %cst_163 = arith.constant dense<0.000000e+00> : vector<8xf32>
    %424 = vector.multi_reduction <add>, %423, %cst_163 [1] : vector<8x8xf32> to vector<8xf32>
    %425 = vector.shape_cast %424 : vector<8xf32> to vector<8x1xf32>
    %426 = tpu.reciprocal %425 {approx = true} : vector<8x1xf32> -> vector<8x1xf32>
    %427 = vector.broadcast %426 : vector<8x1xf32> to vector<8x8xf32>
    %428 = arith.mulf %423, %427 : vector<8x8xf32>
    %cst_164 = arith.constant dense<0.000000e+00> : vector<8x8xf32>
    %429 = tpu.matmul %428, %414, %cst_164 {dimension_numbers = #tpu.dot_dimension_numbers<[1], [0], [0], [1], [0, 0, 1, 1], [], []>} : vector<8x8xf32>, vector<8x8xf32>, vector<8x8xf32> -> vector<8x8xf32>
    %430 = vector.extract_strided_slice %284 {offsets = [8, 0], sizes = [8, 32], strides = [1, 1]} : vector<32x32xf32> to vector<8x32xf32>
    %cst_165 = arith.constant dense<0.000000e+00> : vector<8x32xf32>
    %431 = tpu.matmul %429, %430, %cst_165 {dimension_numbers = #tpu.dot_dimension_numbers<[1], [0], [0], [1], [0, 0, 1, 1], [], []>} : vector<8x8xf32>, vector<8x32xf32>, vector<8x32xf32> -> vector<8x32xf32>
    %432 = arith.addf %411, %431 : vector<8x32xf32>
    %433 = vector.extract_strided_slice %386 {offsets = [0, 16], sizes = [8, 8], strides = [1, 1]} : vector<8x32xf32> to vector<8x8xf32>
    %434 = vector.extract_strided_slice %387 {offsets = [0, 16], sizes = [8, 8], strides = [1, 1]} : vector<8x32xf32> to vector<8x8xf32>
    %435 = vector.extract_strided_slice %388 {offsets = [0, 16], sizes = [8, 8], strides = [1, 1]} : vector<8x32xf32> to vector<8x8xf32>
    %cst_166 = arith.constant dense<0.000000e+00> : vector<8x8xf32>
    %436 = tpu.matmul %433, %434, %cst_166 {dimension_numbers = #tpu.dot_dimension_numbers<[1], [1], [0], [0], [0, 0, 1, 0], [], []>} : vector<8x8xf32>, vector<8x8xf32>, vector<8x8xf32> -> vector<8x8xf32>
    %cst_167 = arith.constant 0.353553385 : f32
    %437 = vector.broadcast %cst_167 : f32 to vector<8x8xf32>
    %438 = arith.mulf %436, %437 : vector<8x8xf32>
    %439 = arith.addf %438, %389 : vector<8x8xf32>
    %cst_168 = arith.constant dense<0xFF800000> : vector<8xf32>
    %440 = vector.multi_reduction <maximumf>, %439, %cst_168 [1] : vector<8x8xf32> to vector<8xf32>
    %441 = vector.shape_cast %440 : vector<8xf32> to vector<8x1xf32>
    %442 = vector.broadcast %441 : vector<8x1xf32> to vector<8x8xf32>
    %443 = arith.subf %439, %442 : vector<8x8xf32>
    %444 = math.exp %443 : vector<8x8xf32>
    %cst_169 = arith.constant dense<0.000000e+00> : vector<8xf32>
    %445 = vector.multi_reduction <add>, %444, %cst_169 [1] : vector<8x8xf32> to vector<8xf32>
    %446 = vector.shape_cast %445 : vector<8xf32> to vector<8x1xf32>
    %447 = tpu.reciprocal %446 {approx = true} : vector<8x1xf32> -> vector<8x1xf32>
    %448 = vector.broadcast %447 : vector<8x1xf32> to vector<8x8xf32>
    %449 = arith.mulf %444, %448 : vector<8x8xf32>
    %cst_170 = arith.constant dense<0.000000e+00> : vector<8x8xf32>
    %450 = tpu.matmul %449, %435, %cst_170 {dimension_numbers = #tpu.dot_dimension_numbers<[1], [0], [0], [1], [0, 0, 1, 1], [], []>} : vector<8x8xf32>, vector<8x8xf32>, vector<8x8xf32> -> vector<8x8xf32>
    %451 = vector.extract_strided_slice %284 {offsets = [16, 0], sizes = [8, 32], strides = [1, 1]} : vector<32x32xf32> to vector<8x32xf32>
    %cst_171 = arith.constant dense<0.000000e+00> : vector<8x32xf32>
    %452 = tpu.matmul %450, %451, %cst_171 {dimension_numbers = #tpu.dot_dimension_numbers<[1], [0], [0], [1], [0, 0, 1, 1], [], []>} : vector<8x8xf32>, vector<8x32xf32>, vector<8x32xf32> -> vector<8x32xf32>
    %453 = arith.addf %432, %452 : vector<8x32xf32>
    %454 = vector.extract_strided_slice %386 {offsets = [0, 24], sizes = [8, 8], strides = [1, 1]} : vector<8x32xf32> to vector<8x8xf32>
    %455 = vector.extract_strided_slice %387 {offsets = [0, 24], sizes = [8, 8], strides = [1, 1]} : vector<8x32xf32> to vector<8x8xf32>
    %456 = vector.extract_strided_slice %388 {offsets = [0, 24], sizes = [8, 8], strides = [1, 1]} : vector<8x32xf32> to vector<8x8xf32>
    %cst_172 = arith.constant dense<0.000000e+00> : vector<8x8xf32>
    %457 = tpu.matmul %454, %455, %cst_172 {dimension_numbers = #tpu.dot_dimension_numbers<[1], [1], [0], [0], [0, 0, 1, 0], [], []>} : vector<8x8xf32>, vector<8x8xf32>, vector<8x8xf32> -> vector<8x8xf32>
    %cst_173 = arith.constant 0.353553385 : f32
    %458 = vector.broadcast %cst_173 : f32 to vector<8x8xf32>
    %459 = arith.mulf %457, %458 : vector<8x8xf32>
    %460 = arith.addf %459, %389 : vector<8x8xf32>
    %cst_174 = arith.constant dense<0xFF800000> : vector<8xf32>
    %461 = vector.multi_reduction <maximumf>, %460, %cst_174 [1] : vector<8x8xf32> to vector<8xf32>
    %462 = vector.shape_cast %461 : vector<8xf32> to vector<8x1xf32>
    %463 = vector.broadcast %462 : vector<8x1xf32> to vector<8x8xf32>
    %464 = arith.subf %460, %463 : vector<8x8xf32>
    %465 = math.exp %464 : vector<8x8xf32>
    %cst_175 = arith.constant dense<0.000000e+00> : vector<8xf32>
    %466 = vector.multi_reduction <add>, %465, %cst_175 [1] : vector<8x8xf32> to vector<8xf32>
    %467 = vector.shape_cast %466 : vector<8xf32> to vector<8x1xf32>
    %468 = tpu.reciprocal %467 {approx = true} : vector<8x1xf32> -> vector<8x1xf32>
    %469 = vector.broadcast %468 : vector<8x1xf32> to vector<8x8xf32>
    %470 = arith.mulf %465, %469 : vector<8x8xf32>
    %cst_176 = arith.constant dense<0.000000e+00> : vector<8x8xf32>
    %471 = tpu.matmul %470, %456, %cst_176 {dimension_numbers = #tpu.dot_dimension_numbers<[1], [0], [0], [1], [0, 0, 1, 1], [], []>} : vector<8x8xf32>, vector<8x8xf32>, vector<8x8xf32> -> vector<8x8xf32>
    %472 = vector.extract_strided_slice %284 {offsets = [24, 0], sizes = [8, 32], strides = [1, 1]} : vector<32x32xf32> to vector<8x32xf32>
    %cst_177 = arith.constant dense<0.000000e+00> : vector<8x32xf32>
    %473 = tpu.matmul %471, %472, %cst_177 {dimension_numbers = #tpu.dot_dimension_numbers<[1], [0], [0], [1], [0, 0, 1, 1], [], []>} : vector<8x8xf32>, vector<8x32xf32>, vector<8x32xf32> -> vector<8x32xf32>
    %474 = arith.addf %453, %473 : vector<8x32xf32>
    %475 = vector.broadcast %286 : vector<1x32xf32> to vector<8x32xf32>
    %476 = arith.addf %474, %475 : vector<8x32xf32>
    %477 = tpu.concatenate %385, %476 in 0 : vector<8x32xf32>, vector<8x32xf32> -> vector<16x32xf32>
    %478 = arith.addf %274, %477 : vector<16x32xf32>
    %c1_178 = arith.constant 1 : index
    %c0_179 = arith.constant 0 : index
    %c0_180 = arith.constant 0 : index
    %479 = vector.load %arg11[%c1_178, %c0_179, %c0_180] : memref<2x1x32xf32, #tpu.memory_space<vmem>>, vector<1x1x32xf32>
    %480 = vector.shape_cast %479 : vector<1x1x32xf32> to vector<1x32xf32>
    %c1_181 = arith.constant 1 : index
    %c0_182 = arith.constant 0 : index
    %c0_183 = arith.constant 0 : index
    %481 = vector.load %arg12[%c1_181, %c0_182, %c0_183] : memref<2x1x32xf32, #tpu.memory_space<vmem>>, vector<1x1x32xf32>
    %482 = vector.shape_cast %481 : vector<1x1x32xf32> to vector<1x32xf32>
    %cst_184 = arith.constant dense<0.000000e+00> : vector<16xf32>
    %483 = vector.multi_reduction <add>, %478, %cst_184 [1] : vector<16x32xf32> to vector<16xf32>
    %484 = vector.shape_cast %483 : vector<16xf32> to vector<16x1xf32>
    %cst_185 = arith.constant 3.200000e+01 : f32
    %485 = vector.broadcast %cst_185 : f32 to vector<16x1xf32>
    %486 = arith.divf %484, %485 : vector<16x1xf32>
    %487 = vector.broadcast %486 : vector<16x1xf32> to vector<16x32xf32>
    %488 = arith.subf %478, %487 : vector<16x32xf32>
    %489 = arith.mulf %488, %488 : vector<16x32xf32>
    %cst_186 = arith.constant dense<0.000000e+00> : vector<16xf32>
    %490 = vector.multi_reduction <add>, %489, %cst_186 [1] : vector<16x32xf32> to vector<16xf32>
    %491 = vector.shape_cast %490 : vector<16xf32> to vector<16x1xf32>
    %cst_187 = arith.constant 3.200000e+01 : f32
    %492 = vector.broadcast %cst_187 : f32 to vector<16x1xf32>
    %493 = arith.divf %491, %492 : vector<16x1xf32>
    %494 = vector.broadcast %486 : vector<16x1xf32> to vector<16x32xf32>
    %495 = arith.subf %478, %494 : vector<16x32xf32>
    %cst_188 = arith.constant 9.99999974E-6 : f32
    %496 = vector.broadcast %cst_188 : f32 to vector<16x1xf32>
    %497 = arith.addf %493, %496 : vector<16x1xf32>
    %498 = math.rsqrt %497 : vector<16x1xf32>
    %499 = vector.broadcast %498 : vector<16x1xf32> to vector<16x32xf32>
    %500 = arith.mulf %495, %499 : vector<16x32xf32>
    %501 = vector.broadcast %480 : vector<1x32xf32> to vector<16x32xf32>
    %502 = arith.mulf %500, %501 : vector<16x32xf32>
    %503 = vector.broadcast %482 : vector<1x32xf32> to vector<16x32xf32>
    %504 = arith.addf %502, %503 : vector<16x32xf32>
    %c1_189 = arith.constant 1 : index
    %c0_190 = arith.constant 0 : index
    %c0_191 = arith.constant 0 : index
    %505 = vector.load %arg13[%c1_189, %c0_190, %c0_191] : memref<2x32x64xf32, #tpu.memory_space<vmem>>, vector<1x32x64xf32>
    %506 = vector.shape_cast %505 : vector<1x32x64xf32> to vector<32x64xf32>
    %c1_192 = arith.constant 1 : index
    %c0_193 = arith.constant 0 : index
    %c0_194 = arith.constant 0 : index
    %507 = vector.load %arg14[%c1_192, %c0_193, %c0_194] : memref<2x1x64xf32, #tpu.memory_space<vmem>>, vector<1x1x64xf32>
    %508 = vector.shape_cast %507 : vector<1x1x64xf32> to vector<1x64xf32>
    %c1_195 = arith.constant 1 : index
    %c0_196 = arith.constant 0 : index
    %c0_197 = arith.constant 0 : index
    %509 = vector.load %arg15[%c1_195, %c0_196, %c0_197] : memref<2x64x32xf32, #tpu.memory_space<vmem>>, vector<1x64x32xf32>
    %510 = vector.shape_cast %509 : vector<1x64x32xf32> to vector<64x32xf32>
    %c1_198 = arith.constant 1 : index
    %c0_199 = arith.constant 0 : index
    %c0_200 = arith.constant 0 : index
    %511 = vector.load %arg16[%c1_198, %c0_199, %c0_200] : memref<2x1x32xf32, #tpu.memory_space<vmem>>, vector<1x1x32xf32>
    %512 = vector.shape_cast %511 : vector<1x1x32xf32> to vector<1x32xf32>
    %cst_201 = arith.constant dense<0.000000e+00> : vector<16x64xf32>
    %513 = tpu.matmul %504, %506, %cst_201 {dimension_numbers = #tpu.dot_dimension_numbers<[1], [0], [0], [1], [0, 0, 1, 1], [], []>} : vector<16x32xf32>, vector<32x64xf32>, vector<16x64xf32> -> vector<16x64xf32>
    %514 = vector.broadcast %508 : vector<1x64xf32> to vector<16x64xf32>
    %515 = arith.addf %513, %514 : vector<16x64xf32>
    %cst_202 = arith.constant 0.000000e+00 : f32
    %516 = vector.broadcast %cst_202 : f32 to vector<16x64xf32>
    %517 = arith.maximumf %515, %516 : vector<16x64xf32>
    %cst_203 = arith.constant dense<0.000000e+00> : vector<16x32xf32>
    %518 = tpu.matmul %517, %510, %cst_203 {dimension_numbers = #tpu.dot_dimension_numbers<[1], [0], [0], [1], [0, 0, 1, 1], [], []>} : vector<16x64xf32>, vector<64x32xf32>, vector<16x32xf32> -> vector<16x32xf32>
    %519 = vector.broadcast %512 : vector<1x32xf32> to vector<16x32xf32>
    %520 = arith.addf %518, %519 : vector<16x32xf32>
    %521 = arith.addf %504, %520 : vector<16x32xf32>
    %c1_204 = arith.constant 1 : index
    %c0_205 = arith.constant 0 : index
    %c0_206 = arith.constant 0 : index
    %522 = vector.load %arg17[%c1_204, %c0_205, %c0_206] : memref<2x1x32xf32, #tpu.memory_space<vmem>>, vector<1x1x32xf32>
    %523 = vector.shape_cast %522 : vector<1x1x32xf32> to vector<1x32xf32>
    %c1_207 = arith.constant 1 : index
    %c0_208 = arith.constant 0 : index
    %c0_209 = arith.constant 0 : index
    %524 = vector.load %arg18[%c1_207, %c0_208, %c0_209] : memref<2x1x32xf32, #tpu.memory_space<vmem>>, vector<1x1x32xf32>
    %525 = vector.shape_cast %524 : vector<1x1x32xf32> to vector<1x32xf32>
    %cst_210 = arith.constant dense<0.000000e+00> : vector<16xf32>
    %526 = vector.multi_reduction <add>, %521, %cst_210 [1] : vector<16x32xf32> to vector<16xf32>
    %527 = vector.shape_cast %526 : vector<16xf32> to vector<16x1xf32>
    %cst_211 = arith.constant 3.200000e+01 : f32
    %528 = vector.broadcast %cst_211 : f32 to vector<16x1xf32>
    %529 = arith.divf %527, %528 : vector<16x1xf32>
    %530 = vector.broadcast %529 : vector<16x1xf32> to vector<16x32xf32>
    %531 = arith.subf %521, %530 : vector<16x32xf32>
    %532 = arith.mulf %531, %531 : vector<16x32xf32>
    %cst_212 = arith.constant dense<0.000000e+00> : vector<16xf32>
    %533 = vector.multi_reduction <add>, %532, %cst_212 [1] : vector<16x32xf32> to vector<16xf32>
    %534 = vector.shape_cast %533 : vector<16xf32> to vector<16x1xf32>
    %cst_213 = arith.constant 3.200000e+01 : f32
    %535 = vector.broadcast %cst_213 : f32 to vector<16x1xf32>
    %536 = arith.divf %534, %535 : vector<16x1xf32>
    %537 = vector.broadcast %529 : vector<16x1xf32> to vector<16x32xf32>
    %538 = arith.subf %521, %537 : vector<16x32xf32>
    %cst_214 = arith.constant 9.99999974E-6 : f32
    %539 = vector.broadcast %cst_214 : f32 to vector<16x1xf32>
    %540 = arith.addf %536, %539 : vector<16x1xf32>
    %541 = math.rsqrt %540 : vector<16x1xf32>
    %542 = vector.broadcast %541 : vector<16x1xf32> to vector<16x32xf32>
    %543 = arith.mulf %538, %542 : vector<16x32xf32>
    %544 = vector.broadcast %523 : vector<1x32xf32> to vector<16x32xf32>
    %545 = arith.mulf %543, %544 : vector<16x32xf32>
    %546 = vector.broadcast %525 : vector<1x32xf32> to vector<16x32xf32>
    %547 = arith.addf %545, %546 : vector<16x32xf32>
    %c0_215 = arith.constant 0 : index
    %c0_216 = arith.constant 0 : index
    %548 = vector.load %arg1[%c0_215, %c0_216] : memref<16x32xf32, #tpu.memory_space<vmem>>, vector<16x32xf32>
    %c0_217 = arith.constant 0 : index
    %c0_218 = arith.constant 0 : index
    %549 = vector.load %arg3[%c0_217, %c0_218] : memref<16x8xf32, #tpu.memory_space<vmem>>, vector<16x8xf32>
    %c0_219 = arith.constant 0 : index
    %c0_220 = arith.constant 0 : index
    %550 = vector.load %arg4[%c0_219, %c0_220] : memref<16x8xf32, #tpu.memory_space<vmem>>, vector<16x8xf32>
    %c0_221 = arith.constant 0 : index
    %c0_222 = arith.constant 0 : index
    %c0_223 = arith.constant 0 : index
    %551 = vector.load %arg19[%c0_221, %c0_222, %c0_223] : memref<2x32x32xf32, #tpu.memory_space<vmem>>, vector<1x32x32xf32>
    %552 = vector.shape_cast %551 : vector<1x32x32xf32> to vector<32x32xf32>
    %c0_224 = arith.constant 0 : index
    %c0_225 = arith.constant 0 : index
    %c0_226 = arith.constant 0 : index
    %553 = vector.load %arg20[%c0_224, %c0_225, %c0_226] : memref<2x1x32xf32, #tpu.memory_space<vmem>>, vector<1x1x32xf32>
    %554 = vector.shape_cast %553 : vector<1x1x32xf32> to vector<1x32xf32>
    %c0_227 = arith.constant 0 : index
    %c0_228 = arith.constant 0 : index
    %c0_229 = arith.constant 0 : index
    %555 = vector.load %arg21[%c0_227, %c0_228, %c0_229] : memref<2x32x64xf32, #tpu.memory_space<vmem>>, vector<1x32x64xf32>
    %556 = vector.shape_cast %555 : vector<1x32x64xf32> to vector<32x64xf32>
    %c0_230 = arith.constant 0 : index
    %c0_231 = arith.constant 0 : index
    %c0_232 = arith.constant 0 : index
    %557 = vector.load %arg22[%c0_230, %c0_231, %c0_232] : memref<2x1x64xf32, #tpu.memory_space<vmem>>, vector<1x1x64xf32>
    %558 = vector.shape_cast %557 : vector<1x1x64xf32> to vector<1x64xf32>
    %c0_233 = arith.constant 0 : index
    %c0_234 = arith.constant 0 : index
    %c0_235 = arith.constant 0 : index
    %559 = vector.load %arg23[%c0_233, %c0_234, %c0_235] : memref<2x32x32xf32, #tpu.memory_space<vmem>>, vector<1x32x32xf32>
    %560 = vector.shape_cast %559 : vector<1x32x32xf32> to vector<32x32xf32>
    %c0_236 = arith.constant 0 : index
    %c0_237 = arith.constant 0 : index
    %c0_238 = arith.constant 0 : index
    %561 = vector.load %arg24[%c0_236, %c0_237, %c0_238] : memref<2x1x32xf32, #tpu.memory_space<vmem>>, vector<1x1x32xf32>
    %562 = vector.shape_cast %561 : vector<1x1x32xf32> to vector<1x32xf32>
    %cst_239 = arith.constant dense<0.000000e+00> : vector<16x32xf32>
    %563 = tpu.matmul %548, %552, %cst_239 {dimension_numbers = #tpu.dot_dimension_numbers<[1], [0], [0], [1], [0, 0, 1, 1], [], []>} : vector<16x32xf32>, vector<32x32xf32>, vector<16x32xf32> -> vector<16x32xf32>
    %564 = vector.broadcast %554 : vector<1x32xf32> to vector<16x32xf32>
    %565 = arith.addf %563, %564 : vector<16x32xf32>
    %cst_240 = arith.constant dense<0.000000e+00> : vector<16x64xf32>
    %566 = tpu.matmul %548, %556, %cst_240 {dimension_numbers = #tpu.dot_dimension_numbers<[1], [0], [0], [1], [0, 0, 1, 1], [], []>} : vector<16x32xf32>, vector<32x64xf32>, vector<16x64xf32> -> vector<16x64xf32>
    %567 = vector.broadcast %558 : vector<1x64xf32> to vector<16x64xf32>
    %568 = arith.addf %566, %567 : vector<16x64xf32>
    %569 = vector.extract_strided_slice %568 {offsets = [0, 0], sizes = [16, 32], strides = [1, 1]} : vector<16x64xf32> to vector<16x32xf32>
    %570 = vector.extract_strided_slice %568 {offsets = [0, 32], sizes = [16, 32], strides = [1, 1]} : vector<16x64xf32> to vector<16x32xf32>
    %571 = vector.extract_strided_slice %565 {offsets = [0, 0], sizes = [8, 32], strides = [1, 1]} : vector<16x32xf32> to vector<8x32xf32>
    %572 = vector.extract_strided_slice %569 {offsets = [0, 0], sizes = [8, 32], strides = [1, 1]} : vector<16x32xf32> to vector<8x32xf32>
    %573 = vector.extract_strided_slice %570 {offsets = [0, 0], sizes = [8, 32], strides = [1, 1]} : vector<16x32xf32> to vector<8x32xf32>
    %574 = vector.extract_strided_slice %549 {offsets = [0, 0], sizes = [8, 8], strides = [1, 1]} : vector<16x8xf32> to vector<8x8xf32>
    %cst_241 = arith.constant 0.000000e+00 : f32
    %575 = vector.broadcast %cst_241 : f32 to vector<8x32xf32>
    %576 = vector.extract_strided_slice %571 {offsets = [0, 0], sizes = [8, 8], strides = [1, 1]} : vector<8x32xf32> to vector<8x8xf32>
    %577 = vector.extract_strided_slice %572 {offsets = [0, 0], sizes = [8, 8], strides = [1, 1]} : vector<8x32xf32> to vector<8x8xf32>
    %578 = vector.extract_strided_slice %573 {offsets = [0, 0], sizes = [8, 8], strides = [1, 1]} : vector<8x32xf32> to vector<8x8xf32>
    %cst_242 = arith.constant dense<0.000000e+00> : vector<8x8xf32>
    %579 = tpu.matmul %576, %577, %cst_242 {dimension_numbers = #tpu.dot_dimension_numbers<[1], [1], [0], [0], [0, 0, 1, 0], [], []>} : vector<8x8xf32>, vector<8x8xf32>, vector<8x8xf32> -> vector<8x8xf32>
    %cst_243 = arith.constant 0.353553385 : f32
    %580 = vector.broadcast %cst_243 : f32 to vector<8x8xf32>
    %581 = arith.mulf %579, %580 : vector<8x8xf32>
    %582 = arith.addf %581, %574 : vector<8x8xf32>
    %cst_244 = arith.constant dense<0xFF800000> : vector<8xf32>
    %583 = vector.multi_reduction <maximumf>, %582, %cst_244 [1] : vector<8x8xf32> to vector<8xf32>
    %584 = vector.shape_cast %583 : vector<8xf32> to vector<8x1xf32>
    %585 = vector.broadcast %584 : vector<8x1xf32> to vector<8x8xf32>
    %586 = arith.subf %582, %585 : vector<8x8xf32>
    %587 = math.exp %586 : vector<8x8xf32>
    %cst_245 = arith.constant dense<0.000000e+00> : vector<8xf32>
    %588 = vector.multi_reduction <add>, %587, %cst_245 [1] : vector<8x8xf32> to vector<8xf32>
    %589 = vector.shape_cast %588 : vector<8xf32> to vector<8x1xf32>
    %590 = tpu.reciprocal %589 {approx = true} : vector<8x1xf32> -> vector<8x1xf32>
    %591 = vector.broadcast %590 : vector<8x1xf32> to vector<8x8xf32>
    %592 = arith.mulf %587, %591 : vector<8x8xf32>
    %cst_246 = arith.constant dense<0.000000e+00> : vector<8x8xf32>
    %593 = tpu.matmul %592, %578, %cst_246 {dimension_numbers = #tpu.dot_dimension_numbers<[1], [0], [0], [1], [0, 0, 1, 1], [], []>} : vector<8x8xf32>, vector<8x8xf32>, vector<8x8xf32> -> vector<8x8xf32>
    %594 = vector.extract_strided_slice %560 {offsets = [0, 0], sizes = [8, 32], strides = [1, 1]} : vector<32x32xf32> to vector<8x32xf32>
    %cst_247 = arith.constant dense<0.000000e+00> : vector<8x32xf32>
    %595 = tpu.matmul %593, %594, %cst_247 {dimension_numbers = #tpu.dot_dimension_numbers<[1], [0], [0], [1], [0, 0, 1, 1], [], []>} : vector<8x8xf32>, vector<8x32xf32>, vector<8x32xf32> -> vector<8x32xf32>
    %596 = arith.addf %575, %595 : vector<8x32xf32>
    %597 = vector.extract_strided_slice %571 {offsets = [0, 8], sizes = [8, 8], strides = [1, 1]} : vector<8x32xf32> to vector<8x8xf32>
    %598 = vector.extract_strided_slice %572 {offsets = [0, 8], sizes = [8, 8], strides = [1, 1]} : vector<8x32xf32> to vector<8x8xf32>
    %599 = vector.extract_strided_slice %573 {offsets = [0, 8], sizes = [8, 8], strides = [1, 1]} : vector<8x32xf32> to vector<8x8xf32>
    %cst_248 = arith.constant dense<0.000000e+00> : vector<8x8xf32>
    %600 = tpu.matmul %597, %598, %cst_248 {dimension_numbers = #tpu.dot_dimension_numbers<[1], [1], [0], [0], [0, 0, 1, 0], [], []>} : vector<8x8xf32>, vector<8x8xf32>, vector<8x8xf32> -> vector<8x8xf32>
    %cst_249 = arith.constant 0.353553385 : f32
    %601 = vector.broadcast %cst_249 : f32 to vector<8x8xf32>
    %602 = arith.mulf %600, %601 : vector<8x8xf32>
    %603 = arith.addf %602, %574 : vector<8x8xf32>
    %cst_250 = arith.constant dense<0xFF800000> : vector<8xf32>
    %604 = vector.multi_reduction <maximumf>, %603, %cst_250 [1] : vector<8x8xf32> to vector<8xf32>
    %605 = vector.shape_cast %604 : vector<8xf32> to vector<8x1xf32>
    %606 = vector.broadcast %605 : vector<8x1xf32> to vector<8x8xf32>
    %607 = arith.subf %603, %606 : vector<8x8xf32>
    %608 = math.exp %607 : vector<8x8xf32>
    %cst_251 = arith.constant dense<0.000000e+00> : vector<8xf32>
    %609 = vector.multi_reduction <add>, %608, %cst_251 [1] : vector<8x8xf32> to vector<8xf32>
    %610 = vector.shape_cast %609 : vector<8xf32> to vector<8x1xf32>
    %611 = tpu.reciprocal %610 {approx = true} : vector<8x1xf32> -> vector<8x1xf32>
    %612 = vector.broadcast %611 : vector<8x1xf32> to vector<8x8xf32>
    %613 = arith.mulf %608, %612 : vector<8x8xf32>
    %cst_252 = arith.constant dense<0.000000e+00> : vector<8x8xf32>
    %614 = tpu.matmul %613, %599, %cst_252 {dimension_numbers = #tpu.dot_dimension_numbers<[1], [0], [0], [1], [0, 0, 1, 1], [], []>} : vector<8x8xf32>, vector<8x8xf32>, vector<8x8xf32> -> vector<8x8xf32>
    %615 = vector.extract_strided_slice %560 {offsets = [8, 0], sizes = [8, 32], strides = [1, 1]} : vector<32x32xf32> to vector<8x32xf32>
    %cst_253 = arith.constant dense<0.000000e+00> : vector<8x32xf32>
    %616 = tpu.matmul %614, %615, %cst_253 {dimension_numbers = #tpu.dot_dimension_numbers<[1], [0], [0], [1], [0, 0, 1, 1], [], []>} : vector<8x8xf32>, vector<8x32xf32>, vector<8x32xf32> -> vector<8x32xf32>
    %617 = arith.addf %596, %616 : vector<8x32xf32>
    %618 = vector.extract_strided_slice %571 {offsets = [0, 16], sizes = [8, 8], strides = [1, 1]} : vector<8x32xf32> to vector<8x8xf32>
    %619 = vector.extract_strided_slice %572 {offsets = [0, 16], sizes = [8, 8], strides = [1, 1]} : vector<8x32xf32> to vector<8x8xf32>
    %620 = vector.extract_strided_slice %573 {offsets = [0, 16], sizes = [8, 8], strides = [1, 1]} : vector<8x32xf32> to vector<8x8xf32>
    %cst_254 = arith.constant dense<0.000000e+00> : vector<8x8xf32>
    %621 = tpu.matmul %618, %619, %cst_254 {dimension_numbers = #tpu.dot_dimension_numbers<[1], [1], [0], [0], [0, 0, 1, 0], [], []>} : vector<8x8xf32>, vector<8x8xf32>, vector<8x8xf32> -> vector<8x8xf32>
    %cst_255 = arith.constant 0.353553385 : f32
    %622 = vector.broadcast %cst_255 : f32 to vector<8x8xf32>
    %623 = arith.mulf %621, %622 : vector<8x8xf32>
    %624 = arith.addf %623, %574 : vector<8x8xf32>
    %cst_256 = arith.constant dense<0xFF800000> : vector<8xf32>
    %625 = vector.multi_reduction <maximumf>, %624, %cst_256 [1] : vector<8x8xf32> to vector<8xf32>
    %626 = vector.shape_cast %625 : vector<8xf32> to vector<8x1xf32>
    %627 = vector.broadcast %626 : vector<8x1xf32> to vector<8x8xf32>
    %628 = arith.subf %624, %627 : vector<8x8xf32>
    %629 = math.exp %628 : vector<8x8xf32>
    %cst_257 = arith.constant dense<0.000000e+00> : vector<8xf32>
    %630 = vector.multi_reduction <add>, %629, %cst_257 [1] : vector<8x8xf32> to vector<8xf32>
    %631 = vector.shape_cast %630 : vector<8xf32> to vector<8x1xf32>
    %632 = tpu.reciprocal %631 {approx = true} : vector<8x1xf32> -> vector<8x1xf32>
    %633 = vector.broadcast %632 : vector<8x1xf32> to vector<8x8xf32>
    %634 = arith.mulf %629, %633 : vector<8x8xf32>
    %cst_258 = arith.constant dense<0.000000e+00> : vector<8x8xf32>
    %635 = tpu.matmul %634, %620, %cst_258 {dimension_numbers = #tpu.dot_dimension_numbers<[1], [0], [0], [1], [0, 0, 1, 1], [], []>} : vector<8x8xf32>, vector<8x8xf32>, vector<8x8xf32> -> vector<8x8xf32>
    %636 = vector.extract_strided_slice %560 {offsets = [16, 0], sizes = [8, 32], strides = [1, 1]} : vector<32x32xf32> to vector<8x32xf32>
    %cst_259 = arith.constant dense<0.000000e+00> : vector<8x32xf32>
    %637 = tpu.matmul %635, %636, %cst_259 {dimension_numbers = #tpu.dot_dimension_numbers<[1], [0], [0], [1], [0, 0, 1, 1], [], []>} : vector<8x8xf32>, vector<8x32xf32>, vector<8x32xf32> -> vector<8x32xf32>
    %638 = arith.addf %617, %637 : vector<8x32xf32>
    %639 = vector.extract_strided_slice %571 {offsets = [0, 24], sizes = [8, 8], strides = [1, 1]} : vector<8x32xf32> to vector<8x8xf32>
    %640 = vector.extract_strided_slice %572 {offsets = [0, 24], sizes = [8, 8], strides = [1, 1]} : vector<8x32xf32> to vector<8x8xf32>
    %641 = vector.extract_strided_slice %573 {offsets = [0, 24], sizes = [8, 8], strides = [1, 1]} : vector<8x32xf32> to vector<8x8xf32>
    %cst_260 = arith.constant dense<0.000000e+00> : vector<8x8xf32>
    %642 = tpu.matmul %639, %640, %cst_260 {dimension_numbers = #tpu.dot_dimension_numbers<[1], [1], [0], [0], [0, 0, 1, 0], [], []>} : vector<8x8xf32>, vector<8x8xf32>, vector<8x8xf32> -> vector<8x8xf32>
    %cst_261 = arith.constant 0.353553385 : f32
    %643 = vector.broadcast %cst_261 : f32 to vector<8x8xf32>
    %644 = arith.mulf %642, %643 : vector<8x8xf32>
    %645 = arith.addf %644, %574 : vector<8x8xf32>
    %cst_262 = arith.constant dense<0xFF800000> : vector<8xf32>
    %646 = vector.multi_reduction <maximumf>, %645, %cst_262 [1] : vector<8x8xf32> to vector<8xf32>
    %647 = vector.shape_cast %646 : vector<8xf32> to vector<8x1xf32>
    %648 = vector.broadcast %647 : vector<8x1xf32> to vector<8x8xf32>
    %649 = arith.subf %645, %648 : vector<8x8xf32>
    %650 = math.exp %649 : vector<8x8xf32>
    %cst_263 = arith.constant dense<0.000000e+00> : vector<8xf32>
    %651 = vector.multi_reduction <add>, %650, %cst_263 [1] : vector<8x8xf32> to vector<8xf32>
    %652 = vector.shape_cast %651 : vector<8xf32> to vector<8x1xf32>
    %653 = tpu.reciprocal %652 {approx = true} : vector<8x1xf32> -> vector<8x1xf32>
    %654 = vector.broadcast %653 : vector<8x1xf32> to vector<8x8xf32>
    %655 = arith.mulf %650, %654 : vector<8x8xf32>
    %cst_264 = arith.constant dense<0.000000e+00> : vector<8x8xf32>
    %656 = tpu.matmul %655, %641, %cst_264 {dimension_numbers = #tpu.dot_dimension_numbers<[1], [0], [0], [1], [0, 0, 1, 1], [], []>} : vector<8x8xf32>, vector<8x8xf32>, vector<8x8xf32> -> vector<8x8xf32>
    %657 = vector.extract_strided_slice %560 {offsets = [24, 0], sizes = [8, 32], strides = [1, 1]} : vector<32x32xf32> to vector<8x32xf32>
    %cst_265 = arith.constant dense<0.000000e+00> : vector<8x32xf32>
    %658 = tpu.matmul %656, %657, %cst_265 {dimension_numbers = #tpu.dot_dimension_numbers<[1], [0], [0], [1], [0, 0, 1, 1], [], []>} : vector<8x8xf32>, vector<8x32xf32>, vector<8x32xf32> -> vector<8x32xf32>
    %659 = arith.addf %638, %658 : vector<8x32xf32>
    %660 = vector.broadcast %562 : vector<1x32xf32> to vector<8x32xf32>
    %661 = arith.addf %659, %660 : vector<8x32xf32>
    %662 = vector.extract_strided_slice %565 {offsets = [8, 0], sizes = [8, 32], strides = [1, 1]} : vector<16x32xf32> to vector<8x32xf32>
    %663 = vector.extract_strided_slice %569 {offsets = [8, 0], sizes = [8, 32], strides = [1, 1]} : vector<16x32xf32> to vector<8x32xf32>
    %664 = vector.extract_strided_slice %570 {offsets = [8, 0], sizes = [8, 32], strides = [1, 1]} : vector<16x32xf32> to vector<8x32xf32>
    %665 = vector.extract_strided_slice %549 {offsets = [8, 0], sizes = [8, 8], strides = [1, 1]} : vector<16x8xf32> to vector<8x8xf32>
    %cst_266 = arith.constant 0.000000e+00 : f32
    %666 = vector.broadcast %cst_266 : f32 to vector<8x32xf32>
    %667 = vector.extract_strided_slice %662 {offsets = [0, 0], sizes = [8, 8], strides = [1, 1]} : vector<8x32xf32> to vector<8x8xf32>
    %668 = vector.extract_strided_slice %663 {offsets = [0, 0], sizes = [8, 8], strides = [1, 1]} : vector<8x32xf32> to vector<8x8xf32>
    %669 = vector.extract_strided_slice %664 {offsets = [0, 0], sizes = [8, 8], strides = [1, 1]} : vector<8x32xf32> to vector<8x8xf32>
    %cst_267 = arith.constant dense<0.000000e+00> : vector<8x8xf32>
    %670 = tpu.matmul %667, %668, %cst_267 {dimension_numbers = #tpu.dot_dimension_numbers<[1], [1], [0], [0], [0, 0, 1, 0], [], []>} : vector<8x8xf32>, vector<8x8xf32>, vector<8x8xf32> -> vector<8x8xf32>
    %cst_268 = arith.constant 0.353553385 : f32
    %671 = vector.broadcast %cst_268 : f32 to vector<8x8xf32>
    %672 = arith.mulf %670, %671 : vector<8x8xf32>
    %673 = arith.addf %672, %665 : vector<8x8xf32>
    %cst_269 = arith.constant dense<0xFF800000> : vector<8xf32>
    %674 = vector.multi_reduction <maximumf>, %673, %cst_269 [1] : vector<8x8xf32> to vector<8xf32>
    %675 = vector.shape_cast %674 : vector<8xf32> to vector<8x1xf32>
    %676 = vector.broadcast %675 : vector<8x1xf32> to vector<8x8xf32>
    %677 = arith.subf %673, %676 : vector<8x8xf32>
    %678 = math.exp %677 : vector<8x8xf32>
    %cst_270 = arith.constant dense<0.000000e+00> : vector<8xf32>
    %679 = vector.multi_reduction <add>, %678, %cst_270 [1] : vector<8x8xf32> to vector<8xf32>
    %680 = vector.shape_cast %679 : vector<8xf32> to vector<8x1xf32>
    %681 = tpu.reciprocal %680 {approx = true} : vector<8x1xf32> -> vector<8x1xf32>
    %682 = vector.broadcast %681 : vector<8x1xf32> to vector<8x8xf32>
    %683 = arith.mulf %678, %682 : vector<8x8xf32>
    %cst_271 = arith.constant dense<0.000000e+00> : vector<8x8xf32>
    %684 = tpu.matmul %683, %669, %cst_271 {dimension_numbers = #tpu.dot_dimension_numbers<[1], [0], [0], [1], [0, 0, 1, 1], [], []>} : vector<8x8xf32>, vector<8x8xf32>, vector<8x8xf32> -> vector<8x8xf32>
    %685 = vector.extract_strided_slice %560 {offsets = [0, 0], sizes = [8, 32], strides = [1, 1]} : vector<32x32xf32> to vector<8x32xf32>
    %cst_272 = arith.constant dense<0.000000e+00> : vector<8x32xf32>
    %686 = tpu.matmul %684, %685, %cst_272 {dimension_numbers = #tpu.dot_dimension_numbers<[1], [0], [0], [1], [0, 0, 1, 1], [], []>} : vector<8x8xf32>, vector<8x32xf32>, vector<8x32xf32> -> vector<8x32xf32>
    %687 = arith.addf %666, %686 : vector<8x32xf32>
    %688 = vector.extract_strided_slice %662 {offsets = [0, 8], sizes = [8, 8], strides = [1, 1]} : vector<8x32xf32> to vector<8x8xf32>
    %689 = vector.extract_strided_slice %663 {offsets = [0, 8], sizes = [8, 8], strides = [1, 1]} : vector<8x32xf32> to vector<8x8xf32>
    %690 = vector.extract_strided_slice %664 {offsets = [0, 8], sizes = [8, 8], strides = [1, 1]} : vector<8x32xf32> to vector<8x8xf32>
    %cst_273 = arith.constant dense<0.000000e+00> : vector<8x8xf32>
    %691 = tpu.matmul %688, %689, %cst_273 {dimension_numbers = #tpu.dot_dimension_numbers<[1], [1], [0], [0], [0, 0, 1, 0], [], []>} : vector<8x8xf32>, vector<8x8xf32>, vector<8x8xf32> -> vector<8x8xf32>
    %cst_274 = arith.constant 0.353553385 : f32
    %692 = vector.broadcast %cst_274 : f32 to vector<8x8xf32>
    %693 = arith.mulf %691, %692 : vector<8x8xf32>
    %694 = arith.addf %693, %665 : vector<8x8xf32>
    %cst_275 = arith.constant dense<0xFF800000> : vector<8xf32>
    %695 = vector.multi_reduction <maximumf>, %694, %cst_275 [1] : vector<8x8xf32> to vector<8xf32>
    %696 = vector.shape_cast %695 : vector<8xf32> to vector<8x1xf32>
    %697 = vector.broadcast %696 : vector<8x1xf32> to vector<8x8xf32>
    %698 = arith.subf %694, %697 : vector<8x8xf32>
    %699 = math.exp %698 : vector<8x8xf32>
    %cst_276 = arith.constant dense<0.000000e+00> : vector<8xf32>
    %700 = vector.multi_reduction <add>, %699, %cst_276 [1] : vector<8x8xf32> to vector<8xf32>
    %701 = vector.shape_cast %700 : vector<8xf32> to vector<8x1xf32>
    %702 = tpu.reciprocal %701 {approx = true} : vector<8x1xf32> -> vector<8x1xf32>
    %703 = vector.broadcast %702 : vector<8x1xf32> to vector<8x8xf32>
    %704 = arith.mulf %699, %703 : vector<8x8xf32>
    %cst_277 = arith.constant dense<0.000000e+00> : vector<8x8xf32>
    %705 = tpu.matmul %704, %690, %cst_277 {dimension_numbers = #tpu.dot_dimension_numbers<[1], [0], [0], [1], [0, 0, 1, 1], [], []>} : vector<8x8xf32>, vector<8x8xf32>, vector<8x8xf32> -> vector<8x8xf32>
    %706 = vector.extract_strided_slice %560 {offsets = [8, 0], sizes = [8, 32], strides = [1, 1]} : vector<32x32xf32> to vector<8x32xf32>
    %cst_278 = arith.constant dense<0.000000e+00> : vector<8x32xf32>
    %707 = tpu.matmul %705, %706, %cst_278 {dimension_numbers = #tpu.dot_dimension_numbers<[1], [0], [0], [1], [0, 0, 1, 1], [], []>} : vector<8x8xf32>, vector<8x32xf32>, vector<8x32xf32> -> vector<8x32xf32>
    %708 = arith.addf %687, %707 : vector<8x32xf32>
    %709 = vector.extract_strided_slice %662 {offsets = [0, 16], sizes = [8, 8], strides = [1, 1]} : vector<8x32xf32> to vector<8x8xf32>
    %710 = vector.extract_strided_slice %663 {offsets = [0, 16], sizes = [8, 8], strides = [1, 1]} : vector<8x32xf32> to vector<8x8xf32>
    %711 = vector.extract_strided_slice %664 {offsets = [0, 16], sizes = [8, 8], strides = [1, 1]} : vector<8x32xf32> to vector<8x8xf32>
    %cst_279 = arith.constant dense<0.000000e+00> : vector<8x8xf32>
    %712 = tpu.matmul %709, %710, %cst_279 {dimension_numbers = #tpu.dot_dimension_numbers<[1], [1], [0], [0], [0, 0, 1, 0], [], []>} : vector<8x8xf32>, vector<8x8xf32>, vector<8x8xf32> -> vector<8x8xf32>
    %cst_280 = arith.constant 0.353553385 : f32
    %713 = vector.broadcast %cst_280 : f32 to vector<8x8xf32>
    %714 = arith.mulf %712, %713 : vector<8x8xf32>
    %715 = arith.addf %714, %665 : vector<8x8xf32>
    %cst_281 = arith.constant dense<0xFF800000> : vector<8xf32>
    %716 = vector.multi_reduction <maximumf>, %715, %cst_281 [1] : vector<8x8xf32> to vector<8xf32>
    %717 = vector.shape_cast %716 : vector<8xf32> to vector<8x1xf32>
    %718 = vector.broadcast %717 : vector<8x1xf32> to vector<8x8xf32>
    %719 = arith.subf %715, %718 : vector<8x8xf32>
    %720 = math.exp %719 : vector<8x8xf32>
    %cst_282 = arith.constant dense<0.000000e+00> : vector<8xf32>
    %721 = vector.multi_reduction <add>, %720, %cst_282 [1] : vector<8x8xf32> to vector<8xf32>
    %722 = vector.shape_cast %721 : vector<8xf32> to vector<8x1xf32>
    %723 = tpu.reciprocal %722 {approx = true} : vector<8x1xf32> -> vector<8x1xf32>
    %724 = vector.broadcast %723 : vector<8x1xf32> to vector<8x8xf32>
    %725 = arith.mulf %720, %724 : vector<8x8xf32>
    %cst_283 = arith.constant dense<0.000000e+00> : vector<8x8xf32>
    %726 = tpu.matmul %725, %711, %cst_283 {dimension_numbers = #tpu.dot_dimension_numbers<[1], [0], [0], [1], [0, 0, 1, 1], [], []>} : vector<8x8xf32>, vector<8x8xf32>, vector<8x8xf32> -> vector<8x8xf32>
    %727 = vector.extract_strided_slice %560 {offsets = [16, 0], sizes = [8, 32], strides = [1, 1]} : vector<32x32xf32> to vector<8x32xf32>
    %cst_284 = arith.constant dense<0.000000e+00> : vector<8x32xf32>
    %728 = tpu.matmul %726, %727, %cst_284 {dimension_numbers = #tpu.dot_dimension_numbers<[1], [0], [0], [1], [0, 0, 1, 1], [], []>} : vector<8x8xf32>, vector<8x32xf32>, vector<8x32xf32> -> vector<8x32xf32>
    %729 = arith.addf %708, %728 : vector<8x32xf32>
    %730 = vector.extract_strided_slice %662 {offsets = [0, 24], sizes = [8, 8], strides = [1, 1]} : vector<8x32xf32> to vector<8x8xf32>
    %731 = vector.extract_strided_slice %663 {offsets = [0, 24], sizes = [8, 8], strides = [1, 1]} : vector<8x32xf32> to vector<8x8xf32>
    %732 = vector.extract_strided_slice %664 {offsets = [0, 24], sizes = [8, 8], strides = [1, 1]} : vector<8x32xf32> to vector<8x8xf32>
    %cst_285 = arith.constant dense<0.000000e+00> : vector<8x8xf32>
    %733 = tpu.matmul %730, %731, %cst_285 {dimension_numbers = #tpu.dot_dimension_numbers<[1], [1], [0], [0], [0, 0, 1, 0], [], []>} : vector<8x8xf32>, vector<8x8xf32>, vector<8x8xf32> -> vector<8x8xf32>
    %cst_286 = arith.constant 0.353553385 : f32
    %734 = vector.broadcast %cst_286 : f32 to vector<8x8xf32>
    %735 = arith.mulf %733, %734 : vector<8x8xf32>
    %736 = arith.addf %735, %665 : vector<8x8xf32>
    %cst_287 = arith.constant dense<0xFF800000> : vector<8xf32>
    %737 = vector.multi_reduction <maximumf>, %736, %cst_287 [1] : vector<8x8xf32> to vector<8xf32>
    %738 = vector.shape_cast %737 : vector<8xf32> to vector<8x1xf32>
    %739 = vector.broadcast %738 : vector<8x1xf32> to vector<8x8xf32>
    %740 = arith.subf %736, %739 : vector<8x8xf32>
    %741 = math.exp %740 : vector<8x8xf32>
    %cst_288 = arith.constant dense<0.000000e+00> : vector<8xf32>
    %742 = vector.multi_reduction <add>, %741, %cst_288 [1] : vector<8x8xf32> to vector<8xf32>
    %743 = vector.shape_cast %742 : vector<8xf32> to vector<8x1xf32>
    %744 = tpu.reciprocal %743 {approx = true} : vector<8x1xf32> -> vector<8x1xf32>
    %745 = vector.broadcast %744 : vector<8x1xf32> to vector<8x8xf32>
    %746 = arith.mulf %741, %745 : vector<8x8xf32>
    %cst_289 = arith.constant dense<0.000000e+00> : vector<8x8xf32>
    %747 = tpu.matmul %746, %732, %cst_289 {dimension_numbers = #tpu.dot_dimension_numbers<[1], [0], [0], [1], [0, 0, 1, 1], [], []>} : vector<8x8xf32>, vector<8x8xf32>, vector<8x8xf32> -> vector<8x8xf32>
    %748 = vector.extract_strided_slice %560 {offsets = [24, 0], sizes = [8, 32], strides = [1, 1]} : vector<32x32xf32> to vector<8x32xf32>
    %cst_290 = arith.constant dense<0.000000e+00> : vector<8x32xf32>
    %749 = tpu.matmul %747, %748, %cst_290 {dimension_numbers = #tpu.dot_dimension_numbers<[1], [0], [0], [1], [0, 0, 1, 1], [], []>} : vector<8x8xf32>, vector<8x32xf32>, vector<8x32xf32> -> vector<8x32xf32>
    %750 = arith.addf %729, %749 : vector<8x32xf32>
    %751 = vector.broadcast %562 : vector<1x32xf32> to vector<8x32xf32>
    %752 = arith.addf %750, %751 : vector<8x32xf32>
    %753 = tpu.concatenate %661, %752 in 0 : vector<8x32xf32>, vector<8x32xf32> -> vector<16x32xf32>
    %754 = arith.addf %548, %753 : vector<16x32xf32>
    %c0_291 = arith.constant 0 : index
    %c0_292 = arith.constant 0 : index
    %c0_293 = arith.constant 0 : index
    %755 = vector.load %arg31[%c0_291, %c0_292, %c0_293] : memref<2x1x32xf32, #tpu.memory_space<vmem>>, vector<1x1x32xf32>
    %756 = vector.shape_cast %755 : vector<1x1x32xf32> to vector<1x32xf32>
    %c0_294 = arith.constant 0 : index
    %c0_295 = arith.constant 0 : index
    %c0_296 = arith.constant 0 : index
    %757 = vector.load %arg32[%c0_294, %c0_295, %c0_296] : memref<2x1x32xf32, #tpu.memory_space<vmem>>, vector<1x1x32xf32>
    %758 = vector.shape_cast %757 : vector<1x1x32xf32> to vector<1x32xf32>
    %cst_297 = arith.constant dense<0.000000e+00> : vector<16xf32>
    %759 = vector.multi_reduction <add>, %754, %cst_297 [1] : vector<16x32xf32> to vector<16xf32>
    %760 = vector.shape_cast %759 : vector<16xf32> to vector<16x1xf32>
    %cst_298 = arith.constant 3.200000e+01 : f32
    %761 = vector.broadcast %cst_298 : f32 to vector<16x1xf32>
    %762 = arith.divf %760, %761 : vector<16x1xf32>
    %763 = vector.broadcast %762 : vector<16x1xf32> to vector<16x32xf32>
    %764 = arith.subf %754, %763 : vector<16x32xf32>
    %765 = arith.mulf %764, %764 : vector<16x32xf32>
    %cst_299 = arith.constant dense<0.000000e+00> : vector<16xf32>
    %766 = vector.multi_reduction <add>, %765, %cst_299 [1] : vector<16x32xf32> to vector<16xf32>
    %767 = vector.shape_cast %766 : vector<16xf32> to vector<16x1xf32>
    %cst_300 = arith.constant 3.200000e+01 : f32
    %768 = vector.broadcast %cst_300 : f32 to vector<16x1xf32>
    %769 = arith.divf %767, %768 : vector<16x1xf32>
    %770 = vector.broadcast %762 : vector<16x1xf32> to vector<16x32xf32>
    %771 = arith.subf %754, %770 : vector<16x32xf32>
    %cst_301 = arith.constant 9.99999974E-6 : f32
    %772 = vector.broadcast %cst_301 : f32 to vector<16x1xf32>
    %773 = arith.addf %769, %772 : vector<16x1xf32>
    %774 = math.rsqrt %773 : vector<16x1xf32>
    %775 = vector.broadcast %774 : vector<16x1xf32> to vector<16x32xf32>
    %776 = arith.mulf %771, %775 : vector<16x32xf32>
    %777 = vector.broadcast %756 : vector<1x32xf32> to vector<16x32xf32>
    %778 = arith.mulf %776, %777 : vector<16x32xf32>
    %779 = vector.broadcast %758 : vector<1x32xf32> to vector<16x32xf32>
    %780 = arith.addf %778, %779 : vector<16x32xf32>
    %c0_302 = arith.constant 0 : index
    %c0_303 = arith.constant 0 : index
    %c0_304 = arith.constant 0 : index
    %781 = vector.load %arg25[%c0_302, %c0_303, %c0_304] : memref<2x32x32xf32, #tpu.memory_space<vmem>>, vector<1x32x32xf32>
    %782 = vector.shape_cast %781 : vector<1x32x32xf32> to vector<32x32xf32>
    %c0_305 = arith.constant 0 : index
    %c0_306 = arith.constant 0 : index
    %c0_307 = arith.constant 0 : index
    %783 = vector.load %arg26[%c0_305, %c0_306, %c0_307] : memref<2x1x32xf32, #tpu.memory_space<vmem>>, vector<1x1x32xf32>
    %784 = vector.shape_cast %783 : vector<1x1x32xf32> to vector<1x32xf32>
    %c0_308 = arith.constant 0 : index
    %c0_309 = arith.constant 0 : index
    %c0_310 = arith.constant 0 : index
    %785 = vector.load %arg27[%c0_308, %c0_309, %c0_310] : memref<2x32x64xf32, #tpu.memory_space<vmem>>, vector<1x32x64xf32>
    %786 = vector.shape_cast %785 : vector<1x32x64xf32> to vector<32x64xf32>
    %c0_311 = arith.constant 0 : index
    %c0_312 = arith.constant 0 : index
    %c0_313 = arith.constant 0 : index
    %787 = vector.load %arg28[%c0_311, %c0_312, %c0_313] : memref<2x1x64xf32, #tpu.memory_space<vmem>>, vector<1x1x64xf32>
    %788 = vector.shape_cast %787 : vector<1x1x64xf32> to vector<1x64xf32>
    %c0_314 = arith.constant 0 : index
    %c0_315 = arith.constant 0 : index
    %c0_316 = arith.constant 0 : index
    %789 = vector.load %arg29[%c0_314, %c0_315, %c0_316] : memref<2x32x32xf32, #tpu.memory_space<vmem>>, vector<1x32x32xf32>
    %790 = vector.shape_cast %789 : vector<1x32x32xf32> to vector<32x32xf32>
    %c0_317 = arith.constant 0 : index
    %c0_318 = arith.constant 0 : index
    %c0_319 = arith.constant 0 : index
    %791 = vector.load %arg30[%c0_317, %c0_318, %c0_319] : memref<2x1x32xf32, #tpu.memory_space<vmem>>, vector<1x1x32xf32>
    %792 = vector.shape_cast %791 : vector<1x1x32xf32> to vector<1x32xf32>
    %cst_320 = arith.constant dense<0.000000e+00> : vector<16x32xf32>
    %793 = tpu.matmul %780, %782, %cst_320 {dimension_numbers = #tpu.dot_dimension_numbers<[1], [0], [0], [1], [0, 0, 1, 1], [], []>} : vector<16x32xf32>, vector<32x32xf32>, vector<16x32xf32> -> vector<16x32xf32>
    %794 = vector.broadcast %784 : vector<1x32xf32> to vector<16x32xf32>
    %795 = arith.addf %793, %794 : vector<16x32xf32>
    %cst_321 = arith.constant dense<0.000000e+00> : vector<16x64xf32>
    %796 = tpu.matmul %547, %786, %cst_321 {dimension_numbers = #tpu.dot_dimension_numbers<[1], [0], [0], [1], [0, 0, 1, 1], [], []>} : vector<16x32xf32>, vector<32x64xf32>, vector<16x64xf32> -> vector<16x64xf32>
    %797 = vector.broadcast %788 : vector<1x64xf32> to vector<16x64xf32>
    %798 = arith.addf %796, %797 : vector<16x64xf32>
    %799 = vector.extract_strided_slice %798 {offsets = [0, 0], sizes = [16, 32], strides = [1, 1]} : vector<16x64xf32> to vector<16x32xf32>
    %800 = vector.extract_strided_slice %798 {offsets = [0, 32], sizes = [16, 32], strides = [1, 1]} : vector<16x64xf32> to vector<16x32xf32>
    %801 = vector.extract_strided_slice %795 {offsets = [0, 0], sizes = [8, 32], strides = [1, 1]} : vector<16x32xf32> to vector<8x32xf32>
    %802 = vector.extract_strided_slice %799 {offsets = [0, 0], sizes = [8, 32], strides = [1, 1]} : vector<16x32xf32> to vector<8x32xf32>
    %803 = vector.extract_strided_slice %800 {offsets = [0, 0], sizes = [8, 32], strides = [1, 1]} : vector<16x32xf32> to vector<8x32xf32>
    %804 = vector.extract_strided_slice %550 {offsets = [0, 0], sizes = [8, 8], strides = [1, 1]} : vector<16x8xf32> to vector<8x8xf32>
    %cst_322 = arith.constant 0.000000e+00 : f32
    %805 = vector.broadcast %cst_322 : f32 to vector<8x32xf32>
    %806 = vector.extract_strided_slice %801 {offsets = [0, 0], sizes = [8, 8], strides = [1, 1]} : vector<8x32xf32> to vector<8x8xf32>
    %807 = vector.extract_strided_slice %802 {offsets = [0, 0], sizes = [8, 8], strides = [1, 1]} : vector<8x32xf32> to vector<8x8xf32>
    %808 = vector.extract_strided_slice %803 {offsets = [0, 0], sizes = [8, 8], strides = [1, 1]} : vector<8x32xf32> to vector<8x8xf32>
    %cst_323 = arith.constant dense<0.000000e+00> : vector<8x8xf32>
    %809 = tpu.matmul %806, %807, %cst_323 {dimension_numbers = #tpu.dot_dimension_numbers<[1], [1], [0], [0], [0, 0, 1, 0], [], []>} : vector<8x8xf32>, vector<8x8xf32>, vector<8x8xf32> -> vector<8x8xf32>
    %cst_324 = arith.constant 0.353553385 : f32
    %810 = vector.broadcast %cst_324 : f32 to vector<8x8xf32>
    %811 = arith.mulf %809, %810 : vector<8x8xf32>
    %812 = arith.addf %811, %804 : vector<8x8xf32>
    %cst_325 = arith.constant dense<0xFF800000> : vector<8xf32>
    %813 = vector.multi_reduction <maximumf>, %812, %cst_325 [1] : vector<8x8xf32> to vector<8xf32>
    %814 = vector.shape_cast %813 : vector<8xf32> to vector<8x1xf32>
    %815 = vector.broadcast %814 : vector<8x1xf32> to vector<8x8xf32>
    %816 = arith.subf %812, %815 : vector<8x8xf32>
    %817 = math.exp %816 : vector<8x8xf32>
    %cst_326 = arith.constant dense<0.000000e+00> : vector<8xf32>
    %818 = vector.multi_reduction <add>, %817, %cst_326 [1] : vector<8x8xf32> to vector<8xf32>
    %819 = vector.shape_cast %818 : vector<8xf32> to vector<8x1xf32>
    %820 = tpu.reciprocal %819 {approx = true} : vector<8x1xf32> -> vector<8x1xf32>
    %821 = vector.broadcast %820 : vector<8x1xf32> to vector<8x8xf32>
    %822 = arith.mulf %817, %821 : vector<8x8xf32>
    %cst_327 = arith.constant dense<0.000000e+00> : vector<8x8xf32>
    %823 = tpu.matmul %822, %808, %cst_327 {dimension_numbers = #tpu.dot_dimension_numbers<[1], [0], [0], [1], [0, 0, 1, 1], [], []>} : vector<8x8xf32>, vector<8x8xf32>, vector<8x8xf32> -> vector<8x8xf32>
    %824 = vector.extract_strided_slice %790 {offsets = [0, 0], sizes = [8, 32], strides = [1, 1]} : vector<32x32xf32> to vector<8x32xf32>
    %cst_328 = arith.constant dense<0.000000e+00> : vector<8x32xf32>
    %825 = tpu.matmul %823, %824, %cst_328 {dimension_numbers = #tpu.dot_dimension_numbers<[1], [0], [0], [1], [0, 0, 1, 1], [], []>} : vector<8x8xf32>, vector<8x32xf32>, vector<8x32xf32> -> vector<8x32xf32>
    %826 = arith.addf %805, %825 : vector<8x32xf32>
    %827 = vector.extract_strided_slice %801 {offsets = [0, 8], sizes = [8, 8], strides = [1, 1]} : vector<8x32xf32> to vector<8x8xf32>
    %828 = vector.extract_strided_slice %802 {offsets = [0, 8], sizes = [8, 8], strides = [1, 1]} : vector<8x32xf32> to vector<8x8xf32>
    %829 = vector.extract_strided_slice %803 {offsets = [0, 8], sizes = [8, 8], strides = [1, 1]} : vector<8x32xf32> to vector<8x8xf32>
    %cst_329 = arith.constant dense<0.000000e+00> : vector<8x8xf32>
    %830 = tpu.matmul %827, %828, %cst_329 {dimension_numbers = #tpu.dot_dimension_numbers<[1], [1], [0], [0], [0, 0, 1, 0], [], []>} : vector<8x8xf32>, vector<8x8xf32>, vector<8x8xf32> -> vector<8x8xf32>
    %cst_330 = arith.constant 0.353553385 : f32
    %831 = vector.broadcast %cst_330 : f32 to vector<8x8xf32>
    %832 = arith.mulf %830, %831 : vector<8x8xf32>
    %833 = arith.addf %832, %804 : vector<8x8xf32>
    %cst_331 = arith.constant dense<0xFF800000> : vector<8xf32>
    %834 = vector.multi_reduction <maximumf>, %833, %cst_331 [1] : vector<8x8xf32> to vector<8xf32>
    %835 = vector.shape_cast %834 : vector<8xf32> to vector<8x1xf32>
    %836 = vector.broadcast %835 : vector<8x1xf32> to vector<8x8xf32>
    %837 = arith.subf %833, %836 : vector<8x8xf32>
    %838 = math.exp %837 : vector<8x8xf32>
    %cst_332 = arith.constant dense<0.000000e+00> : vector<8xf32>
    %839 = vector.multi_reduction <add>, %838, %cst_332 [1] : vector<8x8xf32> to vector<8xf32>
    %840 = vector.shape_cast %839 : vector<8xf32> to vector<8x1xf32>
    %841 = tpu.reciprocal %840 {approx = true} : vector<8x1xf32> -> vector<8x1xf32>
    %842 = vector.broadcast %841 : vector<8x1xf32> to vector<8x8xf32>
    %843 = arith.mulf %838, %842 : vector<8x8xf32>
    %cst_333 = arith.constant dense<0.000000e+00> : vector<8x8xf32>
    %844 = tpu.matmul %843, %829, %cst_333 {dimension_numbers = #tpu.dot_dimension_numbers<[1], [0], [0], [1], [0, 0, 1, 1], [], []>} : vector<8x8xf32>, vector<8x8xf32>, vector<8x8xf32> -> vector<8x8xf32>
    %845 = vector.extract_strided_slice %790 {offsets = [8, 0], sizes = [8, 32], strides = [1, 1]} : vector<32x32xf32> to vector<8x32xf32>
    %cst_334 = arith.constant dense<0.000000e+00> : vector<8x32xf32>
    %846 = tpu.matmul %844, %845, %cst_334 {dimension_numbers = #tpu.dot_dimension_numbers<[1], [0], [0], [1], [0, 0, 1, 1], [], []>} : vector<8x8xf32>, vector<8x32xf32>, vector<8x32xf32> -> vector<8x32xf32>
    %847 = arith.addf %826, %846 : vector<8x32xf32>
    %848 = vector.extract_strided_slice %801 {offsets = [0, 16], sizes = [8, 8], strides = [1, 1]} : vector<8x32xf32> to vector<8x8xf32>
    %849 = vector.extract_strided_slice %802 {offsets = [0, 16], sizes = [8, 8], strides = [1, 1]} : vector<8x32xf32> to vector<8x8xf32>
    %850 = vector.extract_strided_slice %803 {offsets = [0, 16], sizes = [8, 8], strides = [1, 1]} : vector<8x32xf32> to vector<8x8xf32>
    %cst_335 = arith.constant dense<0.000000e+00> : vector<8x8xf32>
    %851 = tpu.matmul %848, %849, %cst_335 {dimension_numbers = #tpu.dot_dimension_numbers<[1], [1], [0], [0], [0, 0, 1, 0], [], []>} : vector<8x8xf32>, vector<8x8xf32>, vector<8x8xf32> -> vector<8x8xf32>
    %cst_336 = arith.constant 0.353553385 : f32
    %852 = vector.broadcast %cst_336 : f32 to vector<8x8xf32>
    %853 = arith.mulf %851, %852 : vector<8x8xf32>
    %854 = arith.addf %853, %804 : vector<8x8xf32>
    %cst_337 = arith.constant dense<0xFF800000> : vector<8xf32>
    %855 = vector.multi_reduction <maximumf>, %854, %cst_337 [1] : vector<8x8xf32> to vector<8xf32>
    %856 = vector.shape_cast %855 : vector<8xf32> to vector<8x1xf32>
    %857 = vector.broadcast %856 : vector<8x1xf32> to vector<8x8xf32>
    %858 = arith.subf %854, %857 : vector<8x8xf32>
    %859 = math.exp %858 : vector<8x8xf32>
    %cst_338 = arith.constant dense<0.000000e+00> : vector<8xf32>
    %860 = vector.multi_reduction <add>, %859, %cst_338 [1] : vector<8x8xf32> to vector<8xf32>
    %861 = vector.shape_cast %860 : vector<8xf32> to vector<8x1xf32>
    %862 = tpu.reciprocal %861 {approx = true} : vector<8x1xf32> -> vector<8x1xf32>
    %863 = vector.broadcast %862 : vector<8x1xf32> to vector<8x8xf32>
    %864 = arith.mulf %859, %863 : vector<8x8xf32>
    %cst_339 = arith.constant dense<0.000000e+00> : vector<8x8xf32>
    %865 = tpu.matmul %864, %850, %cst_339 {dimension_numbers = #tpu.dot_dimension_numbers<[1], [0], [0], [1], [0, 0, 1, 1], [], []>} : vector<8x8xf32>, vector<8x8xf32>, vector<8x8xf32> -> vector<8x8xf32>
    %866 = vector.extract_strided_slice %790 {offsets = [16, 0], sizes = [8, 32], strides = [1, 1]} : vector<32x32xf32> to vector<8x32xf32>
    %cst_340 = arith.constant dense<0.000000e+00> : vector<8x32xf32>
    %867 = tpu.matmul %865, %866, %cst_340 {dimension_numbers = #tpu.dot_dimension_numbers<[1], [0], [0], [1], [0, 0, 1, 1], [], []>} : vector<8x8xf32>, vector<8x32xf32>, vector<8x32xf32> -> vector<8x32xf32>
    %868 = arith.addf %847, %867 : vector<8x32xf32>
    %869 = vector.extract_strided_slice %801 {offsets = [0, 24], sizes = [8, 8], strides = [1, 1]} : vector<8x32xf32> to vector<8x8xf32>
    %870 = vector.extract_strided_slice %802 {offsets = [0, 24], sizes = [8, 8], strides = [1, 1]} : vector<8x32xf32> to vector<8x8xf32>
    %871 = vector.extract_strided_slice %803 {offsets = [0, 24], sizes = [8, 8], strides = [1, 1]} : vector<8x32xf32> to vector<8x8xf32>
    %cst_341 = arith.constant dense<0.000000e+00> : vector<8x8xf32>
    %872 = tpu.matmul %869, %870, %cst_341 {dimension_numbers = #tpu.dot_dimension_numbers<[1], [1], [0], [0], [0, 0, 1, 0], [], []>} : vector<8x8xf32>, vector<8x8xf32>, vector<8x8xf32> -> vector<8x8xf32>
    %cst_342 = arith.constant 0.353553385 : f32
    %873 = vector.broadcast %cst_342 : f32 to vector<8x8xf32>
    %874 = arith.mulf %872, %873 : vector<8x8xf32>
    %875 = arith.addf %874, %804 : vector<8x8xf32>
    %cst_343 = arith.constant dense<0xFF800000> : vector<8xf32>
    %876 = vector.multi_reduction <maximumf>, %875, %cst_343 [1] : vector<8x8xf32> to vector<8xf32>
    %877 = vector.shape_cast %876 : vector<8xf32> to vector<8x1xf32>
    %878 = vector.broadcast %877 : vector<8x1xf32> to vector<8x8xf32>
    %879 = arith.subf %875, %878 : vector<8x8xf32>
    %880 = math.exp %879 : vector<8x8xf32>
    %cst_344 = arith.constant dense<0.000000e+00> : vector<8xf32>
    %881 = vector.multi_reduction <add>, %880, %cst_344 [1] : vector<8x8xf32> to vector<8xf32>
    %882 = vector.shape_cast %881 : vector<8xf32> to vector<8x1xf32>
    %883 = tpu.reciprocal %882 {approx = true} : vector<8x1xf32> -> vector<8x1xf32>
    %884 = vector.broadcast %883 : vector<8x1xf32> to vector<8x8xf32>
    %885 = arith.mulf %880, %884 : vector<8x8xf32>
    %cst_345 = arith.constant dense<0.000000e+00> : vector<8x8xf32>
    %886 = tpu.matmul %885, %871, %cst_345 {dimension_numbers = #tpu.dot_dimension_numbers<[1], [0], [0], [1], [0, 0, 1, 1], [], []>} : vector<8x8xf32>, vector<8x8xf32>, vector<8x8xf32> -> vector<8x8xf32>
    %887 = vector.extract_strided_slice %790 {offsets = [24, 0], sizes = [8, 32], strides = [1, 1]} : vector<32x32xf32> to vector<8x32xf32>
    %cst_346 = arith.constant dense<0.000000e+00> : vector<8x32xf32>
    %888 = tpu.matmul %886, %887, %cst_346 {dimension_numbers = #tpu.dot_dimension_numbers<[1], [0], [0], [1], [0, 0, 1, 1], [], []>} : vector<8x8xf32>, vector<8x32xf32>, vector<8x32xf32> -> vector<8x32xf32>
    %889 = arith.addf %868, %888 : vector<8x32xf32>
    %890 = vector.broadcast %792 : vector<1x32xf32> to vector<8x32xf32>
    %891 = arith.addf %889, %890 : vector<8x32xf32>
    %892 = vector.extract_strided_slice %795 {offsets = [8, 0], sizes = [8, 32], strides = [1, 1]} : vector<16x32xf32> to vector<8x32xf32>
    %893 = vector.extract_strided_slice %799 {offsets = [8, 0], sizes = [8, 32], strides = [1, 1]} : vector<16x32xf32> to vector<8x32xf32>
    %894 = vector.extract_strided_slice %800 {offsets = [8, 0], sizes = [8, 32], strides = [1, 1]} : vector<16x32xf32> to vector<8x32xf32>
    %895 = vector.extract_strided_slice %550 {offsets = [8, 0], sizes = [8, 8], strides = [1, 1]} : vector<16x8xf32> to vector<8x8xf32>
    %cst_347 = arith.constant 0.000000e+00 : f32
    %896 = vector.broadcast %cst_347 : f32 to vector<8x32xf32>
    %897 = vector.extract_strided_slice %892 {offsets = [0, 0], sizes = [8, 8], strides = [1, 1]} : vector<8x32xf32> to vector<8x8xf32>
    %898 = vector.extract_strided_slice %893 {offsets = [0, 0], sizes = [8, 8], strides = [1, 1]} : vector<8x32xf32> to vector<8x8xf32>
    %899 = vector.extract_strided_slice %894 {offsets = [0, 0], sizes = [8, 8], strides = [1, 1]} : vector<8x32xf32> to vector<8x8xf32>
    %cst_348 = arith.constant dense<0.000000e+00> : vector<8x8xf32>
    %900 = tpu.matmul %897, %898, %cst_348 {dimension_numbers = #tpu.dot_dimension_numbers<[1], [1], [0], [0], [0, 0, 1, 0], [], []>} : vector<8x8xf32>, vector<8x8xf32>, vector<8x8xf32> -> vector<8x8xf32>
    %cst_349 = arith.constant 0.353553385 : f32
    %901 = vector.broadcast %cst_349 : f32 to vector<8x8xf32>
    %902 = arith.mulf %900, %901 : vector<8x8xf32>
    %903 = arith.addf %902, %895 : vector<8x8xf32>
    %cst_350 = arith.constant dense<0xFF800000> : vector<8xf32>
    %904 = vector.multi_reduction <maximumf>, %903, %cst_350 [1] : vector<8x8xf32> to vector<8xf32>
    %905 = vector.shape_cast %904 : vector<8xf32> to vector<8x1xf32>
    %906 = vector.broadcast %905 : vector<8x1xf32> to vector<8x8xf32>
    %907 = arith.subf %903, %906 : vector<8x8xf32>
    %908 = math.exp %907 : vector<8x8xf32>
    %cst_351 = arith.constant dense<0.000000e+00> : vector<8xf32>
    %909 = vector.multi_reduction <add>, %908, %cst_351 [1] : vector<8x8xf32> to vector<8xf32>
    %910 = vector.shape_cast %909 : vector<8xf32> to vector<8x1xf32>
    %911 = tpu.reciprocal %910 {approx = true} : vector<8x1xf32> -> vector<8x1xf32>
    %912 = vector.broadcast %911 : vector<8x1xf32> to vector<8x8xf32>
    %913 = arith.mulf %908, %912 : vector<8x8xf32>
    %cst_352 = arith.constant dense<0.000000e+00> : vector<8x8xf32>
    %914 = tpu.matmul %913, %899, %cst_352 {dimension_numbers = #tpu.dot_dimension_numbers<[1], [0], [0], [1], [0, 0, 1, 1], [], []>} : vector<8x8xf32>, vector<8x8xf32>, vector<8x8xf32> -> vector<8x8xf32>
    %915 = vector.extract_strided_slice %790 {offsets = [0, 0], sizes = [8, 32], strides = [1, 1]} : vector<32x32xf32> to vector<8x32xf32>
    %cst_353 = arith.constant dense<0.000000e+00> : vector<8x32xf32>
    %916 = tpu.matmul %914, %915, %cst_353 {dimension_numbers = #tpu.dot_dimension_numbers<[1], [0], [0], [1], [0, 0, 1, 1], [], []>} : vector<8x8xf32>, vector<8x32xf32>, vector<8x32xf32> -> vector<8x32xf32>
    %917 = arith.addf %896, %916 : vector<8x32xf32>
    %918 = vector.extract_strided_slice %892 {offsets = [0, 8], sizes = [8, 8], strides = [1, 1]} : vector<8x32xf32> to vector<8x8xf32>
    %919 = vector.extract_strided_slice %893 {offsets = [0, 8], sizes = [8, 8], strides = [1, 1]} : vector<8x32xf32> to vector<8x8xf32>
    %920 = vector.extract_strided_slice %894 {offsets = [0, 8], sizes = [8, 8], strides = [1, 1]} : vector<8x32xf32> to vector<8x8xf32>
    %cst_354 = arith.constant dense<0.000000e+00> : vector<8x8xf32>
    %921 = tpu.matmul %918, %919, %cst_354 {dimension_numbers = #tpu.dot_dimension_numbers<[1], [1], [0], [0], [0, 0, 1, 0], [], []>} : vector<8x8xf32>, vector<8x8xf32>, vector<8x8xf32> -> vector<8x8xf32>
    %cst_355 = arith.constant 0.353553385 : f32
    %922 = vector.broadcast %cst_355 : f32 to vector<8x8xf32>
    %923 = arith.mulf %921, %922 : vector<8x8xf32>
    %924 = arith.addf %923, %895 : vector<8x8xf32>
    %cst_356 = arith.constant dense<0xFF800000> : vector<8xf32>
    %925 = vector.multi_reduction <maximumf>, %924, %cst_356 [1] : vector<8x8xf32> to vector<8xf32>
    %926 = vector.shape_cast %925 : vector<8xf32> to vector<8x1xf32>
    %927 = vector.broadcast %926 : vector<8x1xf32> to vector<8x8xf32>
    %928 = arith.subf %924, %927 : vector<8x8xf32>
    %929 = math.exp %928 : vector<8x8xf32>
    %cst_357 = arith.constant dense<0.000000e+00> : vector<8xf32>
    %930 = vector.multi_reduction <add>, %929, %cst_357 [1] : vector<8x8xf32> to vector<8xf32>
    %931 = vector.shape_cast %930 : vector<8xf32> to vector<8x1xf32>
    %932 = tpu.reciprocal %931 {approx = true} : vector<8x1xf32> -> vector<8x1xf32>
    %933 = vector.broadcast %932 : vector<8x1xf32> to vector<8x8xf32>
    %934 = arith.mulf %929, %933 : vector<8x8xf32>
    %cst_358 = arith.constant dense<0.000000e+00> : vector<8x8xf32>
    %935 = tpu.matmul %934, %920, %cst_358 {dimension_numbers = #tpu.dot_dimension_numbers<[1], [0], [0], [1], [0, 0, 1, 1], [], []>} : vector<8x8xf32>, vector<8x8xf32>, vector<8x8xf32> -> vector<8x8xf32>
    %936 = vector.extract_strided_slice %790 {offsets = [8, 0], sizes = [8, 32], strides = [1, 1]} : vector<32x32xf32> to vector<8x32xf32>
    %cst_359 = arith.constant dense<0.000000e+00> : vector<8x32xf32>
    %937 = tpu.matmul %935, %936, %cst_359 {dimension_numbers = #tpu.dot_dimension_numbers<[1], [0], [0], [1], [0, 0, 1, 1], [], []>} : vector<8x8xf32>, vector<8x32xf32>, vector<8x32xf32> -> vector<8x32xf32>
    %938 = arith.addf %917, %937 : vector<8x32xf32>
    %939 = vector.extract_strided_slice %892 {offsets = [0, 16], sizes = [8, 8], strides = [1, 1]} : vector<8x32xf32> to vector<8x8xf32>
    %940 = vector.extract_strided_slice %893 {offsets = [0, 16], sizes = [8, 8], strides = [1, 1]} : vector<8x32xf32> to vector<8x8xf32>
    %941 = vector.extract_strided_slice %894 {offsets = [0, 16], sizes = [8, 8], strides = [1, 1]} : vector<8x32xf32> to vector<8x8xf32>
    %cst_360 = arith.constant dense<0.000000e+00> : vector<8x8xf32>
    %942 = tpu.matmul %939, %940, %cst_360 {dimension_numbers = #tpu.dot_dimension_numbers<[1], [1], [0], [0], [0, 0, 1, 0], [], []>} : vector<8x8xf32>, vector<8x8xf32>, vector<8x8xf32> -> vector<8x8xf32>
    %cst_361 = arith.constant 0.353553385 : f32
    %943 = vector.broadcast %cst_361 : f32 to vector<8x8xf32>
    %944 = arith.mulf %942, %943 : vector<8x8xf32>
    %945 = arith.addf %944, %895 : vector<8x8xf32>
    %cst_362 = arith.constant dense<0xFF800000> : vector<8xf32>
    %946 = vector.multi_reduction <maximumf>, %945, %cst_362 [1] : vector<8x8xf32> to vector<8xf32>
    %947 = vector.shape_cast %946 : vector<8xf32> to vector<8x1xf32>
    %948 = vector.broadcast %947 : vector<8x1xf32> to vector<8x8xf32>
    %949 = arith.subf %945, %948 : vector<8x8xf32>
    %950 = math.exp %949 : vector<8x8xf32>
    %cst_363 = arith.constant dense<0.000000e+00> : vector<8xf32>
    %951 = vector.multi_reduction <add>, %950, %cst_363 [1] : vector<8x8xf32> to vector<8xf32>
    %952 = vector.shape_cast %951 : vector<8xf32> to vector<8x1xf32>
    %953 = tpu.reciprocal %952 {approx = true} : vector<8x1xf32> -> vector<8x1xf32>
    %954 = vector.broadcast %953 : vector<8x1xf32> to vector<8x8xf32>
    %955 = arith.mulf %950, %954 : vector<8x8xf32>
    %cst_364 = arith.constant dense<0.000000e+00> : vector<8x8xf32>
    %956 = tpu.matmul %955, %941, %cst_364 {dimension_numbers = #tpu.dot_dimension_numbers<[1], [0], [0], [1], [0, 0, 1, 1], [], []>} : vector<8x8xf32>, vector<8x8xf32>, vector<8x8xf32> -> vector<8x8xf32>
    %957 = vector.extract_strided_slice %790 {offsets = [16, 0], sizes = [8, 32], strides = [1, 1]} : vector<32x32xf32> to vector<8x32xf32>
    %cst_365 = arith.constant dense<0.000000e+00> : vector<8x32xf32>
    %958 = tpu.matmul %956, %957, %cst_365 {dimension_numbers = #tpu.dot_dimension_numbers<[1], [0], [0], [1], [0, 0, 1, 1], [], []>} : vector<8x8xf32>, vector<8x32xf32>, vector<8x32xf32> -> vector<8x32xf32>
    %959 = arith.addf %938, %958 : vector<8x32xf32>
    %960 = vector.extract_strided_slice %892 {offsets = [0, 24], sizes = [8, 8], strides = [1, 1]} : vector<8x32xf32> to vector<8x8xf32>
    %961 = vector.extract_strided_slice %893 {offsets = [0, 24], sizes = [8, 8], strides = [1, 1]} : vector<8x32xf32> to vector<8x8xf32>
    %962 = vector.extract_strided_slice %894 {offsets = [0, 24], sizes = [8, 8], strides = [1, 1]} : vector<8x32xf32> to vector<8x8xf32>
    %cst_366 = arith.constant dense<0.000000e+00> : vector<8x8xf32>
    %963 = tpu.matmul %960, %961, %cst_366 {dimension_numbers = #tpu.dot_dimension_numbers<[1], [1], [0], [0], [0, 0, 1, 0], [], []>} : vector<8x8xf32>, vector<8x8xf32>, vector<8x8xf32> -> vector<8x8xf32>
    %cst_367 = arith.constant 0.353553385 : f32
    %964 = vector.broadcast %cst_367 : f32 to vector<8x8xf32>
    %965 = arith.mulf %963, %964 : vector<8x8xf32>
    %966 = arith.addf %965, %895 : vector<8x8xf32>
    %cst_368 = arith.constant dense<0xFF800000> : vector<8xf32>
    %967 = vector.multi_reduction <maximumf>, %966, %cst_368 [1] : vector<8x8xf32> to vector<8xf32>
    %968 = vector.shape_cast %967 : vector<8xf32> to vector<8x1xf32>
    %969 = vector.broadcast %968 : vector<8x1xf32> to vector<8x8xf32>
    %970 = arith.subf %966, %969 : vector<8x8xf32>
    %971 = math.exp %970 : vector<8x8xf32>
    %cst_369 = arith.constant dense<0.000000e+00> : vector<8xf32>
    %972 = vector.multi_reduction <add>, %971, %cst_369 [1] : vector<8x8xf32> to vector<8xf32>
    %973 = vector.shape_cast %972 : vector<8xf32> to vector<8x1xf32>
    %974 = tpu.reciprocal %973 {approx = true} : vector<8x1xf32> -> vector<8x1xf32>
    %975 = vector.broadcast %974 : vector<8x1xf32> to vector<8x8xf32>
    %976 = arith.mulf %971, %975 : vector<8x8xf32>
    %cst_370 = arith.constant dense<0.000000e+00> : vector<8x8xf32>
    %977 = tpu.matmul %976, %962, %cst_370 {dimension_numbers = #tpu.dot_dimension_numbers<[1], [0], [0], [1], [0, 0, 1, 1], [], []>} : vector<8x8xf32>, vector<8x8xf32>, vector<8x8xf32> -> vector<8x8xf32>
    %978 = vector.extract_strided_slice %790 {offsets = [24, 0], sizes = [8, 32], strides = [1, 1]} : vector<32x32xf32> to vector<8x32xf32>
    %cst_371 = arith.constant dense<0.000000e+00> : vector<8x32xf32>
    %979 = tpu.matmul %977, %978, %cst_371 {dimension_numbers = #tpu.dot_dimension_numbers<[1], [0], [0], [1], [0, 0, 1, 1], [], []>} : vector<8x8xf32>, vector<8x32xf32>, vector<8x32xf32> -> vector<8x32xf32>
    %980 = arith.addf %959, %979 : vector<8x32xf32>
    %981 = vector.broadcast %792 : vector<1x32xf32> to vector<8x32xf32>
    %982 = arith.addf %980, %981 : vector<8x32xf32>
    %983 = tpu.concatenate %891, %982 in 0 : vector<8x32xf32>, vector<8x32xf32> -> vector<16x32xf32>
    %984 = arith.addf %780, %983 : vector<16x32xf32>
    %c0_372 = arith.constant 0 : index
    %c0_373 = arith.constant 0 : index
    %c0_374 = arith.constant 0 : index
    %985 = vector.load %arg33[%c0_372, %c0_373, %c0_374] : memref<2x1x32xf32, #tpu.memory_space<vmem>>, vector<1x1x32xf32>
    %986 = vector.shape_cast %985 : vector<1x1x32xf32> to vector<1x32xf32>
    %c0_375 = arith.constant 0 : index
    %c0_376 = arith.constant 0 : index
    %c0_377 = arith.constant 0 : index
    %987 = vector.load %arg34[%c0_375, %c0_376, %c0_377] : memref<2x1x32xf32, #tpu.memory_space<vmem>>, vector<1x1x32xf32>
    %988 = vector.shape_cast %987 : vector<1x1x32xf32> to vector<1x32xf32>
    %cst_378 = arith.constant dense<0.000000e+00> : vector<16xf32>
    %989 = vector.multi_reduction <add>, %984, %cst_378 [1] : vector<16x32xf32> to vector<16xf32>
    %990 = vector.shape_cast %989 : vector<16xf32> to vector<16x1xf32>
    %cst_379 = arith.constant 3.200000e+01 : f32
    %991 = vector.broadcast %cst_379 : f32 to vector<16x1xf32>
    %992 = arith.divf %990, %991 : vector<16x1xf32>
    %993 = vector.broadcast %992 : vector<16x1xf32> to vector<16x32xf32>
    %994 = arith.subf %984, %993 : vector<16x32xf32>
    %995 = arith.mulf %994, %994 : vector<16x32xf32>
    %cst_380 = arith.constant dense<0.000000e+00> : vector<16xf32>
    %996 = vector.multi_reduction <add>, %995, %cst_380 [1] : vector<16x32xf32> to vector<16xf32>
    %997 = vector.shape_cast %996 : vector<16xf32> to vector<16x1xf32>
    %cst_381 = arith.constant 3.200000e+01 : f32
    %998 = vector.broadcast %cst_381 : f32 to vector<16x1xf32>
    %999 = arith.divf %997, %998 : vector<16x1xf32>
    %1000 = vector.broadcast %992 : vector<16x1xf32> to vector<16x32xf32>
    %1001 = arith.subf %984, %1000 : vector<16x32xf32>
    %cst_382 = arith.constant 9.99999974E-6 : f32
    %1002 = vector.broadcast %cst_382 : f32 to vector<16x1xf32>
    %1003 = arith.addf %999, %1002 : vector<16x1xf32>
    %1004 = math.rsqrt %1003 : vector<16x1xf32>
    %1005 = vector.broadcast %1004 : vector<16x1xf32> to vector<16x32xf32>
    %1006 = arith.mulf %1001, %1005 : vector<16x32xf32>
    %1007 = vector.broadcast %986 : vector<1x32xf32> to vector<16x32xf32>
    %1008 = arith.mulf %1006, %1007 : vector<16x32xf32>
    %1009 = vector.broadcast %988 : vector<1x32xf32> to vector<16x32xf32>
    %1010 = arith.addf %1008, %1009 : vector<16x32xf32>
    %c0_383 = arith.constant 0 : index
    %c0_384 = arith.constant 0 : index
    %c0_385 = arith.constant 0 : index
    %1011 = vector.load %arg37[%c0_383, %c0_384, %c0_385] : memref<2x32x64xf32, #tpu.memory_space<vmem>>, vector<1x32x64xf32>
    %1012 = vector.shape_cast %1011 : vector<1x32x64xf32> to vector<32x64xf32>
    %c0_386 = arith.constant 0 : index
    %c0_387 = arith.constant 0 : index
    %c0_388 = arith.constant 0 : index
    %1013 = vector.load %arg38[%c0_386, %c0_387, %c0_388] : memref<2x1x64xf32, #tpu.memory_space<vmem>>, vector<1x1x64xf32>
    %1014 = vector.shape_cast %1013 : vector<1x1x64xf32> to vector<1x64xf32>
    %c0_389 = arith.constant 0 : index
    %c0_390 = arith.constant 0 : index
    %c0_391 = arith.constant 0 : index
    %1015 = vector.load %arg39[%c0_389, %c0_390, %c0_391] : memref<2x64x32xf32, #tpu.memory_space<vmem>>, vector<1x64x32xf32>
    %1016 = vector.shape_cast %1015 : vector<1x64x32xf32> to vector<64x32xf32>
    %c0_392 = arith.constant 0 : index
    %c0_393 = arith.constant 0 : index
    %c0_394 = arith.constant 0 : index
    %1017 = vector.load %arg40[%c0_392, %c0_393, %c0_394] : memref<2x1x32xf32, #tpu.memory_space<vmem>>, vector<1x1x32xf32>
    %1018 = vector.shape_cast %1017 : vector<1x1x32xf32> to vector<1x32xf32>
    %cst_395 = arith.constant dense<0.000000e+00> : vector<16x64xf32>
    %1019 = tpu.matmul %1010, %1012, %cst_395 {dimension_numbers = #tpu.dot_dimension_numbers<[1], [0], [0], [1], [0, 0, 1, 1], [], []>} : vector<16x32xf32>, vector<32x64xf32>, vector<16x64xf32> -> vector<16x64xf32>
    %1020 = vector.broadcast %1014 : vector<1x64xf32> to vector<16x64xf32>
    %1021 = arith.addf %1019, %1020 : vector<16x64xf32>
    %cst_396 = arith.constant 0.000000e+00 : f32
    %1022 = vector.broadcast %cst_396 : f32 to vector<16x64xf32>
    %1023 = arith.maximumf %1021, %1022 : vector<16x64xf32>
    %cst_397 = arith.constant dense<0.000000e+00> : vector<16x32xf32>
    %1024 = tpu.matmul %1023, %1016, %cst_397 {dimension_numbers = #tpu.dot_dimension_numbers<[1], [0], [0], [1], [0, 0, 1, 1], [], []>} : vector<16x64xf32>, vector<64x32xf32>, vector<16x32xf32> -> vector<16x32xf32>
    %1025 = vector.broadcast %1018 : vector<1x32xf32> to vector<16x32xf32>
    %1026 = arith.addf %1024, %1025 : vector<16x32xf32>
    %1027 = arith.addf %1010, %1026 : vector<16x32xf32>
    %c0_398 = arith.constant 0 : index
    %c0_399 = arith.constant 0 : index
    %c0_400 = arith.constant 0 : index
    %1028 = vector.load %arg35[%c0_398, %c0_399, %c0_400] : memref<2x1x32xf32, #tpu.memory_space<vmem>>, vector<1x1x32xf32>
    %1029 = vector.shape_cast %1028 : vector<1x1x32xf32> to vector<1x32xf32>
    %c0_401 = arith.constant 0 : index
    %c0_402 = arith.constant 0 : index
    %c0_403 = arith.constant 0 : index
    %1030 = vector.load %arg36[%c0_401, %c0_402, %c0_403] : memref<2x1x32xf32, #tpu.memory_space<vmem>>, vector<1x1x32xf32>
    %1031 = vector.shape_cast %1030 : vector<1x1x32xf32> to vector<1x32xf32>
    %cst_404 = arith.constant dense<0.000000e+00> : vector<16xf32>
    %1032 = vector.multi_reduction <add>, %1027, %cst_404 [1] : vector<16x32xf32> to vector<16xf32>
    %1033 = vector.shape_cast %1032 : vector<16xf32> to vector<16x1xf32>
    %cst_405 = arith.constant 3.200000e+01 : f32
    %1034 = vector.broadcast %cst_405 : f32 to vector<16x1xf32>
    %1035 = arith.divf %1033, %1034 : vector<16x1xf32>
    %1036 = vector.broadcast %1035 : vector<16x1xf32> to vector<16x32xf32>
    %1037 = arith.subf %1027, %1036 : vector<16x32xf32>
    %1038 = arith.mulf %1037, %1037 : vector<16x32xf32>
    %cst_406 = arith.constant dense<0.000000e+00> : vector<16xf32>
    %1039 = vector.multi_reduction <add>, %1038, %cst_406 [1] : vector<16x32xf32> to vector<16xf32>
    %1040 = vector.shape_cast %1039 : vector<16xf32> to vector<16x1xf32>
    %cst_407 = arith.constant 3.200000e+01 : f32
    %1041 = vector.broadcast %cst_407 : f32 to vector<16x1xf32>
    %1042 = arith.divf %1040, %1041 : vector<16x1xf32>
    %1043 = vector.broadcast %1035 : vector<16x1xf32> to vector<16x32xf32>
    %1044 = arith.subf %1027, %1043 : vector<16x32xf32>
    %cst_408 = arith.constant 9.99999974E-6 : f32
    %1045 = vector.broadcast %cst_408 : f32 to vector<16x1xf32>
    %1046 = arith.addf %1042, %1045 : vector<16x1xf32>
    %1047 = math.rsqrt %1046 : vector<16x1xf32>
    %1048 = vector.broadcast %1047 : vector<16x1xf32> to vector<16x32xf32>
    %1049 = arith.mulf %1044, %1048 : vector<16x32xf32>
    %1050 = vector.broadcast %1029 : vector<1x32xf32> to vector<16x32xf32>
    %1051 = arith.mulf %1049, %1050 : vector<16x32xf32>
    %1052 = vector.broadcast %1031 : vector<1x32xf32> to vector<16x32xf32>
    %1053 = arith.addf %1051, %1052 : vector<16x32xf32>
    %c1_409 = arith.constant 1 : index
    %c0_410 = arith.constant 0 : index
    %c0_411 = arith.constant 0 : index
    %1054 = vector.load %arg19[%c1_409, %c0_410, %c0_411] : memref<2x32x32xf32, #tpu.memory_space<vmem>>, vector<1x32x32xf32>
    %1055 = vector.shape_cast %1054 : vector<1x32x32xf32> to vector<32x32xf32>
    %c1_412 = arith.constant 1 : index
    %c0_413 = arith.constant 0 : index
    %c0_414 = arith.constant 0 : index
    %1056 = vector.load %arg20[%c1_412, %c0_413, %c0_414] : memref<2x1x32xf32, #tpu.memory_space<vmem>>, vector<1x1x32xf32>
    %1057 = vector.shape_cast %1056 : vector<1x1x32xf32> to vector<1x32xf32>
    %c1_415 = arith.constant 1 : index
    %c0_416 = arith.constant 0 : index
    %c0_417 = arith.constant 0 : index
    %1058 = vector.load %arg21[%c1_415, %c0_416, %c0_417] : memref<2x32x64xf32, #tpu.memory_space<vmem>>, vector<1x32x64xf32>
    %1059 = vector.shape_cast %1058 : vector<1x32x64xf32> to vector<32x64xf32>
    %c1_418 = arith.constant 1 : index
    %c0_419 = arith.constant 0 : index
    %c0_420 = arith.constant 0 : index
    %1060 = vector.load %arg22[%c1_418, %c0_419, %c0_420] : memref<2x1x64xf32, #tpu.memory_space<vmem>>, vector<1x1x64xf32>
    %1061 = vector.shape_cast %1060 : vector<1x1x64xf32> to vector<1x64xf32>
    %c1_421 = arith.constant 1 : index
    %c0_422 = arith.constant 0 : index
    %c0_423 = arith.constant 0 : index
    %1062 = vector.load %arg23[%c1_421, %c0_422, %c0_423] : memref<2x32x32xf32, #tpu.memory_space<vmem>>, vector<1x32x32xf32>
    %1063 = vector.shape_cast %1062 : vector<1x32x32xf32> to vector<32x32xf32>
    %c1_424 = arith.constant 1 : index
    %c0_425 = arith.constant 0 : index
    %c0_426 = arith.constant 0 : index
    %1064 = vector.load %arg24[%c1_424, %c0_425, %c0_426] : memref<2x1x32xf32, #tpu.memory_space<vmem>>, vector<1x1x32xf32>
    %1065 = vector.shape_cast %1064 : vector<1x1x32xf32> to vector<1x32xf32>
    %cst_427 = arith.constant dense<0.000000e+00> : vector<16x32xf32>
    %1066 = tpu.matmul %1053, %1055, %cst_427 {dimension_numbers = #tpu.dot_dimension_numbers<[1], [0], [0], [1], [0, 0, 1, 1], [], []>} : vector<16x32xf32>, vector<32x32xf32>, vector<16x32xf32> -> vector<16x32xf32>
    %1067 = vector.broadcast %1057 : vector<1x32xf32> to vector<16x32xf32>
    %1068 = arith.addf %1066, %1067 : vector<16x32xf32>
    %cst_428 = arith.constant dense<0.000000e+00> : vector<16x64xf32>
    %1069 = tpu.matmul %1053, %1059, %cst_428 {dimension_numbers = #tpu.dot_dimension_numbers<[1], [0], [0], [1], [0, 0, 1, 1], [], []>} : vector<16x32xf32>, vector<32x64xf32>, vector<16x64xf32> -> vector<16x64xf32>
    %1070 = vector.broadcast %1061 : vector<1x64xf32> to vector<16x64xf32>
    %1071 = arith.addf %1069, %1070 : vector<16x64xf32>
    %1072 = vector.extract_strided_slice %1071 {offsets = [0, 0], sizes = [16, 32], strides = [1, 1]} : vector<16x64xf32> to vector<16x32xf32>
    %1073 = vector.extract_strided_slice %1071 {offsets = [0, 32], sizes = [16, 32], strides = [1, 1]} : vector<16x64xf32> to vector<16x32xf32>
    %1074 = vector.extract_strided_slice %1068 {offsets = [0, 0], sizes = [8, 32], strides = [1, 1]} : vector<16x32xf32> to vector<8x32xf32>
    %1075 = vector.extract_strided_slice %1072 {offsets = [0, 0], sizes = [8, 32], strides = [1, 1]} : vector<16x32xf32> to vector<8x32xf32>
    %1076 = vector.extract_strided_slice %1073 {offsets = [0, 0], sizes = [8, 32], strides = [1, 1]} : vector<16x32xf32> to vector<8x32xf32>
    %1077 = vector.extract_strided_slice %549 {offsets = [0, 0], sizes = [8, 8], strides = [1, 1]} : vector<16x8xf32> to vector<8x8xf32>
    %cst_429 = arith.constant 0.000000e+00 : f32
    %1078 = vector.broadcast %cst_429 : f32 to vector<8x32xf32>
    %1079 = vector.extract_strided_slice %1074 {offsets = [0, 0], sizes = [8, 8], strides = [1, 1]} : vector<8x32xf32> to vector<8x8xf32>
    %1080 = vector.extract_strided_slice %1075 {offsets = [0, 0], sizes = [8, 8], strides = [1, 1]} : vector<8x32xf32> to vector<8x8xf32>
    %1081 = vector.extract_strided_slice %1076 {offsets = [0, 0], sizes = [8, 8], strides = [1, 1]} : vector<8x32xf32> to vector<8x8xf32>
    %cst_430 = arith.constant dense<0.000000e+00> : vector<8x8xf32>
    %1082 = tpu.matmul %1079, %1080, %cst_430 {dimension_numbers = #tpu.dot_dimension_numbers<[1], [1], [0], [0], [0, 0, 1, 0], [], []>} : vector<8x8xf32>, vector<8x8xf32>, vector<8x8xf32> -> vector<8x8xf32>
    %cst_431 = arith.constant 0.353553385 : f32
    %1083 = vector.broadcast %cst_431 : f32 to vector<8x8xf32>
    %1084 = arith.mulf %1082, %1083 : vector<8x8xf32>
    %1085 = arith.addf %1084, %1077 : vector<8x8xf32>
    %cst_432 = arith.constant dense<0xFF800000> : vector<8xf32>
    %1086 = vector.multi_reduction <maximumf>, %1085, %cst_432 [1] : vector<8x8xf32> to vector<8xf32>
    %1087 = vector.shape_cast %1086 : vector<8xf32> to vector<8x1xf32>
    %1088 = vector.broadcast %1087 : vector<8x1xf32> to vector<8x8xf32>
    %1089 = arith.subf %1085, %1088 : vector<8x8xf32>
    %1090 = math.exp %1089 : vector<8x8xf32>
    %cst_433 = arith.constant dense<0.000000e+00> : vector<8xf32>
    %1091 = vector.multi_reduction <add>, %1090, %cst_433 [1] : vector<8x8xf32> to vector<8xf32>
    %1092 = vector.shape_cast %1091 : vector<8xf32> to vector<8x1xf32>
    %1093 = tpu.reciprocal %1092 {approx = true} : vector<8x1xf32> -> vector<8x1xf32>
    %1094 = vector.broadcast %1093 : vector<8x1xf32> to vector<8x8xf32>
    %1095 = arith.mulf %1090, %1094 : vector<8x8xf32>
    %cst_434 = arith.constant dense<0.000000e+00> : vector<8x8xf32>
    %1096 = tpu.matmul %1095, %1081, %cst_434 {dimension_numbers = #tpu.dot_dimension_numbers<[1], [0], [0], [1], [0, 0, 1, 1], [], []>} : vector<8x8xf32>, vector<8x8xf32>, vector<8x8xf32> -> vector<8x8xf32>
    %1097 = vector.extract_strided_slice %1063 {offsets = [0, 0], sizes = [8, 32], strides = [1, 1]} : vector<32x32xf32> to vector<8x32xf32>
    %cst_435 = arith.constant dense<0.000000e+00> : vector<8x32xf32>
    %1098 = tpu.matmul %1096, %1097, %cst_435 {dimension_numbers = #tpu.dot_dimension_numbers<[1], [0], [0], [1], [0, 0, 1, 1], [], []>} : vector<8x8xf32>, vector<8x32xf32>, vector<8x32xf32> -> vector<8x32xf32>
    %1099 = arith.addf %1078, %1098 : vector<8x32xf32>
    %1100 = vector.extract_strided_slice %1074 {offsets = [0, 8], sizes = [8, 8], strides = [1, 1]} : vector<8x32xf32> to vector<8x8xf32>
    %1101 = vector.extract_strided_slice %1075 {offsets = [0, 8], sizes = [8, 8], strides = [1, 1]} : vector<8x32xf32> to vector<8x8xf32>
    %1102 = vector.extract_strided_slice %1076 {offsets = [0, 8], sizes = [8, 8], strides = [1, 1]} : vector<8x32xf32> to vector<8x8xf32>
    %cst_436 = arith.constant dense<0.000000e+00> : vector<8x8xf32>
    %1103 = tpu.matmul %1100, %1101, %cst_436 {dimension_numbers = #tpu.dot_dimension_numbers<[1], [1], [0], [0], [0, 0, 1, 0], [], []>} : vector<8x8xf32>, vector<8x8xf32>, vector<8x8xf32> -> vector<8x8xf32>
    %cst_437 = arith.constant 0.353553385 : f32
    %1104 = vector.broadcast %cst_437 : f32 to vector<8x8xf32>
    %1105 = arith.mulf %1103, %1104 : vector<8x8xf32>
    %1106 = arith.addf %1105, %1077 : vector<8x8xf32>
    %cst_438 = arith.constant dense<0xFF800000> : vector<8xf32>
    %1107 = vector.multi_reduction <maximumf>, %1106, %cst_438 [1] : vector<8x8xf32> to vector<8xf32>
    %1108 = vector.shape_cast %1107 : vector<8xf32> to vector<8x1xf32>
    %1109 = vector.broadcast %1108 : vector<8x1xf32> to vector<8x8xf32>
    %1110 = arith.subf %1106, %1109 : vector<8x8xf32>
    %1111 = math.exp %1110 : vector<8x8xf32>
    %cst_439 = arith.constant dense<0.000000e+00> : vector<8xf32>
    %1112 = vector.multi_reduction <add>, %1111, %cst_439 [1] : vector<8x8xf32> to vector<8xf32>
    %1113 = vector.shape_cast %1112 : vector<8xf32> to vector<8x1xf32>
    %1114 = tpu.reciprocal %1113 {approx = true} : vector<8x1xf32> -> vector<8x1xf32>
    %1115 = vector.broadcast %1114 : vector<8x1xf32> to vector<8x8xf32>
    %1116 = arith.mulf %1111, %1115 : vector<8x8xf32>
    %cst_440 = arith.constant dense<0.000000e+00> : vector<8x8xf32>
    %1117 = tpu.matmul %1116, %1102, %cst_440 {dimension_numbers = #tpu.dot_dimension_numbers<[1], [0], [0], [1], [0, 0, 1, 1], [], []>} : vector<8x8xf32>, vector<8x8xf32>, vector<8x8xf32> -> vector<8x8xf32>
    %1118 = vector.extract_strided_slice %1063 {offsets = [8, 0], sizes = [8, 32], strides = [1, 1]} : vector<32x32xf32> to vector<8x32xf32>
    %cst_441 = arith.constant dense<0.000000e+00> : vector<8x32xf32>
    %1119 = tpu.matmul %1117, %1118, %cst_441 {dimension_numbers = #tpu.dot_dimension_numbers<[1], [0], [0], [1], [0, 0, 1, 1], [], []>} : vector<8x8xf32>, vector<8x32xf32>, vector<8x32xf32> -> vector<8x32xf32>
    %1120 = arith.addf %1099, %1119 : vector<8x32xf32>
    %1121 = vector.extract_strided_slice %1074 {offsets = [0, 16], sizes = [8, 8], strides = [1, 1]} : vector<8x32xf32> to vector<8x8xf32>
    %1122 = vector.extract_strided_slice %1075 {offsets = [0, 16], sizes = [8, 8], strides = [1, 1]} : vector<8x32xf32> to vector<8x8xf32>
    %1123 = vector.extract_strided_slice %1076 {offsets = [0, 16], sizes = [8, 8], strides = [1, 1]} : vector<8x32xf32> to vector<8x8xf32>
    %cst_442 = arith.constant dense<0.000000e+00> : vector<8x8xf32>
    %1124 = tpu.matmul %1121, %1122, %cst_442 {dimension_numbers = #tpu.dot_dimension_numbers<[1], [1], [0], [0], [0, 0, 1, 0], [], []>} : vector<8x8xf32>, vector<8x8xf32>, vector<8x8xf32> -> vector<8x8xf32>
    %cst_443 = arith.constant 0.353553385 : f32
    %1125 = vector.broadcast %cst_443 : f32 to vector<8x8xf32>
    %1126 = arith.mulf %1124, %1125 : vector<8x8xf32>
    %1127 = arith.addf %1126, %1077 : vector<8x8xf32>
    %cst_444 = arith.constant dense<0xFF800000> : vector<8xf32>
    %1128 = vector.multi_reduction <maximumf>, %1127, %cst_444 [1] : vector<8x8xf32> to vector<8xf32>
    %1129 = vector.shape_cast %1128 : vector<8xf32> to vector<8x1xf32>
    %1130 = vector.broadcast %1129 : vector<8x1xf32> to vector<8x8xf32>
    %1131 = arith.subf %1127, %1130 : vector<8x8xf32>
    %1132 = math.exp %1131 : vector<8x8xf32>
    %cst_445 = arith.constant dense<0.000000e+00> : vector<8xf32>
    %1133 = vector.multi_reduction <add>, %1132, %cst_445 [1] : vector<8x8xf32> to vector<8xf32>
    %1134 = vector.shape_cast %1133 : vector<8xf32> to vector<8x1xf32>
    %1135 = tpu.reciprocal %1134 {approx = true} : vector<8x1xf32> -> vector<8x1xf32>
    %1136 = vector.broadcast %1135 : vector<8x1xf32> to vector<8x8xf32>
    %1137 = arith.mulf %1132, %1136 : vector<8x8xf32>
    %cst_446 = arith.constant dense<0.000000e+00> : vector<8x8xf32>
    %1138 = tpu.matmul %1137, %1123, %cst_446 {dimension_numbers = #tpu.dot_dimension_numbers<[1], [0], [0], [1], [0, 0, 1, 1], [], []>} : vector<8x8xf32>, vector<8x8xf32>, vector<8x8xf32> -> vector<8x8xf32>
    %1139 = vector.extract_strided_slice %1063 {offsets = [16, 0], sizes = [8, 32], strides = [1, 1]} : vector<32x32xf32> to vector<8x32xf32>
    %cst_447 = arith.constant dense<0.000000e+00> : vector<8x32xf32>
    %1140 = tpu.matmul %1138, %1139, %cst_447 {dimension_numbers = #tpu.dot_dimension_numbers<[1], [0], [0], [1], [0, 0, 1, 1], [], []>} : vector<8x8xf32>, vector<8x32xf32>, vector<8x32xf32> -> vector<8x32xf32>
    %1141 = arith.addf %1120, %1140 : vector<8x32xf32>
    %1142 = vector.extract_strided_slice %1074 {offsets = [0, 24], sizes = [8, 8], strides = [1, 1]} : vector<8x32xf32> to vector<8x8xf32>
    %1143 = vector.extract_strided_slice %1075 {offsets = [0, 24], sizes = [8, 8], strides = [1, 1]} : vector<8x32xf32> to vector<8x8xf32>
    %1144 = vector.extract_strided_slice %1076 {offsets = [0, 24], sizes = [8, 8], strides = [1, 1]} : vector<8x32xf32> to vector<8x8xf32>
    %cst_448 = arith.constant dense<0.000000e+00> : vector<8x8xf32>
    %1145 = tpu.matmul %1142, %1143, %cst_448 {dimension_numbers = #tpu.dot_dimension_numbers<[1], [1], [0], [0], [0, 0, 1, 0], [], []>} : vector<8x8xf32>, vector<8x8xf32>, vector<8x8xf32> -> vector<8x8xf32>
    %cst_449 = arith.constant 0.353553385 : f32
    %1146 = vector.broadcast %cst_449 : f32 to vector<8x8xf32>
    %1147 = arith.mulf %1145, %1146 : vector<8x8xf32>
    %1148 = arith.addf %1147, %1077 : vector<8x8xf32>
    %cst_450 = arith.constant dense<0xFF800000> : vector<8xf32>
    %1149 = vector.multi_reduction <maximumf>, %1148, %cst_450 [1] : vector<8x8xf32> to vector<8xf32>
    %1150 = vector.shape_cast %1149 : vector<8xf32> to vector<8x1xf32>
    %1151 = vector.broadcast %1150 : vector<8x1xf32> to vector<8x8xf32>
    %1152 = arith.subf %1148, %1151 : vector<8x8xf32>
    %1153 = math.exp %1152 : vector<8x8xf32>
    %cst_451 = arith.constant dense<0.000000e+00> : vector<8xf32>
    %1154 = vector.multi_reduction <add>, %1153, %cst_451 [1] : vector<8x8xf32> to vector<8xf32>
    %1155 = vector.shape_cast %1154 : vector<8xf32> to vector<8x1xf32>
    %1156 = tpu.reciprocal %1155 {approx = true} : vector<8x1xf32> -> vector<8x1xf32>
    %1157 = vector.broadcast %1156 : vector<8x1xf32> to vector<8x8xf32>
    %1158 = arith.mulf %1153, %1157 : vector<8x8xf32>
    %cst_452 = arith.constant dense<0.000000e+00> : vector<8x8xf32>
    %1159 = tpu.matmul %1158, %1144, %cst_452 {dimension_numbers = #tpu.dot_dimension_numbers<[1], [0], [0], [1], [0, 0, 1, 1], [], []>} : vector<8x8xf32>, vector<8x8xf32>, vector<8x8xf32> -> vector<8x8xf32>
    %1160 = vector.extract_strided_slice %1063 {offsets = [24, 0], sizes = [8, 32], strides = [1, 1]} : vector<32x32xf32> to vector<8x32xf32>
    %cst_453 = arith.constant dense<0.000000e+00> : vector<8x32xf32>
    %1161 = tpu.matmul %1159, %1160, %cst_453 {dimension_numbers = #tpu.dot_dimension_numbers<[1], [0], [0], [1], [0, 0, 1, 1], [], []>} : vector<8x8xf32>, vector<8x32xf32>, vector<8x32xf32> -> vector<8x32xf32>
    %1162 = arith.addf %1141, %1161 : vector<8x32xf32>
    %1163 = vector.broadcast %1065 : vector<1x32xf32> to vector<8x32xf32>
    %1164 = arith.addf %1162, %1163 : vector<8x32xf32>
    %1165 = vector.extract_strided_slice %1068 {offsets = [8, 0], sizes = [8, 32], strides = [1, 1]} : vector<16x32xf32> to vector<8x32xf32>
    %1166 = vector.extract_strided_slice %1072 {offsets = [8, 0], sizes = [8, 32], strides = [1, 1]} : vector<16x32xf32> to vector<8x32xf32>
    %1167 = vector.extract_strided_slice %1073 {offsets = [8, 0], sizes = [8, 32], strides = [1, 1]} : vector<16x32xf32> to vector<8x32xf32>
    %1168 = vector.extract_strided_slice %549 {offsets = [8, 0], sizes = [8, 8], strides = [1, 1]} : vector<16x8xf32> to vector<8x8xf32>
    %cst_454 = arith.constant 0.000000e+00 : f32
    %1169 = vector.broadcast %cst_454 : f32 to vector<8x32xf32>
    %1170 = vector.extract_strided_slice %1165 {offsets = [0, 0], sizes = [8, 8], strides = [1, 1]} : vector<8x32xf32> to vector<8x8xf32>
    %1171 = vector.extract_strided_slice %1166 {offsets = [0, 0], sizes = [8, 8], strides = [1, 1]} : vector<8x32xf32> to vector<8x8xf32>
    %1172 = vector.extract_strided_slice %1167 {offsets = [0, 0], sizes = [8, 8], strides = [1, 1]} : vector<8x32xf32> to vector<8x8xf32>
    %cst_455 = arith.constant dense<0.000000e+00> : vector<8x8xf32>
    %1173 = tpu.matmul %1170, %1171, %cst_455 {dimension_numbers = #tpu.dot_dimension_numbers<[1], [1], [0], [0], [0, 0, 1, 0], [], []>} : vector<8x8xf32>, vector<8x8xf32>, vector<8x8xf32> -> vector<8x8xf32>
    %cst_456 = arith.constant 0.353553385 : f32
    %1174 = vector.broadcast %cst_456 : f32 to vector<8x8xf32>
    %1175 = arith.mulf %1173, %1174 : vector<8x8xf32>
    %1176 = arith.addf %1175, %1168 : vector<8x8xf32>
    %cst_457 = arith.constant dense<0xFF800000> : vector<8xf32>
    %1177 = vector.multi_reduction <maximumf>, %1176, %cst_457 [1] : vector<8x8xf32> to vector<8xf32>
    %1178 = vector.shape_cast %1177 : vector<8xf32> to vector<8x1xf32>
    %1179 = vector.broadcast %1178 : vector<8x1xf32> to vector<8x8xf32>
    %1180 = arith.subf %1176, %1179 : vector<8x8xf32>
    %1181 = math.exp %1180 : vector<8x8xf32>
    %cst_458 = arith.constant dense<0.000000e+00> : vector<8xf32>
    %1182 = vector.multi_reduction <add>, %1181, %cst_458 [1] : vector<8x8xf32> to vector<8xf32>
    %1183 = vector.shape_cast %1182 : vector<8xf32> to vector<8x1xf32>
    %1184 = tpu.reciprocal %1183 {approx = true} : vector<8x1xf32> -> vector<8x1xf32>
    %1185 = vector.broadcast %1184 : vector<8x1xf32> to vector<8x8xf32>
    %1186 = arith.mulf %1181, %1185 : vector<8x8xf32>
    %cst_459 = arith.constant dense<0.000000e+00> : vector<8x8xf32>
    %1187 = tpu.matmul %1186, %1172, %cst_459 {dimension_numbers = #tpu.dot_dimension_numbers<[1], [0], [0], [1], [0, 0, 1, 1], [], []>} : vector<8x8xf32>, vector<8x8xf32>, vector<8x8xf32> -> vector<8x8xf32>
    %1188 = vector.extract_strided_slice %1063 {offsets = [0, 0], sizes = [8, 32], strides = [1, 1]} : vector<32x32xf32> to vector<8x32xf32>
    %cst_460 = arith.constant dense<0.000000e+00> : vector<8x32xf32>
    %1189 = tpu.matmul %1187, %1188, %cst_460 {dimension_numbers = #tpu.dot_dimension_numbers<[1], [0], [0], [1], [0, 0, 1, 1], [], []>} : vector<8x8xf32>, vector<8x32xf32>, vector<8x32xf32> -> vector<8x32xf32>
    %1190 = arith.addf %1169, %1189 : vector<8x32xf32>
    %1191 = vector.extract_strided_slice %1165 {offsets = [0, 8], sizes = [8, 8], strides = [1, 1]} : vector<8x32xf32> to vector<8x8xf32>
    %1192 = vector.extract_strided_slice %1166 {offsets = [0, 8], sizes = [8, 8], strides = [1, 1]} : vector<8x32xf32> to vector<8x8xf32>
    %1193 = vector.extract_strided_slice %1167 {offsets = [0, 8], sizes = [8, 8], strides = [1, 1]} : vector<8x32xf32> to vector<8x8xf32>
    %cst_461 = arith.constant dense<0.000000e+00> : vector<8x8xf32>
    %1194 = tpu.matmul %1191, %1192, %cst_461 {dimension_numbers = #tpu.dot_dimension_numbers<[1], [1], [0], [0], [0, 0, 1, 0], [], []>} : vector<8x8xf32>, vector<8x8xf32>, vector<8x8xf32> -> vector<8x8xf32>
    %cst_462 = arith.constant 0.353553385 : f32
    %1195 = vector.broadcast %cst_462 : f32 to vector<8x8xf32>
    %1196 = arith.mulf %1194, %1195 : vector<8x8xf32>
    %1197 = arith.addf %1196, %1168 : vector<8x8xf32>
    %cst_463 = arith.constant dense<0xFF800000> : vector<8xf32>
    %1198 = vector.multi_reduction <maximumf>, %1197, %cst_463 [1] : vector<8x8xf32> to vector<8xf32>
    %1199 = vector.shape_cast %1198 : vector<8xf32> to vector<8x1xf32>
    %1200 = vector.broadcast %1199 : vector<8x1xf32> to vector<8x8xf32>
    %1201 = arith.subf %1197, %1200 : vector<8x8xf32>
    %1202 = math.exp %1201 : vector<8x8xf32>
    %cst_464 = arith.constant dense<0.000000e+00> : vector<8xf32>
    %1203 = vector.multi_reduction <add>, %1202, %cst_464 [1] : vector<8x8xf32> to vector<8xf32>
    %1204 = vector.shape_cast %1203 : vector<8xf32> to vector<8x1xf32>
    %1205 = tpu.reciprocal %1204 {approx = true} : vector<8x1xf32> -> vector<8x1xf32>
    %1206 = vector.broadcast %1205 : vector<8x1xf32> to vector<8x8xf32>
    %1207 = arith.mulf %1202, %1206 : vector<8x8xf32>
    %cst_465 = arith.constant dense<0.000000e+00> : vector<8x8xf32>
    %1208 = tpu.matmul %1207, %1193, %cst_465 {dimension_numbers = #tpu.dot_dimension_numbers<[1], [0], [0], [1], [0, 0, 1, 1], [], []>} : vector<8x8xf32>, vector<8x8xf32>, vector<8x8xf32> -> vector<8x8xf32>
    %1209 = vector.extract_strided_slice %1063 {offsets = [8, 0], sizes = [8, 32], strides = [1, 1]} : vector<32x32xf32> to vector<8x32xf32>
    %cst_466 = arith.constant dense<0.000000e+00> : vector<8x32xf32>
    %1210 = tpu.matmul %1208, %1209, %cst_466 {dimension_numbers = #tpu.dot_dimension_numbers<[1], [0], [0], [1], [0, 0, 1, 1], [], []>} : vector<8x8xf32>, vector<8x32xf32>, vector<8x32xf32> -> vector<8x32xf32>
    %1211 = arith.addf %1190, %1210 : vector<8x32xf32>
    %1212 = vector.extract_strided_slice %1165 {offsets = [0, 16], sizes = [8, 8], strides = [1, 1]} : vector<8x32xf32> to vector<8x8xf32>
    %1213 = vector.extract_strided_slice %1166 {offsets = [0, 16], sizes = [8, 8], strides = [1, 1]} : vector<8x32xf32> to vector<8x8xf32>
    %1214 = vector.extract_strided_slice %1167 {offsets = [0, 16], sizes = [8, 8], strides = [1, 1]} : vector<8x32xf32> to vector<8x8xf32>
    %cst_467 = arith.constant dense<0.000000e+00> : vector<8x8xf32>
    %1215 = tpu.matmul %1212, %1213, %cst_467 {dimension_numbers = #tpu.dot_dimension_numbers<[1], [1], [0], [0], [0, 0, 1, 0], [], []>} : vector<8x8xf32>, vector<8x8xf32>, vector<8x8xf32> -> vector<8x8xf32>
    %cst_468 = arith.constant 0.353553385 : f32
    %1216 = vector.broadcast %cst_468 : f32 to vector<8x8xf32>
    %1217 = arith.mulf %1215, %1216 : vector<8x8xf32>
    %1218 = arith.addf %1217, %1168 : vector<8x8xf32>
    %cst_469 = arith.constant dense<0xFF800000> : vector<8xf32>
    %1219 = vector.multi_reduction <maximumf>, %1218, %cst_469 [1] : vector<8x8xf32> to vector<8xf32>
    %1220 = vector.shape_cast %1219 : vector<8xf32> to vector<8x1xf32>
    %1221 = vector.broadcast %1220 : vector<8x1xf32> to vector<8x8xf32>
    %1222 = arith.subf %1218, %1221 : vector<8x8xf32>
    %1223 = math.exp %1222 : vector<8x8xf32>
    %cst_470 = arith.constant dense<0.000000e+00> : vector<8xf32>
    %1224 = vector.multi_reduction <add>, %1223, %cst_470 [1] : vector<8x8xf32> to vector<8xf32>
    %1225 = vector.shape_cast %1224 : vector<8xf32> to vector<8x1xf32>
    %1226 = tpu.reciprocal %1225 {approx = true} : vector<8x1xf32> -> vector<8x1xf32>
    %1227 = vector.broadcast %1226 : vector<8x1xf32> to vector<8x8xf32>
    %1228 = arith.mulf %1223, %1227 : vector<8x8xf32>
    %cst_471 = arith.constant dense<0.000000e+00> : vector<8x8xf32>
    %1229 = tpu.matmul %1228, %1214, %cst_471 {dimension_numbers = #tpu.dot_dimension_numbers<[1], [0], [0], [1], [0, 0, 1, 1], [], []>} : vector<8x8xf32>, vector<8x8xf32>, vector<8x8xf32> -> vector<8x8xf32>
    %1230 = vector.extract_strided_slice %1063 {offsets = [16, 0], sizes = [8, 32], strides = [1, 1]} : vector<32x32xf32> to vector<8x32xf32>
    %cst_472 = arith.constant dense<0.000000e+00> : vector<8x32xf32>
    %1231 = tpu.matmul %1229, %1230, %cst_472 {dimension_numbers = #tpu.dot_dimension_numbers<[1], [0], [0], [1], [0, 0, 1, 1], [], []>} : vector<8x8xf32>, vector<8x32xf32>, vector<8x32xf32> -> vector<8x32xf32>
    %1232 = arith.addf %1211, %1231 : vector<8x32xf32>
    %1233 = vector.extract_strided_slice %1165 {offsets = [0, 24], sizes = [8, 8], strides = [1, 1]} : vector<8x32xf32> to vector<8x8xf32>
    %1234 = vector.extract_strided_slice %1166 {offsets = [0, 24], sizes = [8, 8], strides = [1, 1]} : vector<8x32xf32> to vector<8x8xf32>
    %1235 = vector.extract_strided_slice %1167 {offsets = [0, 24], sizes = [8, 8], strides = [1, 1]} : vector<8x32xf32> to vector<8x8xf32>
    %cst_473 = arith.constant dense<0.000000e+00> : vector<8x8xf32>
    %1236 = tpu.matmul %1233, %1234, %cst_473 {dimension_numbers = #tpu.dot_dimension_numbers<[1], [1], [0], [0], [0, 0, 1, 0], [], []>} : vector<8x8xf32>, vector<8x8xf32>, vector<8x8xf32> -> vector<8x8xf32>
    %cst_474 = arith.constant 0.353553385 : f32
    %1237 = vector.broadcast %cst_474 : f32 to vector<8x8xf32>
    %1238 = arith.mulf %1236, %1237 : vector<8x8xf32>
    %1239 = arith.addf %1238, %1168 : vector<8x8xf32>
    %cst_475 = arith.constant dense<0xFF800000> : vector<8xf32>
    %1240 = vector.multi_reduction <maximumf>, %1239, %cst_475 [1] : vector<8x8xf32> to vector<8xf32>
    %1241 = vector.shape_cast %1240 : vector<8xf32> to vector<8x1xf32>
    %1242 = vector.broadcast %1241 : vector<8x1xf32> to vector<8x8xf32>
    %1243 = arith.subf %1239, %1242 : vector<8x8xf32>
    %1244 = math.exp %1243 : vector<8x8xf32>
    %cst_476 = arith.constant dense<0.000000e+00> : vector<8xf32>
    %1245 = vector.multi_reduction <add>, %1244, %cst_476 [1] : vector<8x8xf32> to vector<8xf32>
    %1246 = vector.shape_cast %1245 : vector<8xf32> to vector<8x1xf32>
    %1247 = tpu.reciprocal %1246 {approx = true} : vector<8x1xf32> -> vector<8x1xf32>
    %1248 = vector.broadcast %1247 : vector<8x1xf32> to vector<8x8xf32>
    %1249 = arith.mulf %1244, %1248 : vector<8x8xf32>
    %cst_477 = arith.constant dense<0.000000e+00> : vector<8x8xf32>
    %1250 = tpu.matmul %1249, %1235, %cst_477 {dimension_numbers = #tpu.dot_dimension_numbers<[1], [0], [0], [1], [0, 0, 1, 1], [], []>} : vector<8x8xf32>, vector<8x8xf32>, vector<8x8xf32> -> vector<8x8xf32>
    %1251 = vector.extract_strided_slice %1063 {offsets = [24, 0], sizes = [8, 32], strides = [1, 1]} : vector<32x32xf32> to vector<8x32xf32>
    %cst_478 = arith.constant dense<0.000000e+00> : vector<8x32xf32>
    %1252 = tpu.matmul %1250, %1251, %cst_478 {dimension_numbers = #tpu.dot_dimension_numbers<[1], [0], [0], [1], [0, 0, 1, 1], [], []>} : vector<8x8xf32>, vector<8x32xf32>, vector<8x32xf32> -> vector<8x32xf32>
    %1253 = arith.addf %1232, %1252 : vector<8x32xf32>
    %1254 = vector.broadcast %1065 : vector<1x32xf32> to vector<8x32xf32>
    %1255 = arith.addf %1253, %1254 : vector<8x32xf32>
    %1256 = tpu.concatenate %1164, %1255 in 0 : vector<8x32xf32>, vector<8x32xf32> -> vector<16x32xf32>
    %1257 = arith.addf %1053, %1256 : vector<16x32xf32>
    %c1_479 = arith.constant 1 : index
    %c0_480 = arith.constant 0 : index
    %c0_481 = arith.constant 0 : index
    %1258 = vector.load %arg31[%c1_479, %c0_480, %c0_481] : memref<2x1x32xf32, #tpu.memory_space<vmem>>, vector<1x1x32xf32>
    %1259 = vector.shape_cast %1258 : vector<1x1x32xf32> to vector<1x32xf32>
    %c1_482 = arith.constant 1 : index
    %c0_483 = arith.constant 0 : index
    %c0_484 = arith.constant 0 : index
    %1260 = vector.load %arg32[%c1_482, %c0_483, %c0_484] : memref<2x1x32xf32, #tpu.memory_space<vmem>>, vector<1x1x32xf32>
    %1261 = vector.shape_cast %1260 : vector<1x1x32xf32> to vector<1x32xf32>
    %cst_485 = arith.constant dense<0.000000e+00> : vector<16xf32>
    %1262 = vector.multi_reduction <add>, %1257, %cst_485 [1] : vector<16x32xf32> to vector<16xf32>
    %1263 = vector.shape_cast %1262 : vector<16xf32> to vector<16x1xf32>
    %cst_486 = arith.constant 3.200000e+01 : f32
    %1264 = vector.broadcast %cst_486 : f32 to vector<16x1xf32>
    %1265 = arith.divf %1263, %1264 : vector<16x1xf32>
    %1266 = vector.broadcast %1265 : vector<16x1xf32> to vector<16x32xf32>
    %1267 = arith.subf %1257, %1266 : vector<16x32xf32>
    %1268 = arith.mulf %1267, %1267 : vector<16x32xf32>
    %cst_487 = arith.constant dense<0.000000e+00> : vector<16xf32>
    %1269 = vector.multi_reduction <add>, %1268, %cst_487 [1] : vector<16x32xf32> to vector<16xf32>
    %1270 = vector.shape_cast %1269 : vector<16xf32> to vector<16x1xf32>
    %cst_488 = arith.constant 3.200000e+01 : f32
    %1271 = vector.broadcast %cst_488 : f32 to vector<16x1xf32>
    %1272 = arith.divf %1270, %1271 : vector<16x1xf32>
    %1273 = vector.broadcast %1265 : vector<16x1xf32> to vector<16x32xf32>
    %1274 = arith.subf %1257, %1273 : vector<16x32xf32>
    %cst_489 = arith.constant 9.99999974E-6 : f32
    %1275 = vector.broadcast %cst_489 : f32 to vector<16x1xf32>
    %1276 = arith.addf %1272, %1275 : vector<16x1xf32>
    %1277 = math.rsqrt %1276 : vector<16x1xf32>
    %1278 = vector.broadcast %1277 : vector<16x1xf32> to vector<16x32xf32>
    %1279 = arith.mulf %1274, %1278 : vector<16x32xf32>
    %1280 = vector.broadcast %1259 : vector<1x32xf32> to vector<16x32xf32>
    %1281 = arith.mulf %1279, %1280 : vector<16x32xf32>
    %1282 = vector.broadcast %1261 : vector<1x32xf32> to vector<16x32xf32>
    %1283 = arith.addf %1281, %1282 : vector<16x32xf32>
    %c1_490 = arith.constant 1 : index
    %c0_491 = arith.constant 0 : index
    %c0_492 = arith.constant 0 : index
    %1284 = vector.load %arg25[%c1_490, %c0_491, %c0_492] : memref<2x32x32xf32, #tpu.memory_space<vmem>>, vector<1x32x32xf32>
    %1285 = vector.shape_cast %1284 : vector<1x32x32xf32> to vector<32x32xf32>
    %c1_493 = arith.constant 1 : index
    %c0_494 = arith.constant 0 : index
    %c0_495 = arith.constant 0 : index
    %1286 = vector.load %arg26[%c1_493, %c0_494, %c0_495] : memref<2x1x32xf32, #tpu.memory_space<vmem>>, vector<1x1x32xf32>
    %1287 = vector.shape_cast %1286 : vector<1x1x32xf32> to vector<1x32xf32>
    %c1_496 = arith.constant 1 : index
    %c0_497 = arith.constant 0 : index
    %c0_498 = arith.constant 0 : index
    %1288 = vector.load %arg27[%c1_496, %c0_497, %c0_498] : memref<2x32x64xf32, #tpu.memory_space<vmem>>, vector<1x32x64xf32>
    %1289 = vector.shape_cast %1288 : vector<1x32x64xf32> to vector<32x64xf32>
    %c1_499 = arith.constant 1 : index
    %c0_500 = arith.constant 0 : index
    %c0_501 = arith.constant 0 : index
    %1290 = vector.load %arg28[%c1_499, %c0_500, %c0_501] : memref<2x1x64xf32, #tpu.memory_space<vmem>>, vector<1x1x64xf32>
    %1291 = vector.shape_cast %1290 : vector<1x1x64xf32> to vector<1x64xf32>
    %c1_502 = arith.constant 1 : index
    %c0_503 = arith.constant 0 : index
    %c0_504 = arith.constant 0 : index
    %1292 = vector.load %arg29[%c1_502, %c0_503, %c0_504] : memref<2x32x32xf32, #tpu.memory_space<vmem>>, vector<1x32x32xf32>
    %1293 = vector.shape_cast %1292 : vector<1x32x32xf32> to vector<32x32xf32>
    %c1_505 = arith.constant 1 : index
    %c0_506 = arith.constant 0 : index
    %c0_507 = arith.constant 0 : index
    %1294 = vector.load %arg30[%c1_505, %c0_506, %c0_507] : memref<2x1x32xf32, #tpu.memory_space<vmem>>, vector<1x1x32xf32>
    %1295 = vector.shape_cast %1294 : vector<1x1x32xf32> to vector<1x32xf32>
    %cst_508 = arith.constant dense<0.000000e+00> : vector<16x32xf32>
    %1296 = tpu.matmul %1283, %1285, %cst_508 {dimension_numbers = #tpu.dot_dimension_numbers<[1], [0], [0], [1], [0, 0, 1, 1], [], []>} : vector<16x32xf32>, vector<32x32xf32>, vector<16x32xf32> -> vector<16x32xf32>
    %1297 = vector.broadcast %1287 : vector<1x32xf32> to vector<16x32xf32>
    %1298 = arith.addf %1296, %1297 : vector<16x32xf32>
    %cst_509 = arith.constant dense<0.000000e+00> : vector<16x64xf32>
    %1299 = tpu.matmul %547, %1289, %cst_509 {dimension_numbers = #tpu.dot_dimension_numbers<[1], [0], [0], [1], [0, 0, 1, 1], [], []>} : vector<16x32xf32>, vector<32x64xf32>, vector<16x64xf32> -> vector<16x64xf32>
    %1300 = vector.broadcast %1291 : vector<1x64xf32> to vector<16x64xf32>
    %1301 = arith.addf %1299, %1300 : vector<16x64xf32>
    %1302 = vector.extract_strided_slice %1301 {offsets = [0, 0], sizes = [16, 32], strides = [1, 1]} : vector<16x64xf32> to vector<16x32xf32>
    %1303 = vector.extract_strided_slice %1301 {offsets = [0, 32], sizes = [16, 32], strides = [1, 1]} : vector<16x64xf32> to vector<16x32xf32>
    %1304 = vector.extract_strided_slice %1298 {offsets = [0, 0], sizes = [8, 32], strides = [1, 1]} : vector<16x32xf32> to vector<8x32xf32>
    %1305 = vector.extract_strided_slice %1302 {offsets = [0, 0], sizes = [8, 32], strides = [1, 1]} : vector<16x32xf32> to vector<8x32xf32>
    %1306 = vector.extract_strided_slice %1303 {offsets = [0, 0], sizes = [8, 32], strides = [1, 1]} : vector<16x32xf32> to vector<8x32xf32>
    %1307 = vector.extract_strided_slice %550 {offsets = [0, 0], sizes = [8, 8], strides = [1, 1]} : vector<16x8xf32> to vector<8x8xf32>
    %cst_510 = arith.constant 0.000000e+00 : f32
    %1308 = vector.broadcast %cst_510 : f32 to vector<8x32xf32>
    %1309 = vector.extract_strided_slice %1304 {offsets = [0, 0], sizes = [8, 8], strides = [1, 1]} : vector<8x32xf32> to vector<8x8xf32>
    %1310 = vector.extract_strided_slice %1305 {offsets = [0, 0], sizes = [8, 8], strides = [1, 1]} : vector<8x32xf32> to vector<8x8xf32>
    %1311 = vector.extract_strided_slice %1306 {offsets = [0, 0], sizes = [8, 8], strides = [1, 1]} : vector<8x32xf32> to vector<8x8xf32>
    %cst_511 = arith.constant dense<0.000000e+00> : vector<8x8xf32>
    %1312 = tpu.matmul %1309, %1310, %cst_511 {dimension_numbers = #tpu.dot_dimension_numbers<[1], [1], [0], [0], [0, 0, 1, 0], [], []>} : vector<8x8xf32>, vector<8x8xf32>, vector<8x8xf32> -> vector<8x8xf32>
    %cst_512 = arith.constant 0.353553385 : f32
    %1313 = vector.broadcast %cst_512 : f32 to vector<8x8xf32>
    %1314 = arith.mulf %1312, %1313 : vector<8x8xf32>
    %1315 = arith.addf %1314, %1307 : vector<8x8xf32>
    %cst_513 = arith.constant dense<0xFF800000> : vector<8xf32>
    %1316 = vector.multi_reduction <maximumf>, %1315, %cst_513 [1] : vector<8x8xf32> to vector<8xf32>
    %1317 = vector.shape_cast %1316 : vector<8xf32> to vector<8x1xf32>
    %1318 = vector.broadcast %1317 : vector<8x1xf32> to vector<8x8xf32>
    %1319 = arith.subf %1315, %1318 : vector<8x8xf32>
    %1320 = math.exp %1319 : vector<8x8xf32>
    %cst_514 = arith.constant dense<0.000000e+00> : vector<8xf32>
    %1321 = vector.multi_reduction <add>, %1320, %cst_514 [1] : vector<8x8xf32> to vector<8xf32>
    %1322 = vector.shape_cast %1321 : vector<8xf32> to vector<8x1xf32>
    %1323 = tpu.reciprocal %1322 {approx = true} : vector<8x1xf32> -> vector<8x1xf32>
    %1324 = vector.broadcast %1323 : vector<8x1xf32> to vector<8x8xf32>
    %1325 = arith.mulf %1320, %1324 : vector<8x8xf32>
    %c0_515 = arith.constant 0 : index
    %c0_516 = arith.constant 0 : index
    %c0_517 = arith.constant 0 : index
    %1326 = vector.load %arg44[%c0_515, %c0_516, %c0_517] : memref<8x8x8xf32, #tpu.memory_space<vmem>>, vector<1x8x8xf32>
    %1327 = vector.shape_cast %1326 : vector<1x8x8xf32> to vector<8x8xf32>
    %1328 = vector.shape_cast %1325 : vector<8x8xf32> to vector<1x8x8xf32>
    tpu.vector_store %arg44[%c0_515, %c0_516, %c0_517], %1328 {strides = array<i32>} : memref<8x8x8xf32, #tpu.memory_space<vmem>>, vector<1x8x8xf32>,
    %cst_518 = arith.constant dense<0.000000e+00> : vector<8x8xf32>
    %1329 = tpu.matmul %1325, %1311, %cst_518 {dimension_numbers = #tpu.dot_dimension_numbers<[1], [0], [0], [1], [0, 0, 1, 1], [], []>} : vector<8x8xf32>, vector<8x8xf32>, vector<8x8xf32> -> vector<8x8xf32>
    %1330 = vector.extract_strided_slice %1293 {offsets = [0, 0], sizes = [8, 32], strides = [1, 1]} : vector<32x32xf32> to vector<8x32xf32>
    %cst_519 = arith.constant dense<0.000000e+00> : vector<8x32xf32>
    %1331 = tpu.matmul %1329, %1330, %cst_519 {dimension_numbers = #tpu.dot_dimension_numbers<[1], [0], [0], [1], [0, 0, 1, 1], [], []>} : vector<8x8xf32>, vector<8x32xf32>, vector<8x32xf32> -> vector<8x32xf32>
    %1332 = arith.addf %1308, %1331 : vector<8x32xf32>
    %1333 = vector.extract_strided_slice %1304 {offsets = [0, 8], sizes = [8, 8], strides = [1, 1]} : vector<8x32xf32> to vector<8x8xf32>
    %1334 = vector.extract_strided_slice %1305 {offsets = [0, 8], sizes = [8, 8], strides = [1, 1]} : vector<8x32xf32> to vector<8x8xf32>
    %1335 = vector.extract_strided_slice %1306 {offsets = [0, 8], sizes = [8, 8], strides = [1, 1]} : vector<8x32xf32> to vector<8x8xf32>
    %cst_520 = arith.constant dense<0.000000e+00> : vector<8x8xf32>
    %1336 = tpu.matmul %1333, %1334, %cst_520 {dimension_numbers = #tpu.dot_dimension_numbers<[1], [1], [0], [0], [0, 0, 1, 0], [], []>} : vector<8x8xf32>, vector<8x8xf32>, vector<8x8xf32> -> vector<8x8xf32>
    %cst_521 = arith.constant 0.353553385 : f32
    %1337 = vector.broadcast %cst_521 : f32 to vector<8x8xf32>
    %1338 = arith.mulf %1336, %1337 : vector<8x8xf32>
    %1339 = arith.addf %1338, %1307 : vector<8x8xf32>
    %cst_522 = arith.constant dense<0xFF800000> : vector<8xf32>
    %1340 = vector.multi_reduction <maximumf>, %1339, %cst_522 [1] : vector<8x8xf32> to vector<8xf32>
    %1341 = vector.shape_cast %1340 : vector<8xf32> to vector<8x1xf32>
    %1342 = vector.broadcast %1341 : vector<8x1xf32> to vector<8x8xf32>
    %1343 = arith.subf %1339, %1342 : vector<8x8xf32>
    %1344 = math.exp %1343 : vector<8x8xf32>
    %cst_523 = arith.constant dense<0.000000e+00> : vector<8xf32>
    %1345 = vector.multi_reduction <add>, %1344, %cst_523 [1] : vector<8x8xf32> to vector<8xf32>
    %1346 = vector.shape_cast %1345 : vector<8xf32> to vector<8x1xf32>
    %1347 = tpu.reciprocal %1346 {approx = true} : vector<8x1xf32> -> vector<8x1xf32>
    %1348 = vector.broadcast %1347 : vector<8x1xf32> to vector<8x8xf32>
    %1349 = arith.mulf %1344, %1348 : vector<8x8xf32>
    %c1_524 = arith.constant 1 : index
    %c0_525 = arith.constant 0 : index
    %c0_526 = arith.constant 0 : index
    %1350 = vector.load %arg44[%c1_524, %c0_525, %c0_526] : memref<8x8x8xf32, #tpu.memory_space<vmem>>, vector<1x8x8xf32>
    %1351 = vector.shape_cast %1350 : vector<1x8x8xf32> to vector<8x8xf32>
    %1352 = vector.shape_cast %1349 : vector<8x8xf32> to vector<1x8x8xf32>
    tpu.vector_store %arg44[%c1_524, %c0_525, %c0_526], %1352 {strides = array<i32>} : memref<8x8x8xf32, #tpu.memory_space<vmem>>, vector<1x8x8xf32>,
    %cst_527 = arith.constant dense<0.000000e+00> : vector<8x8xf32>
    %1353 = tpu.matmul %1349, %1335, %cst_527 {dimension_numbers = #tpu.dot_dimension_numbers<[1], [0], [0], [1], [0, 0, 1, 1], [], []>} : vector<8x8xf32>, vector<8x8xf32>, vector<8x8xf32> -> vector<8x8xf32>
    %1354 = vector.extract_strided_slice %1293 {offsets = [8, 0], sizes = [8, 32], strides = [1, 1]} : vector<32x32xf32> to vector<8x32xf32>
    %cst_528 = arith.constant dense<0.000000e+00> : vector<8x32xf32>
    %1355 = tpu.matmul %1353, %1354, %cst_528 {dimension_numbers = #tpu.dot_dimension_numbers<[1], [0], [0], [1], [0, 0, 1, 1], [], []>} : vector<8x8xf32>, vector<8x32xf32>, vector<8x32xf32> -> vector<8x32xf32>
    %1356 = arith.addf %1332, %1355 : vector<8x32xf32>
    %1357 = vector.extract_strided_slice %1304 {offsets = [0, 16], sizes = [8, 8], strides = [1, 1]} : vector<8x32xf32> to vector<8x8xf32>
    %1358 = vector.extract_strided_slice %1305 {offsets = [0, 16], sizes = [8, 8], strides = [1, 1]} : vector<8x32xf32> to vector<8x8xf32>
    %1359 = vector.extract_strided_slice %1306 {offsets = [0, 16], sizes = [8, 8], strides = [1, 1]} : vector<8x32xf32> to vector<8x8xf32>
    %cst_529 = arith.constant dense<0.000000e+00> : vector<8x8xf32>
    %1360 = tpu.matmul %1357, %1358, %cst_529 {dimension_numbers = #tpu.dot_dimension_numbers<[1], [1], [0], [0], [0, 0, 1, 0], [], []>} : vector<8x8xf32>, vector<8x8xf32>, vector<8x8xf32> -> vector<8x8xf32>
    %cst_530 = arith.constant 0.353553385 : f32
    %1361 = vector.broadcast %cst_530 : f32 to vector<8x8xf32>
    %1362 = arith.mulf %1360, %1361 : vector<8x8xf32>
    %1363 = arith.addf %1362, %1307 : vector<8x8xf32>
    %cst_531 = arith.constant dense<0xFF800000> : vector<8xf32>
    %1364 = vector.multi_reduction <maximumf>, %1363, %cst_531 [1] : vector<8x8xf32> to vector<8xf32>
    %1365 = vector.shape_cast %1364 : vector<8xf32> to vector<8x1xf32>
    %1366 = vector.broadcast %1365 : vector<8x1xf32> to vector<8x8xf32>
    %1367 = arith.subf %1363, %1366 : vector<8x8xf32>
    %1368 = math.exp %1367 : vector<8x8xf32>
    %cst_532 = arith.constant dense<0.000000e+00> : vector<8xf32>
    %1369 = vector.multi_reduction <add>, %1368, %cst_532 [1] : vector<8x8xf32> to vector<8xf32>
    %1370 = vector.shape_cast %1369 : vector<8xf32> to vector<8x1xf32>
    %1371 = tpu.reciprocal %1370 {approx = true} : vector<8x1xf32> -> vector<8x1xf32>
    %1372 = vector.broadcast %1371 : vector<8x1xf32> to vector<8x8xf32>
    %1373 = arith.mulf %1368, %1372 : vector<8x8xf32>
    %c2 = arith.constant 2 : index
    %c0_533 = arith.constant 0 : index
    %c0_534 = arith.constant 0 : index
    %1374 = vector.load %arg44[%c2, %c0_533, %c0_534] : memref<8x8x8xf32, #tpu.memory_space<vmem>>, vector<1x8x8xf32>
    %1375 = vector.shape_cast %1374 : vector<1x8x8xf32> to vector<8x8xf32>
    %1376 = vector.shape_cast %1373 : vector<8x8xf32> to vector<1x8x8xf32>
    tpu.vector_store %arg44[%c2, %c0_533, %c0_534], %1376 {strides = array<i32>} : memref<8x8x8xf32, #tpu.memory_space<vmem>>, vector<1x8x8xf32>,
    %cst_535 = arith.constant dense<0.000000e+00> : vector<8x8xf32>
    %1377 = tpu.matmul %1373, %1359, %cst_535 {dimension_numbers = #tpu.dot_dimension_numbers<[1], [0], [0], [1], [0, 0, 1, 1], [], []>} : vector<8x8xf32>, vector<8x8xf32>, vector<8x8xf32> -> vector<8x8xf32>
    %1378 = vector.extract_strided_slice %1293 {offsets = [16, 0], sizes = [8, 32], strides = [1, 1]} : vector<32x32xf32> to vector<8x32xf32>
    %cst_536 = arith.constant dense<0.000000e+00> : vector<8x32xf32>
    %1379 = tpu.matmul %1377, %1378, %cst_536 {dimension_numbers = #tpu.dot_dimension_numbers<[1], [0], [0], [1], [0, 0, 1, 1], [], []>} : vector<8x8xf32>, vector<8x32xf32>, vector<8x32xf32> -> vector<8x32xf32>
    %1380 = arith.addf %1356, %1379 : vector<8x32xf32>
    %1381 = vector.extract_strided_slice %1304 {offsets = [0, 24], sizes = [8, 8], strides = [1, 1]} : vector<8x32xf32> to vector<8x8xf32>
    %1382 = vector.extract_strided_slice %1305 {offsets = [0, 24], sizes = [8, 8], strides = [1, 1]} : vector<8x32xf32> to vector<8x8xf32>
    %1383 = vector.extract_strided_slice %1306 {offsets = [0, 24], sizes = [8, 8], strides = [1, 1]} : vector<8x32xf32> to vector<8x8xf32>
    %cst_537 = arith.constant dense<0.000000e+00> : vector<8x8xf32>
    %1384 = tpu.matmul %1381, %1382, %cst_537 {dimension_numbers = #tpu.dot_dimension_numbers<[1], [1], [0], [0], [0, 0, 1, 0], [], []>} : vector<8x8xf32>, vector<8x8xf32>, vector<8x8xf32> -> vector<8x8xf32>
    %cst_538 = arith.constant 0.353553385 : f32
    %1385 = vector.broadcast %cst_538 : f32 to vector<8x8xf32>
    %1386 = arith.mulf %1384, %1385 : vector<8x8xf32>
    %1387 = arith.addf %1386, %1307 : vector<8x8xf32>
    %cst_539 = arith.constant dense<0xFF800000> : vector<8xf32>
    %1388 = vector.multi_reduction <maximumf>, %1387, %cst_539 [1] : vector<8x8xf32> to vector<8xf32>
    %1389 = vector.shape_cast %1388 : vector<8xf32> to vector<8x1xf32>
    %1390 = vector.broadcast %1389 : vector<8x1xf32> to vector<8x8xf32>
    %1391 = arith.subf %1387, %1390 : vector<8x8xf32>
    %1392 = math.exp %1391 : vector<8x8xf32>
    %cst_540 = arith.constant dense<0.000000e+00> : vector<8xf32>
    %1393 = vector.multi_reduction <add>, %1392, %cst_540 [1] : vector<8x8xf32> to vector<8xf32>
    %1394 = vector.shape_cast %1393 : vector<8xf32> to vector<8x1xf32>
    %1395 = tpu.reciprocal %1394 {approx = true} : vector<8x1xf32> -> vector<8x1xf32>
    %1396 = vector.broadcast %1395 : vector<8x1xf32> to vector<8x8xf32>
    %1397 = arith.mulf %1392, %1396 : vector<8x8xf32>
    %c3 = arith.constant 3 : index
    %c0_541 = arith.constant 0 : index
    %c0_542 = arith.constant 0 : index
    %1398 = vector.load %arg44[%c3, %c0_541, %c0_542] : memref<8x8x8xf32, #tpu.memory_space<vmem>>, vector<1x8x8xf32>
    %1399 = vector.shape_cast %1398 : vector<1x8x8xf32> to vector<8x8xf32>
    %1400 = vector.shape_cast %1397 : vector<8x8xf32> to vector<1x8x8xf32>
    tpu.vector_store %arg44[%c3, %c0_541, %c0_542], %1400 {strides = array<i32>} : memref<8x8x8xf32, #tpu.memory_space<vmem>>, vector<1x8x8xf32>,
    %cst_543 = arith.constant dense<0.000000e+00> : vector<8x8xf32>
    %1401 = tpu.matmul %1397, %1383, %cst_543 {dimension_numbers = #tpu.dot_dimension_numbers<[1], [0], [0], [1], [0, 0, 1, 1], [], []>} : vector<8x8xf32>, vector<8x8xf32>, vector<8x8xf32> -> vector<8x8xf32>
    %1402 = vector.extract_strided_slice %1293 {offsets = [24, 0], sizes = [8, 32], strides = [1, 1]} : vector<32x32xf32> to vector<8x32xf32>
    %cst_544 = arith.constant dense<0.000000e+00> : vector<8x32xf32>
    %1403 = tpu.matmul %1401, %1402, %cst_544 {dimension_numbers = #tpu.dot_dimension_numbers<[1], [0], [0], [1], [0, 0, 1, 1], [], []>} : vector<8x8xf32>, vector<8x32xf32>, vector<8x32xf32> -> vector<8x32xf32>
    %1404 = arith.addf %1380, %1403 : vector<8x32xf32>
    %1405 = vector.broadcast %1295 : vector<1x32xf32> to vector<8x32xf32>
    %1406 = arith.addf %1404, %1405 : vector<8x32xf32>
    %1407 = vector.extract_strided_slice %1298 {offsets = [8, 0], sizes = [8, 32], strides = [1, 1]} : vector<16x32xf32> to vector<8x32xf32>
    %1408 = vector.extract_strided_slice %1302 {offsets = [8, 0], sizes = [8, 32], strides = [1, 1]} : vector<16x32xf32> to vector<8x32xf32>
    %1409 = vector.extract_strided_slice %1303 {offsets = [8, 0], sizes = [8, 32], strides = [1, 1]} : vector<16x32xf32> to vector<8x32xf32>
    %1410 = vector.extract_strided_slice %550 {offsets = [8, 0], sizes = [8, 8], strides = [1, 1]} : vector<16x8xf32> to vector<8x8xf32>
    %cst_545 = arith.constant 0.000000e+00 : f32
    %1411 = vector.broadcast %cst_545 : f32 to vector<8x32xf32>
    %1412 = vector.extract_strided_slice %1407 {offsets = [0, 0], sizes = [8, 8], strides = [1, 1]} : vector<8x32xf32> to vector<8x8xf32>
    %1413 = vector.extract_strided_slice %1408 {offsets = [0, 0], sizes = [8, 8], strides = [1, 1]} : vector<8x32xf32> to vector<8x8xf32>
    %1414 = vector.extract_strided_slice %1409 {offsets = [0, 0], sizes = [8, 8], strides = [1, 1]} : vector<8x32xf32> to vector<8x8xf32>
    %cst_546 = arith.constant dense<0.000000e+00> : vector<8x8xf32>
    %1415 = tpu.matmul %1412, %1413, %cst_546 {dimension_numbers = #tpu.dot_dimension_numbers<[1], [1], [0], [0], [0, 0, 1, 0], [], []>} : vector<8x8xf32>, vector<8x8xf32>, vector<8x8xf32> -> vector<8x8xf32>
    %cst_547 = arith.constant 0.353553385 : f32
    %1416 = vector.broadcast %cst_547 : f32 to vector<8x8xf32>
    %1417 = arith.mulf %1415, %1416 : vector<8x8xf32>
    %1418 = arith.addf %1417, %1410 : vector<8x8xf32>
    %cst_548 = arith.constant dense<0xFF800000> : vector<8xf32>
    %1419 = vector.multi_reduction <maximumf>, %1418, %cst_548 [1] : vector<8x8xf32> to vector<8xf32>
    %1420 = vector.shape_cast %1419 : vector<8xf32> to vector<8x1xf32>
    %1421 = vector.broadcast %1420 : vector<8x1xf32> to vector<8x8xf32>
    %1422 = arith.subf %1418, %1421 : vector<8x8xf32>
    %1423 = math.exp %1422 : vector<8x8xf32>
    %cst_549 = arith.constant dense<0.000000e+00> : vector<8xf32>
    %1424 = vector.multi_reduction <add>, %1423, %cst_549 [1] : vector<8x8xf32> to vector<8xf32>
    %1425 = vector.shape_cast %1424 : vector<8xf32> to vector<8x1xf32>
    %1426 = tpu.reciprocal %1425 {approx = true} : vector<8x1xf32> -> vector<8x1xf32>
    %1427 = vector.broadcast %1426 : vector<8x1xf32> to vector<8x8xf32>
    %1428 = arith.mulf %1423, %1427 : vector<8x8xf32>
    %c4 = arith.constant 4 : index
    %c0_550 = arith.constant 0 : index
    %c0_551 = arith.constant 0 : index
    %1429 = vector.load %arg44[%c4, %c0_550, %c0_551] : memref<8x8x8xf32, #tpu.memory_space<vmem>>, vector<1x8x8xf32>
    %1430 = vector.shape_cast %1429 : vector<1x8x8xf32> to vector<8x8xf32>
    %1431 = vector.shape_cast %1428 : vector<8x8xf32> to vector<1x8x8xf32>
    tpu.vector_store %arg44[%c4, %c0_550, %c0_551], %1431 {strides = array<i32>} : memref<8x8x8xf32, #tpu.memory_space<vmem>>, vector<1x8x8xf32>,
    %cst_552 = arith.constant dense<0.000000e+00> : vector<8x8xf32>
    %1432 = tpu.matmul %1428, %1414, %cst_552 {dimension_numbers = #tpu.dot_dimension_numbers<[1], [0], [0], [1], [0, 0, 1, 1], [], []>} : vector<8x8xf32>, vector<8x8xf32>, vector<8x8xf32> -> vector<8x8xf32>
    %1433 = vector.extract_strided_slice %1293 {offsets = [0, 0], sizes = [8, 32], strides = [1, 1]} : vector<32x32xf32> to vector<8x32xf32>
    %cst_553 = arith.constant dense<0.000000e+00> : vector<8x32xf32>
    %1434 = tpu.matmul %1432, %1433, %cst_553 {dimension_numbers = #tpu.dot_dimension_numbers<[1], [0], [0], [1], [0, 0, 1, 1], [], []>} : vector<8x8xf32>, vector<8x32xf32>, vector<8x32xf32> -> vector<8x32xf32>
    %1435 = arith.addf %1411, %1434 : vector<8x32xf32>
    %1436 = vector.extract_strided_slice %1407 {offsets = [0, 8], sizes = [8, 8], strides = [1, 1]} : vector<8x32xf32> to vector<8x8xf32>
    %1437 = vector.extract_strided_slice %1408 {offsets = [0, 8], sizes = [8, 8], strides = [1, 1]} : vector<8x32xf32> to vector<8x8xf32>
    %1438 = vector.extract_strided_slice %1409 {offsets = [0, 8], sizes = [8, 8], strides = [1, 1]} : vector<8x32xf32> to vector<8x8xf32>
    %cst_554 = arith.constant dense<0.000000e+00> : vector<8x8xf32>
    %1439 = tpu.matmul %1436, %1437, %cst_554 {dimension_numbers = #tpu.dot_dimension_numbers<[1], [1], [0], [0], [0, 0, 1, 0], [], []>} : vector<8x8xf32>, vector<8x8xf32>, vector<8x8xf32> -> vector<8x8xf32>
    %cst_555 = arith.constant 0.353553385 : f32
    %1440 = vector.broadcast %cst_555 : f32 to vector<8x8xf32>
    %1441 = arith.mulf %1439, %1440 : vector<8x8xf32>
    %1442 = arith.addf %1441, %1410 : vector<8x8xf32>
    %cst_556 = arith.constant dense<0xFF800000> : vector<8xf32>
    %1443 = vector.multi_reduction <maximumf>, %1442, %cst_556 [1] : vector<8x8xf32> to vector<8xf32>
    %1444 = vector.shape_cast %1443 : vector<8xf32> to vector<8x1xf32>
    %1445 = vector.broadcast %1444 : vector<8x1xf32> to vector<8x8xf32>
    %1446 = arith.subf %1442, %1445 : vector<8x8xf32>
    %1447 = math.exp %1446 : vector<8x8xf32>
    %cst_557 = arith.constant dense<0.000000e+00> : vector<8xf32>
    %1448 = vector.multi_reduction <add>, %1447, %cst_557 [1] : vector<8x8xf32> to vector<8xf32>
    %1449 = vector.shape_cast %1448 : vector<8xf32> to vector<8x1xf32>
    %1450 = tpu.reciprocal %1449 {approx = true} : vector<8x1xf32> -> vector<8x1xf32>
    %1451 = vector.broadcast %1450 : vector<8x1xf32> to vector<8x8xf32>
    %1452 = arith.mulf %1447, %1451 : vector<8x8xf32>
    %c5 = arith.constant 5 : index
    %c0_558 = arith.constant 0 : index
    %c0_559 = arith.constant 0 : index
    %1453 = vector.load %arg44[%c5, %c0_558, %c0_559] : memref<8x8x8xf32, #tpu.memory_space<vmem>>, vector<1x8x8xf32>
    %1454 = vector.shape_cast %1453 : vector<1x8x8xf32> to vector<8x8xf32>
    %1455 = vector.shape_cast %1452 : vector<8x8xf32> to vector<1x8x8xf32>
    tpu.vector_store %arg44[%c5, %c0_558, %c0_559], %1455 {strides = array<i32>} : memref<8x8x8xf32, #tpu.memory_space<vmem>>, vector<1x8x8xf32>,
    %cst_560 = arith.constant dense<0.000000e+00> : vector<8x8xf32>
    %1456 = tpu.matmul %1452, %1438, %cst_560 {dimension_numbers = #tpu.dot_dimension_numbers<[1], [0], [0], [1], [0, 0, 1, 1], [], []>} : vector<8x8xf32>, vector<8x8xf32>, vector<8x8xf32> -> vector<8x8xf32>
    %1457 = vector.extract_strided_slice %1293 {offsets = [8, 0], sizes = [8, 32], strides = [1, 1]} : vector<32x32xf32> to vector<8x32xf32>
    %cst_561 = arith.constant dense<0.000000e+00> : vector<8x32xf32>
    %1458 = tpu.matmul %1456, %1457, %cst_561 {dimension_numbers = #tpu.dot_dimension_numbers<[1], [0], [0], [1], [0, 0, 1, 1], [], []>} : vector<8x8xf32>, vector<8x32xf32>, vector<8x32xf32> -> vector<8x32xf32>
    %1459 = arith.addf %1435, %1458 : vector<8x32xf32>
    %1460 = vector.extract_strided_slice %1407 {offsets = [0, 16], sizes = [8, 8], strides = [1, 1]} : vector<8x32xf32> to vector<8x8xf32>
    %1461 = vector.extract_strided_slice %1408 {offsets = [0, 16], sizes = [8, 8], strides = [1, 1]} : vector<8x32xf32> to vector<8x8xf32>
    %1462 = vector.extract_strided_slice %1409 {offsets = [0, 16], sizes = [8, 8], strides = [1, 1]} : vector<8x32xf32> to vector<8x8xf32>
    %cst_562 = arith.constant dense<0.000000e+00> : vector<8x8xf32>
    %1463 = tpu.matmul %1460, %1461, %cst_562 {dimension_numbers = #tpu.dot_dimension_numbers<[1], [1], [0], [0], [0, 0, 1, 0], [], []>} : vector<8x8xf32>, vector<8x8xf32>, vector<8x8xf32> -> vector<8x8xf32>
    %cst_563 = arith.constant 0.353553385 : f32
    %1464 = vector.broadcast %cst_563 : f32 to vector<8x8xf32>
    %1465 = arith.mulf %1463, %1464 : vector<8x8xf32>
    %1466 = arith.addf %1465, %1410 : vector<8x8xf32>
    %cst_564 = arith.constant dense<0xFF800000> : vector<8xf32>
    %1467 = vector.multi_reduction <maximumf>, %1466, %cst_564 [1] : vector<8x8xf32> to vector<8xf32>
    %1468 = vector.shape_cast %1467 : vector<8xf32> to vector<8x1xf32>
    %1469 = vector.broadcast %1468 : vector<8x1xf32> to vector<8x8xf32>
    %1470 = arith.subf %1466, %1469 : vector<8x8xf32>
    %1471 = math.exp %1470 : vector<8x8xf32>
    %cst_565 = arith.constant dense<0.000000e+00> : vector<8xf32>
    %1472 = vector.multi_reduction <add>, %1471, %cst_565 [1] : vector<8x8xf32> to vector<8xf32>
    %1473 = vector.shape_cast %1472 : vector<8xf32> to vector<8x1xf32>
    %1474 = tpu.reciprocal %1473 {approx = true} : vector<8x1xf32> -> vector<8x1xf32>
    %1475 = vector.broadcast %1474 : vector<8x1xf32> to vector<8x8xf32>
    %1476 = arith.mulf %1471, %1475 : vector<8x8xf32>
    %c6 = arith.constant 6 : index
    %c0_566 = arith.constant 0 : index
    %c0_567 = arith.constant 0 : index
    %1477 = vector.load %arg44[%c6, %c0_566, %c0_567] : memref<8x8x8xf32, #tpu.memory_space<vmem>>, vector<1x8x8xf32>
    %1478 = vector.shape_cast %1477 : vector<1x8x8xf32> to vector<8x8xf32>
    %1479 = vector.shape_cast %1476 : vector<8x8xf32> to vector<1x8x8xf32>
    tpu.vector_store %arg44[%c6, %c0_566, %c0_567], %1479 {strides = array<i32>} : memref<8x8x8xf32, #tpu.memory_space<vmem>>, vector<1x8x8xf32>,
    %cst_568 = arith.constant dense<0.000000e+00> : vector<8x8xf32>
    %1480 = tpu.matmul %1476, %1462, %cst_568 {dimension_numbers = #tpu.dot_dimension_numbers<[1], [0], [0], [1], [0, 0, 1, 1], [], []>} : vector<8x8xf32>, vector<8x8xf32>, vector<8x8xf32> -> vector<8x8xf32>
    %1481 = vector.extract_strided_slice %1293 {offsets = [16, 0], sizes = [8, 32], strides = [1, 1]} : vector<32x32xf32> to vector<8x32xf32>
    %cst_569 = arith.constant dense<0.000000e+00> : vector<8x32xf32>
    %1482 = tpu.matmul %1480, %1481, %cst_569 {dimension_numbers = #tpu.dot_dimension_numbers<[1], [0], [0], [1], [0, 0, 1, 1], [], []>} : vector<8x8xf32>, vector<8x32xf32>, vector<8x32xf32> -> vector<8x32xf32>
    %1483 = arith.addf %1459, %1482 : vector<8x32xf32>
    %1484 = vector.extract_strided_slice %1407 {offsets = [0, 24], sizes = [8, 8], strides = [1, 1]} : vector<8x32xf32> to vector<8x8xf32>
    %1485 = vector.extract_strided_slice %1408 {offsets = [0, 24], sizes = [8, 8], strides = [1, 1]} : vector<8x32xf32> to vector<8x8xf32>
    %1486 = vector.extract_strided_slice %1409 {offsets = [0, 24], sizes = [8, 8], strides = [1, 1]} : vector<8x32xf32> to vector<8x8xf32>
    %cst_570 = arith.constant dense<0.000000e+00> : vector<8x8xf32>
    %1487 = tpu.matmul %1484, %1485, %cst_570 {dimension_numbers = #tpu.dot_dimension_numbers<[1], [1], [0], [0], [0, 0, 1, 0], [], []>} : vector<8x8xf32>, vector<8x8xf32>, vector<8x8xf32> -> vector<8x8xf32>
    %cst_571 = arith.constant 0.353553385 : f32
    %1488 = vector.broadcast %cst_571 : f32 to vector<8x8xf32>
    %1489 = arith.mulf %1487, %1488 : vector<8x8xf32>
    %1490 = arith.addf %1489, %1410 : vector<8x8xf32>
    %cst_572 = arith.constant dense<0xFF800000> : vector<8xf32>
    %1491 = vector.multi_reduction <maximumf>, %1490, %cst_572 [1] : vector<8x8xf32> to vector<8xf32>
    %1492 = vector.shape_cast %1491 : vector<8xf32> to vector<8x1xf32>
    %1493 = vector.broadcast %1492 : vector<8x1xf32> to vector<8x8xf32>
    %1494 = arith.subf %1490, %1493 : vector<8x8xf32>
    %1495 = math.exp %1494 : vector<8x8xf32>
    %cst_573 = arith.constant dense<0.000000e+00> : vector<8xf32>
    %1496 = vector.multi_reduction <add>, %1495, %cst_573 [1] : vector<8x8xf32> to vector<8xf32>
    %1497 = vector.shape_cast %1496 : vector<8xf32> to vector<8x1xf32>
    %1498 = tpu.reciprocal %1497 {approx = true} : vector<8x1xf32> -> vector<8x1xf32>
    %1499 = vector.broadcast %1498 : vector<8x1xf32> to vector<8x8xf32>
    %1500 = arith.mulf %1495, %1499 : vector<8x8xf32>
    %c7 = arith.constant 7 : index
    %c0_574 = arith.constant 0 : index
    %c0_575 = arith.constant 0 : index
    %1501 = vector.load %arg44[%c7, %c0_574, %c0_575] : memref<8x8x8xf32, #tpu.memory_space<vmem>>, vector<1x8x8xf32>
    %1502 = vector.shape_cast %1501 : vector<1x8x8xf32> to vector<8x8xf32>
    %1503 = vector.shape_cast %1500 : vector<8x8xf32> to vector<1x8x8xf32>
    tpu.vector_store %arg44[%c7, %c0_574, %c0_575], %1503 {strides = array<i32>} : memref<8x8x8xf32, #tpu.memory_space<vmem>>, vector<1x8x8xf32>,
    %cst_576 = arith.constant dense<0.000000e+00> : vector<8x8xf32>
    %1504 = tpu.matmul %1500, %1486, %cst_576 {dimension_numbers = #tpu.dot_dimension_numbers<[1], [0], [0], [1], [0, 0, 1, 1], [], []>} : vector<8x8xf32>, vector<8x8xf32>, vector<8x8xf32> -> vector<8x8xf32>
    %1505 = vector.extract_strided_slice %1293 {offsets = [24, 0], sizes = [8, 32], strides = [1, 1]} : vector<32x32xf32> to vector<8x32xf32>
    %cst_577 = arith.constant dense<0.000000e+00> : vector<8x32xf32>
    %1506 = tpu.matmul %1504, %1505, %cst_577 {dimension_numbers = #tpu.dot_dimension_numbers<[1], [0], [0], [1], [0, 0, 1, 1], [], []>} : vector<8x8xf32>, vector<8x32xf32>, vector<8x32xf32> -> vector<8x32xf32>
    %1507 = arith.addf %1483, %1506 : vector<8x32xf32>
    %1508 = vector.broadcast %1295 : vector<1x32xf32> to vector<8x32xf32>
    %1509 = arith.addf %1507, %1508 : vector<8x32xf32>
    %1510 = tpu.concatenate %1406, %1509 in 0 : vector<8x32xf32>, vector<8x32xf32> -> vector<16x32xf32>
    %1511 = arith.addf %1283, %1510 : vector<16x32xf32>
    %c1_578 = arith.constant 1 : index
    %c0_579 = arith.constant 0 : index
    %c0_580 = arith.constant 0 : index
    %1512 = vector.load %arg33[%c1_578, %c0_579, %c0_580] : memref<2x1x32xf32, #tpu.memory_space<vmem>>, vector<1x1x32xf32>
    %1513 = vector.shape_cast %1512 : vector<1x1x32xf32> to vector<1x32xf32>
    %c1_581 = arith.constant 1 : index
    %c0_582 = arith.constant 0 : index
    %c0_583 = arith.constant 0 : index
    %1514 = vector.load %arg34[%c1_581, %c0_582, %c0_583] : memref<2x1x32xf32, #tpu.memory_space<vmem>>, vector<1x1x32xf32>
    %1515 = vector.shape_cast %1514 : vector<1x1x32xf32> to vector<1x32xf32>
    %cst_584 = arith.constant dense<0.000000e+00> : vector<16xf32>
    %1516 = vector.multi_reduction <add>, %1511, %cst_584 [1] : vector<16x32xf32> to vector<16xf32>
    %1517 = vector.shape_cast %1516 : vector<16xf32> to vector<16x1xf32>
    %cst_585 = arith.constant 3.200000e+01 : f32
    %1518 = vector.broadcast %cst_585 : f32 to vector<16x1xf32>
    %1519 = arith.divf %1517, %1518 : vector<16x1xf32>
    %1520 = vector.broadcast %1519 : vector<16x1xf32> to vector<16x32xf32>
    %1521 = arith.subf %1511, %1520 : vector<16x32xf32>
    %1522 = arith.mulf %1521, %1521 : vector<16x32xf32>
    %cst_586 = arith.constant dense<0.000000e+00> : vector<16xf32>
    %1523 = vector.multi_reduction <add>, %1522, %cst_586 [1] : vector<16x32xf32> to vector<16xf32>
    %1524 = vector.shape_cast %1523 : vector<16xf32> to vector<16x1xf32>
    %cst_587 = arith.constant 3.200000e+01 : f32
    %1525 = vector.broadcast %cst_587 : f32 to vector<16x1xf32>
    %1526 = arith.divf %1524, %1525 : vector<16x1xf32>
    %1527 = vector.broadcast %1519 : vector<16x1xf32> to vector<16x32xf32>
    %1528 = arith.subf %1511, %1527 : vector<16x32xf32>
    %cst_588 = arith.constant 9.99999974E-6 : f32
    %1529 = vector.broadcast %cst_588 : f32 to vector<16x1xf32>
    %1530 = arith.addf %1526, %1529 : vector<16x1xf32>
    %1531 = math.rsqrt %1530 : vector<16x1xf32>
    %1532 = vector.broadcast %1531 : vector<16x1xf32> to vector<16x32xf32>
    %1533 = arith.mulf %1528, %1532 : vector<16x32xf32>
    %1534 = vector.broadcast %1513 : vector<1x32xf32> to vector<16x32xf32>
    %1535 = arith.mulf %1533, %1534 : vector<16x32xf32>
    %1536 = vector.broadcast %1515 : vector<1x32xf32> to vector<16x32xf32>
    %1537 = arith.addf %1535, %1536 : vector<16x32xf32>
    %c1_589 = arith.constant 1 : index
    %c0_590 = arith.constant 0 : index
    %c0_591 = arith.constant 0 : index
    %1538 = vector.load %arg37[%c1_589, %c0_590, %c0_591] : memref<2x32x64xf32, #tpu.memory_space<vmem>>, vector<1x32x64xf32>
    %1539 = vector.shape_cast %1538 : vector<1x32x64xf32> to vector<32x64xf32>
    %c1_592 = arith.constant 1 : index
    %c0_593 = arith.constant 0 : index
    %c0_594 = arith.constant 0 : index
    %1540 = vector.load %arg38[%c1_592, %c0_593, %c0_594] : memref<2x1x64xf32, #tpu.memory_space<vmem>>, vector<1x1x64xf32>
    %1541 = vector.shape_cast %1540 : vector<1x1x64xf32> to vector<1x64xf32>
    %c1_595 = arith.constant 1 : index
    %c0_596 = arith.constant 0 : index
    %c0_597 = arith.constant 0 : index
    %1542 = vector.load %arg39[%c1_595, %c0_596, %c0_597] : memref<2x64x32xf32, #tpu.memory_space<vmem>>, vector<1x64x32xf32>
    %1543 = vector.shape_cast %1542 : vector<1x64x32xf32> to vector<64x32xf32>
    %c1_598 = arith.constant 1 : index
    %c0_599 = arith.constant 0 : index
    %c0_600 = arith.constant 0 : index
    %1544 = vector.load %arg40[%c1_598, %c0_599, %c0_600] : memref<2x1x32xf32, #tpu.memory_space<vmem>>, vector<1x1x32xf32>
    %1545 = vector.shape_cast %1544 : vector<1x1x32xf32> to vector<1x32xf32>
    %cst_601 = arith.constant dense<0.000000e+00> : vector<16x64xf32>
    %1546 = tpu.matmul %1537, %1539, %cst_601 {dimension_numbers = #tpu.dot_dimension_numbers<[1], [0], [0], [1], [0, 0, 1, 1], [], []>} : vector<16x32xf32>, vector<32x64xf32>, vector<16x64xf32> -> vector<16x64xf32>
    %1547 = vector.broadcast %1541 : vector<1x64xf32> to vector<16x64xf32>
    %1548 = arith.addf %1546, %1547 : vector<16x64xf32>
    %cst_602 = arith.constant 0.000000e+00 : f32
    %1549 = vector.broadcast %cst_602 : f32 to vector<16x64xf32>
    %1550 = arith.maximumf %1548, %1549 : vector<16x64xf32>
    %cst_603 = arith.constant dense<0.000000e+00> : vector<16x32xf32>
    %1551 = tpu.matmul %1550, %1543, %cst_603 {dimension_numbers = #tpu.dot_dimension_numbers<[1], [0], [0], [1], [0, 0, 1, 1], [], []>} : vector<16x64xf32>, vector<64x32xf32>, vector<16x32xf32> -> vector<16x32xf32>
    %1552 = vector.broadcast %1545 : vector<1x32xf32> to vector<16x32xf32>
    %1553 = arith.addf %1551, %1552 : vector<16x32xf32>
    %1554 = arith.addf %1537, %1553 : vector<16x32xf32>
    %c1_604 = arith.constant 1 : index
    %c0_605 = arith.constant 0 : index
    %c0_606 = arith.constant 0 : index
    %1555 = vector.load %arg35[%c1_604, %c0_605, %c0_606] : memref<2x1x32xf32, #tpu.memory_space<vmem>>, vector<1x1x32xf32>
    %1556 = vector.shape_cast %1555 : vector<1x1x32xf32> to vector<1x32xf32>
    %c1_607 = arith.constant 1 : index
    %c0_608 = arith.constant 0 : index
    %c0_609 = arith.constant 0 : index
    %1557 = vector.load %arg36[%c1_607, %c0_608, %c0_609] : memref<2x1x32xf32, #tpu.memory_space<vmem>>, vector<1x1x32xf32>
    %1558 = vector.shape_cast %1557 : vector<1x1x32xf32> to vector<1x32xf32>
    %cst_610 = arith.constant dense<0.000000e+00> : vector<16xf32>
    %1559 = vector.multi_reduction <add>, %1554, %cst_610 [1] : vector<16x32xf32> to vector<16xf32>
    %1560 = vector.shape_cast %1559 : vector<16xf32> to vector<16x1xf32>
    %cst_611 = arith.constant 3.200000e+01 : f32
    %1561 = vector.broadcast %cst_611 : f32 to vector<16x1xf32>
    %1562 = arith.divf %1560, %1561 : vector<16x1xf32>
    %1563 = vector.broadcast %1562 : vector<16x1xf32> to vector<16x32xf32>
    %1564 = arith.subf %1554, %1563 : vector<16x32xf32>
    %1565 = arith.mulf %1564, %1564 : vector<16x32xf32>
    %cst_612 = arith.constant dense<0.000000e+00> : vector<16xf32>
    %1566 = vector.multi_reduction <add>, %1565, %cst_612 [1] : vector<16x32xf32> to vector<16xf32>
    %1567 = vector.shape_cast %1566 : vector<16xf32> to vector<16x1xf32>
    %cst_613 = arith.constant 3.200000e+01 : f32
    %1568 = vector.broadcast %cst_613 : f32 to vector<16x1xf32>
    %1569 = arith.divf %1567, %1568 : vector<16x1xf32>
    %1570 = vector.broadcast %1562 : vector<16x1xf32> to vector<16x32xf32>
    %1571 = arith.subf %1554, %1570 : vector<16x32xf32>
    %cst_614 = arith.constant 9.99999974E-6 : f32
    %1572 = vector.broadcast %cst_614 : f32 to vector<16x1xf32>
    %1573 = arith.addf %1569, %1572 : vector<16x1xf32>
    %1574 = math.rsqrt %1573 : vector<16x1xf32>
    %1575 = vector.broadcast %1574 : vector<16x1xf32> to vector<16x32xf32>
    %1576 = arith.mulf %1571, %1575 : vector<16x32xf32>
    %1577 = vector.broadcast %1556 : vector<1x32xf32> to vector<16x32xf32>
    %1578 = arith.mulf %1576, %1577 : vector<16x32xf32>
    %1579 = vector.broadcast %1558 : vector<1x32xf32> to vector<16x32xf32>
    %1580 = arith.addf %1578, %1579 : vector<16x32xf32>
    %c0_615 = arith.constant 0 : index
    %c0_616 = arith.constant 0 : index
    %1581 = vector.load %arg41[%c0_615, %c0_616] : memref<32x32xf32, #tpu.memory_space<vmem>>, vector<32x32xf32>
    %cst_617 = arith.constant dense<0.000000e+00> : vector<16x32xf32>
    %1582 = tpu.matmul %1580, %1581, %cst_617 {dimension_numbers = #tpu.dot_dimension_numbers<[1], [0], [0], [1], [0, 0, 1, 1], [], []>} : vector<16x32xf32>, vector<32x32xf32>, vector<16x32xf32> -> vector<16x32xf32>
    %c0_618 = arith.constant 0 : index
    %c0_619 = arith.constant 0 : index
    %1583 = vector.load %arg42[%c0_618, %c0_619] : memref<1x32xf32, #tpu.memory_space<vmem>>, vector<1x32xf32>
    %1584 = vector.broadcast %1583 : vector<1x32xf32> to vector<16x32xf32>
    %1585 = arith.addf %1582, %1584 : vector<16x32xf32>
    %c0_620 = arith.constant 0 : index
    %c0_621 = arith.constant 0 : index
    %1586 = vector.load %arg43[%c0_620, %c0_621] : memref<16x32xf32, #tpu.memory_space<vmem>>, vector<16x32xf32>
    tpu.vector_store %arg43[%c0_620, %c0_621], %1585 {strides = array<i32>} : memref<16x32xf32, #tpu.memory_space<vmem>>, vector<16x32xf32>,
    return
  }
}

</mosaic_0001>

<bundles_post_ra>
// kernel: seq2seq_forward.1
= control target key start
LH: loop header
LB: loop body
LE: loop exit
PB: predicated region body
PF: predicated region fallthrough
CT: control target
= control target key end

     0   :  { %s16851_s6 = smov 1   ;;  %s16852_s10 = smov 2   ;;  %s18774_s0 = inlined_call_operand.smem [shape: u32[45], index: -1, kind: input, shape index: {}] }
   0x1   :  { %s16930_s5 = sld [smem:[%s18774_s0]]   ;;  %s16853_s14 = smov 3  }
   0x2   :  { %s16935_s9 = sld [smem:[%s18774_s0 + %s16851_s6]]   ;;  %s16854_s18 = smov 4  }
   0x3   :  { %s16940_s13 = sld [smem:[%s18774_s0 + %s16852_s10]]   ;;  %s16855_s22 = smov 5  }
   0x4   :  { %s16945_s17 = sld [smem:[%s18774_s0 + %s16853_s14]]   ;;  %s16856_s26 = smov 6  }
   0x5   :  { %s16950_s21 = sld [smem:[%s18774_s0 + %s16854_s18]]   ;;  %s16857_s30 = smov 7  }
   0x6   :  { %s16955_s25 = sld [smem:[%s18774_s0 + %s16855_s22]]   ;;  %s16858_s4 = smov 8  }
   0x7   :  { %s16960_s29 = sld [smem:[%s18774_s0 + %s16856_s26]]   ;;  %s16859_s10 = smov 9  }
   0x8   :  { %18802 = sst [smem:[#allocation34_spill]] %s16935_s9  ;;  %s16860_s15 = smov 10  }
   0x9   :  { %18803 = sst [smem:[#allocation35_spill]] %s16940_s13  ;;  %s16861_s20 = smov 11  }
   0xa   :  { %18804 = sst [smem:[#allocation36_spill]] %s16945_s17  ;;  %s16862_s26 = smov 12  }
   0xb   :  { %18805 = sst [smem:[#allocation37_spill]] %s16950_s21  ;;  %s16863_s1 = smov 13  }
   0xc   :  { %s16965_s3 = sld [smem:[%s18774_s0 + %s16857_s30]]   ;;  %s16864_s7 = smov 14  }
   0xd   :  { %18806 = sst [smem:[#allocation38_spill]] %s16960_s29  ;;  %s16866_s22 = smov 16  }
   0xe   :  { %s16970_s8 = sld [smem:[%s18774_s0 + %s16858_s4]]   ;;  %s16867_s28 = smov 17  }
   0xf   :  { %s16975_s14 = sld [smem:[%s18774_s0 + %s16859_s10]]  }
  0x10   :  { %s16980_s19 = sld [smem:[%s18774_s0 + %s16860_s15]]   ;;  %s16865_s15 = smov 15  }
  0x11   :  { %s16985_s24 = sld [smem:[%s18774_s0 + %s16861_s20]]  }
  0x12   :  { %s16990_s30 = sld [smem:[%s18774_s0 + %s16862_s26]]  }
  0x13   :  { %s16995_s6 = sld [smem:[%s18774_s0 + %s16863_s1]]  }
  0x14   :  { %18807 = sst [smem:[#allocation39_spill]] %s16970_s8 }
  0x15   :  { %18808 = sst [smem:[#allocation40_spill]] %s16975_s14 }
  0x16   :  { %18809 = sst [smem:[#allocation41_spill]] %s16980_s19 }
  0x17   :  { %18810 = sst [smem:[#allocation42_spill]] %s16985_s24 }
  0x18   :  { %18811 = sst [smem:[#allocation43_spill]] %s16990_s30 }
  0x19   :  { %18812 = sst [smem:[#allocation44_spill]] %s16995_s6 }
  0x1a   :  { %s17000_s12 = sld [smem:[%s18774_s0 + %s16864_s7]]   ;;  %s16868_s7 = smov 18  }
  0x1b   :  { %s17005_s20 = sld [smem:[%s18774_s0 + %s16865_s15]]   ;;  %s16869_s15 = smov 19  }
  0x1c   :  { %s17010_s27 = sld [smem:[%s18774_s0 + %s16866_s22]]   ;;  %s16870_s22 = smov 20  }
  0x1d   :  { %s17015_s4 = sld [smem:[%s18774_s0 + %s16867_s28]]   ;;  %s16871_s28 = smov 21  }
  0x1e   :  { %s17020_s21 = sld [smem:[%s18774_s0 + %s16868_s7]]   ;;  %s16872_s7 = smov 22  }
  0x1f   :  { %s17025_s17 = sld [smem:[%s18774_s0 + %s16869_s15]]   ;;  %s16873_s15 = smov 23  }
  0x20   :  { %18813 = sst [smem:[#allocation45_spill]] %s17000_s12 }
  0x21   :  { %18814 = sst [smem:[#allocation46_spill]] %s17005_s20 }
  0x22   :  { %18815 = sst [smem:[#allocation47_spill]] %s17010_s27 }
  0x23   :  { %18816 = sst [smem:[#allocation48_spill]] %s17015_s4 }
  0x24   :  { %18817 = sst [smem:[#allocation49_spill]] %s17020_s21 }
  0x25   :  { %18818 = sst [smem:[#allocation50_spill]] %s17025_s17 }
  0x26   :  { %s17030_s9 = sld [smem:[%s18774_s0 + %s16870_s22]]   ;;  %s16874_s22 = smov 24  }
  0x27   :  { %s17035_s4 = sld [smem:[%s18774_s0 + %s16871_s28]]   ;;  %s16875_s28 = smov 25  }
  0x28   :  { %s17040_s21 = sld [smem:[%s18774_s0 + %s16872_s7]]   ;;  %s16876_s7 = smov 26  }
  0x29   :  { %s17045_s17 = sld [smem:[%s18774_s0 + %s16873_s15]]   ;;  %s16877_s15 = smov 27  }
  0x2c   :  { %18819 = sst [smem:[#allocation51_spill]] %s17030_s9 }
  0x2d   :  { %18820 = sst [smem:[#allocation52_spill]] %s17035_s4 }
  0x2e   :  { %18821 = sst [smem:[#allocation53_spill]] %s17040_s21 }
  0x2f   :  { %18822 = sst [smem:[#allocation54_spill]] %s17045_s17 }
  0x30   :  { %s17050_s9 = sld [smem:[%s18774_s0 + %s16874_s22]]   ;;  %s16878_s22 = smov 28  }
  0x31   :  { %s17055_s4 = sld [smem:[%s18774_s0 + %s16875_s28]]   ;;  %s16879_s28 = smov 29  }
  0x32   :  { %s17060_s21 = sld [smem:[%s18774_s0 + %s16876_s7]]   ;;  %s16880_s7 = smov 30  }
  0x33   :  { %s17065_s17 = sld [smem:[%s18774_s0 + %s16877_s15]]   ;;  %s16881_s15 = smov 31  }
  0x34   :  { %s17080_s27 = sld [smem:[%s18774_s0 + %s16880_s7]]   ;;  %s16884_s7 = smov 34  }
  0x35   :  { %s17100_s20 = sld [smem:[%s18774_s0 + %s16884_s7]]   ;;  %s16888_s7 = smov 38  }
  0x36   :  { %18823 = sst [smem:[#allocation55_spill]] %s17050_s9 }
  0x37   :  { %18824 = sst [smem:[#allocation56_spill]] %s17055_s4 }
  0x38   :  { %s17070_s9 = sld [smem:[%s18774_s0 + %s16878_s22]]   ;;  %s16882_s22 = smov 32  }
  0x39   :  { %18825 = sst [smem:[#allocation57_spill]] %s17065_s17 }
  0x3a   :  { %s17075_s4 = sld [smem:[%s18774_s0 + %s16879_s28]]   ;;  %s16883_s28 = smov 33  }
  0x3b   :  { %s17085_s17 = sld [smem:[%s18774_s0 + %s16881_s15]]   ;;  %s16885_s15 = smov 35  }
  0x3c   :  { %s17090_s12 = sld [smem:[%s18774_s0 + %s16882_s22]]   ;;  %s16886_s22 = smov 36  }
  0x3d   :  { %s17105_s6 = sld [smem:[%s18774_s0 + %s16885_s15]]   ;;  %s16889_s15 = smov 39  }
  0x3e   :  { %s17110_s30 = sld [smem:[%s18774_s0 + %s16886_s22]]   ;;  %s16890_s22 = smov 40  }
  0x3f   :  { %s17120_s19 = sld [smem:[%s18774_s0 + %s16888_s7]]   ;;  %s16892_s7 = smov 42  }
  0x40   :  { %18826 = sst [smem:[#allocation58_spill]] %s17075_s4 }
  0x41   :  { %s17095_s4 = sld [smem:[%s18774_s0 + %s16883_s28]]   ;;  %s16887_s28 = smov 37  }
  0x42   :  { %s17115_s24 = sld [smem:[%s18774_s0 + %s16887_s28]]   ;;  %s16891_s28 = smov 41  }
  0x43   :  { %s17125_s14 = sld [smem:[%s18774_s0 + %s16889_s15]]   ;;  %s16893_s15 = smov 43  }
  0x44   :  { %s17130_s13 = sld [smem:[%s18774_s0 + %s16890_s22]]   ;;  %s16894_s22 = smov 44  }
  0x45   :  { %s17140_s29 = sld [smem:[%s18774_s0 + %s16892_s7]]  }
  0x46   :  { %s17150_s8 = sld [smem:[%s18774_s0 + %s16894_s22]]  }
  0x48   :  { %18827 = sst [smem:[#allocation59_spill]] %s17115_s24 }
  0x49   :  { %18828 = sst [smem:[#allocation60_spill]] %s17125_s14 }
  0x4a   :  { %s17135_s24 = sld [smem:[%s18774_s0 + %s16891_s28]]  }
  0x4b   :  { %s17145_s14 = sld [smem:[%s18774_s0 + %s16893_s15]]  }
  0x4c   :  { %95 = vsyncpa [#allocation3], 0 }
  0x4d   :  { %96 = vsyncpa [#allocation6], 0 }
  0x4e   :  { %97 = vsyncpa [#allocation9], 0 }
  0x4f   :  { %98 = vsyncpa [#allocation12], 0 }
  0x50   :  { %99 = vsyncpa [#allocation15], 0 }
  0x51   :  { %100 = vsyncpa [#allocation18], 0 }
  0x52   :  { %101 = vsyncpa [#allocation21], 0 }
  0x53   :  { %102 = vsyncpa [#allocation4], 0 }
  0x54   :  { %103 = vsyncpa [#allocation24], 0  ;;  %s16895_s28 = smov [#allocation5]   ;;  %s16896_s2 = smov [#allocation8]  }
  0x55   :  { %s175_s1 = sshll.u32 %s16895_s28, 4  ;;  %s201_s7 = sshll.u32 %s16896_s2, 4  ;;  %s176_s1 = int_to_ptr.vmem [resolvable:$true] %s175_s1  ;;  %s202_s7 = int_to_ptr.vmem [resolvable:$true] %s201_s7 }
  0x56   :  { %s16561_s10 = scalar_lea.vmem %s176_s1, 32  ;;  %p16566_p1 = scmp.lt.s32.totalorder %s176_s1, %s176_s1 }
  0x57   :  { %p16562_p0 = scmp.ne.s32.totalorder %s176_s1, %s16561_s10  ;;  %p16567_p2 = scmp.lt.s32.totalorder %s16561_s10, %s16561_s10 }
  0x59   :  { %p16568_p3 = por %p16567_p2, %p16566_p1 }
  0x5b   :  { %p16569_p4 = pnand %p16568_p3, %p16562_p0 }
  0x5d   :  { %16572 = shalt.err (!%p16569_p4)
}
  0x5e   :  { %s16897_s0 = smov 16   ;;  %s16898_s11 = smov 1  }
  0x5f   :  { %181 = dma.hbm_to_vmem [thread:$0]  %s17070_s9, 32, %s176_s1, [#allocation6], %s16897_s0, %s16897_s0, %s16898_s11  }
  0x60   :  { %s16581_s15 = scalar_lea.vmem %s202_s7, 32  ;;  %p16586_p6 = scmp.lt.s32.totalorder %s202_s7, %s202_s7 }
  0x61   :  { %p16582_p5 = scmp.ne.s32.totalorder %s202_s7, %s16581_s15  ;;  %p16587_p7 = scmp.lt.s32.totalorder %s16581_s15, %s16581_s15 }
  0x63   :  { %p16588_p8 = por %p16587_p7, %p16586_p6 }
  0x65   :  { %p16589_p9 = pnand %p16588_p8, %p16582_p5 }
  0x67   :  { %16592 = shalt.err (!%p16589_p9)
}
  0x68   :  { %207 = dma.hbm_to_vmem [thread:$0]  %s17085_s17, 32, %s202_s7, [#allocation9], %s16897_s0, %s16897_s0, %s16898_s11  }
  0x69   :  { %s16899_s16 = smov [#allocation11]   ;;  %s16900_s22 = smov [#allocation14]  }
  0x6a   :  { %s225_s18 = sshll.u32 %s16899_s16, 4  ;;  %s249_s23 = sshll.u32 %s16900_s22, 4  ;;  %s226_s18 = int_to_ptr.vmem [resolvable:$true] %s225_s18  ;;  %s250_s23 = int_to_ptr.vmem [resolvable:$true] %s249_s23 }
  0x6b   :  { %s16601_s26 = scalar_lea.vmem %s226_s18, 32  ;;  %p16606_p11 = scmp.lt.s32.totalorder %s226_s18, %s226_s18 }
  0x6c   :  { %p16602_p10 = scmp.ne.s32.totalorder %s226_s18, %s16601_s26  ;;  %p16607_p12 = scmp.lt.s32.totalorder %s16601_s26, %s16601_s26 }
  0x6e   :  { %p16608_p13 = por %p16607_p12, %p16606_p11 }
  0x70   :  { %p16609_p0 = pnand %p16608_p13, %p16602_p10 }
  0x72   :  { %16612 = shalt.err (!%p16609_p0)
}
  0x73   :  { %231 = dma.hbm_to_vmem [thread:$0]  %s17095_s4, 32, %s226_s18, [#allocation12], %s16897_s0, %s16897_s0, %s16898_s11  }
  0x74   :  { %s16621_s9 = scalar_lea.vmem %s250_s23, 32  ;;  %p16626_p2 = scmp.lt.s32.totalorder %s250_s23, %s250_s23 }
  0x75   :  { %p16622_p1 = scmp.ne.s32.totalorder %s250_s23, %s16621_s9  ;;  %p16627_p3 = scmp.lt.s32.totalorder %s16621_s9, %s16621_s9 }
  0x77   :  { %p16628_p4 = por %p16627_p3, %p16626_p2 }
  0x79   :  { %p16629_p5 = pnand %p16628_p4, %p16622_p1 }
  0x7b   :  { %16632 = shalt.err (!%p16629_p5)
}
  0x7c   :  { %255 = dma.hbm_to_vmem [thread:$0]  %s17105_s6, 32, %s250_s23, [#allocation15], %s16897_s0, %s16897_s0, %s16898_s11  }
  0x7d   :  { %s16901_s17 = smov [#allocation17]   ;;  %s16902_s1 = smov [#allocation2]  }
  0x7e   :  { %s275_s28 = sshll.u32 %s16901_s17, 4  ;;  %s161_s2 = sshll.u32 %s16902_s1, 4  ;;  %s276_s28 = int_to_ptr.vmem [resolvable:$true] %s275_s28  ;;  %s162_s2 = int_to_ptr.vmem [resolvable:$true] %s161_s2 }
  0x7f   :  { %s16641_s7 = scalar_lea.vmem %s276_s28, 32  ;;  %p16646_p7 = scmp.lt.s32.totalorder %s276_s28, %s276_s28 }
  0x80   :  { %p16642_p6 = scmp.ne.s32.totalorder %s276_s28, %s16641_s7  ;;  %p16647_p8 = scmp.lt.s32.totalorder %s16641_s7, %s16641_s7 }
  0x82   :  { %p16648_p9 = por %p16647_p8, %p16646_p7 }
  0x84   :  { %p16649_p10 = pnand %p16648_p9, %p16642_p6 }
  0x86   :  { %16652 = shalt.err (!%p16649_p10)
}
  0x87   :  { %281 = dma.hbm_to_vmem [thread:$0]  %s17120_s19, 32, %s276_s28, [#allocation18], %s16897_s0, %s16897_s0, %s16898_s11  }
  0x88   :  { %s16661_s4 = scalar_lea.vmem %s162_s2, 32  ;;  %p16666_p12 = scmp.lt.s32.totalorder %s162_s2, %s162_s2 }
  0x89   :  { %p16662_p11 = scmp.ne.s32.totalorder %s162_s2, %s16661_s4  ;;  %p16667_p13 = scmp.lt.s32.totalorder %s16661_s4, %s16661_s4 }
  0x8b   :  { %p16668_p0 = por %p16667_p13, %p16666_p12 }
  0x8d   :  { %p16669_p1 = pnand %p16668_p0, %p16662_p11 }
  0x8f   :  { %16672 = shalt.err (!%p16669_p1)
}
  0x90   :  { %167 = dma.hbm_to_vmem [thread:$0]  %s17060_s21, 32, %s162_s2, [#allocation3], %s16897_s0, %s16897_s0, %s16898_s11  }
  0x91   :  { %s16903_s6 = smov [#allocation7]   ;;  %s16904_s15 = smov [#allocation10]  }
  0x92   :  { %s189_s10 = sshll.u32 %s16903_s6, 4  ;;  %s213_s16 = sshll.u32 %s16904_s15, 4  ;;  %s190_s10 = int_to_ptr.vmem [resolvable:$true] %s189_s10  ;;  %s214_s16 = int_to_ptr.vmem [resolvable:$true] %s213_s16 }
  0x93   :  { %s16681_s18 = scalar_lea.vmem %s190_s10, 32  ;;  %p16686_p3 = scmp.lt.s32.totalorder %s190_s10, %s190_s10 }
  0x94   :  { %p16682_p2 = scmp.ne.s32.totalorder %s190_s10, %s16681_s18  ;;  %p16687_p4 = scmp.lt.s32.totalorder %s16681_s18, %s16681_s18 }
  0x96   :  { %p16688_p5 = por %p16687_p4, %p16686_p3 }
  0x98   :  { %p16689_p6 = pnand %p16688_p5, %p16682_p2 }
  0x9a   :  { %16692 = shalt.err (!%p16689_p6)
}
  0x9b   :  { %195 = dma.hbm_to_vmem [thread:$0]  %s17080_s27, 32, %s190_s10, [#allocation6], %s16897_s0, %s16897_s0, %s16898_s11  }
  0x9c   :  { %s16701_s19 = scalar_lea.vmem %s214_s16, 32  ;;  %p16706_p8 = scmp.lt.s32.totalorder %s214_s16, %s214_s16 }
  0x9d   :  { %p16702_p7 = scmp.ne.s32.totalorder %s214_s16, %s16701_s19  ;;  %p16707_p9 = scmp.lt.s32.totalorder %s16701_s19, %s16701_s19 }
  0x9f   :  { %p16708_p10 = por %p16707_p9, %p16706_p8 }
  0xa1   :  { %p16709_p11 = pnand %p16708_p10, %p16702_p7 }
  0xa3   :  { %16712 = shalt.err (!%p16709_p11)
}
  0xa4   :  { %219 = dma.hbm_to_vmem [thread:$0]  %s17090_s12, 32, %s214_s16, [#allocation9], %s16897_s0, %s16897_s0, %s16898_s11  }
  0xa5   :  { %s16905_s21 = smov [#allocation13]   ;;  %s16906_s23 = smov [#allocation16]  }
  0xa6   :  { %s237_s22 = sshll.u32 %s16905_s21, 4  ;;  %s261_s26 = sshll.u32 %s16906_s23, 4  ;;  %s238_s22 = int_to_ptr.vmem [resolvable:$true] %s237_s22  ;;  %s262_s26 = int_to_ptr.vmem [resolvable:$true] %s261_s26 }
  0xa7   :  { %s16721_s9 = scalar_lea.vmem %s238_s22, 32  ;;  %p16726_p13 = scmp.lt.s32.totalorder %s238_s22, %s238_s22 }
  0xa8   :  { %p16722_p12 = scmp.ne.s32.totalorder %s238_s22, %s16721_s9  ;;  %p16727_p0 = scmp.lt.s32.totalorder %s16721_s9, %s16721_s9 }
  0xaa   :  { %p16728_p1 = por %p16727_p0, %p16726_p13 }
  0xac   :  { %p16729_p2 = pnand %p16728_p1, %p16722_p12 }
  0xae   :  { %16732 = shalt.err (!%p16729_p2)
}
  0xaf   :  { %243 = dma.hbm_to_vmem [thread:$0]  %s17100_s20, 32, %s238_s22, [#allocation12], %s16897_s0, %s16897_s0, %s16898_s11  }
  0xb0   :  { %s16741_s27 = scalar_lea.vmem %s262_s26, 32  ;;  %p16746_p4 = scmp.lt.s32.totalorder %s262_s26, %s262_s26 }
  0xb1   :  { %p16742_p3 = scmp.ne.s32.totalorder %s262_s26, %s16741_s27  ;;  %p16747_p5 = scmp.lt.s32.totalorder %s16741_s27, %s16741_s27 }
  0xb3   :  { %p16748_p6 = por %p16747_p5, %p16746_p4 }
  0xb5   :  { %p16749_p7 = pnand %p16748_p6, %p16742_p3 }
  0xb7   :  { %16752 = shalt.err (!%p16749_p7)
}
  0xb8   :  { %267 = dma.hbm_to_vmem [thread:$0]  %s17110_s30, 32, %s262_s26, [#allocation15], %s16897_s0, %s16897_s0, %s16898_s11  }
  0xb9   :  { %s16907_s12 = smov [#allocation19]   ;;  %s16908_s28 = smov [#allocation20]  }
  0xba   :  { %s289_s17 = sshll.u32 %s16907_s12, 4  ;;  %s304_s1 = sshll.u32 %s16908_s28, 4  ;;  %s290_s17 = int_to_ptr.vmem [resolvable:$true] %s289_s17  ;;  %s305_s1 = int_to_ptr.vmem [resolvable:$true] %s304_s1 }
  0xbb   :  { %s16761_s2 = scalar_lea.vmem %s290_s17, 32  ;;  %p16766_p9 = scmp.lt.s32.totalorder %s290_s17, %s290_s17 }
  0xbc   :  { %p16762_p8 = scmp.ne.s32.totalorder %s290_s17, %s16761_s2  ;;  %p16767_p10 = scmp.lt.s32.totalorder %s16761_s2, %s16761_s2 }
  0xbe   :  { %p16768_p11 = por %p16767_p10, %p16766_p9 }
  0xc0   :  { %p16769_p12 = pnand %p16768_p11, %p16762_p8 }
  0xc2   :  { %16772 = shalt.err (!%p16769_p12)
}
  0xc3   :  { %295 = dma.hbm_to_vmem [thread:$0]  %s17130_s13, 32, %s290_s17, [#allocation18], %s16897_s0, %s16897_s0, %s16898_s11  }
  0xc4   :  { %s16781_s20 = scalar_lea.vmem %s305_s1, 16  ;;  %s16785_s30 = scalar_lea.vmem %s305_s1, 32 }
  0xc5   :  { %p16782_p13 = scmp.ne.s32.totalorder %s305_s1, %s16781_s20  ;;  %p16786_p0 = scmp.lt.s32.totalorder %s305_s1, %s305_s1 }
  0xc6   :  { %p16787_p1 = scmp.lt.s32.totalorder %s16785_s30, %s16781_s20 }
  0xc8   :  { %p16788_p2 = por %p16787_p1, %p16786_p0 }
  0xca   :  { %p16789_p3 = pnand %p16788_p2, %p16782_p13 }
  0xcc   :  { %16792 = shalt.err (!%p16789_p3)
}
  0xcd   :  { %307 = dma.hbm_to_vmem [thread:$0]  %s17140_s29, 16, %s305_s1, [#allocation21]  }
  0xce   :  { %16833 = dma.done.wait [#allocation3], 32  }
  0xcf   :  { %16834 = vsyncadd [#allocation3], 4294967264 }
  0xd0   :  { %16835 = dma.done.wait [#allocation6], 64  }
  0xd1   :  { %16836 = vsyncadd [#allocation6], 4294967232 }
  0xd2   :  { %16837 = dma.done.wait [#allocation9], 64  }
  0xd3   :  { %16838 = vsyncadd [#allocation9], 4294967232 }
  0xd4   :  { %16839 = dma.done.wait [#allocation12], 64  }
  0xd5   :  { %16840 = vsyncadd [#allocation12], 4294967232 }
  0xd6   :  { %16841 = dma.done.wait [#allocation15], 64  }
  0xd7   :  { %16842 = vsyncadd [#allocation15], 4294967232 }
  0xd8   :  { %16843 = dma.done.wait [#allocation18], 64  }
  0xd9   :  { %16844 = vsyncadd [#allocation18], 4294967232 }
  0xda   :  { %16845 = dma.done.wait [#allocation21], 16  }
  0xdb   :  { %16846 = vsyncadd [#allocation21], 4294967280  ;;  %v356_v0 = vld [vmem:[%s16965_s3 + $0x18] sm:$0xff]  ;;  %v355_v2 = vld [vmem:[%s16965_s3 + $0x10] sm:$0xff]  ;;  %vm369_vm0 = vcmask 261120   ;;  %s18829_s13 = sld [smem:[#allocation39_spill]] }
  0xdc   :  { %v351_v1 = vld [vmem:[%s16955_s25 + $0x18] sm:$0xff]  ;;  %15272 = vmatprep.subr.mxu1 %v356_v0  ;;  %v350_v3 = vld [vmem:[%s16955_s25 + $0x10] sm:$0xff]  ;;  %v354_v4 = vld [vmem:[%s16965_s3 + $0x8] sm:$0xff]  ;;  %s18830_s29 = sld [smem:[#allocation38_spill]]  ;;  %v16909_v10 = vmov 0.0   ;;  %vm16910_vm1 = vmmov 0  }
  0xdd   :  { %15261 = vmatprep.subr.mxu0 %v351_v1  ;;  %15273 = vmatpush3.msra.mxu1 %v356_v0  ;;  %v349_v5 = vld [vmem:[%s16955_s25 + $0x8] sm:$0xff]  ;;  %v353_v6 = vld [vmem:[%s16965_s3] sm:$0xff]  ;;  %vm532_vm2 = vcmask 64512   ;;  %s16911_s0 = smov 120   ;;  %s16912_s11 = smov 96   ;;  %vm2617_vm3 = vcmask 523264  }
  0xde   :  { %15262 = vmatpush3.msra.mxu0 %v351_v1  ;;  %15274 = vmatprep.subr.mxu1 %v355_v2  ;;  %v17205_v7 = vld [vmem:[%s16930_s5] sm:$0xff]  ;;  %v17209_v9 = vld [vmem:[%s16930_s5 + $0x8] sm:$0xff]  ;;  %s18831_s5 = sld [smem:[#allocation35_spill]]  ;;  %s16913_s4 = smov 88  }
  0xdf   :  { %15263 = vmatprep.subr.mxu0 %v350_v3  ;;  %15275 = vmatpush3.msra.mxu1 %v355_v2  ;;  %v348_v8 = vld [vmem:[%s16955_s25] sm:$0xff]  ;;  %s18832_s7 = sld [smem:[#allocation40_spill]]  ;;  %s16914_s6 = smov 112  }
  0xe0   :  { %15264 = vmatpush3.msra.mxu0 %v350_v3  ;;  %15276 = vmatprep.subr.mxu1 %v354_v4  ;;  %s16915_s10 = smov 80   ;;  %s16916_s15 = smov 104  }
  0xe1   :  { %15265 = vmatprep.subr.mxu0 %v349_v5  ;;  %15277 = vmatpush3.msra.mxu1 %v354_v4  ;;  %v14481_v11 = vld [vmem:[%s18829_s13] ss:$0 sm:$0xff]  ;;  %s16917_s16 = smov 72   ;;  %s18833_s18 = sld [smem:[#allocation41_spill]] }
  0xe2   :  { %15266 = vmatpush3.msra.mxu0 %v349_v5  ;;  %15278 = vmatprep.subr.mxu1 %v353_v6  ;;  %v14478_v13 = vld [vmem:[%s18830_s29] ss:$0 sm:$0xff]  ;;  %s18834_s19 = sld [smem:[#allocation42_spill]] }
  0xe3   :  { %15280 = vmatprep.mubr.msk.f32.mxu1 %vm369_vm0, %v17205_v7  ;;  %15279 = vmatpush3.msra.mxu1 %v353_v6  ;;  %s18835_s21 = sld [smem:[#allocation43_spill]] }
  0xe4   :  { %15267 = vmatprep.subr.mxu0 %v348_v8  ;;  %15281 = vmatmul.mubr.msk.f32.vlgmr.msra.gmra.mxu1 %vm369_vm0, %v17209_v9  ;;  %v17252_v24 = vld [vmem:[%s18831_s5] sm:$0xff]  ;;  %s18836_s22 = sld [smem:[#allocation44_spill]] }
  0xe5   :  { %15268 = vmatpush3.msra.mxu0 %v348_v8  ;;  %15269 = vmatprep.mubr.msk.f32.mxu0 %vm369_vm0, %v17205_v7  ;;  %v17273_v48 = vld [vmem:[%s18832_s7 + $0x8] sm:$0xff]  ;;  %v17279_v53 = vld [vmem:[%s18832_s7] sm:$0xff]  ;;  %s18837_s23 = sld [smem:[#allocation46_spill]] }
  0xe6   :  { %15270 = vmatmul.mubr.msk.f32.vlgmr.msra.gmra.mxu0 %vm369_vm0, %v17209_v9  ;;  %15283 = vmatprep.subr.mxu0 %v16909_v10  ;;  %s18838_s26 = sld [smem:[#allocation45_spill]] }
  0xe7   :  { %15288 = vmatprep.subr.mxu1 %v16909_v10  ;;  %15285 = vmatprep.mubr.msk.f32.mxu0 %vm16910_vm1, %v16909_v10  ;;  %s18839_s9 = sld [smem:[#allocation47_spill]] }
  0xe8   :  { %15290 = vmatprep.mubr.msk.f32.mxu1 %vm16910_vm1, %v16909_v10  ;;  %s18840_s27 = sld [smem:[#allocation48_spill]] }
  0xe9   :  { %s18841_s12 = sld [smem:[#allocation49_spill]] }
  0xea   :  { %s18844_s17 = sld [smem:[#allocation52_spill]] }
  0xeb   :  { %s18845_s28 = sld [smem:[#allocation51_spill]] }
  0xec   :  { %s18846_s1 = sld [smem:[#allocation53_spill]] }
  0xed   :  { %s18847_s2 = sld [smem:[#allocation36_spill]] }
  0xee   :  { %s18848_s20 = sld [smem:[#allocation54_spill]] }
  0xef   :  { %s18849_s30 = sld [smem:[#allocation55_spill]] }
 0x1a4   :  { %v15282_v12 = vpop.f32.mrf.mxu1 }
 0x1a5   :  { %v17227_v14 = vadd.f32 %v15282_v12, %v14481_v11 }
 0x1a6   :  { %v15271_v15 = vpop.f32.mrf.mxu0  ;;  %v523_v16 = vpop.f32.mrf.mxu1 }
 0x1a7   :  { %v17229_v17 = vadd.f32 %v15271_v15, %v14478_v13  ;;  %v17231_v18 = vadd.f32 %v14481_v11, %v523_v16  ;;  %v17314_v15 = vld [vmem:[%s18832_s7 + $0x10] sm:$0xff] }
 0x1a8   :  { %v442_v19 = vpop.f32.mrf.mxu0 }
 0x1a9   :  { %v17233_v20 = vadd.f32 %v14478_v13, %v442_v19  ;;  %700 = vrot.lane.b32.xlu0 %v17231_v18, %s16911_s0  ;;  %15284 = vmatpush3.xpose.msk.msra.mxu0 %vm532_vm2, %v17231_v18 }
 0x1aa   :  { %15293 = vmatprep.subr.mxu0 %v16909_v10 }
 0x1ac   :  { %15286 = vmatmul.mubr.msk.f32.vlgmr.msra.gmra.mxu0 %vm532_vm2, %v17233_v20 }
 0x1ad   :  { %698 = vrot.lane.b32.xlu0 %v17233_v20, %s16911_s0  ;;  %15295 = vmatprep.mubr.msk.f32.mxu0 %vm16910_vm1, %v16909_v10 }
 0x21b   :  { %v701_v21 = vpop.permute.xlu0 %700 }
 0x21c   :  { %15294 = vmatpush3.xpose.msk.msra.mxu0 %vm532_vm2, %v701_v21 }
 0x21d   :  { %15303 = vmatprep.subr.mxu0 %v16909_v10 }
 0x21f   :  { %v699_v22 = vpop.permute.xlu0 %698 }
 0x220   :  { %15296 = vmatmul.mubr.msk.f32.vlgmr.msra.gmra.mxu0 %vm532_vm2, %v699_v22 }
 0x221   :  { %15305 = vmatprep.mubr.msk.f32.mxu0 %vm16910_vm1, %v16909_v10  ;;  %15304 = vmatpush3.msra.mxu0 %v17273_v48 }
 0x222   :  { %15313 = vmatprep.subr.mxu0 %v16909_v10 }
 0x26c   :  { %v605_v23 = vpop.f32.mrf.mxu0 }
 0x26d   :  { %v609_v25 = vmul.f32 0.35355338, %v605_v23 }
 0x26e   :  { %v15287_v26 = vpop.f32.mrf.mxu0 }
 0x26f   :  { %v610_v27 = vadd.f32 %v609_v25, %v17252_v24 }
 0x271   :  { %v611_v28 = vsel %vm532_vm2, %v610_v27, -inf }
 0x272   :  { %612 = vmax.xlane.f32.xlu1 %v611_v28 }
 0x2e0   :  { %v772_v29 = vpop.f32.mrf.mxu0 }
 0x2e1   :  { %v776_v30 = vmul.f32 0.35355338, %v772_v29 }
 0x2e2   :  { %v15297_v31 = vpop.f32.mrf.mxu0 }
 0x2e3   :  { %v777_v32 = vadd.f32 %v776_v30, %v17252_v24 }
 0x2e5   :  { %v778_v33 = vsel %vm532_vm2, %v777_v32, -inf }
 0x2e6   :  { %779 = vmax.xlane.f32.xlu1 %v778_v33 }
 0x2f7   :  { %622 = vrot.lane.b32.xlu1 %v17231_v18, %s16912_s11 }
 0x2fb   :  { %v613_v34 = vpop.xlane.xlu1 %612 }
 0x2fc   :  { %v614_v35 = vsub.f32 %v610_v27, %v613_v34 }
 0x2fe   :  { %v615_v36 = vmul.f32 1.442695, %v614_v35 }
 0x300   :  { %16315 = vpow2.f32 %v615_v36 }
 0x30d   :  { %v16316_v37 = vpop.eup %16315 }
 0x30e   :  { %v617_v38 = vsel %vm532_vm2, %v16316_v37, 0.0 }
 0x30f   :  { %618 = vadd.xlane.f32.xlu0 %v617_v38 }
 0x36f   :  { %v780_v39 = vpop.xlane.xlu1 %779 }
 0x370   :  { %v781_v40 = vsub.f32 %v777_v32, %v780_v39 }
 0x372   :  { %v782_v41 = vmul.f32 1.442695, %v781_v40 }
 0x373   :  { %v623_v42 = vpop.permute.xlu1 %622 }
 0x374   :  { %16317 = vpow2.f32 %v782_v41  ;;  %15289 = vmatpush3.msra.mxu1 %v623_v42 }
 0x375   :  { %15298 = vmatprep.subr.mxu1 %v16909_v10 }
 0x381   :  { %v16318_v43 = vpop.eup %16317 }
 0x382   :  { %v784_v44 = vsel %vm532_vm2, %v16318_v43, 0.0 }
 0x383   :  { %785 = vadd.xlane.f32.xlu1 %v784_v44 }
 0x394   :  { %789 = vrot.lane.b32.xlu1 %v17231_v18, %s16913_s4 }
 0x398   :  { %v619_v45 = vpop.xlane.xlu0 %618  ;;  %1013 = vrot.lane.b32.xlu1 %v17231_v18, %s16914_s6 }
 0x399   :  { %16319 = vrcp.f32 %v619_v45  ;;  %v17354_v45 = vld [vmem:[%s18832_s7 + $0x18] sm:$0xff] }
 0x39c   :  { %1011 = vrot.lane.b32.xlu1 %v17233_v20, %s16914_s6 }
 0x3a6   :  { %v16320_v46 = vpop.eup %16319 }
 0x3a7   :  { %v621_v47 = vmul.f32 %v16320_v46, %v16316_v37 }
 0x3a9   :  { %15291 = vmatmul.mubr.msk.f32.vlgmr.msra.gmra.mxu1 %vm532_vm2, %v621_v47 }
 0x3aa   :  { %15300 = vmatprep.mubr.msk.f32.mxu1 %vm16910_vm1, %v16909_v10 }
 0x40c   :  { %v786_v49 = vpop.xlane.xlu1 %785 }
 0x40d   :  { %16321 = vrcp.f32 %v786_v49 }
 0x410   :  { %v790_v50 = vpop.permute.xlu1 %789 }
 0x411   :  { %15299 = vmatpush3.msra.mxu1 %v790_v50 }
 0x412   :  { %15308 = vmatprep.subr.mxu1 %v16909_v10 }
 0x414   :  { %v1014_v56 = vpop.permute.xlu1 %1013 }
 0x418   :  { %v1012_v59 = vpop.permute.xlu1 %1011 }
 0x41a   :  { %v16322_v51 = vpop.eup %16321 }
 0x41b   :  { %v788_v52 = vmul.f32 %v16322_v51, %v16318_v43 }
 0x41d   :  { %15301 = vmatmul.mubr.msk.f32.vlgmr.msra.gmra.mxu1 %vm532_vm2, %v788_v52 }
 0x41e   :  { %15309 = vmatpush3.msra.mxu1 %v17279_v53  ;;  %15310 = vmatprep.mubr.msk.f32.mxu1 %vm16910_vm1, %v16909_v10 }
 0x41f   :  { %15318 = vmatprep.subr.mxu1 %v16909_v10 }
 0x469   :  { %v694_v54 = vpop.f32.mrf.mxu1 }
 0x46a   :  { %15311 = vmatmul.mubr.msk.f32.vlgmr.msra.gmra.mxu1 %vm532_vm2, %v694_v54 }
 0x46b   :  { %v15292_v55 = vpop.f32.mrf.mxu1  ;;  %15320 = vmatprep.mubr.msk.f32.mxu1 %vm16910_vm1, %v16909_v10 }
 0x4dd   :  { %v861_v57 = vpop.f32.mrf.mxu1 }
 0x4de   :  { %15306 = vmatmul.mubr.msk.f32.vlgmr.msra.gmra.mxu0 %vm532_vm2, %v861_v57 }
 0x4df   :  { %15314 = vmatpush3.xpose.msk.msra.mxu0 %vm532_vm2, %v1014_v56  ;;  %v15302_v58 = vpop.f32.mrf.mxu1  ;;  %15315 = vmatprep.mubr.msk.f32.mxu0 %vm16910_vm1, %v16909_v10 }
 0x4e0   :  { %15323 = vmatprep.subr.mxu0 %v16909_v10 }
 0x4e2   :  { %15316 = vmatmul.mubr.msk.f32.vlgmr.msra.gmra.mxu0 %vm532_vm2, %v1012_v59 }
 0x4e3   :  { %15325 = vmatprep.mubr.msk.f32.mxu0 %vm16910_vm1, %v16909_v10  ;;  %15324 = vmatpush3.msra.mxu0 %v17314_v15 }
 0x4e4   :  { %15333 = vmatprep.subr.mxu0 %v16909_v10 }
 0x52a   :  { %v17297_v60 = vpop.f32.mrf.mxu1 }
 0x52c   :  { %v15312_v61 = vpop.f32.mrf.mxu1 }
 0x59e   :  { %v934_v62 = vpop.f32.mrf.mxu0 }
 0x59f   :  { %v1008_v36 = vadd.f32 %v17297_v60, %v934_v62 }
 0x5a0   :  { %v15307_v63 = vpop.f32.mrf.mxu0 }
 0x5a2   :  { %v1085_v0 = vpop.f32.mrf.mxu0 }
 0x5a3   :  { %v1089_v1 = vmul.f32 0.35355338, %v1085_v0 }
 0x5a4   :  { %v15317_v2 = vpop.f32.mrf.mxu0 }
 0x5a5   :  { %v1090_v3 = vadd.f32 %v1089_v1, %v17252_v24 }
 0x5a7   :  { %v1091_v4 = vsel %vm532_vm2, %v1090_v3, -inf }
 0x5a8   :  { %1092 = vmax.xlane.f32.xlu0 %v1091_v4 }
 0x5be   :  { %1102 = vrot.lane.b32.xlu0 %v17231_v18, %s16915_s10 }
 0x5c2   :  { %1254 = vrot.lane.b32.xlu0 %v17231_v18, %s16916_s15 }
 0x5c6   :  { %1252 = vrot.lane.b32.xlu0 %v17233_v20, %s16916_s15 }
 0x631   :  { %v1093_v5 = vpop.xlane.xlu0 %1092 }
 0x632   :  { %v1094_v6 = vsub.f32 %v1090_v3, %v1093_v5 }
 0x634   :  { %v1095_v8 = vmul.f32 1.442695, %v1094_v6 }
 0x635   :  { %v1103_v11 = vpop.permute.xlu0 %1102 }
 0x636   :  { %16323 = vpow2.f32 %v1095_v8  ;;  %15319 = vmatpush3.msra.mxu1 %v1103_v11 }
 0x637   :  { %15328 = vmatprep.subr.mxu1 %v16909_v10 }
 0x639   :  { %v1255_v20 = vpop.permute.xlu0 %1254 }
 0x643   :  { %v16324_v12 = vpop.eup %16323 }
 0x644   :  { %v1097_v13 = vsel %vm532_vm2, %v16324_v12, 0.0 }
 0x645   :  { %1098 = vadd.xlane.f32.xlu1 %v1097_v13 }
 0x656   :  { %1343 = vrot.lane.b32.xlu1 %v17231_v18, %s16917_s16  ;;  %v1253_v18 = vpop.permute.xlu0 %1252 }
 0x65a   :  { %1667 = vrot.lane.b32.xlu1 %v17227_v14, %s16911_s0 }
 0x6ce   :  { %v1099_v16 = vpop.xlane.xlu1 %1098 }
 0x6cf   :  { %16325 = vrcp.f32 %v1099_v16 }
 0x6d2   :  { %v1344_v23 = vpop.permute.xlu1 %1343 }
 0x6d6   :  { %v1668_v40 = vpop.permute.xlu1 %1667 }
 0x6dc   :  { %v16326_v19 = vpop.eup %16325 }
 0x6dd   :  { %v1101_v21 = vmul.f32 %v16326_v19, %v16324_v12 }
 0x6df   :  { %15321 = vmatmul.mubr.msk.f32.vlgmr.msra.gmra.mxu1 %vm532_vm2, %v1101_v21 }
 0x6e0   :  { %15329 = vmatpush3.xpose.msk.msra.mxu1 %vm532_vm2, %v1255_v20  ;;  %15330 = vmatprep.mubr.msk.f32.mxu1 %vm16910_vm1, %v16909_v10 }
 0x6e1   :  { %15338 = vmatprep.subr.mxu1 %v16909_v10 }
 0x6e3   :  { %15331 = vmatmul.mubr.msk.f32.vlgmr.msra.gmra.mxu1 %vm532_vm2, %v1253_v18 }
 0x6e4   :  { %15340 = vmatprep.mubr.msk.f32.mxu1 %vm16910_vm1, %v16909_v10  ;;  %15339 = vmatpush3.msra.mxu1 %v17354_v45 }
 0x6e5   :  { %15348 = vmatprep.subr.mxu1 %v16909_v10 }
 0x79f   :  { %v1174_v22 = vpop.f32.mrf.mxu1 }
 0x7a0   :  { %15326 = vmatmul.mubr.msk.f32.vlgmr.msra.gmra.mxu0 %vm532_vm2, %v1174_v22 }
 0x7a1   :  { %15334 = vmatpush3.msra.mxu0 %v1344_v23  ;;  %v15322_v25 = vpop.f32.mrf.mxu1  ;;  %15335 = vmatprep.mubr.msk.f32.mxu0 %vm16910_vm1, %v16909_v10 }
 0x7a2   :  { %15343 = vmatprep.subr.mxu0 %v16909_v10 }
 0x7a3   :  { %v1326_v26 = vpop.f32.mrf.mxu1 }
 0x7a4   :  { %v1330_v27 = vmul.f32 0.35355338, %v1326_v26 }
 0x7a5   :  { %v15332_v28 = vpop.f32.mrf.mxu1 }
 0x7a6   :  { %v1331_v29 = vadd.f32 %v1330_v27, %v17252_v24 }
 0x7a8   :  { %v1332_v30 = vsel %vm532_vm2, %v1331_v29, -inf }
 0x7a9   :  { %1333 = vmax.xlane.f32.xlu0 %v1332_v30 }
 0x832   :  { %v1334_v31 = vpop.xlane.xlu0 %1333 }
 0x833   :  { %v1335_v32 = vsub.f32 %v1331_v29, %v1334_v31 }
 0x835   :  { %v1336_v33 = vmul.f32 1.442695, %v1335_v32 }
 0x837   :  { %16327 = vpow2.f32 %v1336_v33 }
 0x844   :  { %v16328_v34 = vpop.eup %16327 }
 0x845   :  { %v1338_v35 = vsel %vm532_vm2, %v16328_v34, 0.0 }
 0x846   :  { %1339 = vadd.xlane.f32.xlu1 %v1338_v35 }
 0x857   :  { %1665 = vrot.lane.b32.xlu1 %v17229_v17, %s16911_s0 }
 0x860   :  { %v1247_v37 = vpop.f32.mrf.mxu0 }
 0x861   :  { %v1251_v38 = vadd.f32 %v1247_v37, %v1008_v36 }
 0x862   :  { %v15327_v39 = vpop.f32.mrf.mxu0 }
 0x8cf   :  { %v1340_v41 = vpop.xlane.xlu1 %1339 }
 0x8d0   :  { %16329 = vrcp.f32 %v1340_v41 }
 0x8d3   :  { %v1666_v44 = vpop.permute.xlu1 %1665 }
 0x8dd   :  { %v16330_v42 = vpop.eup %16329 }
 0x8de   :  { %v1342_v43 = vmul.f32 %v16330_v42, %v16328_v34 }
 0x8e0   :  { %15336 = vmatmul.mubr.msk.f32.vlgmr.msra.gmra.mxu0 %vm532_vm2, %v1342_v43 }
 0x8e1   :  { %15344 = vmatpush3.xpose.msk.msra.mxu0 %vm532_vm2, %v17227_v14  ;;  %15345 = vmatprep.mubr.msk.f32.mxu0 %vm16910_vm1, %v16909_v10 }
 0x8e2   :  { %15353 = vmatprep.subr.mxu0 %v16909_v10 }
 0x8e4   :  { %15346 = vmatmul.mubr.msk.f32.vlgmr.msra.gmra.mxu0 %vm532_vm2, %v17229_v17 }
 0x8e5   :  { %15354 = vmatpush3.xpose.msk.msra.mxu0 %vm532_vm2, %v1668_v40  ;;  %15355 = vmatprep.mubr.msk.f32.mxu0 %vm16910_vm1, %v16909_v10 }
 0x8e6   :  { %15363 = vmatprep.subr.mxu0 %v16909_v10 }
 0x8e8   :  { %15356 = vmatmul.mubr.msk.f32.vlgmr.msra.gmra.mxu0 %vm532_vm2, %v1666_v44 }
 0x8e9   :  { %15364 = vmatpush3.msra.mxu0 %v17273_v48  ;;  %15365 = vmatprep.mubr.msk.f32.mxu0 %vm16910_vm1, %v16909_v10  ;;  %v17362_v48 = vld [vmem:[%s18831_s5 + $0x8] sm:$0xff] }
 0x8ea   :  { %15373 = vmatprep.subr.mxu0 %v16909_v10 }
 0x9a0   :  { %v1415_v46 = vpop.f32.mrf.mxu0 }
 0x9a1   :  { %15341 = vmatmul.mubr.msk.f32.vlgmr.msra.gmra.mxu1 %vm532_vm2, %v1415_v46 }
 0x9a2   :  { %v15337_v47 = vpop.f32.mrf.mxu0  ;;  %15350 = vmatprep.mubr.msk.f32.mxu1 %vm16910_vm1, %v16909_v10 }
 0x9a4   :  { %v1572_v49 = vpop.f32.mrf.mxu0 }
 0x9a5   :  { %v1576_v50 = vmul.f32 0.35355338, %v1572_v49 }
 0x9a6   :  { %v15347_v51 = vpop.f32.mrf.mxu0 }
 0x9a7   :  { %v1577_v52 = vadd.f32 %v1576_v50, %v17362_v48 }
 0x9a8   :  { %v1739_v54 = vpop.f32.mrf.mxu0 }
 0x9a9   :  { %v1743_v55 = vmul.f32 0.35355338, %v1739_v54  ;;  %v1578_v56 = vsel %vm532_vm2, %v1577_v52, -inf }
 0x9aa   :  { %1579 = vmax.xlane.f32.xlu0 %v1578_v56  ;;  %v15357_v57 = vpop.f32.mrf.mxu0 }
 0x9ab   :  { %v1744_v58 = vadd.f32 %v1743_v55, %v17362_v48 }
 0x9ad   :  { %v1745_v59 = vsel %vm532_vm2, %v1744_v58, -inf }
 0x9ae   :  { %1746 = vmax.xlane.f32.xlu1 %v1745_v59 }
 0x9bf   :  { %1978 = vrot.lane.b32.xlu1 %v17229_v17, %s16914_s6 }
 0x9c0   :  { %1589 = vrot.lane.b32.xlu0 %v17227_v14, %s16912_s11 }
 0xa33   :  { %v1580_v60 = vpop.xlane.xlu0 %1579 }
 0xa34   :  { %v1581_v61 = vsub.f32 %v1577_v52, %v1580_v60 }
 0xa36   :  { %v1582_v62 = vmul.f32 1.442695, %v1581_v61  ;;  %v14500_v61 = vld [vmem:[%s18833_s18] ss:$0 sm:$0xff] }
 0xa37   :  { %v1590_v63 = vpop.permute.xlu0 %1589  ;;  %v1747_v0 = vpop.xlane.xlu1 %1746 }
 0xa38   :  { %16331 = vpow2.f32 %v1582_v62  ;;  %v1748_v1 = vsub.f32 %v1744_v58, %v1747_v0  ;;  %15349 = vmatpush3.msra.mxu1 %v1590_v63 }
 0xa39   :  { %15358 = vmatprep.subr.mxu1 %v16909_v10 }
 0xa3a   :  { %v1749_v2 = vmul.f32 1.442695, %v1748_v1 }
 0xa3c   :  { %16333 = vpow2.f32 %v1749_v2 }
 0xa45   :  { %v16332_v3 = vpop.eup %16331 }
 0xa46   :  { %v1584_v4 = vsel %vm532_vm2, %v16332_v3, 0.0 }
 0xa47   :  { %1585 = vadd.xlane.f32.xlu0 %v1584_v4 }
 0xa49   :  { %v16334_v5 = vpop.eup %16333 }
 0xa4a   :  { %v1751_v6 = vsel %vm532_vm2, %v16334_v5, 0.0 }
 0xa4b   :  { %1752 = vadd.xlane.f32.xlu0 %v1751_v6 }
 0xa61   :  { %v1488_v8 = vpop.f32.mrf.mxu1  ;;  %1756 = vrot.lane.b32.xlu0 %v17227_v14, %s16913_s4 }
 0xa62   :  { %v17377_v11 = vadd.f32 %v1488_v8, %v1251_v38 }
 0xa63   :  { %v15342_v12 = vpop.f32.mrf.mxu1 }
 0xa64   :  { %v1499_v62 = vadd.f32 %v14500_v61, %v17377_v11 }
 0xa65   :  { %1980 = vrot.lane.b32.xlu0 %v17227_v14, %s16914_s6 }
 0xa66   :  { %v2461_v1 = vadd.f32 %v1499_v62, %v17205_v7 }
 0xa68   :  { %v2465_v2 = vsel %vm369_vm0, %v2461_v1, 0.0 }
 0xad0   :  { %v1586_v13 = vpop.xlane.xlu0 %1585 }
 0xad1   :  { %16335 = vrcp.f32 %v1586_v13 }
 0xad4   :  { %v1753_v16 = vpop.xlane.xlu0 %1752 }
 0xad5   :  { %16337 = vrcp.f32 %v1753_v16 }
 0xad8   :  { %v1757_v21 = vpop.permute.xlu0 %1756 }
 0xadc   :  { %v1981_v27 = vpop.permute.xlu0 %1980 }
 0xade   :  { %v16336_v19 = vpop.eup %16335 }
 0xadf   :  { %v1588_v20 = vmul.f32 %v16336_v19, %v16332_v3 }
 0xae1   :  { %15351 = vmatmul.mubr.msk.f32.vlgmr.msra.gmra.mxu1 %vm532_vm2, %v1588_v20 }
 0xae2   :  { %v16338_v18 = vpop.eup %16337  ;;  %15359 = vmatpush3.msra.mxu1 %v1757_v21  ;;  %15360 = vmatprep.mubr.msk.f32.mxu1 %vm16910_vm1, %v16909_v10 }
 0xae3   :  { %v1755_v22 = vmul.f32 %v16338_v18, %v16334_v5  ;;  %15368 = vmatprep.subr.mxu1 %v16909_v10 }
 0xae5   :  { %15361 = vmatmul.mubr.msk.f32.vlgmr.msra.gmra.mxu1 %vm532_vm2, %v1755_v22  ;;  %v14517_v22 = vld [vmem:[%s18834_s19] ss:$0 sm:$0xff] }
 0xae6   :  { %15369 = vmatpush3.msra.mxu1 %v17279_v53  ;;  %15370 = vmatprep.mubr.msk.f32.mxu1 %vm16910_vm1, %v16909_v10  ;;  %v1979_v53 = vpop.permute.xlu1 %1978 }
 0xae7   :  { %15378 = vmatprep.subr.mxu1 %v16909_v10 }
 0xba1   :  { %v1661_v23 = vpop.f32.mrf.mxu1 }
 0xba2   :  { %15371 = vmatmul.mubr.msk.f32.vlgmr.msra.gmra.mxu1 %vm532_vm2, %v1661_v23 }
 0xba3   :  { %v15352_v25 = vpop.f32.mrf.mxu1  ;;  %15380 = vmatprep.mubr.msk.f32.mxu1 %vm16910_vm1, %v16909_v10 }
 0xba4   :  { %v14518_v25 = vld [vmem:[%s18835_s21] ss:$0 sm:$0xff] }
 0xba5   :  { %v1828_v26 = vpop.f32.mrf.mxu1 }
 0xba6   :  { %15366 = vmatmul.mubr.msk.f32.vlgmr.msra.gmra.mxu0 %vm532_vm2, %v1828_v26 }
 0xba7   :  { %15374 = vmatpush3.xpose.msk.msra.mxu0 %vm532_vm2, %v1981_v27  ;;  %v15362_v28 = vpop.f32.mrf.mxu1  ;;  %15375 = vmatprep.mubr.msk.f32.mxu0 %vm16910_vm1, %v16909_v10 }
 0xba8   :  { %15383 = vmatprep.subr.mxu0 %v16909_v10 }
 0xbaa   :  { %15376 = vmatmul.mubr.msk.f32.vlgmr.msra.gmra.mxu0 %vm532_vm2, %v1979_v53 }
 0xbab   :  { %15384 = vmatpush3.msra.mxu0 %v17314_v15  ;;  %15385 = vmatprep.mubr.msk.f32.mxu0 %vm16910_vm1, %v16909_v10 }
 0xbac   :  { %15393 = vmatprep.subr.mxu0 %v16909_v10 }
 0xc62   :  { %v1974_v29 = vpop.f32.mrf.mxu1 }
 0xc64   :  { %v15372_v30 = vpop.f32.mrf.mxu1 }
 0xc66   :  { %v1901_v31 = vpop.f32.mrf.mxu0 }
 0xc67   :  { %v1975_v32 = vadd.f32 %v1974_v29, %v1901_v31 }
 0xc68   :  { %v15367_v33 = vpop.f32.mrf.mxu0 }
 0xc6a   :  { %v2052_v34 = vpop.f32.mrf.mxu0 }
 0xc6b   :  { %v2056_v35 = vmul.f32 0.35355338, %v2052_v34 }
 0xc6c   :  { %v15377_v36 = vpop.f32.mrf.mxu0 }
 0xc6d   :  { %v2057_v37 = vadd.f32 %v2056_v35, %v17362_v48 }
 0xc6f   :  { %v2058_v38 = vsel %vm532_vm2, %v2057_v37, -inf }
 0xc70   :  { %2059 = vmax.xlane.f32.xlu0 %v2058_v38 }
 0xc86   :  { %2069 = vrot.lane.b32.xlu0 %v17227_v14, %s16915_s10 }
 0xc8a   :  { %2219 = vrot.lane.b32.xlu0 %v17229_v17, %s16916_s15 }
 0xcf9   :  { %v2060_v15 = vpop.xlane.xlu0 %2059 }
 0xcfa   :  { %v2061_v39 = vsub.f32 %v2057_v37, %v2060_v15 }
 0xcfc   :  { %v2062_v40 = vmul.f32 1.442695, %v2061_v39  ;;  %v2511_v39 = vld [vmem:[%s18836_s22 + $0x18] sm:$0xff] }
 0xcfd   :  { %v2070_v41 = vpop.permute.xlu0 %2069 }
 0xcfe   :  { %16339 = vpow2.f32 %v2062_v40  ;;  %15379 = vmatpush3.msra.mxu1 %v2070_v41  ;;  %v2510_v40 = vld [vmem:[%s18836_s22 + $0x10] sm:$0xff]  ;;  %v2508_v41 = vld [vmem:[%s18836_s22] sm:$0xff] }
 0xcff   :  { %15388 = vmatprep.subr.mxu1 %v16909_v10 }
 0xd01   :  { %v2220_v49 = vpop.permute.xlu0 %2219 }
 0xd0b   :  { %v16340_v42 = vpop.eup %16339 }
 0xd0c   :  { %v2064_v43 = vsel %vm532_vm2, %v16340_v42, 0.0 }
 0xd0d   :  { %2065 = vadd.xlane.f32.xlu1 %v2064_v43  ;;  %v2519_v43 = vld [vmem:[%s18837_s23 + $0x30] sm:$0xff] }
 0xd1e   :  { %2221 = vrot.lane.b32.xlu1 %v17227_v14, %s16916_s15 }
 0xd96   :  { %v2066_v44 = vpop.xlane.xlu1 %2065 }
 0xd97   :  { %16341 = vrcp.f32 %v2066_v44  ;;  %v2518_v44 = vld [vmem:[%s18837_s23 + $0x28] sm:$0xff] }
 0xd9a   :  { %v2222_v17 = vpop.permute.xlu1 %2221 }
 0xda4   :  { %v16342_v46 = vpop.eup %16341 }
 0xda5   :  { %v2068_v47 = vmul.f32 %v16342_v46, %v16340_v42  ;;  %v2520_v42 = vld [vmem:[%s18837_s23 + $0x38] sm:$0xff]  ;;  %v2517_v46 = vld [vmem:[%s18837_s23 + $0x20] sm:$0xff] }
 0xda7   :  { %15381 = vmatmul.mubr.msk.f32.vlgmr.msra.gmra.mxu1 %vm532_vm2, %v2068_v47 }
 0xda8   :  { %15389 = vmatpush3.xpose.msk.msra.mxu1 %vm532_vm2, %v2222_v17  ;;  %15390 = vmatprep.mubr.msk.f32.mxu1 %vm16910_vm1, %v16909_v10 }
 0xda9   :  { %15398 = vmatprep.subr.mxu1 %v16909_v10 }
 0xdab   :  { %15391 = vmatmul.mubr.msk.f32.vlgmr.msra.gmra.mxu1 %vm532_vm2, %v2220_v49 }
 0xdac   :  { %15399 = vmatpush3.msra.mxu1 %v17354_v45  ;;  %15400 = vmatprep.mubr.msk.f32.mxu1 %vm16910_vm1, %v16909_v10 }
 0xdad   :  { %15414 = vmatprep.subr.mxu1 %v2520_v42 }
 0xe67   :  { %v2141_v50 = vpop.f32.mrf.mxu1 }
 0xe68   :  { %15386 = vmatmul.mubr.msk.f32.vlgmr.msra.gmra.mxu0 %vm532_vm2, %v2141_v50 }
 0xe69   :  { %v15382_v51 = vpop.f32.mrf.mxu1  ;;  %15395 = vmatprep.mubr.msk.f32.mxu0 %vm16910_vm1, %v16909_v10 }
 0xe6b   :  { %v2293_v52 = vpop.f32.mrf.mxu1 }
 0xe6c   :  { %v2297_v54 = vmul.f32 0.35355338, %v2293_v52 }
 0xe6d   :  { %v15392_v55 = vpop.f32.mrf.mxu1 }
 0xe6e   :  { %v2298_v56 = vadd.f32 %v2297_v54, %v17362_v48  ;;  %v2516_v55 = vld [vmem:[%s18837_s23 + $0x18] sm:$0xff] }
 0xe70   :  { %v2299_v57 = vsel %vm532_vm2, %v2298_v56, -inf }
 0xe71   :  { %2300 = vmax.xlane.f32.xlu0 %v2299_v57  ;;  %v2514_v57 = vld [vmem:[%s18837_s23 + $0x8] sm:$0xff] }
 0xe87   :  { %2310 = vrot.lane.b32.xlu0 %v17227_v14, %s16917_s16 }
 0xefa   :  { %v2301_v45 = vpop.xlane.xlu0 %2300 }
 0xefb   :  { %v2302_v58 = vsub.f32 %v2298_v56, %v2301_v45  ;;  %v2515_v56 = vld [vmem:[%s18837_s23 + $0x10] sm:$0xff]  ;;  %v2513_v45 = vld [vmem:[%s18837_s23] sm:$0xff] }
 0xefd   :  { %v2303_v59 = vmul.f32 1.442695, %v2302_v58  ;;  %v14519_v58 = vld [vmem:[%s18838_s26] ss:$0 sm:$0xff] }
 0xefe   :  { %v2311_v60 = vpop.permute.xlu0 %2310 }
 0xeff   :  { %16343 = vpow2.f32 %v2303_v59  ;;  %15394 = vmatpush3.msra.mxu0 %v2311_v60 }
 0xf00   :  { %15403 = vmatprep.subr.mxu0 %v2511_v39 }
 0xf0c   :  { %v16344_v63 = vpop.eup %16343 }
 0xf0d   :  { %v2305_v0 = vsel %vm532_vm2, %v16344_v63, 0.0 }
 0xf0e   :  { %2306 = vadd.xlane.f32.xlu1 %v2305_v0 }
 0xf12   :  { %2466 = vadd.xlane.f32.xlu1 %v2465_v2  ;;  %v14522_v2 = vld [vmem:[%s18839_s9] ss:$0 sm:$0xff] }
 0xf28   :  { %v2214_v3 = vpop.f32.mrf.mxu0 }
 0xf29   :  { %v2218_v14 = vadd.f32 %v2214_v3, %v1975_v32 }
 0xf2a   :  { %v15387_v4 = vpop.f32.mrf.mxu0 }
 0xf97   :  { %v2307_v5 = vpop.xlane.xlu1 %2306 }
 0xf98   :  { %16345 = vrcp.f32 %v2307_v5 }
 0xf9b   :  { %v2467_v6 = vpop.xlane.xlu1 %2466 }
 0xf9c   :  { %v2472_v8 = vmul.f32 0.03125, %v2467_v6 }
 0xf9e   :  { %v2474_v12 = vsub.f32 %v2461_v1, %v2472_v8 }
 0xfa0   :  { %v2476_v11 = vmul.f32 %v2474_v12, %v2474_v12 }
 0xfa2   :  { %v2478_v13 = vsel %vm369_vm0, %v2476_v11, 0.0 }
 0xfa3   :  { %2479 = vadd.xlane.f32.xlu0 %v2478_v13 }
 0xfa5   :  { %v16346_v16 = vpop.eup %16345 }
 0xfa6   :  { %v2309_v7 = vmul.f32 %v16346_v16, %v16344_v63 }
 0xfa8   :  { %15396 = vmatmul.mubr.msk.f32.vlgmr.msra.gmra.mxu0 %vm532_vm2, %v2309_v7 }
 0xfa9   :  { %15404 = vmatpush3.msra.mxu0 %v2511_v39 }
 0xfaa   :  { %15405 = vmatprep.subr.mxu0 %v2510_v40 }
 0xfab   :  { %15406 = vmatpush3.msra.mxu0 %v2510_v40 }
0x102c   :  { %v2480_v19 = vpop.xlane.xlu0 %2479 }
0x102d   :  { %v2484_v20 = vmul.f32 0.03125, %v2480_v19 }
0x102f   :  { %v2486_v21 = vadd.f32 1e-05, %v2484_v20 }
0x1031   :  { %16347 = vrsqrt.f32 %v2486_v21 }
0x103e   :  { %v16348_v18 = vpop.eup %16347 }
0x103f   :  { %v2490_v23 = vmul.f32 %v16348_v18, %v2474_v12 }
0x1041   :  { %v2498_v26 = vmul.f32 %v14517_v22, %v2490_v23 }
0x1043   :  { %v17438_v27 = vadd.f32 %v14518_v25, %v2498_v26  ;;  %v14529_v26 = vld [vmem:[%s16955_s25 + $0x30] sm:$0xff] }
0x1045   :  { %15411 = vmatprep.mubr.msk.f32.mxu0 %vm369_vm0, %v17438_v27 }
0x1068   :  { %v2382_v28 = vpop.f32.mrf.mxu0 }
0x1069   :  { %15401 = vmatmul.mubr.msk.f32.vlgmr.msra.gmra.mxu1 %vm532_vm2, %v2382_v28  ;;  %v14527_v28 = vld [vmem:[%s16955_s25 + $0x20] sm:$0xff] }
0x106a   :  { %v15397_v53 = vpop.f32.mrf.mxu0  ;;  %15415 = vmatpush3.msra.mxu1 %v2520_v42 }
0x106b   :  { %15416 = vmatprep.subr.mxu1 %v2519_v43  ;;  %v14535_v53 = vld [vmem:[%s16965_s3 + $0x38] sm:$0xff] }
0x106c   :  { %15417 = vmatpush3.msra.mxu1 %v2519_v43  ;;  %v14534_v43 = vld [vmem:[%s16965_s3 + $0x30] sm:$0xff] }
0x106d   :  { %15418 = vmatprep.subr.mxu1 %v2518_v44 }
0x106e   :  { %15419 = vmatpush3.msra.mxu1 %v2518_v44  ;;  %v14533_v44 = vld [vmem:[%s16965_s3 + $0x28] sm:$0xff] }
0x106f   :  { %15420 = vmatprep.subr.mxu1 %v2517_v46 }
0x1070   :  { %15421 = vmatpush3.msra.mxu1 %v2517_v46  ;;  %v14532_v46 = vld [vmem:[%s16965_s3 + $0x20] sm:$0xff]  ;;  %s18843_s3 = sld [smem:[#allocation34_spill]] }
0x1071   :  { %15422 = vmatprep.subr.mxu1 %v2516_v55 }
0x1072   :  { %15423 = vmatpush3.msra.mxu1 %v2516_v55 }
0x1073   :  { %15424 = vmatprep.subr.mxu1 %v2515_v56 }
0x1074   :  { %15425 = vmatpush3.msra.mxu1 %v2515_v56 }
0x1075   :  { %15426 = vmatprep.subr.mxu1 %v2514_v57 }
0x1076   :  { %15427 = vmatpush3.msra.mxu1 %v2514_v57 }
0x1077   :  { %15428 = vmatprep.subr.mxu1 %v2513_v45 }
0x1078   :  { %15429 = vmatpush3.msra.mxu1 %v2513_v45 }
0x1079   :  { %15455 = vmatprep.subr.mxu1 %v16909_v10 }
0x1129   :  { %v2455_v29 = vpop.f32.mrf.mxu1 }
0x112a   :  { %v2459_v30 = vadd.f32 %v2455_v29, %v2218_v14 }
0x112b   :  { %v15402_v31 = vpop.f32.mrf.mxu1 }
0x112c   :  { %v2460_v32 = vadd.f32 %v14500_v61, %v2459_v30 }
0x112e   :  { %v2462_v33 = vadd.f32 %v2460_v32, %v17209_v9  ;;  %v2509_v9 = vld [vmem:[%s18836_s22 + $0x8] sm:$0xff] }
0x112f   :  { %15407 = vmatprep.subr.mxu0 %v2509_v9 }
0x1130   :  { %v2468_v34 = vsel %vm369_vm0, %v2462_v33, 0.0  ;;  %15408 = vmatpush3.msra.mxu0 %v2509_v9 }
0x1131   :  { %2469 = vadd.xlane.f32.xlu1 %v2468_v34  ;;  %15409 = vmatprep.subr.mxu0 %v2508_v41 }
0x1132   :  { %15410 = vmatpush3.msra.mxu0 %v2508_v41 }
0x11ba   :  { %v2470_v35 = vpop.xlane.xlu1 %2469 }
0x11bb   :  { %v2473_v36 = vmul.f32 0.03125, %v2470_v35 }
0x11bd   :  { %v2475_v37 = vsub.f32 %v2462_v33, %v2473_v36  ;;  %v14525_v36 = vld [vmem:[%s18840_s27] ss:$0 sm:$0xff] }
0x11bf   :  { %v2477_v38 = vmul.f32 %v2475_v37, %v2475_v37 }
0x11c1   :  { %v2481_v15 = vsel %vm369_vm0, %v2477_v38, 0.0  ;;  %v14526_v38 = vld [vmem:[%s18841_s12] ss:$0 sm:$0xff] }
0x11c2   :  { %2482 = vadd.xlane.f32.xlu1 %v2481_v15 }
0x124b   :  { %v2483_v47 = vpop.xlane.xlu1 %2482 }
0x124c   :  { %v2485_v17 = vmul.f32 0.03125, %v2483_v47  ;;  %v14542_v47 = vld [vmem:[%s18830_s29 + $0x1] ss:$0 sm:$0xff]  ;;  %s18851_s29 = sld [smem:[#allocation56_spill]] }
0x124e   :  { %v2487_v49 = vadd.f32 1e-05, %v2485_v17 }
0x1250   :  { %16349 = vrsqrt.f32 %v2487_v49 }
0x125d   :  { %v16350_v50 = vpop.eup %16349 }
0x125e   :  { %v2491_v51 = vmul.f32 %v16350_v50, %v2475_v37 }
0x1260   :  { %v2499_v52 = vmul.f32 %v14517_v22, %v2491_v51 }
0x1262   :  { %v2507_v54 = vadd.f32 %v14518_v25, %v2499_v52  ;;  %v14530_v25 = vld [vmem:[%s16955_s25 + $0x38] sm:$0xff]  ;;  %v14545_v52 = vld [vmem:[%s18829_s13 + $0x1] ss:$0 sm:$0xff]  ;;  %s18850_s13 = sld [smem:[#allocation57_spill]] }
0x1263   :  { %15433 = vmatprep.subr.mxu0 %v14530_v25 }
0x1264   :  { %15412 = vmatmul.mubr.msk.f32.vlgmr.msra.gmra.mxu0 %vm369_vm0, %v2507_v54 }
0x1265   :  { %15434 = vmatpush3.msra.mxu0 %v14530_v25 }
0x1266   :  { %15435 = vmatprep.subr.mxu0 %v14529_v26 }
0x1267   :  { %15436 = vmatpush3.msra.mxu0 %v14529_v26 }
0x1324   :  { %v15413_v59 = vpop.f32.mrf.mxu0 }
0x1325   :  { %v2606_v60 = vadd.f32 %v15413_v59, %v14519_v58 }
0x1326   :  { %v2600_v61 = vpop.f32.mrf.mxu0 }
0x1327   :  { %v2601_v62 = vadd.f32 %v14519_v58, %v2600_v61  ;;  %v2610_v0 = vmax.f32 %v2606_v60, 0.0 }
0x1329   :  { %v2609_v63 = vmax.f32 %v2601_v62, 0.0 }
0x132b   :  { %15430 = vmatprep.mubr.msk.f32.mxu1 %vm2617_vm3, %v2609_v63 }
0x132c   :  { %15431 = vmatmul.mubr.msk.f32.vlgmr.msra.gmra.mxu1 %vm2617_vm3, %v2610_v0 }
0x132d   :  { %15457 = vmatprep.mubr.msk.f32.mxu1 %vm16910_vm1, %v16909_v10 }
0x13ec   :  { %v15432_v1 = vpop.f32.mrf.mxu1 }
0x13ed   :  { %v2696_v14 = vadd.f32 %v15432_v1, %v14522_v2 }
0x13ee   :  { %v2690_v3 = vpop.f32.mrf.mxu1 }
0x13ef   :  { %v2691_v4 = vadd.f32 %v14522_v2, %v2690_v3  ;;  %v2700_v8 = vadd.f32 %v2696_v14, %v2507_v54 }
0x13f1   :  { %v2699_v5 = vadd.f32 %v2691_v4, %v17438_v27  ;;  %v2706_v12 = vsel %vm369_vm0, %v2700_v8, 0.0  ;;  %v14528_v27 = vld [vmem:[%s16955_s25 + $0x28] sm:$0xff]  ;;  %s18842_s25 = sld [smem:[#allocation50_spill]] }
0x13f2   :  { %15437 = vmatprep.subr.mxu0 %v14528_v27 }
0x13f3   :  { %v2703_v6 = vsel %vm369_vm0, %v2699_v5, 0.0  ;;  %15438 = vmatpush3.msra.mxu0 %v14528_v27  ;;  %v17545_v27 = vld [vmem:[%s18832_s7 + $0x20] sm:$0xff] }
0x13f4   :  { %2704 = vadd.xlane.f32.xlu1 %v2703_v6  ;;  %15439 = vmatprep.subr.mxu0 %v14527_v28 }
0x13f5   :  { %15440 = vmatpush3.msra.mxu0 %v14527_v28  ;;  %v17550_v28 = vld [vmem:[%s18832_s7 + $0x28] sm:$0xff] }
0x13f6   :  { %15444 = vmatprep.subr.mxu0 %v14535_v53 }
0x13f8   :  { %2707 = vadd.xlane.f32.xlu1 %v2706_v12 }
0x147d   :  { %v2705_v11 = vpop.xlane.xlu1 %2704 }
0x147e   :  { %v2709_v13 = vmul.f32 0.03125, %v2705_v11 }
0x1480   :  { %v2711_v16 = vsub.f32 %v2699_v5, %v2709_v13 }
0x1481   :  { %v2708_v7 = vpop.xlane.xlu1 %2707 }
0x1482   :  { %v2710_v19 = vmul.f32 0.03125, %v2708_v7  ;;  %v2713_v20 = vmul.f32 %v2711_v16, %v2711_v16 }
0x1484   :  { %v2712_v21 = vsub.f32 %v2700_v8, %v2710_v19  ;;  %v2715_v18 = vsel %vm369_vm0, %v2713_v20, 0.0 }
0x1485   :  { %2716 = vadd.xlane.f32.xlu1 %v2715_v18 }
0x1486   :  { %v2714_v22 = vmul.f32 %v2712_v21, %v2712_v21 }
0x1488   :  { %v2718_v23 = vsel %vm369_vm0, %v2714_v22, 0.0 }
0x1489   :  { %2719 = vadd.xlane.f32.xlu1 %v2718_v23 }
0x150e   :  { %v2717_v29 = vpop.xlane.xlu1 %2716 }
0x150f   :  { %v2721_v30 = vmul.f32 0.03125, %v2717_v29 }
0x1511   :  { %v2723_v31 = vadd.f32 1e-05, %v2721_v30 }
0x1512   :  { %v2720_v32 = vpop.xlane.xlu1 %2719 }
0x1513   :  { %16351 = vrsqrt.f32 %v2723_v31  ;;  %v2722_v33 = vmul.f32 0.03125, %v2720_v32 }
0x1515   :  { %v2724_v34 = vadd.f32 1e-05, %v2722_v33 }
0x1517   :  { %16353 = vrsqrt.f32 %v2724_v34 }
0x1520   :  { %v16352_v35 = vpop.eup %16351 }
0x1521   :  { %v2727_v37 = vmul.f32 %v16352_v35, %v2711_v16 }
0x1523   :  { %v2735_v15 = vmul.f32 %v14525_v36, %v2727_v37 }
0x1524   :  { %v16354_v39 = vpop.eup %16353 }
0x1525   :  { %v2728_v40 = vmul.f32 %v16354_v39, %v2712_v21  ;;  %v17478_v9 = vadd.f32 %v14526_v38, %v2735_v15 }
0x1527   :  { %v2736_v41 = vmul.f32 %v14525_v36, %v2728_v40  ;;  %15441 = vmatprep.mubr.msk.f32.mxu0 %vm369_vm0, %v17478_v9 }
0x1529   :  { %v17482_v42 = vadd.f32 %v14526_v38, %v2736_v41  ;;  %v16547_v41 = vld [vmem:[%s18831_s5] sm:$0xff] }
0x152b   :  { %15442 = vmatmul.mubr.msk.f32.vlgmr.msra.gmra.mxu0 %vm369_vm0, %v17482_v42 }
0x152c   :  { %15445 = vmatpush3.msra.mxu0 %v14535_v53  ;;  %15452 = vmatprep.mubr.msk.f32.mxu0 %vm369_vm0, %v17478_v9 }
0x152d   :  { %15446 = vmatprep.subr.mxu0 %v14534_v43 }
0x152e   :  { %15447 = vmatpush3.msra.mxu0 %v14534_v43 }
0x152f   :  { %15448 = vmatprep.subr.mxu0 %v14533_v44 }
0x1530   :  { %15449 = vmatpush3.msra.mxu0 %v14533_v44 }
0x1531   :  { %15450 = vmatprep.subr.mxu0 %v14532_v46 }
0x1532   :  { %15451 = vmatpush3.msra.mxu0 %v14532_v46 }
0x1533   :  { %15453 = vmatmul.mubr.msk.f32.vlgmr.msra.gmra.mxu0 %vm369_vm0, %v17482_v42  ;;  %15465 = vmatprep.subr.mxu0 %v16909_v10 }
0x1534   :  { %15467 = vmatprep.mubr.msk.f32.mxu0 %vm16910_vm1, %v16909_v10 }
0x15eb   :  { %v15443_v17 = vpop.f32.mrf.mxu0 }
0x15ec   :  { %v17497_v49 = vadd.f32 %v15443_v17, %v14542_v47 }
0x15ed   :  { %v2844_v50 = vpop.f32.mrf.mxu0 }
0x15ee   :  { %v17499_v51 = vadd.f32 %v14542_v47, %v2844_v50 }
0x15f0   :  { %3099 = vrot.lane.b32.xlu0 %v17499_v51, %s16911_s0 }
0x15f3   :  { %v15454_v54 = vpop.f32.mrf.mxu0 }
0x15f4   :  { %v17504_v55 = vadd.f32 %v15454_v54, %v14545_v52 }
0x15f5   :  { %v2925_v56 = vpop.f32.mrf.mxu0 }
0x15f6   :  { %v17506_v57 = vadd.f32 %v14545_v52, %v2925_v56 }
0x15f8   :  { %3101 = vrot.lane.b32.xlu1 %v17506_v57, %s16911_s0  ;;  %15456 = vmatpush3.xpose.msk.msra.mxu1 %vm532_vm2, %v17506_v57 }
0x15f9   :  { %15460 = vmatprep.subr.mxu1 %v16909_v10 }
0x15fb   :  { %15458 = vmatmul.mubr.msk.f32.vlgmr.msra.gmra.mxu1 %vm532_vm2, %v17499_v51 }
0x15fc   :  { %15462 = vmatprep.mubr.msk.f32.mxu1 %vm16910_vm1, %v16909_v10 }
0x1662   :  { %v3100_v58 = vpop.permute.xlu0 %3099 }
0x166a   :  { %v3102_v45 = vpop.permute.xlu1 %3101 }
0x166b   :  { %15466 = vmatpush3.xpose.msk.msra.mxu0 %vm532_vm2, %v3102_v45 }
0x166c   :  { %15475 = vmatprep.subr.mxu0 %v16909_v10 }
0x166e   :  { %15468 = vmatmul.mubr.msk.f32.vlgmr.msra.gmra.mxu0 %vm532_vm2, %v3100_v58 }
0x166f   :  { %15477 = vmatprep.mubr.msk.f32.mxu0 %vm16910_vm1, %v16909_v10  ;;  %15476 = vmatpush3.msra.mxu0 %v17550_v28 }
0x1670   :  { %15485 = vmatprep.subr.mxu0 %v16909_v10 }
0x16bb   :  { %v3006_v59 = vpop.f32.mrf.mxu1 }
0x16bc   :  { %v3010_v60 = vmul.f32 0.35355338, %v3006_v59 }
0x16bd   :  { %v15459_v61 = vpop.f32.mrf.mxu1 }
0x16be   :  { %v3011_v62 = vadd.f32 %v3010_v60, %v17252_v24  ;;  %v17584_v60 = vld [vmem:[%s18832_s7 + $0x30] sm:$0xff] }
0x16c0   :  { %v3012_v63 = vsel %vm532_vm2, %v3011_v62, -inf }
0x16c1   :  { %3013 = vmax.xlane.f32.xlu1 %v3012_v63 }
0x172e   :  { %v3173_v0 = vpop.f32.mrf.mxu0 }
0x172f   :  { %v3177_v1 = vmul.f32 0.35355338, %v3173_v0 }
0x1730   :  { %v15469_v2 = vpop.f32.mrf.mxu0 }
0x1731   :  { %v3178_v3 = vadd.f32 %v3177_v1, %v17252_v24 }
0x1733   :  { %v3179_v14 = vsel %vm532_vm2, %v3178_v3, -inf }
0x1734   :  { %3180 = vmax.xlane.f32.xlu0 %v3179_v14 }
0x174a   :  { %3190 = vrot.lane.b32.xlu0 %v17506_v57, %s16913_s4  ;;  %v3014_v4 = vpop.xlane.xlu1 %3013 }
0x174b   :  { %v3015_v5 = vsub.f32 %v3011_v62, %v3014_v4 }
0x174d   :  { %v3016_v6 = vmul.f32 1.442695, %v3015_v5 }
0x174f   :  { %16355 = vpow2.f32 %v3016_v6 }
0x175c   :  { %v16356_v8 = vpop.eup %16355 }
0x175d   :  { %v3018_v12 = vsel %vm532_vm2, %v16356_v8, 0.0 }
0x175e   :  { %3019 = vadd.xlane.f32.xlu1 %v3018_v12 }
0x17bd   :  { %v3181_v11 = vpop.xlane.xlu0 %3180 }
0x17be   :  { %v3182_v13 = vsub.f32 %v3178_v3, %v3181_v11 }
0x17c0   :  { %v3183_v16 = vmul.f32 1.442695, %v3182_v13 }
0x17c1   :  { %v3191_v23 = vpop.permute.xlu0 %3190 }
0x17c2   :  { %16357 = vpow2.f32 %v3183_v16 }
0x17cf   :  { %v16358_v7 = vpop.eup %16357 }
0x17d0   :  { %v3185_v24 = vsel %vm532_vm2, %v16358_v7, 0.0 }
0x17d1   :  { %3186 = vadd.xlane.f32.xlu1 %v3185_v24 }
0x17e2   :  { %3023 = vrot.lane.b32.xlu1 %v17506_v57, %s16912_s11 }
0x17e6   :  { %3414 = vrot.lane.b32.xlu1 %v17506_v57, %s16914_s6 }
0x17e7   :  { %v3020_v19 = vpop.xlane.xlu1 %3019 }
0x17e8   :  { %16359 = vrcp.f32 %v3020_v19 }
0x17ea   :  { %3412 = vrot.lane.b32.xlu1 %v17499_v51, %s16914_s6 }
0x17f5   :  { %v16360_v21 = vpop.eup %16359 }
0x17f6   :  { %v3022_v22 = vmul.f32 %v16360_v21, %v16356_v8  ;;  %v17620_v21 = vld [vmem:[%s18832_s7 + $0x38] sm:$0xff]  ;;  %s18853_s7 = sld [smem:[#allocation58_spill]] }
0x185a   :  { %v3187_v20 = vpop.xlane.xlu1 %3186 }
0x185b   :  { %16361 = vrcp.f32 %v3187_v20 }
0x185e   :  { %v3024_v18 = vpop.permute.xlu1 %3023 }
0x185f   :  { %15461 = vmatpush3.msra.mxu1 %v3024_v18 }
0x1860   :  { %15463 = vmatmul.mubr.msk.f32.vlgmr.msra.gmra.mxu1 %vm532_vm2, %v3022_v22  ;;  %15470 = vmatprep.subr.mxu1 %v16909_v10 }
0x1861   :  { %15471 = vmatpush3.msra.mxu1 %v3191_v23  ;;  %15472 = vmatprep.mubr.msk.f32.mxu1 %vm16910_vm1, %v16909_v10 }
0x1862   :  { %15480 = vmatprep.subr.mxu1 %v16909_v10  ;;  %v3415_v30 = vpop.permute.xlu1 %3414 }
0x1866   :  { %v3413_v33 = vpop.permute.xlu1 %3412 }
0x1868   :  { %v16362_v25 = vpop.eup %16361 }
0x1869   :  { %v3189_v26 = vmul.f32 %v16362_v25, %v16358_v7 }
0x186b   :  { %15473 = vmatmul.mubr.msk.f32.vlgmr.msra.gmra.mxu1 %vm532_vm2, %v3189_v26 }
0x186c   :  { %15482 = vmatprep.mubr.msk.f32.mxu1 %vm16910_vm1, %v16909_v10  ;;  %15481 = vmatpush3.msra.mxu1 %v17545_v27 }
0x186d   :  { %15490 = vmatprep.subr.mxu1 %v16909_v10 }
0x1920   :  { %v3095_v53 = vpop.f32.mrf.mxu1 }
0x1921   :  { %15483 = vmatmul.mubr.msk.f32.vlgmr.msra.gmra.mxu1 %vm532_vm2, %v3095_v53 }
0x1922   :  { %v15464_v29 = vpop.f32.mrf.mxu1  ;;  %15492 = vmatprep.mubr.msk.f32.mxu1 %vm16910_vm1, %v16909_v10 }
0x192b   :  { %v3262_v31 = vpop.f32.mrf.mxu1 }
0x192c   :  { %15478 = vmatmul.mubr.msk.f32.vlgmr.msra.gmra.mxu0 %vm532_vm2, %v3262_v31 }
0x192d   :  { %15486 = vmatpush3.xpose.msk.msra.mxu0 %vm532_vm2, %v3415_v30  ;;  %v15474_v32 = vpop.f32.mrf.mxu1  ;;  %15487 = vmatprep.mubr.msk.f32.mxu0 %vm16910_vm1, %v16909_v10 }
0x192e   :  { %15495 = vmatprep.subr.mxu0 %v16909_v10 }
0x1930   :  { %15488 = vmatmul.mubr.msk.f32.vlgmr.msra.gmra.mxu0 %vm532_vm2, %v3413_v33 }
0x1931   :  { %15497 = vmatprep.mubr.msk.f32.mxu0 %vm16910_vm1, %v16909_v10  ;;  %15496 = vmatpush3.msra.mxu0 %v17584_v60 }
0x1932   :  { %15505 = vmatprep.subr.mxu0 %v16909_v10 }
0x19e1   :  { %v3408_v34 = vpop.f32.mrf.mxu1 }
0x19e3   :  { %v15484_v35 = vpop.f32.mrf.mxu1 }
0x19ec   :  { %v3335_v36 = vpop.f32.mrf.mxu0 }
0x19ed   :  { %v3409_v37 = vadd.f32 %v3408_v34, %v3335_v36 }
0x19ee   :  { %v15479_v38 = vpop.f32.mrf.mxu0 }
0x19f0   :  { %v3486_v15 = vpop.f32.mrf.mxu0 }
0x19f1   :  { %v3490_v39 = vmul.f32 0.35355338, %v3486_v15 }
0x19f2   :  { %v15489_v40 = vpop.f32.mrf.mxu0 }
0x19f3   :  { %v3491_v43 = vadd.f32 %v16547_v41, %v3490_v39 }
0x19f5   :  { %v3492_v44 = vsel %vm532_vm2, %v3491_v43, -inf }
0x19f6   :  { %3493 = vmax.xlane.f32.xlu0 %v3492_v44 }
0x1a0c   :  { %3503 = vrot.lane.b32.xlu0 %v17506_v57, %s16915_s10 }
0x1a10   :  { %3653 = vrot.lane.b32.xlu0 %v17499_v51, %s16916_s15 }
0x1a7f   :  { %v3494_v46 = vpop.xlane.xlu0 %3493 }
0x1a80   :  { %v3495_v47 = vsub.f32 %v3491_v43, %v3494_v46 }
0x1a82   :  { %v3496_v17 = vmul.f32 1.442695, %v3495_v47 }
0x1a83   :  { %v3504_v50 = vpop.permute.xlu0 %3503 }
0x1a84   :  { %16363 = vpow2.f32 %v3496_v17  ;;  %15491 = vmatpush3.msra.mxu1 %v3504_v50 }
0x1a85   :  { %15500 = vmatprep.subr.mxu1 %v16909_v10 }
0x1a87   :  { %v3654_v59 = vpop.permute.xlu0 %3653 }
0x1a91   :  { %v16364_v52 = vpop.eup %16363 }
0x1a92   :  { %v3498_v54 = vsel %vm532_vm2, %v16364_v52, 0.0 }
0x1a93   :  { %3499 = vadd.xlane.f32.xlu1 %v3498_v54 }
0x1aa4   :  { %3655 = vrot.lane.b32.xlu1 %v17506_v57, %s16916_s15 }
0x1b1c   :  { %v3500_v56 = vpop.xlane.xlu1 %3499 }
0x1b1d   :  { %16365 = vrcp.f32 %v3500_v56 }
0x1b20   :  { %v3656_v58 = vpop.permute.xlu1 %3655 }
0x1b2a   :  { %v16366_v45 = vpop.eup %16365 }
0x1b2b   :  { %v3502_v51 = vmul.f32 %v16366_v45, %v16364_v52 }
0x1b2d   :  { %15493 = vmatmul.mubr.msk.f32.vlgmr.msra.gmra.mxu1 %vm532_vm2, %v3502_v51 }
0x1b2e   :  { %15501 = vmatpush3.xpose.msk.msra.mxu1 %vm532_vm2, %v3656_v58  ;;  %15502 = vmatprep.mubr.msk.f32.mxu1 %vm16910_vm1, %v16909_v10 }
0x1b2f   :  { %15510 = vmatprep.subr.mxu1 %v16909_v10 }
0x1b31   :  { %15503 = vmatmul.mubr.msk.f32.vlgmr.msra.gmra.mxu1 %vm532_vm2, %v3654_v59 }
0x1b32   :  { %15512 = vmatprep.mubr.msk.f32.mxu1 %vm16910_vm1, %v16909_v10  ;;  %15511 = vmatpush3.msra.mxu1 %v17620_v21 }
0x1b33   :  { %15520 = vmatprep.subr.mxu1 %v16909_v10 }
0x1bed   :  { %v3575_v61 = vpop.f32.mrf.mxu1 }
0x1bee   :  { %15498 = vmatmul.mubr.msk.f32.vlgmr.msra.gmra.mxu0 %vm532_vm2, %v3575_v61 }
0x1bef   :  { %v15494_v62 = vpop.f32.mrf.mxu1  ;;  %15507 = vmatprep.mubr.msk.f32.mxu0 %vm16910_vm1, %v16909_v10 }
0x1bf1   :  { %v3727_v63 = vpop.f32.mrf.mxu1 }
0x1bf2   :  { %v3731_v0 = vmul.f32 0.35355338, %v3727_v63 }
0x1bf3   :  { %v15504_v1 = vpop.f32.mrf.mxu1 }
0x1bf4   :  { %v3732_v2 = vadd.f32 %v16547_v41, %v3731_v0 }
0x1bf6   :  { %v3733_v3 = vsel %vm532_vm2, %v3732_v2, -inf }
0x1bf7   :  { %3734 = vmax.xlane.f32.xlu1 %v3733_v3 }
0x1c08   :  { %4068 = vrot.lane.b32.xlu1 %v17504_v55, %s16911_s0 }
0x1c0c   :  { %4066 = vrot.lane.b32.xlu1 %v17497_v49, %s16911_s0 }
0x1c80   :  { %v3735_v14 = vpop.xlane.xlu1 %3734 }
0x1c81   :  { %v3736_v4 = vsub.f32 %v3732_v2, %v3735_v14 }
0x1c83   :  { %v3737_v5 = vmul.f32 1.442695, %v3736_v4 }
0x1c84   :  { %v4069_v20 = vpop.permute.xlu1 %4068 }
0x1c85   :  { %16367 = vpow2.f32 %v3737_v5 }
0x1c92   :  { %v16368_v6 = vpop.eup %16367 }
0x1c93   :  { %v3739_v8 = vsel %vm532_vm2, %v16368_v6, 0.0 }
0x1c94   :  { %3740 = vadd.xlane.f32.xlu0 %v3739_v8  ;;  %v16548_v8 = vld [vmem:[%s18831_s5 + $0x8] sm:$0xff]  ;;  %s18852_s5 = sld [smem:[#allocation37_spill]] }
0x1caa   :  { %3744 = vrot.lane.b32.xlu0 %v17506_v57, %s16917_s16  ;;  %v4067_v57 = vpop.permute.xlu1 %4066 }
0x1cae   :  { %v3648_v12 = vpop.f32.mrf.mxu0 }
0x1caf   :  { %v17599_v11 = vadd.f32 %v3648_v12, %v3409_v37 }
0x1cb0   :  { %v15499_v13 = vpop.f32.mrf.mxu0 }
0x1d1d   :  { %v3741_v16 = vpop.xlane.xlu0 %3740 }
0x1d1e   :  { %16369 = vrcp.f32 %v3741_v16 }
0x1d21   :  { %v3745_v7 = vpop.permute.xlu0 %3744 }
0x1d22   :  { %15506 = vmatpush3.msra.mxu0 %v3745_v7 }
0x1d23   :  { %15515 = vmatprep.subr.mxu0 %v16909_v10 }
0x1d2b   :  { %v16370_v24 = vpop.eup %16369 }
0x1d2c   :  { %v3743_v19 = vmul.f32 %v16370_v24, %v16368_v6 }
0x1d2e   :  { %15508 = vmatmul.mubr.msk.f32.vlgmr.msra.gmra.mxu0 %vm532_vm2, %v3743_v19 }
0x1d2f   :  { %15516 = vmatpush3.xpose.msk.msra.mxu0 %vm532_vm2, %v17504_v55  ;;  %15517 = vmatprep.mubr.msk.f32.mxu0 %vm16910_vm1, %v16909_v10 }
0x1d30   :  { %15525 = vmatprep.subr.mxu0 %v16909_v10 }
0x1d32   :  { %15518 = vmatmul.mubr.msk.f32.vlgmr.msra.gmra.mxu0 %vm532_vm2, %v17497_v49 }
0x1d33   :  { %15526 = vmatpush3.xpose.msk.msra.mxu0 %vm532_vm2, %v4069_v20  ;;  %15527 = vmatprep.mubr.msk.f32.mxu0 %vm16910_vm1, %v16909_v10 }
0x1d34   :  { %15535 = vmatprep.subr.mxu0 %v16909_v10 }
0x1d36   :  { %15528 = vmatmul.mubr.msk.f32.vlgmr.msra.gmra.mxu0 %vm532_vm2, %v4067_v57 }
0x1d37   :  { %15536 = vmatpush3.msra.mxu0 %v17550_v28  ;;  %15537 = vmatprep.mubr.msk.f32.mxu0 %vm16910_vm1, %v16909_v10 }
0x1d38   :  { %15545 = vmatprep.subr.mxu0 %v16909_v10 }
0x1dee   :  { %v3816_v18 = vpop.f32.mrf.mxu0 }
0x1def   :  { %15513 = vmatmul.mubr.msk.f32.vlgmr.msra.gmra.mxu1 %vm532_vm2, %v3816_v18 }
0x1df0   :  { %v15509_v22 = vpop.f32.mrf.mxu0  ;;  %15522 = vmatprep.mubr.msk.f32.mxu1 %vm16910_vm1, %v16909_v10 }
0x1df2   :  { %v3973_v23 = vpop.f32.mrf.mxu0 }
0x1df3   :  { %v3977_v25 = vmul.f32 0.35355338, %v3973_v23 }
0x1df4   :  { %v15519_v26 = vpop.f32.mrf.mxu0 }
0x1df5   :  { %v3978_v28 = vadd.f32 %v3977_v25, %v17362_v48  ;;  %v14564_v25 = vld [vmem:[%s18833_s18 + $0x1] ss:$0 sm:$0xff]  ;;  %s18854_s18 = sld [smem:[#allocation59_spill]] }
0x1df6   :  { %v4140_v53 = vpop.f32.mrf.mxu0 }
0x1df7   :  { %v4144_v29 = vmul.f32 0.35355338, %v4140_v53  ;;  %v3979_v30 = vsel %vm532_vm2, %v3978_v28, -inf }
0x1df8   :  { %3980 = vmax.xlane.f32.xlu0 %v3979_v30  ;;  %v15529_v31 = vpop.f32.mrf.mxu0 }
0x1df9   :  { %v4145_v32 = vadd.f32 %v4144_v29, %v17362_v48 }
0x1dfb   :  { %v4146_v33 = vsel %vm532_vm2, %v4145_v32, -inf }
0x1dfc   :  { %4147 = vmax.xlane.f32.xlu1 %v4146_v33 }
0x1e0d   :  { %3990 = vrot.lane.b32.xlu1 %v17504_v55, %s16912_s11 }
0x1e11   :  { %4381 = vrot.lane.b32.xlu1 %v17504_v55, %s16914_s6 }
0x1e15   :  { %4379 = vrot.lane.b32.xlu1 %v17497_v49, %s16914_s6 }
0x1e81   :  { %v3981_v34 = vpop.xlane.xlu0 %3980 }
0x1e82   :  { %v3982_v35 = vsub.f32 %v3978_v28, %v3981_v34 }
0x1e84   :  { %v3983_v36 = vmul.f32 1.442695, %v3982_v35 }
0x1e85   :  { %v4148_v37 = vpop.xlane.xlu1 %4147 }
0x1e86   :  { %16371 = vpow2.f32 %v3983_v36  ;;  %v4149_v38 = vsub.f32 %v4145_v32, %v4148_v37 }
0x1e88   :  { %v4150_v15 = vmul.f32 1.442695, %v4149_v38 }
0x1e89   :  { %v3991_v48 = vpop.permute.xlu1 %3990 }
0x1e8a   :  { %16373 = vpow2.f32 %v4150_v15  ;;  %15521 = vmatpush3.msra.mxu1 %v3991_v48 }
0x1e8b   :  { %15530 = vmatprep.subr.mxu1 %v16909_v10 }
0x1e8d   :  { %v4382_v59 = vpop.permute.xlu1 %4381 }
0x1e93   :  { %v16372_v39 = vpop.eup %16371 }
0x1e94   :  { %v3985_v40 = vsel %vm532_vm2, %v16372_v39, 0.0 }
0x1e95   :  { %3986 = vadd.xlane.f32.xlu0 %v3985_v40 }
0x1e97   :  { %v16374_v41 = vpop.eup %16373 }
0x1e98   :  { %v4152_v43 = vsel %vm532_vm2, %v16374_v41, 0.0 }
0x1e99   :  { %4153 = vadd.xlane.f32.xlu0 %v4152_v43 }
0x1eaf   :  { %4157 = vrot.lane.b32.xlu0 %v17504_v55, %s16913_s4  ;;  %v3889_v44 = vpop.f32.mrf.mxu1 }
0x1eb0   :  { %v17643_v46 = vadd.f32 %v3889_v44, %v17599_v11 }
0x1eb1   :  { %v15514_v47 = vpop.f32.mrf.mxu1 }
0x1eb2   :  { %v3900_v53 = vadd.f32 %v14564_v25, %v17643_v46 }
0x1f1e   :  { %v3987_v17 = vpop.xlane.xlu0 %3986 }
0x1f1f   :  { %16375 = vrcp.f32 %v3987_v17 }
0x1f22   :  { %v4154_v50 = vpop.xlane.xlu0 %4153 }
0x1f23   :  { %16377 = vrcp.f32 %v4154_v50 }
0x1f26   :  { %v4158_v56 = vpop.permute.xlu0 %4157 }
0x1f2c   :  { %v16376_v52 = vpop.eup %16375 }
0x1f2d   :  { %v3989_v54 = vmul.f32 %v16376_v52, %v16372_v39 }
0x1f2f   :  { %15523 = vmatmul.mubr.msk.f32.vlgmr.msra.gmra.mxu1 %vm532_vm2, %v3989_v54 }
0x1f30   :  { %v16378_v45 = vpop.eup %16377  ;;  %15531 = vmatpush3.msra.mxu1 %v4158_v56  ;;  %15532 = vmatprep.mubr.msk.f32.mxu1 %vm16910_vm1, %v16909_v10 }
0x1f31   :  { %v4156_v51 = vmul.f32 %v16378_v45, %v16374_v41  ;;  %15540 = vmatprep.subr.mxu1 %v16909_v10 }
0x1f33   :  { %15533 = vmatmul.mubr.msk.f32.vlgmr.msra.gmra.mxu1 %vm532_vm2, %v4156_v51 }
0x1f34   :  { %15541 = vmatpush3.msra.mxu1 %v17545_v27  ;;  %15542 = vmatprep.mubr.msk.f32.mxu1 %vm16910_vm1, %v16909_v10  ;;  %v4380_v27 = vpop.permute.xlu1 %4379 }
0x1f35   :  { %15550 = vmatprep.subr.mxu1 %v16909_v10 }
0x1fef   :  { %v4062_v58 = vpop.f32.mrf.mxu1 }
0x1ff0   :  { %15543 = vmatmul.mubr.msk.f32.vlgmr.msra.gmra.mxu1 %vm532_vm2, %v4062_v58 }
0x1ff1   :  { %v15524_v61 = vpop.f32.mrf.mxu1  ;;  %15552 = vmatprep.mubr.msk.f32.mxu1 %vm16910_vm1, %v16909_v10 }
0x1ff3   :  { %v4229_v62 = vpop.f32.mrf.mxu1 }
0x1ff4   :  { %15538 = vmatmul.mubr.msk.f32.vlgmr.msra.gmra.mxu0 %vm532_vm2, %v4229_v62 }
0x1ff5   :  { %15546 = vmatpush3.xpose.msk.msra.mxu0 %vm532_vm2, %v4382_v59  ;;  %v15534_v63 = vpop.f32.mrf.mxu1  ;;  %15547 = vmatprep.mubr.msk.f32.mxu0 %vm16910_vm1, %v16909_v10 }
0x1ff6   :  { %15555 = vmatprep.subr.mxu0 %v16909_v10 }
0x1ff8   :  { %15548 = vmatmul.mubr.msk.f32.vlgmr.msra.gmra.mxu0 %vm532_vm2, %v4380_v27 }
0x1ff9   :  { %15556 = vmatpush3.msra.mxu0 %v17584_v60  ;;  %15557 = vmatprep.mubr.msk.f32.mxu0 %vm16910_vm1, %v16909_v10 }
0x1ffa   :  { %15565 = vmatprep.subr.mxu0 %v16909_v10 }
0x20b0   :  { %v4375_v0 = vpop.f32.mrf.mxu1 }
0x20b2   :  { %v15544_v1 = vpop.f32.mrf.mxu1 }
0x20b4   :  { %v4302_v2 = vpop.f32.mrf.mxu0 }
0x20b5   :  { %v4376_v3 = vadd.f32 %v4375_v0, %v4302_v2 }
0x20b6   :  { %v15539_v14 = vpop.f32.mrf.mxu0 }
0x20b7   :  { %v14583_v14 = vld [vmem:[%s18834_s19 + $0x1] ss:$0 sm:$0xff]  ;;  %s18855_s19 = sld [smem:[#allocation60_spill]] }
0x20b8   :  { %v4453_v4 = vpop.f32.mrf.mxu0 }
0x20b9   :  { %v4457_v5 = vmul.f32 0.35355338, %v4453_v4  ;;  %v14588_v4 = vld [vmem:[%s18836_s22 + $0x38] sm:$0xff] }
0x20ba   :  { %v15549_v6 = vpop.f32.mrf.mxu0 }
0x20bb   :  { %v4458_v12 = vadd.f32 %v16548_v8, %v4457_v5  ;;  %v14587_v5 = vld [vmem:[%s18836_s22 + $0x30] sm:$0xff] }
0x20bd   :  { %v4459_v11 = vsel %vm532_vm2, %v4458_v12, -inf }
0x20be   :  { %4460 = vmax.xlane.f32.xlu0 %v4459_v11 }
0x20d4   :  { %4470 = vrot.lane.b32.xlu0 %v17504_v55, %s16915_s10 }
0x20d8   :  { %4620 = vrot.lane.b32.xlu0 %v17497_v49, %s16916_s15 }
0x2147   :  { %v4461_v60 = vpop.xlane.xlu0 %4460 }
0x2148   :  { %v4462_v13 = vsub.f32 %v4458_v12, %v4461_v60  ;;  %v14586_v12 = vld [vmem:[%s18836_s22 + $0x28] sm:$0xff]  ;;  %v14585_v60 = vld [vmem:[%s18836_s22 + $0x20] sm:$0xff] }
0x214a   :  { %v4463_v16 = vmul.f32 1.442695, %v4462_v13 }
0x214b   :  { %v4471_v7 = vpop.permute.xlu0 %4470 }
0x214c   :  { %16379 = vpow2.f32 %v4463_v16  ;;  %15551 = vmatpush3.msra.mxu1 %v4471_v7  ;;  %v5161_v16 = vld [vmem:[%s18842_s25 + $0x18] sm:$0xff] }
0x214d   :  { %15560 = vmatprep.subr.mxu1 %v16909_v10  ;;  %v14597_v7 = vld [vmem:[%s18837_s23 + $0x78] sm:$0xff] }
0x214f   :  { %v4621_v22 = vpop.permute.xlu0 %4620 }
0x2159   :  { %v16380_v24 = vpop.eup %16379 }
0x215a   :  { %v4465_v19 = vsel %vm532_vm2, %v16380_v24, 0.0 }
0x215b   :  { %4466 = vadd.xlane.f32.xlu1 %v4465_v19  ;;  %v14595_v19 = vld [vmem:[%s18837_s23 + $0x68] sm:$0xff] }
0x216c   :  { %4622 = vrot.lane.b32.xlu1 %v17504_v55, %s16916_s15 }
0x21e4   :  { %v4467_v20 = vpop.xlane.xlu1 %4466 }
0x21e5   :  { %16381 = vrcp.f32 %v4467_v20  ;;  %v14594_v20 = vld [vmem:[%s18837_s23 + $0x60] sm:$0xff] }
0x21e8   :  { %v4623_v18 = vpop.permute.xlu1 %4622 }
0x21f2   :  { %v16382_v57 = vpop.eup %16381 }
0x21f3   :  { %v4469_v49 = vmul.f32 %v16382_v57, %v16380_v24  ;;  %v14596_v24 = vld [vmem:[%s18837_s23 + $0x70] sm:$0xff] }
0x21f5   :  { %15553 = vmatmul.mubr.msk.f32.vlgmr.msra.gmra.mxu1 %vm532_vm2, %v4469_v49 }
0x21f6   :  { %15561 = vmatpush3.xpose.msk.msra.mxu1 %vm532_vm2, %v4623_v18  ;;  %15562 = vmatprep.mubr.msk.f32.mxu1 %vm16910_vm1, %v16909_v10 }
0x21f7   :  { %15570 = vmatprep.subr.mxu1 %v16909_v10 }
0x21f9   :  { %15563 = vmatmul.mubr.msk.f32.vlgmr.msra.gmra.mxu1 %vm532_vm2, %v4621_v22 }
0x21fa   :  { %15571 = vmatpush3.msra.mxu1 %v17620_v21  ;;  %15572 = vmatprep.mubr.msk.f32.mxu1 %vm16910_vm1, %v16909_v10  ;;  %v4862_v21 = vadd.f32 %v3900_v53, %v17478_v9  ;;  %v5160_v53 = vld [vmem:[%s18842_s25 + $0x10] sm:$0xff] }
0x21fb   :  { %15586 = vmatprep.subr.mxu1 %v14597_v7 }
0x21fc   :  { %v4868_v33 = vsel %vm369_vm0, %v4862_v21, 0.0 }
0x22b5   :  { %v4542_v23 = vpop.f32.mrf.mxu1 }
0x22b6   :  { %15558 = vmatmul.mubr.msk.f32.vlgmr.msra.gmra.mxu0 %vm532_vm2, %v4542_v23 }
0x22b7   :  { %v15554_v26 = vpop.f32.mrf.mxu1  ;;  %15567 = vmatprep.mubr.msk.f32.mxu0 %vm16910_vm1, %v16909_v10 }
0x22b9   :  { %v4694_v28 = vpop.f32.mrf.mxu1 }
0x22ba   :  { %v4698_v29 = vmul.f32 0.35355338, %v4694_v28  ;;  %v17721_v28 = vld [vmem:[%s18843_s3] sm:$0xff] }
0x22bb   :  { %v15564_v30 = vpop.f32.mrf.mxu1 }
0x22bc   :  { %v4699_v31 = vadd.f32 %v16548_v8, %v4698_v29  ;;  %v14584_v8 = vld [vmem:[%s18835_s21 + $0x1] ss:$0 sm:$0xff]  ;;  %v5159_v29 = vld [vmem:[%s18842_s25 + $0x8] sm:$0xff] }
0x22bd   :  { %v5158_v30 = vld [vmem:[%s18842_s25] sm:$0xff] }
0x22be   :  { %v4700_v32 = vsel %vm532_vm2, %v4699_v31, -inf }
0x22bf   :  { %4701 = vmax.xlane.f32.xlu1 %v4700_v32  ;;  %v5166_v32 = vld [vmem:[%s18844_s17 + $0x18] sm:$0xff] }
0x22c3   :  { %4869 = vadd.xlane.f32.xlu1 %v4868_v33  ;;  %v5164_v33 = vld [vmem:[%s18844_s17 + $0x8] sm:$0xff] }
0x2348   :  { %v4702_v34 = vpop.xlane.xlu1 %4701 }
0x2349   :  { %v4703_v35 = vsub.f32 %v4699_v31, %v4702_v34  ;;  %v17731_v31 = vld [vmem:[%s18843_s3 + $0x8] sm:$0xff]  ;;  %v5163_v34 = vld [vmem:[%s18844_s17] sm:$0xff] }
0x234b   :  { %v4704_v36 = vmul.f32 1.442695, %v4703_v35  ;;  %v14593_v35 = vld [vmem:[%s18837_s23 + $0x58] sm:$0xff] }
0x234c   :  { %v4870_v47 = vpop.xlane.xlu1 %4869 }
0x234d   :  { %16383 = vpow2.f32 %v4704_v36  ;;  %v4874_v17 = vmul.f32 0.03125, %v4870_v47  ;;  %v14592_v36 = vld [vmem:[%s18837_s23 + $0x50] sm:$0xff] }
0x234f   :  { %v4876_v54 = vsub.f32 %v4862_v21, %v4874_v17  ;;  %v5165_v21 = vld [vmem:[%s18844_s17 + $0x10] sm:$0xff] }
0x2351   :  { %v4878_v58 = vmul.f32 %v4876_v54, %v4876_v54 }
0x2353   :  { %v4880_v59 = vsel %vm369_vm0, %v4878_v58, 0.0 }
0x235a   :  { %v16384_v37 = vpop.eup %16383 }
0x235b   :  { %v4706_v38 = vsel %vm532_vm2, %v16384_v37, 0.0 }
0x235c   :  { %4707 = vadd.xlane.f32.xlu0 %v4706_v38  ;;  %v14590_v38 = vld [vmem:[%s18837_s23 + $0x40] sm:$0xff] }
0x2372   :  { %4711 = vrot.lane.b32.xlu0 %v17504_v55, %s16917_s16 }
0x2376   :  { %v4615_v15 = vpop.f32.mrf.mxu0 }
0x2377   :  { %v4619_v48 = vadd.f32 %v4615_v15, %v4376_v3  ;;  %v14599_v15 = vld [vmem:[%s18838_s26 + $0x1] ss:$0 sm:$0xff] }
0x2378   :  { %v15559_v39 = vpop.f32.mrf.mxu0 }
0x23e5   :  { %v4708_v40 = vpop.xlane.xlu0 %4707 }
0x23e6   :  { %16385 = vrcp.f32 %v4708_v40 }
0x23e9   :  { %v4712_v9 = vpop.permute.xlu0 %4711 }
0x23ea   :  { %15566 = vmatpush3.msra.mxu0 %v4712_v9 }
0x23eb   :  { %15575 = vmatprep.subr.mxu0 %v14588_v4 }
0x23f3   :  { %v16386_v41 = vpop.eup %16385 }
0x23f4   :  { %v4710_v43 = vmul.f32 %v16386_v41, %v16384_v37  ;;  %v14591_v37 = vld [vmem:[%s18837_s23 + $0x48] sm:$0xff] }
0x23f6   :  { %15568 = vmatmul.mubr.msk.f32.vlgmr.msra.gmra.mxu0 %vm532_vm2, %v4710_v43 }
0x23f7   :  { %15576 = vmatpush3.msra.mxu0 %v14588_v4 }
0x23f8   :  { %15577 = vmatprep.subr.mxu0 %v14587_v5 }
0x23f9   :  { %15578 = vmatpush3.msra.mxu0 %v14587_v5 }
0x23fa   :  { %15579 = vmatprep.subr.mxu0 %v14586_v12 }
0x23fb   :  { %15580 = vmatpush3.msra.mxu0 %v14586_v12 }
0x23fc   :  { %15581 = vmatprep.subr.mxu0 %v14585_v60 }
0x23fd   :  { %15582 = vmatpush3.msra.mxu0 %v14585_v60 }
0x23fe   :  { %15605 = vmatprep.subr.mxu0 %v5161_v16 }
0x24b6   :  { %v4783_v44 = vpop.f32.mrf.mxu0 }
0x24b7   :  { %15573 = vmatmul.mubr.msk.f32.vlgmr.msra.gmra.mxu1 %vm532_vm2, %v4783_v44  ;;  %v14609_v44 = vld [vmem:[%s18845_s28] ss:$0 sm:$0xff] }
0x24b8   :  { %v15569_v46 = vpop.f32.mrf.mxu0  ;;  %15587 = vmatpush3.msra.mxu1 %v14597_v7 }
0x24b9   :  { %15588 = vmatprep.subr.mxu1 %v14596_v24 }
0x24ba   :  { %15589 = vmatpush3.msra.mxu1 %v14596_v24 }
0x24bb   :  { %15590 = vmatprep.subr.mxu1 %v14595_v19 }
0x24bc   :  { %15591 = vmatpush3.msra.mxu1 %v14595_v19 }
0x24bd   :  { %15592 = vmatprep.subr.mxu1 %v14594_v20 }
0x24be   :  { %15593 = vmatpush3.msra.mxu1 %v14594_v20 }
0x24bf   :  { %15594 = vmatprep.subr.mxu1 %v14593_v35 }
0x24c0   :  { %15595 = vmatpush3.msra.mxu1 %v14593_v35 }
0x24c1   :  { %15596 = vmatprep.subr.mxu1 %v14592_v36 }
0x24c2   :  { %15597 = vmatpush3.msra.mxu1 %v14592_v36 }
0x24c3   :  { %15598 = vmatprep.subr.mxu1 %v14591_v37 }
0x24c4   :  { %15599 = vmatpush3.msra.mxu1 %v14591_v37 }
0x24c5   :  { %15600 = vmatprep.subr.mxu1 %v14590_v38 }
0x24c6   :  { %15601 = vmatpush3.msra.mxu1 %v14590_v38 }
0x24c7   :  { %15627 = vmatprep.subr.mxu1 %v16909_v10 }
0x2577   :  { %v4856_v50 = vpop.f32.mrf.mxu1 }
0x2578   :  { %v4860_v52 = vadd.f32 %v4856_v50, %v4619_v48 }
0x2579   :  { %v15574_v55 = vpop.f32.mrf.mxu1 }
0x257a   :  { %v4861_v56 = vadd.f32 %v14564_v25, %v4860_v52  ;;  %v14612_v52 = vld [vmem:[%s18846_s1] ss:$0 sm:$0xff] }
0x257c   :  { %v4863_v45 = vadd.f32 %v4861_v56, %v17482_v42 }
0x257e   :  { %v4871_v51 = vsel %vm369_vm0, %v4863_v45, 0.0 }
0x257f   :  { %4872 = vadd.xlane.f32.xlu1 %v4871_v51 }
0x2583   :  { %4881 = vadd.xlane.f32.xlu1 %v4880_v59 }
0x2608   :  { %v4873_v61 = vpop.xlane.xlu1 %4872 }
0x2609   :  { %v4875_v62 = vmul.f32 0.03125, %v4873_v61 }
0x260b   :  { %v4877_v63 = vsub.f32 %v4863_v45, %v4875_v62 }
0x260c   :  { %v4882_v27 = vpop.xlane.xlu1 %4881 }
0x260d   :  { %v4886_v0 = vmul.f32 0.03125, %v4882_v27  ;;  %v4879_v1 = vmul.f32 %v4877_v63, %v4877_v63 }
0x260f   :  { %v4888_v2 = vadd.f32 1e-05, %v4886_v0  ;;  %v4883_v42 = vsel %vm369_vm0, %v4879_v1, 0.0 }
0x2610   :  { %4884 = vadd.xlane.f32.xlu1 %v4883_v42 }
0x2611   :  { %16387 = vrsqrt.f32 %v4888_v2 }
0x261e   :  { %v16388_v3 = vpop.eup %16387 }
0x261f   :  { %v4892_v6 = vmul.f32 %v16388_v3, %v4876_v54 }
0x2621   :  { %v4900_v11 = vmul.f32 %v14583_v14, %v4892_v6 }
0x2623   :  { %v17709_v13 = vadd.f32 %v14584_v8, %v4900_v11 }
0x2625   :  { %15583 = vmatprep.mubr.msk.f32.mxu0 %vm369_vm0, %v17709_v13 }
0x2699   :  { %v4885_v57 = vpop.xlane.xlu1 %4884 }
0x269a   :  { %v4887_v49 = vmul.f32 0.03125, %v4885_v57 }
0x269c   :  { %v4889_v18 = vadd.f32 1e-05, %v4887_v49 }
0x269e   :  { %16389 = vrsqrt.f32 %v4889_v18 }
0x26ab   :  { %v16390_v22 = vpop.eup %16389 }
0x26ac   :  { %v4893_v23 = vmul.f32 %v16390_v22, %v4877_v63  ;;  %v17787_v63 = vld [vmem:[%s18847_s2] sm:$0xff] }
0x26ae   :  { %v4901_v25 = vmul.f32 %v14583_v14, %v4893_v23 }
0x26b0   :  { %v17718_v26 = vadd.f32 %v14584_v8, %v4901_v25 }
0x26b2   :  { %15584 = vmatmul.mubr.msk.f32.vlgmr.msra.gmra.mxu0 %vm369_vm0, %v17718_v26 }
0x26b3   :  { %15606 = vmatpush3.msra.mxu0 %v5161_v16  ;;  %15613 = vmatprep.mubr.msk.f32.mxu0 %vm369_vm0, %v17721_v28 }
0x26b4   :  { %15607 = vmatprep.subr.mxu0 %v5160_v53 }
0x26b5   :  { %15608 = vmatpush3.msra.mxu0 %v5160_v53 }
0x26b6   :  { %15609 = vmatprep.subr.mxu0 %v5159_v29 }
0x26b7   :  { %15610 = vmatpush3.msra.mxu0 %v5159_v29 }
0x26b8   :  { %15611 = vmatprep.subr.mxu0 %v5158_v30 }
0x26b9   :  { %15612 = vmatpush3.msra.mxu0 %v5158_v30  ;;  %v17812_v30 = vld [vmem:[%s18848_s20] sm:$0xff] }
0x26ba   :  { %15614 = vmatmul.mubr.msk.f32.vlgmr.msra.gmra.mxu0 %vm369_vm0, %v17731_v31  ;;  %15616 = vmatprep.subr.mxu0 %v5166_v32 }
0x26bb   :  { %15617 = vmatpush3.msra.mxu0 %v5166_v32  ;;  %15624 = vmatprep.mubr.msk.f32.mxu0 %vm369_vm0, %v17721_v28  ;;  %v17817_v32 = vld [vmem:[%s18848_s20 + $0x8] sm:$0xff] }
0x26bc   :  { %15618 = vmatprep.subr.mxu0 %v5165_v21 }
0x26bd   :  { %15619 = vmatpush3.msra.mxu0 %v5165_v21 }
0x26be   :  { %15620 = vmatprep.subr.mxu0 %v5164_v33 }
0x26bf   :  { %15621 = vmatpush3.msra.mxu0 %v5164_v33 }
0x26c0   :  { %15622 = vmatprep.subr.mxu0 %v5163_v34 }
0x26c1   :  { %15623 = vmatpush3.msra.mxu0 %v5163_v34 }
0x26c2   :  { %15625 = vmatmul.mubr.msk.f32.vlgmr.msra.gmra.mxu0 %vm369_vm0, %v17731_v31  ;;  %15637 = vmatprep.subr.mxu0 %v16909_v10 }
0x26c3   :  { %15639 = vmatprep.mubr.msk.f32.mxu0 %vm16910_vm1, %v16909_v10 }
0x2772   :  { %v15585_v48 = vpop.f32.mrf.mxu0 }
0x2773   :  { %v5012_v39 = vadd.f32 %v15585_v48, %v14599_v15 }
0x2774   :  { %v5006_v40 = vpop.f32.mrf.mxu0 }
0x2775   :  { %v5007_v9 = vadd.f32 %v14599_v15, %v5006_v40  ;;  %v5016_v43 = vmax.f32 %v5012_v39, 0.0 }
0x2777   :  { %v5015_v41 = vmax.f32 %v5007_v9, 0.0 }
0x2779   :  { %15602 = vmatprep.mubr.msk.f32.mxu1 %vm2617_vm3, %v5015_v41 }
0x277a   :  { %v15615_v46 = vpop.f32.mrf.mxu0  ;;  %15603 = vmatmul.mubr.msk.f32.vlgmr.msra.gmra.mxu1 %vm2617_vm3, %v5016_v43 }
0x277b   :  { %v17755_v47 = vadd.f32 %v15615_v46, %v14609_v44  ;;  %15629 = vmatprep.mubr.msk.f32.mxu1 %vm16910_vm1, %v16909_v10 }
0x277c   :  { %v5251_v17 = vpop.f32.mrf.mxu0 }
0x277d   :  { %v17759_v50 = vadd.f32 %v14609_v44, %v5251_v17 }
0x277f   :  { %5506 = vrot.lane.b32.xlu0 %v17759_v50, %s16911_s0 }
0x2782   :  { %v15626_v55 = vpop.f32.mrf.mxu0 }
0x2783   :  { %v17764_v54 = vadd.f32 %v15626_v55, %v14612_v52 }
0x2784   :  { %v5332_v56 = vpop.f32.mrf.mxu0 }
0x2785   :  { %v17766_v45 = vadd.f32 %v14612_v52, %v5332_v56 }
0x2787   :  { %5508 = vrot.lane.b32.xlu1 %v17766_v45, %s16911_s0  ;;  %15628 = vmatpush3.xpose.msk.msra.mxu1 %vm532_vm2, %v17766_v45 }
0x2788   :  { %15632 = vmatprep.subr.mxu1 %v16909_v10 }
0x278a   :  { %15630 = vmatmul.mubr.msk.f32.vlgmr.msra.gmra.mxu1 %vm532_vm2, %v17759_v50 }
0x278b   :  { %15634 = vmatprep.mubr.msk.f32.mxu1 %vm16910_vm1, %v16909_v10 }
0x27f1   :  { %v5507_v58 = vpop.permute.xlu0 %5506 }
0x27f9   :  { %v5509_v51 = vpop.permute.xlu1 %5508 }
0x27fa   :  { %15638 = vmatpush3.xpose.msk.msra.mxu0 %vm532_vm2, %v5509_v51 }
0x27fb   :  { %15647 = vmatprep.subr.mxu0 %v16909_v10 }
0x27fd   :  { %15640 = vmatmul.mubr.msk.f32.vlgmr.msra.gmra.mxu0 %vm532_vm2, %v5507_v58 }
0x27fe   :  { %15649 = vmatprep.mubr.msk.f32.mxu0 %vm16910_vm1, %v16909_v10  ;;  %15648 = vmatpush3.msra.mxu0 %v17817_v32 }
0x27ff   :  { %15657 = vmatprep.subr.mxu0 %v16909_v10 }
0x283a   :  { %v17782_v59 = vpop.f32.mrf.mxu1 }
0x283c   :  { %v17784_v61 = vpop.f32.mrf.mxu1 }
0x284a   :  { %v5413_v62 = vpop.f32.mrf.mxu1 }
0x284b   :  { %v5417_v27 = vmul.f32 0.35355338, %v5413_v62 }
0x284c   :  { %v15631_v0 = vpop.f32.mrf.mxu1 }
0x284d   :  { %v5418_v1 = vadd.f32 %v5417_v27, %v17787_v63 }
0x284f   :  { %v5419_v2 = vsel %vm532_vm2, %v5418_v1, -inf }
0x2850   :  { %5420 = vmax.xlane.f32.xlu0 %v5419_v2  ;;  %v17851_v2 = vld [vmem:[%s18848_s20 + $0x10] sm:$0xff] }
0x28bd   :  { %v5580_v42 = vpop.f32.mrf.mxu0 }
0x28be   :  { %v5584_v3 = vmul.f32 0.35355338, %v5580_v42 }
0x28bf   :  { %v15641_v14 = vpop.f32.mrf.mxu0 }
0x28c0   :  { %v5585_v4 = vadd.f32 %v5584_v3, %v17787_v63 }
0x28c2   :  { %v5586_v5 = vsel %vm532_vm2, %v5585_v4, -inf }
0x28c3   :  { %5587 = vmax.xlane.f32.xlu1 %v5586_v5 }
0x28d4   :  { %5597 = vrot.lane.b32.xlu1 %v17766_v45, %s16913_s4 }
0x28d8   :  { %5819 = vrot.lane.b32.xlu1 %v17759_v50, %s16914_s6 }
0x28d9   :  { %v5421_v6 = vpop.xlane.xlu0 %5420 }
0x28da   :  { %v5422_v8 = vsub.f32 %v5418_v1, %v5421_v6 }
0x28dc   :  { %v5423_v12 = vmul.f32 1.442695, %v5422_v8 }
0x28de   :  { %16391 = vpow2.f32 %v5423_v12 }
0x28eb   :  { %v16392_v11 = vpop.eup %16391 }
0x28ec   :  { %v5425_v60 = vsel %vm532_vm2, %v16392_v11, 0.0 }
0x28ed   :  { %5426 = vadd.xlane.f32.xlu0 %v5425_v60 }
0x294c   :  { %v5588_v16 = vpop.xlane.xlu1 %5587 }
0x294d   :  { %v5589_v7 = vsub.f32 %v5585_v4, %v5588_v16 }
0x294f   :  { %v5590_v24 = vmul.f32 1.442695, %v5589_v7 }
0x2950   :  { %v5598_v25 = vpop.permute.xlu1 %5597 }
0x2951   :  { %16393 = vpow2.f32 %v5590_v24 }
0x2954   :  { %v5820_v37 = vpop.permute.xlu1 %5819 }
0x295e   :  { %v16394_v19 = vpop.eup %16393 }
0x295f   :  { %v5592_v20 = vsel %vm532_vm2, %v16394_v19, 0.0 }
0x2960   :  { %5593 = vadd.xlane.f32.xlu0 %v5592_v20 }
0x2976   :  { %5430 = vrot.lane.b32.xlu0 %v17766_v45, %s16912_s11  ;;  %v5427_v57 = vpop.xlane.xlu0 %5426 }
0x2977   :  { %16395 = vrcp.f32 %v5427_v57 }
0x297a   :  { %5821 = vrot.lane.b32.xlu0 %v17766_v45, %s16914_s6 }
0x2984   :  { %v16396_v18 = vpop.eup %16395 }
0x2985   :  { %v5429_v23 = vmul.f32 %v16396_v18, %v16392_v11 }
0x29e9   :  { %v5594_v49 = vpop.xlane.xlu0 %5593 }
0x29ea   :  { %16397 = vrcp.f32 %v5594_v49 }
0x29ed   :  { %v5431_v22 = vpop.permute.xlu0 %5430 }
0x29ee   :  { %15633 = vmatpush3.msra.mxu1 %v5431_v22 }
0x29ef   :  { %15635 = vmatmul.mubr.msk.f32.vlgmr.msra.gmra.mxu1 %vm532_vm2, %v5429_v23  ;;  %15642 = vmatprep.subr.mxu1 %v16909_v10  ;;  %v17888_v23 = vld [vmem:[%s18848_s20 + $0x18] sm:$0xff] }
0x29f0   :  { %15643 = vmatpush3.msra.mxu1 %v5598_v25  ;;  %15644 = vmatprep.mubr.msk.f32.mxu1 %vm16910_vm1, %v16909_v10 }
0x29f1   :  { %15652 = vmatprep.subr.mxu1 %v16909_v10  ;;  %v5822_v35 = vpop.permute.xlu0 %5821 }
0x29f7   :  { %v16398_v53 = vpop.eup %16397 }
0x29f8   :  { %v5596_v29 = vmul.f32 %v16398_v53, %v16394_v19 }
0x29fa   :  { %15645 = vmatmul.mubr.msk.f32.vlgmr.msra.gmra.mxu1 %vm532_vm2, %v5596_v29 }
0x29fb   :  { %15654 = vmatprep.mubr.msk.f32.mxu1 %vm16910_vm1, %v16909_v10  ;;  %15653 = vmatpush3.msra.mxu1 %v17812_v30 }
0x29fc   :  { %15662 = vmatprep.subr.mxu1 %v16909_v10 }
0x2aaf   :  { %v5502_v21 = vpop.f32.mrf.mxu1 }
0x2ab0   :  { %15655 = vmatmul.mubr.msk.f32.vlgmr.msra.gmra.mxu1 %vm532_vm2, %v5502_v21 }
0x2ab1   :  { %v15636_v33 = vpop.f32.mrf.mxu1  ;;  %15664 = vmatprep.mubr.msk.f32.mxu1 %vm16910_vm1, %v16909_v10 }
0x2aba   :  { %v5669_v34 = vpop.f32.mrf.mxu1 }
0x2abb   :  { %15650 = vmatmul.mubr.msk.f32.vlgmr.msra.gmra.mxu0 %vm532_vm2, %v5669_v34 }
0x2abc   :  { %15658 = vmatpush3.xpose.msk.msra.mxu0 %vm532_vm2, %v5822_v35  ;;  %v15646_v36 = vpop.f32.mrf.mxu1  ;;  %15659 = vmatprep.mubr.msk.f32.mxu0 %vm16910_vm1, %v16909_v10 }
0x2abd   :  { %15667 = vmatprep.subr.mxu0 %v16909_v10 }
0x2abf   :  { %15660 = vmatmul.mubr.msk.f32.vlgmr.msra.gmra.mxu0 %vm532_vm2, %v5820_v37 }
0x2ac0   :  { %15669 = vmatprep.mubr.msk.f32.mxu0 %vm16910_vm1, %v16909_v10  ;;  %15668 = vmatpush3.msra.mxu0 %v17851_v2 }
0x2ac1   :  { %15677 = vmatprep.subr.mxu0 %v16909_v10 }
0x2b70   :  { %v5815_v38 = vpop.f32.mrf.mxu1 }
0x2b72   :  { %v15656_v15 = vpop.f32.mrf.mxu1 }
0x2b7b   :  { %v5742_v48 = vpop.f32.mrf.mxu0 }
0x2b7c   :  { %v5816_v39 = vadd.f32 %v5815_v38, %v5742_v48 }
0x2b7d   :  { %v15651_v40 = vpop.f32.mrf.mxu0 }
0x2b7f   :  { %v5893_v9 = vpop.f32.mrf.mxu0 }
0x2b80   :  { %v5897_v41 = vmul.f32 0.35355338, %v5893_v9 }
0x2b81   :  { %v15661_v43 = vpop.f32.mrf.mxu0 }
0x2b82   :  { %v5898_v44 = vadd.f32 %v5897_v41, %v17787_v63 }
0x2b84   :  { %v5899_v46 = vsel %vm532_vm2, %v5898_v44, -inf }
0x2b85   :  { %5900 = vmax.xlane.f32.xlu0 %v5899_v46 }
0x2b9b   :  { %5910 = vrot.lane.b32.xlu0 %v17766_v45, %s16915_s10 }
0x2b9f   :  { %6060 = vrot.lane.b32.xlu0 %v17759_v50, %s16916_s15 }
0x2c0e   :  { %v5901_v17 = vpop.xlane.xlu0 %5900 }
0x2c0f   :  { %v5902_v52 = vsub.f32 %v5898_v44, %v5901_v17 }
0x2c11   :  { %v5903_v55 = vmul.f32 1.442695, %v5902_v52 }
0x2c12   :  { %v5911_v56 = vpop.permute.xlu0 %5910 }
0x2c13   :  { %16399 = vpow2.f32 %v5903_v55  ;;  %15663 = vmatpush3.msra.mxu1 %v5911_v56 }
0x2c14   :  { %15672 = vmatprep.subr.mxu1 %v16909_v10 }
0x2c16   :  { %v6061_v1 = vpop.permute.xlu0 %6060 }
0x2c20   :  { %v16400_v51 = vpop.eup %16399 }
0x2c21   :  { %v5905_v58 = vsel %vm532_vm2, %v16400_v51, 0.0 }
0x2c22   :  { %5906 = vadd.xlane.f32.xlu1 %v5905_v58 }
0x2c33   :  { %6062 = vrot.lane.b32.xlu1 %v17766_v45, %s16916_s15 }
0x2cab   :  { %v5907_v62 = vpop.xlane.xlu1 %5906 }
0x2cac   :  { %16401 = vrcp.f32 %v5907_v62 }
0x2caf   :  { %v6063_v0 = vpop.permute.xlu1 %6062 }
0x2cb9   :  { %v16402_v27 = vpop.eup %16401 }
0x2cba   :  { %v5909_v50 = vmul.f32 %v16402_v27, %v16400_v51 }
0x2cbc   :  { %15665 = vmatmul.mubr.msk.f32.vlgmr.msra.gmra.mxu1 %vm532_vm2, %v5909_v50 }
0x2cbd   :  { %15673 = vmatpush3.xpose.msk.msra.mxu1 %vm532_vm2, %v6063_v0  ;;  %15674 = vmatprep.mubr.msk.f32.mxu1 %vm16910_vm1, %v16909_v10 }
0x2cbe   :  { %15682 = vmatprep.subr.mxu1 %v16909_v10 }
0x2cc0   :  { %15675 = vmatmul.mubr.msk.f32.vlgmr.msra.gmra.mxu1 %vm532_vm2, %v6061_v1 }
0x2cc1   :  { %15684 = vmatprep.mubr.msk.f32.mxu1 %vm16910_vm1, %v16909_v10  ;;  %15683 = vmatpush3.msra.mxu1 %v17888_v23 }
0x2cc2   :  { %15692 = vmatprep.subr.mxu1 %v16909_v10 }
0x2d7c   :  { %v5982_v42 = vpop.f32.mrf.mxu1 }
0x2d7d   :  { %15670 = vmatmul.mubr.msk.f32.vlgmr.msra.gmra.mxu0 %vm532_vm2, %v5982_v42 }
0x2d7e   :  { %v15666_v3 = vpop.f32.mrf.mxu1  ;;  %15679 = vmatprep.mubr.msk.f32.mxu0 %vm16910_vm1, %v16909_v10 }
0x2d80   :  { %v6134_v14 = vpop.f32.mrf.mxu1 }
0x2d81   :  { %v6138_v4 = vmul.f32 0.35355338, %v6134_v14 }
0x2d82   :  { %v15676_v5 = vpop.f32.mrf.mxu1 }
0x2d83   :  { %v6139_v6 = vadd.f32 %v6138_v4, %v17787_v63 }
0x2d85   :  { %v6140_v8 = vsel %vm532_vm2, %v6139_v6, -inf }
0x2d86   :  { %6141 = vmax.xlane.f32.xlu1 %v6140_v8 }
0x2d97   :  { %6475 = vrot.lane.b32.xlu1 %v17764_v54, %s16911_s0 }
0x2d9b   :  { %6473 = vrot.lane.b32.xlu1 %v17755_v47, %s16911_s0 }
0x2e0f   :  { %v6142_v12 = vpop.xlane.xlu1 %6141 }
0x2e10   :  { %v6143_v11 = vsub.f32 %v6139_v6, %v6142_v12 }
0x2e12   :  { %v6144_v60 = vmul.f32 1.442695, %v6143_v11 }
0x2e13   :  { %v6476_v22 = vpop.permute.xlu1 %6475 }
0x2e14   :  { %16403 = vpow2.f32 %v6144_v60 }
0x2e21   :  { %v16404_v16 = vpop.eup %16403 }
0x2e22   :  { %v6146_v7 = vsel %vm532_vm2, %v16404_v16, 0.0 }
0x2e23   :  { %6147 = vadd.xlane.f32.xlu0 %v6146_v7 }
0x2e39   :  { %6151 = vrot.lane.b32.xlu0 %v17766_v45, %s16917_s16  ;;  %v6474_v45 = vpop.permute.xlu1 %6473 }
0x2e3d   :  { %v6055_v63 = vpop.f32.mrf.mxu0 }
0x2e3e   :  { %v17867_v24 = vadd.f32 %v6055_v63, %v5816_v39 }
0x2e3f   :  { %v15671_v19 = vpop.f32.mrf.mxu0 }
0x2eac   :  { %v6148_v20 = vpop.xlane.xlu0 %6147 }
0x2ead   :  { %16405 = vrcp.f32 %v6148_v20 }
0x2eb0   :  { %v6152_v57 = vpop.permute.xlu0 %6151 }
0x2eb1   :  { %15678 = vmatpush3.msra.mxu0 %v6152_v57 }
0x2eb2   :  { %15687 = vmatprep.subr.mxu0 %v16909_v10 }
0x2eba   :  { %v16406_v49 = vpop.eup %16405 }
0x2ebb   :  { %v6150_v18 = vmul.f32 %v16406_v49, %v16404_v16 }
0x2ebd   :  { %15680 = vmatmul.mubr.msk.f32.vlgmr.msra.gmra.mxu0 %vm532_vm2, %v6150_v18 }
0x2ebe   :  { %15688 = vmatpush3.xpose.msk.msra.mxu0 %vm532_vm2, %v17764_v54  ;;  %15689 = vmatprep.mubr.msk.f32.mxu0 %vm16910_vm1, %v16909_v10 }
0x2ebf   :  { %15697 = vmatprep.subr.mxu0 %v16909_v10 }
0x2ec1   :  { %15690 = vmatmul.mubr.msk.f32.vlgmr.msra.gmra.mxu0 %vm532_vm2, %v17755_v47 }
0x2ec2   :  { %15698 = vmatpush3.xpose.msk.msra.mxu0 %vm532_vm2, %v6476_v22  ;;  %15699 = vmatprep.mubr.msk.f32.mxu0 %vm16910_vm1, %v16909_v10 }
0x2ec3   :  { %15707 = vmatprep.subr.mxu0 %v16909_v10 }
0x2ec5   :  { %15700 = vmatmul.mubr.msk.f32.vlgmr.msra.gmra.mxu0 %vm532_vm2, %v6474_v45 }
0x2ec6   :  { %15708 = vmatpush3.msra.mxu0 %v17817_v32  ;;  %15709 = vmatprep.mubr.msk.f32.mxu0 %vm16910_vm1, %v16909_v10  ;;  %v17896_v32 = vld [vmem:[%s18847_s2 + $0x8] sm:$0xff] }
0x2ec7   :  { %15717 = vmatprep.subr.mxu0 %v16909_v10 }
0x2f7d   :  { %v6223_v25 = vpop.f32.mrf.mxu0 }
0x2f7e   :  { %15685 = vmatmul.mubr.msk.f32.vlgmr.msra.gmra.mxu1 %vm532_vm2, %v6223_v25 }
0x2f7f   :  { %v15681_v53 = vpop.f32.mrf.mxu0  ;;  %15694 = vmatprep.mubr.msk.f32.mxu1 %vm16910_vm1, %v16909_v10 }
0x2f81   :  { %v6380_v29 = vpop.f32.mrf.mxu0 }
0x2f82   :  { %v6384_v21 = vmul.f32 0.35355338, %v6380_v29 }
0x2f83   :  { %v15691_v33 = vpop.f32.mrf.mxu0 }
0x2f84   :  { %v6385_v34 = vadd.f32 %v6384_v21, %v17896_v32 }
0x2f85   :  { %v6547_v35 = vpop.f32.mrf.mxu0 }
0x2f86   :  { %v6551_v36 = vmul.f32 0.35355338, %v6547_v35  ;;  %v6386_v37 = vsel %vm532_vm2, %v6385_v34, -inf }
0x2f87   :  { %6387 = vmax.xlane.f32.xlu0 %v6386_v37  ;;  %v15701_v38 = vpop.f32.mrf.mxu0  ;;  %v14602_v37 = vld [vmem:[%s18839_s9 + $0x1] ss:$0 sm:$0xff] }
0x2f88   :  { %v6552_v15 = vadd.f32 %v6551_v36, %v17896_v32 }
0x2f8a   :  { %v6553_v48 = vsel %vm532_vm2, %v6552_v15, -inf }
0x2f8b   :  { %6554 = vmax.xlane.f32.xlu1 %v6553_v48 }
0x2f9c   :  { %6397 = vrot.lane.b32.xlu1 %v17764_v54, %s16912_s11 }
0x2fa0   :  { %6788 = vrot.lane.b32.xlu1 %v17764_v54, %s16914_s6 }
0x2fa4   :  { %6786 = vrot.lane.b32.xlu1 %v17755_v47, %s16914_s6 }
0x3010   :  { %v6388_v39 = vpop.xlane.xlu0 %6387 }
0x3011   :  { %v6389_v40 = vsub.f32 %v6385_v34, %v6388_v39 }
0x3013   :  { %v6390_v9 = vmul.f32 1.442695, %v6389_v40 }
0x3014   :  { %v6555_v41 = vpop.xlane.xlu1 %6554 }
0x3015   :  { %16407 = vpow2.f32 %v6390_v9  ;;  %v6556_v43 = vsub.f32 %v6552_v15, %v6555_v41  ;;  %v5096_v15 = vadd.f32 %v14602_v37, %v17784_v61 }
0x3017   :  { %v6557_v44 = vmul.f32 1.442695, %v6556_v43  ;;  %v5104_v9 = vadd.f32 %v5096_v15, %v17709_v13  ;;  %v14631_v43 = vld [vmem:[%s18849_s30] ss:$0 sm:$0xff] }
0x3018   :  { %v6398_v46 = vpop.permute.xlu1 %6397 }
0x3019   :  { %16409 = vpow2.f32 %v6557_v44  ;;  %15693 = vmatpush3.msra.mxu1 %v6398_v46 }
0x301a   :  { %15702 = vmatprep.subr.mxu1 %v16909_v10 }
0x301c   :  { %v6789_v5 = vpop.permute.xlu1 %6788 }
0x3022   :  { %v16408_v17 = vpop.eup %16407 }
0x3023   :  { %v6392_v52 = vsel %vm532_vm2, %v16408_v17, 0.0 }
0x3024   :  { %6393 = vadd.xlane.f32.xlu0 %v6392_v52 }
0x3026   :  { %v16410_v55 = vpop.eup %16409 }
0x3027   :  { %v6559_v56 = vsel %vm532_vm2, %v16410_v55, 0.0 }
0x3028   :  { %6560 = vadd.xlane.f32.xlu0 %v6559_v56 }
0x303e   :  { %6564 = vrot.lane.b32.xlu0 %v17764_v54, %s16913_s4  ;;  %v6296_v51 = vpop.f32.mrf.mxu1 }
0x303f   :  { %v17914_v58 = vadd.f32 %v6296_v51, %v17867_v24 }
0x3040   :  { %v15686_v62 = vpop.f32.mrf.mxu1 }
0x3041   :  { %v6307_v46 = vadd.f32 %v14631_v43, %v17914_v58 }
0x3043   :  { %v7269_v52 = vadd.f32 %v6307_v46, %v17721_v28 }
0x30ad   :  { %v6394_v27 = vpop.xlane.xlu0 %6393 }
0x30ae   :  { %16411 = vrcp.f32 %v6394_v27 }
0x30b1   :  { %v6561_v50 = vpop.xlane.xlu0 %6560 }
0x30b2   :  { %16413 = vrcp.f32 %v6561_v50 }
0x30b5   :  { %v6565_v42 = vpop.permute.xlu0 %6564 }
0x30bb   :  { %v16412_v0 = vpop.eup %16411 }
0x30bc   :  { %v6396_v1 = vmul.f32 %v16412_v0, %v16408_v17  ;;  %v5110_v17 = vsel %vm369_vm0, %v5104_v9, 0.0 }
0x30be   :  { %15695 = vmatmul.mubr.msk.f32.vlgmr.msra.gmra.mxu1 %vm532_vm2, %v6396_v1 }
0x30bf   :  { %v16414_v3 = vpop.eup %16413  ;;  %15703 = vmatpush3.msra.mxu1 %v6565_v42  ;;  %15704 = vmatprep.mubr.msk.f32.mxu1 %vm16910_vm1, %v16909_v10 }
0x30c0   :  { %v6563_v14 = vmul.f32 %v16414_v3, %v16410_v55  ;;  %15712 = vmatprep.subr.mxu1 %v16909_v10 }
0x30c2   :  { %15705 = vmatmul.mubr.msk.f32.vlgmr.msra.gmra.mxu1 %vm532_vm2, %v6563_v14 }
0x30c3   :  { %15713 = vmatpush3.msra.mxu1 %v17812_v30  ;;  %15714 = vmatprep.mubr.msk.f32.mxu1 %vm16910_vm1, %v16909_v10  ;;  %v6787_v30 = vpop.permute.xlu1 %6786 }
0x30c4   :  { %15722 = vmatprep.subr.mxu1 %v16909_v10 }
0x317e   :  { %v6469_v4 = vpop.f32.mrf.mxu1 }
0x317f   :  { %15715 = vmatmul.mubr.msk.f32.vlgmr.msra.gmra.mxu1 %vm532_vm2, %v6469_v4 }
0x3180   :  { %v15696_v6 = vpop.f32.mrf.mxu1  ;;  %15724 = vmatprep.mubr.msk.f32.mxu1 %vm16910_vm1, %v16909_v10 }
0x3182   :  { %v6636_v8 = vpop.f32.mrf.mxu1 }
0x3183   :  { %15710 = vmatmul.mubr.msk.f32.vlgmr.msra.gmra.mxu0 %vm532_vm2, %v6636_v8 }
0x3184   :  { %15718 = vmatpush3.xpose.msk.msra.mxu0 %vm532_vm2, %v6789_v5  ;;  %v15706_v12 = vpop.f32.mrf.mxu1  ;;  %15719 = vmatprep.mubr.msk.f32.mxu0 %vm16910_vm1, %v16909_v10 }
0x3185   :  { %15727 = vmatprep.subr.mxu0 %v16909_v10 }
0x3187   :  { %15720 = vmatmul.mubr.msk.f32.vlgmr.msra.gmra.mxu0 %vm532_vm2, %v6787_v30 }
0x3188   :  { %15728 = vmatpush3.msra.mxu0 %v17851_v2  ;;  %15729 = vmatprep.mubr.msk.f32.mxu0 %vm16910_vm1, %v16909_v10 }
0x3189   :  { %15737 = vmatprep.subr.mxu0 %v16909_v10 }
0x323f   :  { %v6782_v11 = vpop.f32.mrf.mxu1 }
0x3241   :  { %v15716_v60 = vpop.f32.mrf.mxu1 }
0x3243   :  { %v6709_v16 = vpop.f32.mrf.mxu0 }
0x3244   :  { %v17938_v7 = vadd.f32 %v6782_v11, %v6709_v16  ;;  %v17981_v11 = vld [vmem:[#allocation8] ss:$0 sm:$0xff]  ;;  %v17983_v16 = vld [vmem:[#allocation10] ss:$0 sm:$0xff] }
0x3245   :  { %v15711_v63 = vpop.f32.mrf.mxu0 }
0x3247   :  { %v6860_v24 = vpop.f32.mrf.mxu0 }
0x3248   :  { %v6864_v19 = vmul.f32 0.35355338, %v6860_v24 }
0x3249   :  { %v15721_v20 = vpop.f32.mrf.mxu0 }
0x324a   :  { %v6865_v57 = vadd.f32 %v6864_v19, %v17896_v32 }
0x324c   :  { %v6866_v49 = vsel %vm532_vm2, %v6865_v57, -inf }
0x324d   :  { %6867 = vmax.xlane.f32.xlu0 %v6866_v49 }
0x3263   :  { %6877 = vrot.lane.b32.xlu0 %v17764_v54, %s16915_s10 }
0x3267   :  { %7027 = vrot.lane.b32.xlu0 %v17755_v47, %s16916_s15 }
0x32d6   :  { %v6868_v2 = vpop.xlane.xlu0 %6867 }
0x32d7   :  { %v6869_v18 = vsub.f32 %v6865_v57, %v6868_v2 }
0x32d9   :  { %v6870_v22 = vmul.f32 1.442695, %v6869_v18 }
0x32da   :  { %v6878_v45 = vpop.permute.xlu0 %6877 }
0x32db   :  { %16415 = vpow2.f32 %v6870_v22  ;;  %15723 = vmatpush3.msra.mxu1 %v6878_v45 }
0x32dc   :  { %15732 = vmatprep.subr.mxu1 %v16909_v10 }
0x32de   :  { %v7028_v34 = vpop.permute.xlu0 %7027 }
0x32e8   :  { %v16416_v25 = vpop.eup %16415 }
0x32e9   :  { %v6872_v53 = vsel %vm532_vm2, %v16416_v25, 0.0 }
0x32ea   :  { %6873 = vadd.xlane.f32.xlu1 %v6872_v53 }
0x32fb   :  { %7029 = vrot.lane.b32.xlu1 %v17764_v54, %s16916_s15 }
0x3373   :  { %v6874_v29 = vpop.xlane.xlu1 %6873 }
0x3374   :  { %16417 = vrcp.f32 %v6874_v29 }
0x3377   :  { %v7030_v33 = vpop.permute.xlu1 %7029 }
0x3381   :  { %v16418_v21 = vpop.eup %16417 }
0x3382   :  { %v6876_v47 = vmul.f32 %v16418_v21, %v16416_v25 }
0x3384   :  { %15725 = vmatmul.mubr.msk.f32.vlgmr.msra.gmra.mxu1 %vm532_vm2, %v6876_v47 }
0x3385   :  { %15733 = vmatpush3.xpose.msk.msra.mxu1 %vm532_vm2, %v7030_v33  ;;  %15734 = vmatprep.mubr.msk.f32.mxu1 %vm16910_vm1, %v16909_v10 }
0x3386   :  { %15742 = vmatprep.subr.mxu1 %v16909_v10 }
0x3388   :  { %15735 = vmatmul.mubr.msk.f32.vlgmr.msra.gmra.mxu1 %vm532_vm2, %v7028_v34 }
0x3389   :  { %15743 = vmatpush3.msra.mxu1 %v17888_v23  ;;  %15744 = vmatprep.mubr.msk.f32.mxu1 %vm16910_vm1, %v16909_v10  ;;  %v5101_v23 = vadd.f32 %v17782_v59, %v14602_v37  ;;  %v7273_v59 = vsel %vm369_vm0, %v7269_v52, 0.0  ;;  %v7321_v37 = vld [vmem:[%s18850_s13 + $0x8] sm:$0xff] }
0x338b   :  { %v5105_v44 = vadd.f32 %v5101_v23, %v17718_v26 }
0x338d   :  { %v5113_v61 = vsel %vm369_vm0, %v5105_v44, 0.0 }
0x3444   :  { %v6949_v35 = vpop.f32.mrf.mxu1 }
0x3445   :  { %15730 = vmatmul.mubr.msk.f32.vlgmr.msra.gmra.mxu0 %vm532_vm2, %v6949_v35  ;;  %v7323_v35 = vld [vmem:[%s18850_s13 + $0x18] sm:$0xff] }
0x3446   :  { %v15726_v36 = vpop.f32.mrf.mxu1  ;;  %15739 = vmatprep.mubr.msk.f32.mxu0 %vm16910_vm1, %v16909_v10  ;;  %15758 = vmatprep.subr.mxu1 %v7323_v35 }
0x3447   :  { %v7322_v36 = vld [vmem:[%s18850_s13 + $0x10] sm:$0xff] }
0x3448   :  { %v7101_v38 = vpop.f32.mrf.mxu1 }
0x3449   :  { %v7105_v48 = vmul.f32 0.35355338, %v7101_v38 }
0x344a   :  { %v15736_v39 = vpop.f32.mrf.mxu1 }
0x344b   :  { %v7106_v40 = vadd.f32 %v7105_v48, %v17896_v32 }
0x344d   :  { %v7107_v41 = vsel %vm532_vm2, %v7106_v40, -inf }
0x344e   :  { %7108 = vmax.xlane.f32.xlu1 %v7107_v41 }
0x3452   :  { %5111 = vadd.xlane.f32.xlu1 %v5110_v17 }
0x3456   :  { %5114 = vadd.xlane.f32.xlu1 %v5113_v61  ;;  %v14607_v61 = vld [vmem:[%s18840_s27 + $0x1] ss:$0 sm:$0xff] }
0x345a   :  { %7274 = vadd.xlane.f32.xlu1 %v7273_v59  ;;  %v7317_v59 = vld [vmem:[%s18851_s29 + $0x10] sm:$0xff] }
0x34d7   :  { %v7109_v13 = vpop.xlane.xlu1 %7108 }
0x34d8   :  { %v7110_v32 = vsub.f32 %v7106_v40, %v7109_v13 }
0x34da   :  { %v7111_v55 = vmul.f32 1.442695, %v7110_v32  ;;  %v14608_v32 = vld [vmem:[%s18841_s12 + $0x1] ss:$0 sm:$0xff] }
0x34db   :  { %v5112_v51 = vpop.xlane.xlu1 %5111 }
0x34dc   :  { %16419 = vpow2.f32 %v7111_v55  ;;  %v5116_v20 = vmul.f32 0.03125, %v5112_v51  ;;  %v7316_v55 = vld [vmem:[%s18851_s29 + $0x8] sm:$0xff]  ;;  %v7315_v51 = vld [vmem:[%s18851_s29] sm:$0xff] }
0x34de   :  { %v5118_v18 = vsub.f32 %v5104_v9, %v5116_v20  ;;  %v18052_v20 = vld [vmem:[%s18852_s5] sm:$0xff] }
0x34df   :  { %v5115_v27 = vpop.xlane.xlu1 %5114 }
0x34e0   :  { %v5117_v22 = vmul.f32 0.03125, %v5115_v27  ;;  %v5120_v21 = vmul.f32 %v5118_v18, %v5118_v18 }
0x34e2   :  { %v5119_v53 = vsub.f32 %v5105_v44, %v5117_v22  ;;  %v5122_v47 = vsel %vm369_vm0, %v5120_v21, 0.0 }
0x34e3   :  { %v7275_v50 = vpop.xlane.xlu1 %7274 }
0x34e4   :  { %v7279_v0 = vmul.f32 0.03125, %v7275_v50  ;;  %v5121_v33 = vmul.f32 %v5119_v53, %v5119_v53 }
0x34e6   :  { %v7281_v1 = vsub.f32 %v7269_v52, %v7279_v0  ;;  %v5125_v34 = vsel %vm369_vm0, %v5121_v33, 0.0  ;;  %v7318_v52 = vld [vmem:[%s18851_s29 + $0x18] sm:$0xff] }
0x34e8   :  { %v7283_v42 = vmul.f32 %v7281_v1, %v7281_v1 }
0x34e9   :  { %v16420_v56 = vpop.eup %16419 }
0x34ea   :  { %v7113_v26 = vsel %vm532_vm2, %v16420_v56, 0.0  ;;  %v7285_v3 = vsel %vm369_vm0, %v7283_v42, 0.0 }
0x34eb   :  { %7114 = vadd.xlane.f32.xlu0 %v7113_v26 }
0x3501   :  { %7118 = vrot.lane.b32.xlu0 %v17764_v54, %s16917_s16 }
0x3505   :  { %v7022_v58 = vpop.f32.mrf.mxu0 }
0x3506   :  { %v7026_v62 = vadd.f32 %v7022_v58, %v17938_v7 }
0x3507   :  { %v15731_v28 = vpop.f32.mrf.mxu0 }
0x3520   :  { %7286 = vadd.xlane.f32.xlu0 %v7285_v3 }
0x3574   :  { %v7115_v14 = vpop.xlane.xlu0 %7114 }
0x3575   :  { %16421 = vrcp.f32 %v7115_v14 }
0x3578   :  { %v7119_v4 = vpop.permute.xlu0 %7118 }
0x3579   :  { %15738 = vmatpush3.msra.mxu0 %v7119_v4 }
0x357a   :  { %15747 = vmatprep.subr.mxu0 %v7318_v52 }
0x3582   :  { %v16422_v5 = vpop.eup %16421 }
0x3583   :  { %v7117_v6 = vmul.f32 %v16422_v5, %v16420_v56  ;;  %v14653_v5 = vld [vmem:[#allocation5] ss:$0 sm:$0xff] }
0x3585   :  { %15740 = vmatmul.mubr.msk.f32.vlgmr.msra.gmra.mxu0 %vm532_vm2, %v7117_v6 }
0x3586   :  { %15748 = vmatpush3.msra.mxu0 %v7318_v52 }
0x3587   :  { %15749 = vmatprep.subr.mxu0 %v7317_v59 }
0x3588   :  { %15750 = vmatpush3.msra.mxu0 %v7317_v59 }
0x3589   :  { %15751 = vmatprep.subr.mxu0 %v7316_v55 }
0x358a   :  { %15752 = vmatpush3.msra.mxu0 %v7316_v55 }
0x358b   :  { %15753 = vmatprep.subr.mxu0 %v7315_v51 }
0x358c   :  { %15754 = vmatpush3.msra.mxu0 %v7315_v51 }
0x358d   :  { %15769 = vmatprep.subr.mxu0 %v16909_v10 }
0x35a9   :  { %v7287_v54 = vpop.xlane.xlu0 %7286 }
0x35aa   :  { %v7291_v8 = vmul.f32 0.03125, %v7287_v54 }
0x35ac   :  { %v7293_v12 = vadd.f32 1e-05, %v7291_v8 }
0x35ae   :  { %16423 = vrsqrt.f32 %v7293_v12 }
0x35bb   :  { %v16424_v30 = vpop.eup %16423 }
0x35bc   :  { %v7297_v60 = vmul.f32 %v16424_v30, %v7281_v1  ;;  %v14650_v30 = vld [vmem:[#allocation2] ss:$0 sm:$0xff] }
0x35be   :  { %v7305_v7 = vmul.f32 %v17981_v11, %v7297_v60 }
0x35c0   :  { %v17987_v63 = vadd.f32 %v17983_v16, %v7305_v7 }
0x35c2   :  { %15755 = vmatprep.mubr.msk.f32.mxu0 %vm369_vm0, %v17987_v63 }
0x3645   :  { %v7190_v24 = vpop.f32.mrf.mxu0 }
0x3646   :  { %15745 = vmatmul.mubr.msk.f32.vlgmr.msra.gmra.mxu1 %vm532_vm2, %v7190_v24 }
0x3647   :  { %v15741_v19 = vpop.f32.mrf.mxu0  ;;  %15759 = vmatpush3.msra.mxu1 %v7323_v35 }
0x3648   :  { %15760 = vmatprep.subr.mxu1 %v7322_v36 }
0x3649   :  { %15761 = vmatpush3.msra.mxu1 %v7322_v36 }
0x364a   :  { %15762 = vmatprep.subr.mxu1 %v7321_v37 }
0x364b   :  { %15763 = vmatpush3.msra.mxu1 %v7321_v37 }
0x3706   :  { %v7263_v57 = vpop.f32.mrf.mxu1 }
0x3707   :  { %v7267_v49 = vadd.f32 %v7263_v57, %v7026_v62 }
0x3708   :  { %v15746_v2 = vpop.f32.mrf.mxu1 }
0x3709   :  { %v7268_v45 = vadd.f32 %v14631_v43, %v7267_v49 }
0x370b   :  { %v7270_v25 = vadd.f32 %v7268_v45, %v17731_v31  ;;  %v7320_v31 = vld [vmem:[%s18850_s13] sm:$0xff] }
0x370c   :  { %15764 = vmatprep.subr.mxu1 %v7320_v31 }
0x370d   :  { %v7276_v29 = vsel %vm369_vm0, %v7270_v25, 0.0  ;;  %15765 = vmatpush3.msra.mxu1 %v7320_v31 }
0x370e   :  { %7277 = vadd.xlane.f32.xlu1 %v7276_v29  ;;  %15774 = vmatprep.subr.mxu1 %v16909_v10 }
0x3712   :  { %5123 = vadd.xlane.f32.xlu1 %v5122_v47 }
0x3716   :  { %5126 = vadd.xlane.f32.xlu1 %v5125_v34 }
0x3797   :  { %v7278_v38 = vpop.xlane.xlu1 %7277 }
0x3798   :  { %v7280_v15 = vmul.f32 0.03125, %v7278_v38 }
0x379a   :  { %v7282_v48 = vsub.f32 %v7270_v25, %v7280_v15 }
0x379b   :  { %v5124_v39 = vpop.xlane.xlu1 %5123 }
0x379c   :  { %v5128_v40 = vmul.f32 0.03125, %v5124_v39  ;;  %v7284_v23 = vmul.f32 %v7282_v48, %v7282_v48 }
0x379e   :  { %v5130_v9 = vadd.f32 1e-05, %v5128_v40  ;;  %v7288_v41 = vsel %vm369_vm0, %v7284_v23, 0.0 }
0x379f   :  { %7289 = vadd.xlane.f32.xlu1 %v7288_v41  ;;  %v5127_v43 = vpop.xlane.xlu1 %5126 }
0x37a0   :  { %16425 = vrsqrt.f32 %v5130_v9  ;;  %v5129_v44 = vmul.f32 0.03125, %v5127_v43 }
0x37a2   :  { %v5131_v46 = vadd.f32 1e-05, %v5129_v44 }
0x37a4   :  { %16427 = vrsqrt.f32 %v5131_v46 }
0x37ad   :  { %v16426_v17 = vpop.eup %16425 }
0x37ae   :  { %v5134_v13 = vmul.f32 %v16426_v17, %v5118_v18  ;;  %v18077_v17 = vld [vmem:[%s18853_s7] sm:$0xff] }
0x37b0   :  { %v5142_v56 = vmul.f32 %v14607_v61, %v5134_v13 }
0x37b1   :  { %v16428_v26 = vpop.eup %16427 }
0x37b2   :  { %v5135_v58 = vmul.f32 %v16428_v26, %v5119_v53  ;;  %v18008_v62 = vadd.f32 %v14608_v32, %v5142_v56 }
0x37b4   :  { %v5143_v28 = vmul.f32 %v14607_v61, %v5135_v58  ;;  %15766 = vmatprep.mubr.msk.f32.mxu1 %vm369_vm0, %v18008_v62  ;;  %v18081_v61 = vld [vmem:[%s18853_s7 + $0x8] sm:$0xff] }
0x37b6   :  { %v18012_v27 = vadd.f32 %v14608_v32, %v5143_v28 }
0x37b8   :  { %15767 = vmatmul.mubr.msk.f32.vlgmr.msra.gmra.mxu1 %vm369_vm0, %v18012_v27 }
0x37b9   :  { %15776 = vmatprep.mubr.msk.f32.mxu1 %vm16910_vm1, %v16909_v10 }
0x3828   :  { %v7290_v50 = vpop.xlane.xlu1 %7289 }
0x3829   :  { %v7292_v0 = vmul.f32 0.03125, %v7290_v50 }
0x382b   :  { %v7294_v1 = vadd.f32 1e-05, %v7292_v0 }
0x382d   :  { %16429 = vrsqrt.f32 %v7294_v1 }
0x383a   :  { %v16430_v42 = vpop.eup %16429 }
0x383b   :  { %v7298_v3 = vmul.f32 %v16430_v42, %v7282_v48 }
0x383d   :  { %v7306_v14 = vmul.f32 %v17981_v11, %v7298_v3 }
0x383f   :  { %v18021_v4 = vadd.f32 %v17983_v16, %v7306_v14 }
0x3841   :  { %15756 = vmatmul.mubr.msk.f32.vlgmr.msra.gmra.mxu0 %vm369_vm0, %v18021_v4 }
0x3842   :  { %15771 = vmatprep.mubr.msk.f32.mxu0 %vm16910_vm1, %v16909_v10 }
0x3878   :  { %v15768_v6 = vpop.f32.mrf.mxu1 }
0x3879   :  { %v18027_v54 = vadd.f32 %v15768_v6, %v14653_v5 }
0x387a   :  { %v7495_v8 = vpop.f32.mrf.mxu1 }
0x387b   :  { %v18029_v12 = vadd.f32 %v14653_v5, %v7495_v8 }
0x387d   :  { %7671 = vrot.lane.b32.xlu1 %v18029_v12, %s16911_s0  ;;  %15770 = vmatpush3.xpose.msk.msra.mxu0 %vm532_vm2, %v18029_v12 }
0x387e   :  { %15779 = vmatprep.subr.mxu0 %v16909_v10 }
0x38ef   :  { %v7672_v24 = vpop.permute.xlu1 %7671 }
0x3901   :  { %v15757_v11 = vpop.f32.mrf.mxu0 }
0x3902   :  { %v18036_v60 = vadd.f32 %v15757_v11, %v14650_v30 }
0x3903   :  { %v7408_v16 = vpop.f32.mrf.mxu0 }
0x3904   :  { %v18038_v7 = vadd.f32 %v14650_v30, %v7408_v16 }
0x3906   :  { %7669 = vrot.lane.b32.xlu1 %v18038_v7, %s16911_s0  ;;  %15772 = vmatmul.mubr.msk.f32.vlgmr.msra.gmra.mxu0 %vm532_vm2, %v18038_v7 }
0x3907   :  { %15780 = vmatpush3.xpose.msk.msra.mxu0 %vm532_vm2, %v7672_v24  ;;  %15781 = vmatprep.mubr.msk.f32.mxu0 %vm16910_vm1, %v16909_v10 }
0x3908   :  { %15789 = vmatprep.subr.mxu0 %v16909_v10 }
0x3978   :  { %v7670_v19 = vpop.permute.xlu1 %7669 }
0x3979   :  { %15782 = vmatmul.mubr.msk.f32.vlgmr.msra.gmra.mxu0 %vm532_vm2, %v7670_v19 }
0x397a   :  { %15791 = vmatprep.mubr.msk.f32.mxu0 %vm16910_vm1, %v16909_v10  ;;  %15790 = vmatpush3.msra.mxu0 %v18081_v61 }
0x397b   :  { %15799 = vmatprep.subr.mxu0 %v16909_v10 }
0x39c6   :  { %v7576_v57 = vpop.f32.mrf.mxu0 }
0x39c7   :  { %v7580_v49 = vmul.f32 0.35355338, %v7576_v57 }
0x39c8   :  { %v15773_v2 = vpop.f32.mrf.mxu0 }
0x39c9   :  { %v7581_v18 = vadd.f32 %v7580_v49, %v18052_v20  ;;  %v18116_v2 = vld [vmem:[%s18853_s7 + $0x10] sm:$0xff] }
0x39cb   :  { %v7582_v22 = vsel %vm532_vm2, %v7581_v18, -inf }
0x39cc   :  { %7583 = vmax.xlane.f32.xlu1 %v7582_v22 }
0x39dd   :  { %7760 = vrot.lane.b32.xlu1 %v18029_v12, %s16913_s4 }
0x3a39   :  { %v7743_v45 = vpop.f32.mrf.mxu0 }
0x3a3a   :  { %v7747_v25 = vmul.f32 0.35355338, %v7743_v45 }
0x3a3b   :  { %v15783_v53 = vpop.f32.mrf.mxu0 }
0x3a3c   :  { %v7748_v29 = vadd.f32 %v7747_v25, %v18052_v20 }
0x3a3e   :  { %v7749_v21 = vsel %vm532_vm2, %v7748_v29, -inf }
0x3a3f   :  { %7750 = vmax.xlane.f32.xlu0 %v7749_v21 }
0x3a55   :  { %v7584_v47 = vpop.xlane.xlu1 %7583 }
0x3a56   :  { %v7585_v33 = vsub.f32 %v7581_v18, %v7584_v47 }
0x3a58   :  { %v7586_v34 = vmul.f32 1.442695, %v7585_v33 }
0x3a59   :  { %v7761_v43 = vpop.permute.xlu1 %7760 }
0x3a5a   :  { %16431 = vpow2.f32 %v7586_v34 }
0x3a67   :  { %v16432_v35 = vpop.eup %16431 }
0x3a68   :  { %v7588_v36 = vsel %vm532_vm2, %v16432_v35, 0.0 }
0x3a69   :  { %7589 = vadd.xlane.f32.xlu0 %v7588_v36 }
0x3ac8   :  { %v7751_v37 = vpop.xlane.xlu0 %7750 }
0x3ac9   :  { %v7752_v31 = vsub.f32 %v7748_v29, %v7751_v37 }
0x3acb   :  { %v7753_v38 = vmul.f32 1.442695, %v7752_v31 }
0x3acd   :  { %16433 = vpow2.f32 %v7753_v38 }
0x3ada   :  { %v16434_v15 = vpop.eup %16433 }
0x3adb   :  { %v7755_v48 = vsel %vm532_vm2, %v16434_v15, 0.0 }
0x3adc   :  { %7756 = vadd.xlane.f32.xlu0 %v7755_v48 }
0x3af2   :  { %7593 = vrot.lane.b32.xlu0 %v18029_v12, %s16912_s11  ;;  %v7590_v39 = vpop.xlane.xlu0 %7589 }
0x3af3   :  { %16435 = vrcp.f32 %v7590_v39 }
0x3af6   :  { %7984 = vrot.lane.b32.xlu0 %v18029_v12, %s16914_s6 }
0x3afa   :  { %7982 = vrot.lane.b32.xlu0 %v18038_v7, %s16914_s6 }
0x3b00   :  { %v16436_v23 = vpop.eup %16435 }
0x3b01   :  { %v7592_v41 = vmul.f32 %v16436_v23, %v16432_v35  ;;  %v18151_v23 = vld [vmem:[%s18853_s7 + $0x18] sm:$0xff] }
0x3b65   :  { %v7757_v40 = vpop.xlane.xlu0 %7756 }
0x3b66   :  { %16437 = vrcp.f32 %v7757_v40 }
0x3b69   :  { %v7594_v9 = vpop.permute.xlu0 %7593 }
0x3b6a   :  { %15775 = vmatpush3.msra.mxu1 %v7594_v9 }
0x3b6b   :  { %15777 = vmatmul.mubr.msk.f32.vlgmr.msra.gmra.mxu1 %vm532_vm2, %v7592_v41  ;;  %15784 = vmatprep.subr.mxu1 %v16909_v10 }
0x3b6c   :  { %15785 = vmatpush3.msra.mxu1 %v7761_v43  ;;  %15786 = vmatprep.mubr.msk.f32.mxu1 %vm16910_vm1, %v16909_v10  ;;  %v18159_v43 = vld [vmem:[%s18852_s5 + $0x8] sm:$0xff] }
0x3b6d   :  { %15794 = vmatprep.subr.mxu1 %v16909_v10  ;;  %v7985_v13 = vpop.permute.xlu0 %7984 }
0x3b71   :  { %v7983_v56 = vpop.permute.xlu0 %7982 }
0x3b73   :  { %v16438_v44 = vpop.eup %16437 }
0x3b74   :  { %v7759_v46 = vmul.f32 %v16438_v44, %v16434_v15 }
0x3b76   :  { %15787 = vmatmul.mubr.msk.f32.vlgmr.msra.gmra.mxu1 %vm532_vm2, %v7759_v46 }
0x3b77   :  { %15796 = vmatprep.mubr.msk.f32.mxu1 %vm16910_vm1, %v16909_v10  ;;  %15795 = vmatpush3.msra.mxu1 %v18077_v17 }
0x3b78   :  { %15804 = vmatprep.subr.mxu1 %v16909_v10 }
0x3c2b   :  { %v7665_v52 = vpop.f32.mrf.mxu1 }
0x3c2c   :  { %15797 = vmatmul.mubr.msk.f32.vlgmr.msra.gmra.mxu1 %vm532_vm2, %v7665_v52 }
0x3c2d   :  { %v15778_v59 = vpop.f32.mrf.mxu1  ;;  %15806 = vmatprep.mubr.msk.f32.mxu1 %vm16910_vm1, %v16909_v10 }
0x3c36   :  { %v7832_v32 = vpop.f32.mrf.mxu1 }
0x3c37   :  { %15792 = vmatmul.mubr.msk.f32.vlgmr.msra.gmra.mxu0 %vm532_vm2, %v7832_v32 }
0x3c38   :  { %15800 = vmatpush3.xpose.msk.msra.mxu0 %vm532_vm2, %v7985_v13  ;;  %v15788_v55 = vpop.f32.mrf.mxu1  ;;  %15801 = vmatprep.mubr.msk.f32.mxu0 %vm16910_vm1, %v16909_v10 }
0x3c39   :  { %15809 = vmatprep.subr.mxu0 %v16909_v10 }
0x3c3b   :  { %15802 = vmatmul.mubr.msk.f32.vlgmr.msra.gmra.mxu0 %vm532_vm2, %v7983_v56 }
0x3c3c   :  { %15811 = vmatprep.mubr.msk.f32.mxu0 %vm16910_vm1, %v16909_v10  ;;  %15810 = vmatpush3.msra.mxu0 %v18116_v2 }
0x3c3d   :  { %15819 = vmatprep.subr.mxu0 %v16909_v10 }
0x3cec   :  { %v7978_v26 = vpop.f32.mrf.mxu1 }
0x3cee   :  { %v15798_v51 = vpop.f32.mrf.mxu1 }
0x3cf7   :  { %v7905_v58 = vpop.f32.mrf.mxu0 }
0x3cf8   :  { %v7979_v28 = vadd.f32 %v7978_v26, %v7905_v58 }
0x3cf9   :  { %v15793_v50 = vpop.f32.mrf.mxu0 }
0x3cfb   :  { %v8056_v0 = vpop.f32.mrf.mxu0 }
0x3cfc   :  { %v8060_v1 = vmul.f32 0.35355338, %v8056_v0 }
0x3cfd   :  { %v15803_v42 = vpop.f32.mrf.mxu0 }
0x3cfe   :  { %v8061_v3 = vadd.f32 %v8060_v1, %v18052_v20 }
0x3d00   :  { %v8062_v14 = vsel %vm532_vm2, %v8061_v3, -inf }
0x3d01   :  { %8063 = vmax.xlane.f32.xlu0 %v8062_v14 }
0x3d17   :  { %8073 = vrot.lane.b32.xlu0 %v18029_v12, %s16915_s10 }
0x3d1b   :  { %8223 = vrot.lane.b32.xlu0 %v18038_v7, %s16916_s15 }
0x3d8a   :  { %v8064_v5 = vpop.xlane.xlu0 %8063 }
0x3d8b   :  { %v8065_v6 = vsub.f32 %v8061_v3, %v8064_v5 }
0x3d8d   :  { %v8066_v8 = vmul.f32 1.442695, %v8065_v6 }
0x3d8e   :  { %v8074_v30 = vpop.permute.xlu0 %8073 }
0x3d8f   :  { %16439 = vpow2.f32 %v8066_v8  ;;  %15805 = vmatpush3.msra.mxu1 %v8074_v30 }
0x3d90   :  { %15814 = vmatprep.subr.mxu1 %v16909_v10 }
0x3d92   :  { %v8224_v49 = vpop.permute.xlu0 %8223 }
0x3d9c   :  { %v16440_v11 = vpop.eup %16439 }
0x3d9d   :  { %v8068_v16 = vsel %vm532_vm2, %v16440_v11, 0.0 }
0x3d9e   :  { %8069 = vadd.xlane.f32.xlu1 %v8068_v16 }
0x3daf   :  { %8225 = vrot.lane.b32.xlu1 %v18029_v12, %s16916_s15 }
0x3e27   :  { %v8070_v24 = vpop.xlane.xlu1 %8069 }
0x3e28   :  { %16441 = vrcp.f32 %v8070_v24 }
0x3e2b   :  { %v8226_v57 = vpop.permute.xlu1 %8225 }
0x3e35   :  { %v16442_v19 = vpop.eup %16441 }
0x3e36   :  { %v8072_v7 = vmul.f32 %v16442_v19, %v16440_v11 }
0x3e38   :  { %15807 = vmatmul.mubr.msk.f32.vlgmr.msra.gmra.mxu1 %vm532_vm2, %v8072_v7 }
0x3e39   :  { %15815 = vmatpush3.xpose.msk.msra.mxu1 %vm532_vm2, %v8226_v57  ;;  %15816 = vmatprep.mubr.msk.f32.mxu1 %vm16910_vm1, %v16909_v10 }
0x3e3a   :  { %15824 = vmatprep.subr.mxu1 %v16909_v10 }
0x3e3c   :  { %15817 = vmatmul.mubr.msk.f32.vlgmr.msra.gmra.mxu1 %vm532_vm2, %v8224_v49 }
0x3e3d   :  { %15826 = vmatprep.mubr.msk.f32.mxu1 %vm16910_vm1, %v16909_v10  ;;  %15825 = vmatpush3.msra.mxu1 %v18151_v23 }
0x3e3e   :  { %15834 = vmatprep.subr.mxu1 %v16909_v10 }
0x3ef8   :  { %v8145_v18 = vpop.f32.mrf.mxu1 }
0x3ef9   :  { %15812 = vmatmul.mubr.msk.f32.vlgmr.msra.gmra.mxu0 %vm532_vm2, %v8145_v18 }
0x3efa   :  { %v15808_v22 = vpop.f32.mrf.mxu1  ;;  %15821 = vmatprep.mubr.msk.f32.mxu0 %vm16910_vm1, %v16909_v10 }
0x3efc   :  { %v8297_v45 = vpop.f32.mrf.mxu1 }
0x3efd   :  { %v8301_v25 = vmul.f32 0.35355338, %v8297_v45 }
0x3efe   :  { %v15818_v53 = vpop.f32.mrf.mxu1 }
0x3eff   :  { %v8302_v29 = vadd.f32 %v8301_v25, %v18052_v20 }
0x3f01   :  { %v8303_v21 = vsel %vm532_vm2, %v8302_v29, -inf }
0x3f02   :  { %8304 = vmax.xlane.f32.xlu0 %v8303_v21 }
0x3f18   :  { %8314 = vrot.lane.b32.xlu0 %v18029_v12, %s16917_s16 }
0x3f1c   :  { %8636 = vrot.lane.b32.xlu0 %v18036_v60, %s16911_s0 }
0x3f8b   :  { %v8305_v47 = vpop.xlane.xlu0 %8304 }
0x3f8c   :  { %v8306_v33 = vsub.f32 %v8302_v29, %v8305_v47 }
0x3f8e   :  { %v8307_v34 = vmul.f32 1.442695, %v8306_v33 }
0x3f8f   :  { %v8315_v35 = vpop.permute.xlu0 %8314 }
0x3f90   :  { %16443 = vpow2.f32 %v8307_v34  ;;  %15820 = vmatpush3.msra.mxu0 %v8315_v35 }
0x3f91   :  { %15829 = vmatprep.subr.mxu0 %v16909_v10 }
0x3f93   :  { %v8637_v40 = vpop.permute.xlu0 %8636 }
0x3f9d   :  { %v16444_v36 = vpop.eup %16443 }
0x3f9e   :  { %v8309_v20 = vsel %vm532_vm2, %v16444_v36, 0.0 }
0x3f9f   :  { %8310 = vadd.xlane.f32.xlu1 %v8309_v20 }
0x3fb0   :  { %8638 = vrot.lane.b32.xlu1 %v18027_v54, %s16911_s0 }
0x3fb9   :  { %v8218_v37 = vpop.f32.mrf.mxu0 }
0x3fba   :  { %v8222_v12 = vadd.f32 %v8218_v37, %v7979_v28 }
0x3fbb   :  { %v15813_v31 = vpop.f32.mrf.mxu0 }
0x4028   :  { %v8311_v38 = vpop.xlane.xlu1 %8310 }
0x4029   :  { %16445 = vrcp.f32 %v8311_v38 }
0x402c   :  { %v8639_v39 = vpop.permute.xlu1 %8638 }
0x4036   :  { %v16446_v15 = vpop.eup %16445 }
0x4037   :  { %v8313_v48 = vmul.f32 %v16446_v15, %v16444_v36 }
0x4039   :  { %15822 = vmatmul.mubr.msk.f32.vlgmr.msra.gmra.mxu0 %vm532_vm2, %v8313_v48 }
0x403a   :  { %15830 = vmatpush3.xpose.msk.msra.mxu0 %vm532_vm2, %v18027_v54  ;;  %15831 = vmatprep.mubr.msk.f32.mxu0 %vm16910_vm1, %v16909_v10 }
0x403b   :  { %15839 = vmatprep.subr.mxu0 %v16909_v10 }
0x403d   :  { %15832 = vmatmul.mubr.msk.f32.vlgmr.msra.gmra.mxu0 %vm532_vm2, %v18036_v60 }
0x403e   :  { %15840 = vmatpush3.xpose.msk.msra.mxu0 %vm532_vm2, %v8639_v39  ;;  %15841 = vmatprep.mubr.msk.f32.mxu0 %vm16910_vm1, %v16909_v10 }
0x403f   :  { %15849 = vmatprep.subr.mxu0 %v16909_v10 }
0x4041   :  { %15842 = vmatmul.mubr.msk.f32.vlgmr.msra.gmra.mxu0 %vm532_vm2, %v8637_v40 }
0x4042   :  { %15850 = vmatpush3.msra.mxu0 %v18081_v61  ;;  %15851 = vmatprep.mubr.msk.f32.mxu0 %vm16910_vm1, %v16909_v10 }
0x4043   :  { %15859 = vmatprep.subr.mxu0 %v16909_v10 }
0x40f9   :  { %v8386_v9 = vpop.f32.mrf.mxu0 }
0x40fa   :  { %15827 = vmatmul.mubr.msk.f32.vlgmr.msra.gmra.mxu1 %vm532_vm2, %v8386_v9 }
0x40fb   :  { %v15823_v41 = vpop.f32.mrf.mxu0  ;;  %15836 = vmatprep.mubr.msk.f32.mxu1 %vm16910_vm1, %v16909_v10 }
0x40fd   :  { %v8543_v44 = vpop.f32.mrf.mxu0 }
0x40fe   :  { %v8547_v46 = vmul.f32 0.35355338, %v8543_v44 }
0x40ff   :  { %v15833_v61 = vpop.f32.mrf.mxu0 }
0x4100   :  { %v8548_v52 = vadd.f32 %v8547_v46, %v18159_v43 }
0x4101   :  { %v8710_v59 = vpop.f32.mrf.mxu0 }
0x4102   :  { %v8714_v13 = vmul.f32 0.35355338, %v8710_v59  ;;  %v8549_v32 = vsel %vm532_vm2, %v8548_v52, -inf }
0x4103   :  { %8550 = vmax.xlane.f32.xlu0 %v8549_v32  ;;  %v15843_v55 = vpop.f32.mrf.mxu0 }
0x4104   :  { %v8715_v56 = vadd.f32 %v8714_v13, %v18159_v43 }
0x4106   :  { %v8716_v26 = vsel %vm532_vm2, %v8715_v56, -inf }
0x4107   :  { %8717 = vmax.xlane.f32.xlu1 %v8716_v26 }
0x4118   :  { %8560 = vrot.lane.b32.xlu1 %v18027_v54, %s16912_s11 }
0x411c   :  { %8951 = vrot.lane.b32.xlu1 %v18027_v54, %s16914_s6 }
0x4120   :  { %8949 = vrot.lane.b32.xlu1 %v18036_v60, %s16914_s6 }
0x418c   :  { %v8551_v51 = vpop.xlane.xlu0 %8550 }
0x418d   :  { %v8552_v58 = vsub.f32 %v8548_v52, %v8551_v51  ;;  %v14672_v52 = vld [vmem:[#allocation7] ss:$0 sm:$0xff] }
0x418f   :  { %v8553_v28 = vmul.f32 1.442695, %v8552_v58 }
0x4190   :  { %v8718_v50 = vpop.xlane.xlu1 %8717 }
0x4191   :  { %16447 = vpow2.f32 %v8553_v28  ;;  %v8719_v0 = vsub.f32 %v8715_v56, %v8718_v50 }
0x4193   :  { %v8720_v1 = vmul.f32 1.442695, %v8719_v0 }
0x4194   :  { %v8561_v42 = vpop.permute.xlu1 %8560 }
0x4195   :  { %16449 = vpow2.f32 %v8720_v1  ;;  %15835 = vmatpush3.msra.mxu1 %v8561_v42 }
0x4196   :  { %15844 = vmatprep.subr.mxu1 %v16909_v10 }
0x4198   :  { %v8952_v45 = vpop.permute.xlu1 %8951 }
0x419e   :  { %v16448_v3 = vpop.eup %16447 }
0x419f   :  { %v8555_v14 = vsel %vm532_vm2, %v16448_v3, 0.0 }
0x41a0   :  { %8556 = vadd.xlane.f32.xlu0 %v8555_v14 }
0x41a2   :  { %v16450_v5 = vpop.eup %16449 }
0x41a3   :  { %v8722_v6 = vsel %vm532_vm2, %v16450_v5, 0.0 }
0x41a4   :  { %8723 = vadd.xlane.f32.xlu0 %v8722_v6 }
0x41ba   :  { %8727 = vrot.lane.b32.xlu0 %v18027_v54, %s16913_s4  ;;  %v8459_v8 = vpop.f32.mrf.mxu1 }
0x41bb   :  { %v18176_v30 = vadd.f32 %v8459_v8, %v8222_v12 }
0x41bc   :  { %v15828_v11 = vpop.f32.mrf.mxu1 }
0x41bd   :  { %v8470_v32 = vadd.f32 %v14672_v52, %v18176_v30 }
0x41bf   :  { %v9432_v51 = vadd.f32 %v8470_v32, %v17987_v63  ;;  %v9486_v32 = vld [vmem:[%s18855_s19 + $0x18] sm:$0xff] }
0x41c1   :  { %v9436_v58 = vsel %vm369_vm0, %v9432_v51, 0.0 }
0x4229   :  { %v8557_v16 = vpop.xlane.xlu0 %8556 }
0x422a   :  { %16451 = vrcp.f32 %v8557_v16 }
0x422d   :  { %v8724_v24 = vpop.xlane.xlu0 %8723 }
0x422e   :  { %16453 = vrcp.f32 %v8724_v24 }
0x4231   :  { %v8728_v57 = vpop.permute.xlu0 %8727 }
0x4237   :  { %v16452_v19 = vpop.eup %16451 }
0x4238   :  { %v8559_v7 = vmul.f32 %v16452_v19, %v16448_v3 }
0x423a   :  { %15837 = vmatmul.mubr.msk.f32.vlgmr.msra.gmra.mxu1 %vm532_vm2, %v8559_v7 }
0x423b   :  { %v16454_v49 = vpop.eup %16453  ;;  %15845 = vmatpush3.msra.mxu1 %v8728_v57  ;;  %15846 = vmatprep.mubr.msk.f32.mxu1 %vm16910_vm1, %v16909_v10 }
0x423c   :  { %v8726_v18 = vmul.f32 %v16454_v49, %v16450_v5  ;;  %15854 = vmatprep.subr.mxu1 %v16909_v10 }
0x423e   :  { %15847 = vmatmul.mubr.msk.f32.vlgmr.msra.gmra.mxu1 %vm532_vm2, %v8726_v18 }
0x423f   :  { %15855 = vmatpush3.msra.mxu1 %v18077_v17  ;;  %15856 = vmatprep.mubr.msk.f32.mxu1 %vm16910_vm1, %v16909_v10  ;;  %v8950_v17 = vpop.permute.xlu1 %8949 }
0x4240   :  { %15864 = vmatprep.subr.mxu1 %v16909_v10 }
0x42fa   :  { %v8632_v22 = vpop.f32.mrf.mxu1 }
0x42fb   :  { %15857 = vmatmul.mubr.msk.f32.vlgmr.msra.gmra.mxu1 %vm532_vm2, %v8632_v22 }
0x42fc   :  { %v15838_v25 = vpop.f32.mrf.mxu1  ;;  %15866 = vmatprep.mubr.msk.f32.mxu1 %vm16910_vm1, %v16909_v10 }
0x42fe   :  { %v8799_v53 = vpop.f32.mrf.mxu1 }
0x42ff   :  { %15852 = vmatmul.mubr.msk.f32.vlgmr.msra.gmra.mxu0 %vm532_vm2, %v8799_v53 }
0x4300   :  { %15860 = vmatpush3.xpose.msk.msra.mxu0 %vm532_vm2, %v8952_v45  ;;  %v15848_v29 = vpop.f32.mrf.mxu1  ;;  %15861 = vmatprep.mubr.msk.f32.mxu0 %vm16910_vm1, %v16909_v10 }
0x4301   :  { %15869 = vmatprep.subr.mxu0 %v16909_v10 }
0x4303   :  { %15862 = vmatmul.mubr.msk.f32.vlgmr.msra.gmra.mxu0 %vm532_vm2, %v8950_v17 }
0x4304   :  { %15870 = vmatpush3.msra.mxu0 %v18116_v2  ;;  %15871 = vmatprep.mubr.msk.f32.mxu0 %vm16910_vm1, %v16909_v10 }
0x4305   :  { %15879 = vmatprep.subr.mxu0 %v16909_v10 }
0x43bb   :  { %v8945_v21 = vpop.f32.mrf.mxu1 }
0x43bd   :  { %v15858_v47 = vpop.f32.mrf.mxu1 }
0x43bf   :  { %v8872_v33 = vpop.f32.mrf.mxu0 }
0x43c0   :  { %v8946_v34 = vadd.f32 %v8945_v21, %v8872_v33 }
0x43c1   :  { %v15853_v35 = vpop.f32.mrf.mxu0 }
0x43c3   :  { %v9023_v36 = vpop.f32.mrf.mxu0 }
0x43c4   :  { %v9027_v20 = vmul.f32 0.35355338, %v9023_v36  ;;  %v14689_v36 = vld [vmem:[#allocation11] ss:$0 sm:$0xff] }
0x43c5   :  { %v15863_v37 = vpop.f32.mrf.mxu0 }
0x43c6   :  { %v9028_v12 = vadd.f32 %v9027_v20, %v18159_v43  ;;  %v14690_v37 = vld [vmem:[#allocation13] ss:$0 sm:$0xff] }
0x43c8   :  { %v9029_v31 = vsel %vm532_vm2, %v9028_v12, -inf }
0x43c9   :  { %9030 = vmax.xlane.f32.xlu0 %v9029_v31 }
0x43df   :  { %9040 = vrot.lane.b32.xlu0 %v18027_v54, %s16915_s10 }
0x43e3   :  { %9190 = vrot.lane.b32.xlu0 %v18036_v60, %s16916_s15 }
0x4452   :  { %v9031_v2 = vpop.xlane.xlu0 %9030 }
0x4453   :  { %v9032_v38 = vsub.f32 %v9028_v12, %v9031_v2  ;;  %v9481_v2 = vld [vmem:[%s18854_s18 + $0x18] sm:$0xff] }
0x4455   :  { %v9033_v15 = vmul.f32 1.442695, %v9032_v38  ;;  %v9480_v38 = vld [vmem:[%s18854_s18 + $0x10] sm:$0xff] }
0x4456   :  { %v9041_v48 = vpop.permute.xlu0 %9040 }
0x4457   :  { %16455 = vpow2.f32 %v9033_v15  ;;  %15865 = vmatpush3.msra.mxu1 %v9041_v48  ;;  %v9479_v15 = vld [vmem:[%s18854_s18 + $0x8] sm:$0xff]  ;;  %v9478_v48 = vld [vmem:[%s18854_s18] sm:$0xff] }
0x4458   :  { %15874 = vmatprep.subr.mxu1 %v16909_v10 }
0x445a   :  { %v9191_v46 = vpop.permute.xlu0 %9190 }
0x4464   :  { %v16456_v39 = vpop.eup %16455 }
0x4465   :  { %v9035_v40 = vsel %vm532_vm2, %v16456_v39, 0.0 }
0x4466   :  { %9036 = vadd.xlane.f32.xlu1 %v9035_v40  ;;  %v9489_v40 = vld [vmem:[%s18855_s19 + $0x30] sm:$0xff] }
0x4477   :  { %9192 = vrot.lane.b32.xlu1 %v18027_v54, %s16916_s15 }
0x44ef   :  { %v9037_v9 = vpop.xlane.xlu1 %9036 }
0x44f0   :  { %16457 = vrcp.f32 %v9037_v9  ;;  %v9488_v9 = vld [vmem:[%s18855_s19 + $0x28] sm:$0xff] }
0x44f3   :  { %v9193_v60 = vpop.permute.xlu1 %9192 }
0x44fd   :  { %v16458_v41 = vpop.eup %16457 }
0x44fe   :  { %v9039_v44 = vmul.f32 %v16458_v41, %v16456_v39  ;;  %v9490_v39 = vld [vmem:[%s18855_s19 + $0x38] sm:$0xff]  ;;  %v9487_v41 = vld [vmem:[%s18855_s19 + $0x20] sm:$0xff] }
0x4500   :  { %15867 = vmatmul.mubr.msk.f32.vlgmr.msra.gmra.mxu1 %vm532_vm2, %v9039_v44 }
0x4501   :  { %15875 = vmatpush3.xpose.msk.msra.mxu1 %vm532_vm2, %v9193_v60  ;;  %15876 = vmatprep.mubr.msk.f32.mxu1 %vm16910_vm1, %v16909_v10 }
0x4502   :  { %15884 = vmatprep.subr.mxu1 %v16909_v10 }
0x4504   :  { %15877 = vmatmul.mubr.msk.f32.vlgmr.msra.gmra.mxu1 %vm532_vm2, %v9191_v46 }
0x4505   :  { %15885 = vmatpush3.msra.mxu1 %v18151_v23  ;;  %15886 = vmatprep.mubr.msk.f32.mxu1 %vm16910_vm1, %v16909_v10 }
0x4506   :  { %15900 = vmatprep.subr.mxu1 %v9490_v39 }
0x45c0   :  { %v9112_v61 = vpop.f32.mrf.mxu1 }
0x45c1   :  { %15872 = vmatmul.mubr.msk.f32.vlgmr.msra.gmra.mxu0 %vm532_vm2, %v9112_v61 }
0x45c2   :  { %v15868_v59 = vpop.f32.mrf.mxu1  ;;  %15881 = vmatprep.mubr.msk.f32.mxu0 %vm16910_vm1, %v16909_v10 }
0x45c4   :  { %v9264_v13 = vpop.f32.mrf.mxu1 }
0x45c5   :  { %v9268_v55 = vmul.f32 0.35355338, %v9264_v13 }
0x45c6   :  { %v15878_v56 = vpop.f32.mrf.mxu1 }
0x45c7   :  { %v9269_v26 = vadd.f32 %v9268_v55, %v18159_v43  ;;  %v9485_v55 = vld [vmem:[%s18855_s19 + $0x10] sm:$0xff]  ;;  %v9484_v56 = vld [vmem:[%s18855_s19 + $0x8] sm:$0xff] }
0x45c9   :  { %v9270_v23 = vsel %vm532_vm2, %v9269_v26, -inf }
0x45ca   :  { %9271 = vmax.xlane.f32.xlu1 %v9270_v23  ;;  %v14691_v23 = vld [vmem:[#allocation17] ss:$0 sm:$0xff] }
0x45ce   :  { %9437 = vadd.xlane.f32.xlu1 %v9436_v58 }
0x4653   :  { %v9272_v28 = vpop.xlane.xlu1 %9271 }
0x4654   :  { %v9273_v50 = vsub.f32 %v9269_v26, %v9272_v28  ;;  %v9483_v26 = vld [vmem:[%s18855_s19] sm:$0xff] }
0x4656   :  { %v9274_v0 = vmul.f32 1.442695, %v9273_v50 }
0x4657   :  { %v9438_v16 = vpop.xlane.xlu1 %9437 }
0x4658   :  { %16459 = vpow2.f32 %v9274_v0  ;;  %v9442_v24 = vmul.f32 0.03125, %v9438_v16 }
0x465a   :  { %v9444_v57 = vsub.f32 %v9432_v51, %v9442_v24 }
0x465c   :  { %v9446_v45 = vmul.f32 %v9444_v57, %v9444_v57 }
0x465e   :  { %v9448_v25 = vsel %vm369_vm0, %v9446_v45, 0.0  ;;  %v14702_v45 = vld [vmem:[%s18842_s25 + $0x38] sm:$0xff] }
0x4665   :  { %v16460_v1 = vpop.eup %16459 }
0x4666   :  { %v9276_v42 = vsel %vm532_vm2, %v16460_v1, 0.0 }
0x4667   :  { %9277 = vadd.xlane.f32.xlu0 %v9276_v42 }
0x467d   :  { %9281 = vrot.lane.b32.xlu0 %v18027_v54, %s16917_s16 }
0x4681   :  { %v9185_v43 = vpop.f32.mrf.mxu0 }
0x4682   :  { %v9189_v3 = vadd.f32 %v9185_v43, %v8946_v34  ;;  %v14694_v43 = vld [vmem:[#allocation19] ss:$0 sm:$0xff] }
0x4683   :  { %v15873_v14 = vpop.f32.mrf.mxu0 }
0x46f0   :  { %v9278_v5 = vpop.xlane.xlu0 %9277 }
0x46f1   :  { %16461 = vrcp.f32 %v9278_v5 }
0x46f4   :  { %v9282_v63 = vpop.permute.xlu0 %9281 }
0x46f5   :  { %15880 = vmatpush3.msra.mxu0 %v9282_v63 }
0x46f6   :  { %15889 = vmatprep.subr.mxu0 %v9481_v2 }
0x46fe   :  { %v16462_v6 = vpop.eup %16461 }
0x46ff   :  { %v9280_v8 = vmul.f32 %v16462_v6, %v16460_v1 }
0x4701   :  { %15882 = vmatmul.mubr.msk.f32.vlgmr.msra.gmra.mxu0 %vm532_vm2, %v9280_v8 }
0x4702   :  { %15890 = vmatpush3.msra.mxu0 %v9481_v2 }
0x4703   :  { %15891 = vmatprep.subr.mxu0 %v9480_v38 }
0x4704   :  { %15892 = vmatpush3.msra.mxu0 %v9480_v38 }
0x4705   :  { %15893 = vmatprep.subr.mxu0 %v9479_v15 }
0x4706   :  { %15894 = vmatpush3.msra.mxu0 %v9479_v15 }
0x4707   :  { %15895 = vmatprep.subr.mxu0 %v9478_v48 }
0x4708   :  { %15896 = vmatpush3.msra.mxu0 %v9478_v48 }
0x4709   :  { %15919 = vmatprep.subr.mxu0 %v14702_v45 }
0x47c1   :  { %v9353_v30 = vpop.f32.mrf.mxu0 }
0x47c2   :  { %15887 = vmatmul.mubr.msk.f32.vlgmr.msra.gmra.mxu1 %vm532_vm2, %v9353_v30 }
0x47c3   :  { %v15883_v11 = vpop.f32.mrf.mxu0  ;;  %15901 = vmatpush3.msra.mxu1 %v9490_v39 }
0x47c4   :  { %15902 = vmatprep.subr.mxu1 %v9489_v40 }
0x47c5   :  { %15903 = vmatpush3.msra.mxu1 %v9489_v40  ;;  %v14706_v40 = vld [vmem:[%s18844_s17 + $0x30] sm:$0xff] }
0x47c6   :  { %15904 = vmatprep.subr.mxu1 %v9488_v9 }
0x47c7   :  { %15905 = vmatpush3.msra.mxu1 %v9488_v9  ;;  %v14705_v9 = vld [vmem:[%s18844_s17 + $0x28] sm:$0xff] }
0x47c8   :  { %15906 = vmatprep.subr.mxu1 %v9487_v41 }
0x47c9   :  { %15907 = vmatpush3.msra.mxu1 %v9487_v41  ;;  %v14704_v41 = vld [vmem:[%s18844_s17 + $0x20] sm:$0xff] }
0x47ca   :  { %15908 = vmatprep.subr.mxu1 %v9486_v32 }
0x47cb   :  { %15909 = vmatpush3.msra.mxu1 %v9486_v32 }
0x47cc   :  { %15910 = vmatprep.subr.mxu1 %v9485_v55 }
0x47cd   :  { %15911 = vmatpush3.msra.mxu1 %v9485_v55 }
0x47ce   :  { %15912 = vmatprep.subr.mxu1 %v9484_v56 }
0x47cf   :  { %15913 = vmatpush3.msra.mxu1 %v9484_v56 }
0x47d0   :  { %15914 = vmatprep.subr.mxu1 %v9483_v26 }
0x47d1   :  { %15915 = vmatpush3.msra.mxu1 %v9483_v26 }
0x47d2   :  { %15941 = vmatprep.subr.mxu1 %v16909_v10 }
0x4882   :  { %v9426_v19 = vpop.f32.mrf.mxu1 }
0x4883   :  { %v9430_v7 = vadd.f32 %v9426_v19, %v9189_v3 }
0x4884   :  { %v15888_v54 = vpop.f32.mrf.mxu1 }
0x4885   :  { %v9431_v49 = vadd.f32 %v14672_v52, %v9430_v7 }
0x4887   :  { %v9433_v18 = vadd.f32 %v9431_v49, %v18021_v4 }
0x4889   :  { %v9439_v22 = vsel %vm369_vm0, %v9433_v18, 0.0 }
0x488a   :  { %9440 = vadd.xlane.f32.xlu1 %v9439_v22 }
0x488e   :  { %9449 = vadd.xlane.f32.xlu1 %v9448_v25  ;;  %v14701_v25 = vld [vmem:[%s18842_s25 + $0x30] sm:$0xff] }
0x4913   :  { %v9441_v53 = vpop.xlane.xlu1 %9440 }
0x4914   :  { %v9443_v29 = vmul.f32 0.03125, %v9441_v53  ;;  %v14700_v53 = vld [vmem:[%s18842_s25 + $0x28] sm:$0xff] }
0x4916   :  { %v9445_v17 = vsub.f32 %v9433_v18, %v9443_v29  ;;  %v14699_v29 = vld [vmem:[%s18842_s25 + $0x20] sm:$0xff] }
0x4917   :  { %v9450_v21 = vpop.xlane.xlu1 %9449 }
0x4918   :  { %v9454_v47 = vmul.f32 0.03125, %v9450_v21  ;;  %v9447_v33 = vmul.f32 %v9445_v17, %v9445_v17 }
0x491a   :  { %v9456_v34 = vadd.f32 1e-05, %v9454_v47  ;;  %v9451_v35 = vsel %vm369_vm0, %v9447_v33, 0.0 }
0x491b   :  { %9452 = vadd.xlane.f32.xlu1 %v9451_v35 }
0x491c   :  { %16463 = vrsqrt.f32 %v9456_v34 }
0x4929   :  { %v16464_v4 = vpop.eup %16463 }
0x492a   :  { %v9460_v20 = vmul.f32 %v16464_v4, %v9444_v57 }
0x492c   :  { %v9468_v12 = vmul.f32 %v14689_v36, %v9460_v20  ;;  %v14697_v20 = vld [vmem:[#allocation14] ss:$0 sm:$0xff] }
0x492e   :  { %v18236_v31 = vadd.f32 %v14690_v37, %v9468_v12  ;;  %v14698_v12 = vld [vmem:[#allocation16] ss:$0 sm:$0xff] }
0x4930   :  { %15897 = vmatprep.mubr.msk.f32.mxu0 %vm369_vm0, %v18236_v31 }
0x49a4   :  { %v9453_v44 = vpop.xlane.xlu1 %9452 }
0x49a5   :  { %v9455_v60 = vmul.f32 0.03125, %v9453_v44  ;;  %v14714_v44 = vld [vmem:[%s18845_s28 + $0x1] ss:$0 sm:$0xff] }
0x49a7   :  { %v9457_v46 = vadd.f32 1e-05, %v9455_v60 }
0x49a9   :  { %16465 = vrsqrt.f32 %v9457_v46 }
0x49b6   :  { %v16466_v61 = vpop.eup %16465 }
0x49b7   :  { %v9461_v52 = vmul.f32 %v16466_v61, %v9445_v17  ;;  %v14707_v17 = vld [vmem:[%s18844_s17 + $0x38] sm:$0xff] }
0x49b9   :  { %v9469_v59 = vmul.f32 %v14689_v36, %v9461_v52  ;;  %v14717_v52 = vld [vmem:[%s18846_s1 + $0x1] ss:$0 sm:$0xff] }
0x49bb   :  { %v9477_v13 = vadd.f32 %v14690_v37, %v9469_v59 }
0x49bd   :  { %15898 = vmatmul.mubr.msk.f32.vlgmr.msra.gmra.mxu0 %vm369_vm0, %v9477_v13 }
0x49be   :  { %15920 = vmatpush3.msra.mxu0 %v14702_v45 }
0x49bf   :  { %15921 = vmatprep.subr.mxu0 %v14701_v25 }
0x49c0   :  { %15922 = vmatpush3.msra.mxu0 %v14701_v25 }
0x49c1   :  { %15923 = vmatprep.subr.mxu0 %v14700_v53 }
0x49c2   :  { %15924 = vmatpush3.msra.mxu0 %v14700_v53 }
0x49c3   :  { %15925 = vmatprep.subr.mxu0 %v14699_v29 }
0x49c4   :  { %15926 = vmatpush3.msra.mxu0 %v14699_v29 }
0x49c5   :  { %15930 = vmatprep.subr.mxu0 %v14707_v17 }
0x4a7d   :  { %v15899_v51 = vpop.f32.mrf.mxu0 }
0x4a7e   :  { %v9576_v58 = vadd.f32 %v15899_v51, %v14691_v23 }
0x4a7f   :  { %v9570_v28 = vpop.f32.mrf.mxu0 }
0x4a80   :  { %v9571_v50 = vadd.f32 %v14691_v23, %v9570_v28  ;;  %v9580_v1 = vmax.f32 %v9576_v58, 0.0 }
0x4a82   :  { %v9579_v0 = vmax.f32 %v9571_v50, 0.0  ;;  %v18313_v50 = vld [vmem:[%s18847_s2] sm:$0xff] }
0x4a84   :  { %15916 = vmatprep.mubr.msk.f32.mxu1 %vm2617_vm3, %v9579_v0 }
0x4a85   :  { %15917 = vmatmul.mubr.msk.f32.vlgmr.msra.gmra.mxu1 %vm2617_vm3, %v9580_v1 }
0x4a86   :  { %15943 = vmatprep.mubr.msk.f32.mxu1 %vm16910_vm1, %v16909_v10 }
0x4b45   :  { %v15918_v42 = vpop.f32.mrf.mxu1 }
0x4b46   :  { %v9665_v14 = vadd.f32 %v15918_v42, %v14694_v43 }
0x4b47   :  { %v9659_v3 = vpop.f32.mrf.mxu1 }
0x4b48   :  { %v9660_v5 = vadd.f32 %v14694_v43, %v9659_v3  ;;  %v9669_v6 = vadd.f32 %v9665_v14, %v9477_v13 }
0x4b4a   :  { %v9668_v63 = vadd.f32 %v9660_v5, %v18236_v31  ;;  %v9675_v30 = vsel %vm369_vm0, %v9669_v6, 0.0 }
0x4b4c   :  { %v9672_v8 = vsel %vm369_vm0, %v9668_v63, 0.0 }
0x4b4d   :  { %9673 = vadd.xlane.f32.xlu1 %v9672_v8 }
0x4b51   :  { %9676 = vadd.xlane.f32.xlu1 %v9675_v30 }
0x4bd6   :  { %v9674_v11 = vpop.xlane.xlu1 %9673 }
0x4bd7   :  { %v9678_v16 = vmul.f32 0.03125, %v9674_v11 }
0x4bd9   :  { %v9680_v24 = vsub.f32 %v9668_v63, %v9678_v16 }
0x4bda   :  { %v9677_v19 = vpop.xlane.xlu1 %9676 }
0x4bdb   :  { %v9679_v7 = vmul.f32 0.03125, %v9677_v19  ;;  %v9682_v54 = vmul.f32 %v9680_v24, %v9680_v24 }
0x4bdd   :  { %v9681_v57 = vsub.f32 %v9669_v6, %v9679_v7  ;;  %v9684_v49 = vsel %vm369_vm0, %v9682_v54, 0.0 }
0x4bde   :  { %9685 = vadd.xlane.f32.xlu0 %v9684_v49 }
0x4bdf   :  { %v9683_v18 = vmul.f32 %v9681_v57, %v9681_v57 }
0x4be1   :  { %v9687_v22 = vsel %vm369_vm0, %v9683_v18, 0.0 }
0x4be2   :  { %9688 = vadd.xlane.f32.xlu1 %v9687_v22 }
0x4c67   :  { %v9686_v21 = vpop.xlane.xlu0 %9685 }
0x4c68   :  { %v9690_v47 = vmul.f32 0.03125, %v9686_v21  ;;  %v18343_v21 = vld [vmem:[%s18848_s20 + $0x28] sm:$0xff] }
0x4c6a   :  { %v9692_v33 = vadd.f32 1e-05, %v9690_v47 }
0x4c6b   :  { %v9689_v34 = vpop.xlane.xlu1 %9688 }
0x4c6c   :  { %16467 = vrsqrt.f32 %v9692_v33  ;;  %v9691_v35 = vmul.f32 0.03125, %v9689_v34 }
0x4c6e   :  { %v9693_v4 = vadd.f32 1e-05, %v9691_v35 }
0x4c70   :  { %16469 = vrsqrt.f32 %v9693_v4 }
0x4c79   :  { %v16468_v36 = vpop.eup %16467 }
0x4c7a   :  { %v9696_v37 = vmul.f32 %v16468_v36, %v9680_v24 }
0x4c7c   :  { %v9704_v31 = vmul.f32 %v14697_v20, %v9696_v37 }
0x4c7d   :  { %v16470_v2 = vpop.eup %16469 }
0x4c7e   :  { %v9697_v38 = vmul.f32 %v16470_v2, %v9681_v57  ;;  %v18268_v15 = vadd.f32 %v14698_v12, %v9704_v31 }
0x4c80   :  { %v9705_v48 = vmul.f32 %v14697_v20, %v9697_v38  ;;  %15927 = vmatprep.mubr.msk.f32.mxu0 %vm369_vm0, %v18268_v15 }
0x4c82   :  { %v18272_v39 = vadd.f32 %v14698_v12, %v9705_v48 }
0x4c84   :  { %15928 = vmatmul.mubr.msk.f32.vlgmr.msra.gmra.mxu0 %vm369_vm0, %v18272_v39 }
0x4c85   :  { %15931 = vmatpush3.msra.mxu0 %v14707_v17  ;;  %15938 = vmatprep.mubr.msk.f32.mxu0 %vm369_vm0, %v18268_v15  ;;  %v18338_v17 = vld [vmem:[%s18848_s20 + $0x20] sm:$0xff] }
0x4c86   :  { %15932 = vmatprep.subr.mxu0 %v14706_v40 }
0x4c87   :  { %15933 = vmatpush3.msra.mxu0 %v14706_v40 }
0x4c88   :  { %15934 = vmatprep.subr.mxu0 %v14705_v9 }
0x4c89   :  { %15935 = vmatpush3.msra.mxu0 %v14705_v9 }
0x4c8a   :  { %15936 = vmatprep.subr.mxu0 %v14704_v41 }
0x4c8b   :  { %15937 = vmatpush3.msra.mxu0 %v14704_v41 }
0x4c8c   :  { %15939 = vmatmul.mubr.msk.f32.vlgmr.msra.gmra.mxu0 %vm369_vm0, %v18272_v39  ;;  %15951 = vmatprep.subr.mxu0 %v16909_v10 }
0x4c8d   :  { %15953 = vmatprep.mubr.msk.f32.mxu0 %vm16910_vm1, %v16909_v10 }
0x4d44   :  { %v15929_v60 = vpop.f32.mrf.mxu0 }
0x4d45   :  { %v18287_v46 = vadd.f32 %v15929_v60, %v14714_v44 }
0x4d46   :  { %v9813_v61 = vpop.f32.mrf.mxu0 }
0x4d47   :  { %v18298_v56 = vadd.f32 %v14714_v44, %v9813_v61 }
0x4d4c   :  { %v15940_v59 = vpop.f32.mrf.mxu0 }
0x4d4d   :  { %v18290_v13 = vadd.f32 %v15940_v59, %v14717_v52 }
0x4d4e   :  { %v9894_v32 = vpop.f32.mrf.mxu0 }
0x4d4f   :  { %v18292_v55 = vadd.f32 %v14717_v52, %v9894_v32 }
0x4d51   :  { %10070 = vrot.lane.b32.xlu1 %v18292_v55, %s16911_s0  ;;  %15942 = vmatpush3.xpose.msk.msra.mxu1 %vm532_vm2, %v18292_v55 }
0x4d52   :  { %15946 = vmatprep.subr.mxu1 %v16909_v10 }
0x4d54   :  { %15944 = vmatmul.mubr.msk.f32.vlgmr.msra.gmra.mxu1 %vm532_vm2, %v18298_v56 }
0x4d55   :  { %10068 = vrot.lane.b32.xlu1 %v18298_v56, %s16911_s0  ;;  %15948 = vmatprep.mubr.msk.f32.mxu1 %vm16910_vm1, %v16909_v10 }
0x4dc3   :  { %v10071_v26 = vpop.permute.xlu1 %10070 }
0x4dc4   :  { %15952 = vmatpush3.xpose.msk.msra.mxu0 %vm532_vm2, %v10071_v26 }
0x4dc5   :  { %15961 = vmatprep.subr.mxu0 %v16909_v10 }
0x4dc7   :  { %v10069_v23 = vpop.permute.xlu1 %10068 }
0x4dc8   :  { %15954 = vmatmul.mubr.msk.f32.vlgmr.msra.gmra.mxu0 %vm532_vm2, %v10069_v23 }
0x4dc9   :  { %15963 = vmatprep.mubr.msk.f32.mxu0 %vm16910_vm1, %v16909_v10  ;;  %15962 = vmatpush3.msra.mxu0 %v18343_v21 }
0x4dca   :  { %15971 = vmatprep.subr.mxu0 %v16909_v10 }
0x4e14   :  { %v9975_v51 = vpop.f32.mrf.mxu1 }
0x4e15   :  { %v9979_v58 = vmul.f32 0.35355338, %v9975_v51 }
0x4e16   :  { %v15945_v28 = vpop.f32.mrf.mxu1 }
0x4e17   :  { %v9980_v0 = vadd.f32 %v18313_v50, %v9979_v58  ;;  %v18377_v28 = vld [vmem:[%s18848_s20 + $0x30] sm:$0xff] }
0x4e19   :  { %v9981_v1 = vsel %vm532_vm2, %v9980_v0, -inf }
0x4e1a   :  { %9982 = vmax.xlane.f32.xlu1 %v9981_v1 }
0x4e2b   :  { %10159 = vrot.lane.b32.xlu1 %v18292_v55, %s16913_s4 }
0x4e88   :  { %v10142_v42 = vpop.f32.mrf.mxu0 }
0x4e89   :  { %v10146_v43 = vmul.f32 0.35355338, %v10142_v42 }
0x4e8a   :  { %v15955_v3 = vpop.f32.mrf.mxu0 }
0x4e8b   :  { %v10147_v14 = vadd.f32 %v18313_v50, %v10146_v43 }
0x4e8d   :  { %v10148_v5 = vsel %vm532_vm2, %v10147_v14, -inf }
0x4e8e   :  { %10149 = vmax.xlane.f32.xlu0 %v10148_v5 }
0x4ea3   :  { %v9983_v63 = vpop.xlane.xlu1 %9982 }
0x4ea4   :  { %v9984_v6 = vsub.f32 %v9980_v0, %v9983_v63 }
0x4ea6   :  { %v9985_v8 = vmul.f32 1.442695, %v9984_v6 }
0x4ea7   :  { %v10160_v25 = vpop.permute.xlu1 %10159 }
0x4ea8   :  { %16471 = vpow2.f32 %v9985_v8 }
0x4eb5   :  { %v16472_v30 = vpop.eup %16471 }
0x4eb6   :  { %v9987_v11 = vsel %vm532_vm2, %v16472_v30, 0.0 }
0x4eb7   :  { %9988 = vadd.xlane.f32.xlu0 %v9987_v11 }
0x4f17   :  { %v10150_v16 = vpop.xlane.xlu0 %10149 }
0x4f18   :  { %v10151_v24 = vsub.f32 %v10147_v14, %v10150_v16 }
0x4f1a   :  { %v10152_v19 = vmul.f32 1.442695, %v10151_v24 }
0x4f1c   :  { %16473 = vpow2.f32 %v10152_v19 }
0x4f29   :  { %v16474_v7 = vpop.eup %16473 }
0x4f2a   :  { %v10154_v54 = vsel %vm532_vm2, %v16474_v7, 0.0 }
0x4f2b   :  { %10155 = vadd.xlane.f32.xlu0 %v10154_v54 }
0x4f40   :  { %v9989_v57 = vpop.xlane.xlu0 %9988 }
0x4f41   :  { %9992 = vrot.lane.b32.xlu0 %v18292_v55, %s16912_s11  ;;  %16475 = vrcp.f32 %v9989_v57 }
0x4f45   :  { %10383 = vrot.lane.b32.xlu0 %v18292_v55, %s16914_s6 }
0x4f49   :  { %10381 = vrot.lane.b32.xlu0 %v18298_v56, %s16914_s6 }
0x4f4e   :  { %v16476_v18 = vpop.eup %16475 }
0x4f4f   :  { %v9991_v22 = vmul.f32 %v16476_v18, %v16472_v30  ;;  %v18412_v18 = vld [vmem:[%s18848_s20 + $0x38] sm:$0xff] }
0x4fb4   :  { %v10156_v49 = vpop.xlane.xlu0 %10155 }
0x4fb5   :  { %16477 = vrcp.f32 %v10156_v49 }
0x4fb8   :  { %v9993_v45 = vpop.permute.xlu0 %9992 }
0x4fb9   :  { %15947 = vmatpush3.msra.mxu1 %v9993_v45 }
0x4fba   :  { %15949 = vmatmul.mubr.msk.f32.vlgmr.msra.gmra.mxu1 %vm532_vm2, %v9991_v22  ;;  %15956 = vmatprep.subr.mxu1 %v16909_v10 }
0x4fbb   :  { %15957 = vmatpush3.msra.mxu1 %v10160_v25  ;;  %15958 = vmatprep.mubr.msk.f32.mxu1 %vm16910_vm1, %v16909_v10 }
0x4fbc   :  { %15966 = vmatprep.subr.mxu1 %v16909_v10  ;;  %v10384_v34 = vpop.permute.xlu0 %10383 }
0x4fc0   :  { %v10382_v36 = vpop.permute.xlu0 %10381 }
0x4fc2   :  { %v16478_v53 = vpop.eup %16477 }
0x4fc3   :  { %v10158_v29 = vmul.f32 %v16478_v53, %v16474_v7 }
0x4fc5   :  { %15959 = vmatmul.mubr.msk.f32.vlgmr.msra.gmra.mxu1 %vm532_vm2, %v10158_v29 }
0x4fc6   :  { %15968 = vmatprep.mubr.msk.f32.mxu1 %vm16910_vm1, %v16909_v10  ;;  %15967 = vmatpush3.msra.mxu1 %v18338_v17 }
0x4fc7   :  { %15976 = vmatprep.subr.mxu1 %v16909_v10 }
0x507a   :  { %v10064_v47 = vpop.f32.mrf.mxu1 }
0x507b   :  { %15969 = vmatmul.mubr.msk.f32.vlgmr.msra.gmra.mxu1 %vm532_vm2, %v10064_v47 }
0x507c   :  { %v15950_v33 = vpop.f32.mrf.mxu1  ;;  %15978 = vmatprep.mubr.msk.f32.mxu1 %vm16910_vm1, %v16909_v10 }
0x5085   :  { %v10231_v35 = vpop.f32.mrf.mxu1 }
0x5086   :  { %15964 = vmatmul.mubr.msk.f32.vlgmr.msra.gmra.mxu0 %vm532_vm2, %v10231_v35 }
0x5087   :  { %15972 = vmatpush3.xpose.msk.msra.mxu0 %vm532_vm2, %v10384_v34  ;;  %v15960_v4 = vpop.f32.mrf.mxu1  ;;  %15973 = vmatprep.mubr.msk.f32.mxu0 %vm16910_vm1, %v16909_v10 }
0x5088   :  { %15981 = vmatprep.subr.mxu0 %v16909_v10 }
0x508a   :  { %15974 = vmatmul.mubr.msk.f32.vlgmr.msra.gmra.mxu0 %vm532_vm2, %v10382_v36 }
0x508b   :  { %15983 = vmatprep.mubr.msk.f32.mxu0 %vm16910_vm1, %v16909_v10  ;;  %15982 = vmatpush3.msra.mxu0 %v18377_v28 }
0x508c   :  { %15991 = vmatprep.subr.mxu0 %v16909_v10 }
0x513b   :  { %v10377_v20 = vpop.f32.mrf.mxu1 }
0x513d   :  { %v15970_v37 = vpop.f32.mrf.mxu1 }
0x5146   :  { %v10304_v12 = vpop.f32.mrf.mxu0 }
0x5147   :  { %v10378_v31 = vadd.f32 %v10377_v20, %v10304_v12 }
0x5148   :  { %v15965_v2 = vpop.f32.mrf.mxu0 }
0x514a   :  { %v10455_v38 = vpop.f32.mrf.mxu0 }
0x514b   :  { %v10459_v48 = vmul.f32 0.35355338, %v10455_v38 }
0x514c   :  { %v15975_v40 = vpop.f32.mrf.mxu0 }
0x514d   :  { %v10460_v9 = vadd.f32 %v18313_v50, %v10459_v48 }
0x514f   :  { %v10461_v41 = vsel %vm532_vm2, %v10460_v9, -inf }
0x5150   :  { %10462 = vmax.xlane.f32.xlu0 %v10461_v41 }
0x5166   :  { %10472 = vrot.lane.b32.xlu0 %v18292_v55, %s16915_s10 }
0x516a   :  { %10622 = vrot.lane.b32.xlu0 %v18298_v56, %s16916_s15 }
0x51d9   :  { %v10463_v44 = vpop.xlane.xlu0 %10462 }
0x51da   :  { %v10464_v60 = vsub.f32 %v10460_v9, %v10463_v44 }
0x51dc   :  { %v10465_v61 = vmul.f32 1.442695, %v10464_v60 }
0x51dd   :  { %v10473_v52 = vpop.permute.xlu0 %10472 }
0x51de   :  { %16479 = vpow2.f32 %v10465_v61  ;;  %15977 = vmatpush3.msra.mxu1 %v10473_v52 }
0x51df   :  { %15986 = vmatprep.subr.mxu1 %v16909_v10 }
0x51e1   :  { %v10623_v58 = vpop.permute.xlu0 %10622 }
0x51eb   :  { %v16480_v59 = vpop.eup %16479 }
0x51ec   :  { %v10467_v32 = vsel %vm532_vm2, %v16480_v59, 0.0 }
0x51ed   :  { %10468 = vadd.xlane.f32.xlu1 %v10467_v32 }
0x51fe   :  { %10624 = vrot.lane.b32.xlu1 %v18292_v55, %s16916_s15 }
0x5276   :  { %v10469_v26 = vpop.xlane.xlu1 %10468 }
0x5277   :  { %16481 = vrcp.f32 %v10469_v26 }
0x527a   :  { %v10625_v51 = vpop.permute.xlu1 %10624 }
0x5284   :  { %v16482_v23 = vpop.eup %16481 }
0x5285   :  { %v10471_v56 = vmul.f32 %v16482_v23, %v16480_v59 }
0x5287   :  { %15979 = vmatmul.mubr.msk.f32.vlgmr.msra.gmra.mxu1 %vm532_vm2, %v10471_v56 }
0x5288   :  { %15987 = vmatpush3.xpose.msk.msra.mxu1 %vm532_vm2, %v10625_v51  ;;  %15988 = vmatprep.mubr.msk.f32.mxu1 %vm16910_vm1, %v16909_v10 }
0x5289   :  { %15996 = vmatprep.subr.mxu1 %v16909_v10 }
0x528b   :  { %15989 = vmatmul.mubr.msk.f32.vlgmr.msra.gmra.mxu1 %vm532_vm2, %v10623_v58 }
0x528c   :  { %15998 = vmatprep.mubr.msk.f32.mxu1 %vm16910_vm1, %v16909_v10  ;;  %15997 = vmatpush3.msra.mxu1 %v18412_v18 }
0x528d   :  { %16006 = vmatprep.subr.mxu1 %v16909_v10 }
0x5347   :  { %v10544_v0 = vpop.f32.mrf.mxu1 }
0x5348   :  { %15984 = vmatmul.mubr.msk.f32.vlgmr.msra.gmra.mxu0 %vm532_vm2, %v10544_v0 }
0x5349   :  { %v15980_v1 = vpop.f32.mrf.mxu1  ;;  %15993 = vmatprep.mubr.msk.f32.mxu0 %vm16910_vm1, %v16909_v10 }
0x534b   :  { %v10696_v42 = vpop.f32.mrf.mxu1 }
0x534c   :  { %v10700_v43 = vmul.f32 0.35355338, %v10696_v42 }
0x534d   :  { %v15990_v3 = vpop.f32.mrf.mxu1 }
0x534e   :  { %v10701_v14 = vadd.f32 %v18313_v50, %v10700_v43 }
0x5350   :  { %v10702_v5 = vsel %vm532_vm2, %v10701_v14, -inf }
0x5351   :  { %10703 = vmax.xlane.f32.xlu0 %v10702_v5 }
0x5367   :  { %10713 = vrot.lane.b32.xlu0 %v18292_v55, %s16917_s16 }
0x536b   :  { %11035 = vrot.lane.b32.xlu0 %v18287_v46, %s16911_s0 }
0x53da   :  { %v10704_v63 = vpop.xlane.xlu0 %10703 }
0x53db   :  { %v10705_v6 = vsub.f32 %v10701_v14, %v10704_v63 }
0x53dd   :  { %v10706_v8 = vmul.f32 1.442695, %v10705_v6 }
0x53de   :  { %v10714_v30 = vpop.permute.xlu0 %10713 }
0x53df   :  { %16483 = vpow2.f32 %v10706_v8  ;;  %15992 = vmatpush3.msra.mxu0 %v10714_v30 }
0x53e0   :  { %16001 = vmatprep.subr.mxu0 %v16909_v10 }
0x53e2   :  { %v11036_v49 = vpop.permute.xlu0 %11035 }
0x53ec   :  { %v16484_v11 = vpop.eup %16483 }
0x53ed   :  { %v10708_v50 = vsel %vm532_vm2, %v16484_v11, 0.0 }
0x53ee   :  { %10709 = vadd.xlane.f32.xlu1 %v10708_v50 }
0x53ff   :  { %11037 = vrot.lane.b32.xlu1 %v18290_v13, %s16911_s0 }
0x5408   :  { %v10617_v16 = vpop.f32.mrf.mxu0 }
0x5409   :  { %v10621_v55 = vadd.f32 %v10617_v16, %v10378_v31 }
0x540a   :  { %v15985_v24 = vpop.f32.mrf.mxu0 }
0x5477   :  { %v10710_v19 = vpop.xlane.xlu1 %10709 }
0x5478   :  { %16485 = vrcp.f32 %v10710_v19 }
0x547b   :  { %v11038_v57 = vpop.permute.xlu1 %11037 }
0x5485   :  { %v16486_v7 = vpop.eup %16485 }
0x5486   :  { %v10712_v54 = vmul.f32 %v16486_v7, %v16484_v11 }
0x5488   :  { %15994 = vmatmul.mubr.msk.f32.vlgmr.msra.gmra.mxu0 %vm532_vm2, %v10712_v54 }
0x5489   :  { %16002 = vmatpush3.xpose.msk.msra.mxu0 %vm532_vm2, %v18290_v13  ;;  %16003 = vmatprep.mubr.msk.f32.mxu0 %vm16910_vm1, %v16909_v10 }
0x548a   :  { %16011 = vmatprep.subr.mxu0 %v16909_v10 }
0x548c   :  { %16004 = vmatmul.mubr.msk.f32.vlgmr.msra.gmra.mxu0 %vm532_vm2, %v18287_v46 }
0x548d   :  { %16012 = vmatpush3.xpose.msk.msra.mxu0 %vm532_vm2, %v11038_v57  ;;  %16013 = vmatprep.mubr.msk.f32.mxu0 %vm16910_vm1, %v16909_v10 }
0x548e   :  { %16021 = vmatprep.subr.mxu0 %v16909_v10 }
0x5490   :  { %16014 = vmatmul.mubr.msk.f32.vlgmr.msra.gmra.mxu0 %vm532_vm2, %v11036_v49 }
0x5491   :  { %16022 = vmatpush3.msra.mxu0 %v18343_v21  ;;  %16023 = vmatprep.mubr.msk.f32.mxu0 %vm16910_vm1, %v16909_v10  ;;  %v18420_v21 = vld [vmem:[%s18847_s2 + $0x8] sm:$0xff] }
0x5492   :  { %16031 = vmatprep.subr.mxu0 %v16909_v10 }
0x5548   :  { %v10785_v22 = vpop.f32.mrf.mxu0 }
0x5549   :  { %15999 = vmatmul.mubr.msk.f32.vlgmr.msra.gmra.mxu1 %vm532_vm2, %v10785_v22 }
0x554a   :  { %v15995_v45 = vpop.f32.mrf.mxu0  ;;  %16008 = vmatprep.mubr.msk.f32.mxu1 %vm16910_vm1, %v16909_v10 }
0x554c   :  { %v10942_v25 = vpop.f32.mrf.mxu0 }
0x554d   :  { %v10946_v53 = vmul.f32 0.35355338, %v10942_v25 }
0x554e   :  { %v16005_v29 = vpop.f32.mrf.mxu0 }
0x554f   :  { %v10947_v47 = vadd.f32 %v18420_v21, %v10946_v53 }
0x5550   :  { %v11109_v33 = vpop.f32.mrf.mxu0 }
0x5551   :  { %v11113_v34 = vmul.f32 0.35355338, %v11109_v33  ;;  %v10948_v35 = vsel %vm532_vm2, %v10947_v47, -inf }
0x5552   :  { %10949 = vmax.xlane.f32.xlu0 %v10948_v35  ;;  %v16015_v4 = vpop.f32.mrf.mxu0 }
0x5553   :  { %v11114_v36 = vadd.f32 %v18420_v21, %v11113_v34 }
0x5555   :  { %v11115_v20 = vsel %vm532_vm2, %v11114_v36, -inf }
0x5556   :  { %11116 = vmax.xlane.f32.xlu1 %v11115_v20 }
0x5567   :  { %10959 = vrot.lane.b32.xlu1 %v18290_v13, %s16912_s11 }
0x556b   :  { %11350 = vrot.lane.b32.xlu1 %v18290_v13, %s16914_s6 }
0x556f   :  { %11348 = vrot.lane.b32.xlu1 %v18287_v46, %s16914_s6 }
0x55db   :  { %v10950_v37 = vpop.xlane.xlu0 %10949 }
0x55dc   :  { %v10951_v12 = vsub.f32 %v10947_v47, %v10950_v37  ;;  %v14736_v47 = vld [vmem:[%s18849_s30 + $0x1] ss:$0 sm:$0xff] }
0x55de   :  { %v10952_v31 = vmul.f32 1.442695, %v10951_v12 }
0x55df   :  { %v11117_v2 = vpop.xlane.xlu1 %11116 }
0x55e0   :  { %16487 = vpow2.f32 %v10952_v31  ;;  %v11118_v38 = vsub.f32 %v11114_v36, %v11117_v2 }
0x55e2   :  { %v11119_v48 = vmul.f32 1.442695, %v11118_v38 }
0x55e3   :  { %v10960_v40 = vpop.permute.xlu1 %10959 }
0x55e4   :  { %16489 = vpow2.f32 %v11119_v48  ;;  %16007 = vmatpush3.msra.mxu1 %v10960_v40 }
0x55e5   :  { %16016 = vmatprep.subr.mxu1 %v16909_v10 }
0x55e7   :  { %v11351_v42 = vpop.permute.xlu1 %11350 }
0x55ed   :  { %v16488_v9 = vpop.eup %16487 }
0x55ee   :  { %v10954_v41 = vsel %vm532_vm2, %v16488_v9, 0.0 }
0x55ef   :  { %10955 = vadd.xlane.f32.xlu0 %v10954_v41 }
0x55f1   :  { %v16490_v44 = vpop.eup %16489 }
0x55f2   :  { %v11121_v60 = vsel %vm532_vm2, %v16490_v44, 0.0 }
0x55f3   :  { %11122 = vadd.xlane.f32.xlu0 %v11121_v60 }
0x5609   :  { %11126 = vrot.lane.b32.xlu0 %v18290_v13, %s16913_s4  ;;  %v10858_v61 = vpop.f32.mrf.mxu1 }
0x560a   :  { %v18437_v52 = vadd.f32 %v10858_v61, %v10621_v55 }
0x560b   :  { %v16000_v59 = vpop.f32.mrf.mxu1 }
0x560c   :  { %v10869_v35 = vadd.f32 %v14736_v47, %v18437_v52  ;;  %v14762_v52 = vld [vmem:[%s18850_s13 + $0x38] sm:$0xff] }
0x560e   :  { %v11831_v37 = vadd.f32 %v10869_v35, %v18268_v15 }
0x5610   :  { %v11837_v12 = vsel %vm369_vm0, %v11831_v37, 0.0 }
0x5678   :  { %v10956_v32 = vpop.xlane.xlu0 %10955 }
0x5679   :  { %16491 = vrcp.f32 %v10956_v32  ;;  %v14761_v32 = vld [vmem:[%s18850_s13 + $0x30] sm:$0xff] }
0x567c   :  { %v11123_v26 = vpop.xlane.xlu0 %11122 }
0x567d   :  { %16493 = vrcp.f32 %v11123_v26  ;;  %v14760_v26 = vld [vmem:[%s18850_s13 + $0x28] sm:$0xff] }
0x5680   :  { %v11127_v51 = vpop.permute.xlu0 %11126 }
0x5686   :  { %v16492_v23 = vpop.eup %16491 }
0x5687   :  { %v10958_v56 = vmul.f32 %v16492_v23, %v16488_v9  ;;  %v14759_v23 = vld [vmem:[%s18850_s13 + $0x20] sm:$0xff] }
0x5689   :  { %16009 = vmatmul.mubr.msk.f32.vlgmr.msra.gmra.mxu1 %vm532_vm2, %v10958_v56 }
0x568a   :  { %v16494_v58 = vpop.eup %16493  ;;  %16017 = vmatpush3.msra.mxu1 %v11127_v51  ;;  %16018 = vmatprep.mubr.msk.f32.mxu1 %vm16910_vm1, %v16909_v10 }
0x568b   :  { %v11125_v0 = vmul.f32 %v16494_v58, %v16490_v44  ;;  %16026 = vmatprep.subr.mxu1 %v16909_v10 }
0x568d   :  { %16019 = vmatmul.mubr.msk.f32.vlgmr.msra.gmra.mxu1 %vm532_vm2, %v11125_v0 }
0x568e   :  { %16027 = vmatpush3.msra.mxu1 %v18338_v17  ;;  %16028 = vmatprep.mubr.msk.f32.mxu1 %vm16910_vm1, %v16909_v10  ;;  %v11349_v17 = vpop.permute.xlu1 %11348 }
0x568f   :  { %16036 = vmatprep.subr.mxu1 %v16909_v10 }
0x5749   :  { %v11031_v1 = vpop.f32.mrf.mxu1 }
0x574a   :  { %16029 = vmatmul.mubr.msk.f32.vlgmr.msra.gmra.mxu1 %vm532_vm2, %v11031_v1 }
0x574b   :  { %v16010_v43 = vpop.f32.mrf.mxu1  ;;  %16038 = vmatprep.mubr.msk.f32.mxu1 %vm16910_vm1, %v16909_v10 }
0x574d   :  { %v11198_v3 = vpop.f32.mrf.mxu1 }
0x574e   :  { %16024 = vmatmul.mubr.msk.f32.vlgmr.msra.gmra.mxu0 %vm532_vm2, %v11198_v3  ;;  %v14770_v3 = vld [vmem:[#allocation5 + $0x1] ss:$0 sm:$0xff] }
0x574f   :  { %16032 = vmatpush3.xpose.msk.msra.mxu0 %vm532_vm2, %v11351_v42  ;;  %v16020_v14 = vpop.f32.mrf.mxu1  ;;  %16033 = vmatprep.mubr.msk.f32.mxu0 %vm16910_vm1, %v16909_v10 }
0x5750   :  { %16041 = vmatprep.subr.mxu0 %v16909_v10 }
0x5752   :  { %16034 = vmatmul.mubr.msk.f32.vlgmr.msra.gmra.mxu0 %vm532_vm2, %v11349_v17 }
0x5753   :  { %16042 = vmatpush3.msra.mxu0 %v18377_v28  ;;  %16043 = vmatprep.mubr.msk.f32.mxu0 %vm16910_vm1, %v16909_v10 }
0x5754   :  { %16051 = vmatprep.subr.mxu0 %v16909_v10 }
0x580a   :  { %v11344_v5 = vpop.f32.mrf.mxu1 }
0x580c   :  { %v16030_v63 = vpop.f32.mrf.mxu1 }
0x580e   :  { %v11271_v6 = vpop.f32.mrf.mxu0 }
0x580f   :  { %v11345_v8 = vadd.f32 %v11344_v5, %v11271_v6 }
0x5810   :  { %v16025_v30 = vpop.f32.mrf.mxu0 }
0x5812   :  { %v11422_v11 = vpop.f32.mrf.mxu0 }
0x5813   :  { %v11426_v50 = vmul.f32 0.35355338, %v11422_v11 }
0x5814   :  { %v16035_v16 = vpop.f32.mrf.mxu0 }
0x5815   :  { %v11427_v55 = vadd.f32 %v18420_v21, %v11426_v50 }
0x5817   :  { %v11428_v24 = vsel %vm532_vm2, %v11427_v55, -inf }
0x5818   :  { %11429 = vmax.xlane.f32.xlu0 %v11428_v24 }
0x582e   :  { %11439 = vrot.lane.b32.xlu0 %v18290_v13, %s16915_s10 }
0x5832   :  { %11589 = vrot.lane.b32.xlu0 %v18287_v46, %s16916_s15 }
0x58a1   :  { %v11430_v28 = vpop.xlane.xlu0 %11429 }
0x58a2   :  { %v11431_v19 = vsub.f32 %v11427_v55, %v11430_v28 }
0x58a4   :  { %v11432_v7 = vmul.f32 1.442695, %v11431_v19  ;;  %v14753_v19 = vld [vmem:[#allocation8 + $0x1] ss:$0 sm:$0xff] }
0x58a5   :  { %v11440_v54 = vpop.permute.xlu0 %11439 }
0x58a6   :  { %16495 = vpow2.f32 %v11432_v7  ;;  %16037 = vmatpush3.msra.mxu1 %v11440_v54 }
0x58a7   :  { %16046 = vmatprep.subr.mxu1 %v16909_v10 }
0x58a9   :  { %v11590_v53 = vpop.permute.xlu0 %11589 }
0x58b3   :  { %v16496_v57 = vpop.eup %16495 }
0x58b4   :  { %v11434_v49 = vsel %vm532_vm2, %v16496_v57, 0.0 }
0x58b5   :  { %11435 = vadd.xlane.f32.xlu1 %v11434_v49 }
0x58c6   :  { %11591 = vrot.lane.b32.xlu1 %v18290_v13, %s16916_s15 }
0x593e   :  { %v11436_v22 = vpop.xlane.xlu1 %11435 }
0x593f   :  { %16497 = vrcp.f32 %v11436_v22 }
0x5942   :  { %v11592_v25 = vpop.permute.xlu1 %11591 }
0x594c   :  { %v16498_v45 = vpop.eup %16497 }
0x594d   :  { %v11438_v46 = vmul.f32 %v16498_v45, %v16496_v57  ;;  %v14754_v57 = vld [vmem:[#allocation10 + $0x1] ss:$0 sm:$0xff]  ;;  %v14758_v45 = vld [vmem:[%s18851_s29 + $0x38] sm:$0xff] }
0x594f   :  { %16039 = vmatmul.mubr.msk.f32.vlgmr.msra.gmra.mxu1 %vm532_vm2, %v11438_v46  ;;  %v14757_v46 = vld [vmem:[%s18851_s29 + $0x30] sm:$0xff] }
0x5950   :  { %16047 = vmatpush3.xpose.msk.msra.mxu1 %vm532_vm2, %v11592_v25  ;;  %16048 = vmatprep.mubr.msk.f32.mxu1 %vm16910_vm1, %v16909_v10  ;;  %v14756_v25 = vld [vmem:[%s18851_s29 + $0x28] sm:$0xff] }
0x5951   :  { %16056 = vmatprep.subr.mxu1 %v16909_v10 }
0x5953   :  { %16049 = vmatmul.mubr.msk.f32.vlgmr.msra.gmra.mxu1 %vm532_vm2, %v11590_v53  ;;  %v14755_v53 = vld [vmem:[%s18851_s29 + $0x20] sm:$0xff] }
0x5954   :  { %16057 = vmatpush3.msra.mxu1 %v18412_v18  ;;  %16058 = vmatprep.mubr.msk.f32.mxu1 %vm16910_vm1, %v16909_v10 }
0x5955   :  { %16072 = vmatprep.subr.mxu1 %v14762_v52 }
0x5a0f   :  { %v11511_v29 = vpop.f32.mrf.mxu1 }
0x5a10   :  { %16044 = vmatmul.mubr.msk.f32.vlgmr.msra.gmra.mxu0 %vm532_vm2, %v11511_v29 }
0x5a11   :  { %v16040_v33 = vpop.f32.mrf.mxu1  ;;  %16053 = vmatprep.mubr.msk.f32.mxu0 %vm16910_vm1, %v16909_v10 }
0x5a13   :  { %v11663_v34 = vpop.f32.mrf.mxu1 }
0x5a14   :  { %v11667_v4 = vmul.f32 0.35355338, %v11663_v34 }
0x5a15   :  { %v16050_v36 = vpop.f32.mrf.mxu1 }
0x5a16   :  { %v11668_v20 = vadd.f32 %v18420_v21, %v11667_v4 }
0x5a18   :  { %v11669_v18 = vsel %vm532_vm2, %v11668_v20, -inf }
0x5a19   :  { %11670 = vmax.xlane.f32.xlu1 %v11669_v18 }
0x5a1d   :  { %11838 = vadd.xlane.f32.xlu1 %v11837_v12 }
0x5aa2   :  { %v11671_v31 = vpop.xlane.xlu1 %11670 }
0x5aa3   :  { %v11672_v2 = vsub.f32 %v11668_v20, %v11671_v31  ;;  %v14767_v20 = vld [vmem:[#allocation2 + $0x1] ss:$0 sm:$0xff] }
0x5aa5   :  { %v11673_v38 = vmul.f32 1.442695, %v11672_v2 }
0x5aa6   :  { %v11839_v56 = vpop.xlane.xlu1 %11838 }
0x5aa7   :  { %16499 = vpow2.f32 %v11673_v38  ;;  %v11843_v51 = vmul.f32 0.03125, %v11839_v56 }
0x5aa9   :  { %v11845_v1 = vsub.f32 %v11831_v37, %v11843_v51 }
0x5aab   :  { %v11847_v17 = vmul.f32 %v11845_v1, %v11845_v1 }
0x5aad   :  { %v11849_v63 = vsel %vm369_vm0, %v11847_v17, 0.0 }
0x5ab4   :  { %v16500_v48 = vpop.eup %16499 }
0x5ab5   :  { %v11675_v40 = vsel %vm532_vm2, %v16500_v48, 0.0 }
0x5ab6   :  { %11676 = vadd.xlane.f32.xlu0 %v11675_v40 }
0x5acc   :  { %11680 = vrot.lane.b32.xlu0 %v18290_v13, %s16917_s16 }
0x5ad0   :  { %v11584_v21 = vpop.f32.mrf.mxu0 }
0x5ad1   :  { %v11588_v9 = vadd.f32 %v11584_v21, %v11345_v8 }
0x5ad2   :  { %v16045_v15 = vpop.f32.mrf.mxu0 }
0x5b3f   :  { %v11677_v41 = vpop.xlane.xlu0 %11676 }
0x5b40   :  { %16501 = vrcp.f32 %v11677_v41 }
0x5b43   :  { %v11681_v44 = vpop.permute.xlu0 %11680 }
0x5b44   :  { %16052 = vmatpush3.msra.mxu0 %v11681_v44 }
0x5b45   :  { %16061 = vmatprep.subr.mxu0 %v14758_v45 }
0x5b4d   :  { %v16502_v60 = vpop.eup %16501 }
0x5b4e   :  { %v11679_v61 = vmul.f32 %v16502_v60, %v16500_v48 }
0x5b50   :  { %16054 = vmatmul.mubr.msk.f32.vlgmr.msra.gmra.mxu0 %vm532_vm2, %v11679_v61 }
0x5b51   :  { %16062 = vmatpush3.msra.mxu0 %v14758_v45 }
0x5b52   :  { %16063 = vmatprep.subr.mxu0 %v14757_v46 }
0x5b53   :  { %16064 = vmatpush3.msra.mxu0 %v14757_v46 }
0x5b54   :  { %16065 = vmatprep.subr.mxu0 %v14756_v25 }
0x5b55   :  { %16066 = vmatpush3.msra.mxu0 %v14756_v25 }
0x5b56   :  { %16067 = vmatprep.subr.mxu0 %v14755_v53 }
0x5b57   :  { %16068 = vmatpush3.msra.mxu0 %v14755_v53 }
0x5b58   :  { %16083 = vmatprep.subr.mxu0 %v16909_v10 }
0x5c10   :  { %v11752_v59 = vpop.f32.mrf.mxu0 }
0x5c11   :  { %16059 = vmatmul.mubr.msk.f32.vlgmr.msra.gmra.mxu1 %vm532_vm2, %v11752_v59 }
0x5c12   :  { %16073 = vmatpush3.msra.mxu1 %v14762_v52  ;;  %v16055_v13 = vpop.f32.mrf.mxu0  ;;  %16080 = vmatprep.mubr.msk.f32.mxu1 %vm369_vm0, %v18008_v62 }
0x5c13   :  { %16074 = vmatprep.subr.mxu1 %v14761_v32 }
0x5c14   :  { %16075 = vmatpush3.msra.mxu1 %v14761_v32 }
0x5c15   :  { %16076 = vmatprep.subr.mxu1 %v14760_v26 }
0x5c16   :  { %16077 = vmatpush3.msra.mxu1 %v14760_v26 }
0x5c17   :  { %16078 = vmatprep.subr.mxu1 %v14759_v23 }
0x5c18   :  { %16079 = vmatpush3.msra.mxu1 %v14759_v23 }
0x5c19   :  { %16081 = vmatmul.mubr.msk.f32.vlgmr.msra.gmra.mxu1 %vm369_vm0, %v18012_v27  ;;  %16088 = vmatprep.subr.mxu1 %v16909_v10 }
0x5c1a   :  { %16090 = vmatprep.mubr.msk.f32.mxu1 %vm16910_vm1, %v16909_v10 }
0x5cd1   :  { %v11825_v58 = vpop.f32.mrf.mxu1 }
0x5cd2   :  { %v11829_v62 = vadd.f32 %v11825_v58, %v11588_v9  ;;  %v18549_v9 = vld [vmem:[%s18852_s5] sm:$0xff] }
0x5cd3   :  { %v16060_v0 = vpop.f32.mrf.mxu1 }
0x5cd4   :  { %v11830_v42 = vadd.f32 %v14736_v47, %v11829_v62 }
0x5cd6   :  { %v11832_v43 = vadd.f32 %v11830_v42, %v18272_v39 }
0x5cd8   :  { %v11840_v14 = vsel %vm369_vm0, %v11832_v43, 0.0 }
0x5cd9   :  { %v16082_v5 = vpop.f32.mrf.mxu1  ;;  %11841 = vadd.xlane.f32.xlu1 %v11840_v14 }
0x5cda   :  { %v18507_v27 = vadd.f32 %v16082_v5, %v14770_v3 }
0x5cdb   :  { %v12059_v24 = vpop.f32.mrf.mxu1 }
0x5cdc   :  { %v18511_v7 = vadd.f32 %v14770_v3, %v12059_v24 }
0x5cdd   :  { %11850 = vadd.xlane.f32.xlu1 %v11849_v63 }
0x5d62   :  { %v11842_v6 = vpop.xlane.xlu1 %11841 }
0x5d63   :  { %v11844_v8 = vmul.f32 0.03125, %v11842_v6 }
0x5d65   :  { %v11846_v30 = vsub.f32 %v11832_v43, %v11844_v8  ;;  %v18576_v8 = vld [vmem:[%s18853_s7 + $0x20] sm:$0xff] }
0x5d66   :  { %v11851_v11 = vpop.xlane.xlu1 %11850 }
0x5d67   :  { %v11855_v50 = vmul.f32 0.03125, %v11851_v11  ;;  %v11848_v16 = vmul.f32 %v11846_v30, %v11846_v30 }
0x5d69   :  { %v11857_v55 = vadd.f32 1e-05, %v11855_v50  ;;  %v11852_v39 = vsel %vm369_vm0, %v11848_v16, 0.0 }
0x5d6a   :  { %11853 = vadd.xlane.f32.xlu1 %v11852_v39 }
0x5d6b   :  { %16503 = vrsqrt.f32 %v11857_v55 }
0x5d78   :  { %v16504_v28 = vpop.eup %16503 }
0x5d79   :  { %v11861_v54 = vmul.f32 %v16504_v28, %v11845_v1 }
0x5d7b   :  { %12236 = vrot.lane.b32.xlu1 %v18511_v7, %s16911_s0  ;;  %v11869_v49 = vmul.f32 %v14753_v19, %v11861_v54 }
0x5d7d   :  { %v18515_v22 = vadd.f32 %v14754_v57, %v11869_v49 }
0x5d7f   :  { %16069 = vmatprep.mubr.msk.f32.mxu0 %vm369_vm0, %v18515_v22 }
0x5df3   :  { %v11854_v29 = vpop.xlane.xlu1 %11853 }
0x5df4   :  { %v11856_v47 = vmul.f32 0.03125, %v11854_v29 }
0x5df6   :  { %v11858_v33 = vadd.f32 1e-05, %v11856_v47 }
0x5df7   :  { %v12237_v2 = vpop.permute.xlu1 %12236 }
0x5df8   :  { %16505 = vrsqrt.f32 %v11858_v33 }
0x5e05   :  { %v16506_v34 = vpop.eup %16505 }
0x5e06   :  { %v11862_v35 = vmul.f32 %v16506_v34, %v11846_v30  ;;  %v18580_v30 = vld [vmem:[%s18853_s7 + $0x28] sm:$0xff] }
0x5e08   :  { %v11870_v4 = vmul.f32 %v14753_v19, %v11862_v35 }
0x5e0a   :  { %v18524_v36 = vadd.f32 %v14754_v57, %v11870_v4 }
0x5e0c   :  { %16070 = vmatmul.mubr.msk.f32.vlgmr.msra.gmra.mxu0 %vm369_vm0, %v18524_v36 }
0x5e0d   :  { %16084 = vmatpush3.xpose.msk.msra.mxu0 %vm532_vm2, %v18511_v7  ;;  %16085 = vmatprep.mubr.msk.f32.mxu0 %vm16910_vm1, %v16909_v10 }
0x5e0e   :  { %16093 = vmatprep.subr.mxu0 %v16909_v10 }
0x5ecc   :  { %v16071_v18 = vpop.f32.mrf.mxu0 }
0x5ecd   :  { %v18533_v37 = vadd.f32 %v16071_v18, %v14767_v20 }
0x5ece   :  { %v11978_v12 = vpop.f32.mrf.mxu0 }
0x5ecf   :  { %v18535_v31 = vadd.f32 %v14767_v20, %v11978_v12 }
0x5ed1   :  { %12234 = vrot.lane.b32.xlu0 %v18535_v31, %s16911_s0  ;;  %16086 = vmatmul.mubr.msk.f32.vlgmr.msra.gmra.mxu0 %vm532_vm2, %v18535_v31 }
0x5ed2   :  { %16094 = vmatpush3.xpose.msk.msra.mxu0 %vm532_vm2, %v12237_v2  ;;  %16095 = vmatprep.mubr.msk.f32.mxu0 %vm16910_vm1, %v16909_v10 }
0x5ed3   :  { %16103 = vmatprep.subr.mxu0 %v16909_v10 }
0x5f43   :  { %v12235_v38 = vpop.permute.xlu0 %12234 }
0x5f44   :  { %16096 = vmatmul.mubr.msk.f32.vlgmr.msra.gmra.mxu0 %vm532_vm2, %v12235_v38 }
0x5f45   :  { %16105 = vmatprep.mubr.msk.f32.mxu0 %vm16910_vm1, %v16909_v10  ;;  %16104 = vmatpush3.msra.mxu0 %v18580_v30 }
0x5f46   :  { %16113 = vmatprep.subr.mxu0 %v16909_v10 }
0x5f91   :  { %v12140_v48 = vpop.f32.mrf.mxu0 }
0x5f92   :  { %v12144_v40 = vmul.f32 0.35355338, %v12140_v48  ;;  %v18616_v48 = vld [vmem:[%s18853_s7 + $0x30] sm:$0xff] }
0x5f93   :  { %v16087_v21 = vpop.f32.mrf.mxu0 }
0x5f94   :  { %v12145_v15 = vadd.f32 %v18549_v9, %v12144_v40 }
0x5f96   :  { %v12146_v41 = vsel %vm532_vm2, %v12145_v15, -inf }
0x5f97   :  { %12147 = vmax.xlane.f32.xlu0 %v12146_v41 }
0x6004   :  { %v12308_v44 = vpop.f32.mrf.mxu0 }
0x6005   :  { %v12312_v60 = vmul.f32 0.35355338, %v12308_v44 }
0x6006   :  { %v16097_v61 = vpop.f32.mrf.mxu0 }
0x6007   :  { %v12313_v52 = vadd.f32 %v18549_v9, %v12312_v60 }
0x6009   :  { %v12314_v59 = vsel %vm532_vm2, %v12313_v52, -inf }
0x600a   :  { %12315 = vmax.xlane.f32.xlu1 %v12314_v59 }
0x601b   :  { %12327 = vrot.lane.b32.xlu1 %v18511_v7, %s16913_s4 }
0x601f   :  { %12549 = vrot.lane.b32.xlu1 %v18535_v31, %s16914_s6 }
0x6020   :  { %v12148_v32 = vpop.xlane.xlu0 %12147 }
0x6021   :  { %v12149_v13 = vsub.f32 %v12145_v15, %v12148_v32 }
0x6023   :  { %v12150_v26 = vmul.f32 1.442695, %v12149_v13 }
0x6025   :  { %16507 = vpow2.f32 %v12150_v26 }
0x6032   :  { %v16508_v23 = vpop.eup %16507 }
0x6033   :  { %v12152_v56 = vsel %vm532_vm2, %v16508_v23, 0.0 }
0x6034   :  { %12153 = vadd.xlane.f32.xlu0 %v12152_v56 }
0x6093   :  { %v12316_v51 = vpop.xlane.xlu1 %12315 }
0x6094   :  { %v12317_v58 = vsub.f32 %v12313_v52, %v12316_v51 }
0x6096   :  { %v12318_v62 = vmul.f32 1.442695, %v12317_v58 }
0x6097   :  { %v12328_v5 = vpop.permute.xlu1 %12327 }
0x6098   :  { %16509 = vpow2.f32 %v12318_v62 }
0x609b   :  { %v12550_v24 = vpop.permute.xlu1 %12549 }
0x60a5   :  { %v16510_v0 = vpop.eup %16509 }
0x60a6   :  { %v12320_v1 = vsel %vm532_vm2, %v16510_v0, 0.0 }
0x60a7   :  { %12321 = vadd.xlane.f32.xlu0 %v12320_v1 }
0x60bd   :  { %v12154_v42 = vpop.xlane.xlu0 %12153  ;;  %12158 = vrot.lane.b32.xlu0 %v18511_v7, %s16912_s11 }
0x60be   :  { %16511 = vrcp.f32 %v12154_v42  ;;  %v18654_v42 = vld [vmem:[%s18853_s7 + $0x38] sm:$0xff] }
0x60c1   :  { %12551 = vrot.lane.b32.xlu0 %v18511_v7, %s16914_s6 }
0x60cb   :  { %v16512_v43 = vpop.eup %16511 }
0x60cc   :  { %v12156_v3 = vmul.f32 %v16512_v43, %v16508_v23 }
0x60ce   :  { %12157 = vst.msk [vmem:[#allocation23] sm:$0xff] %vm532_vm2, %v12156_v3 }
0x6130   :  { %v12322_v14 = vpop.xlane.xlu0 %12321 }
0x6131   :  { %16513 = vrcp.f32 %v12322_v14 }
0x6134   :  { %v12159_v17 = vpop.permute.xlu0 %12158 }
0x6135   :  { %16089 = vmatpush3.msra.mxu1 %v12159_v17 }
0x6136   :  { %16091 = vmatmul.mubr.msk.f32.vlgmr.msra.gmra.mxu1 %vm532_vm2, %v12156_v3  ;;  %16098 = vmatprep.subr.mxu1 %v16909_v10 }
0x6137   :  { %16099 = vmatpush3.msra.mxu1 %v12328_v5  ;;  %16100 = vmatprep.mubr.msk.f32.mxu1 %vm16910_vm1, %v16909_v10 }
0x6138   :  { %16108 = vmatprep.subr.mxu1 %v16909_v10  ;;  %v12552_v55 = vpop.permute.xlu0 %12551 }
0x613e   :  { %v16514_v63 = vpop.eup %16513 }
0x613f   :  { %v12324_v6 = vmul.f32 %v16514_v63, %v16510_v0  ;;  %v18662_v63 = vld [vmem:[%s18852_s5 + $0x8] sm:$0xff] }
0x6141   :  { %12326 = vst.msk [vmem:[#allocation23 + $0x8] sm:$0xff] %vm532_vm2, %v12324_v6  ;;  %16101 = vmatmul.mubr.msk.f32.vlgmr.msra.gmra.mxu1 %vm532_vm2, %v12324_v6 }
0x6142   :  { %16110 = vmatprep.mubr.msk.f32.mxu1 %vm16910_vm1, %v16909_v10  ;;  %16109 = vmatpush3.msra.mxu1 %v18576_v8 }
0x6143   :  { %16118 = vmatprep.subr.mxu1 %v16909_v10 }
0x61f6   :  { %v12230_v11 = vpop.f32.mrf.mxu1 }
0x61f7   :  { %16111 = vmatmul.mubr.msk.f32.vlgmr.msra.gmra.mxu1 %vm532_vm2, %v12230_v11 }
0x61f8   :  { %v16092_v50 = vpop.f32.mrf.mxu1  ;;  %16120 = vmatprep.mubr.msk.f32.mxu1 %vm16910_vm1, %v16909_v10 }
0x6201   :  { %v12399_v16 = vpop.f32.mrf.mxu1 }
0x6202   :  { %16106 = vmatmul.mubr.msk.f32.vlgmr.msra.gmra.mxu0 %vm532_vm2, %v12399_v16 }
0x6203   :  { %16114 = vmatpush3.xpose.msk.msra.mxu0 %vm532_vm2, %v12552_v55  ;;  %v16102_v39 = vpop.f32.mrf.mxu1  ;;  %16115 = vmatprep.mubr.msk.f32.mxu0 %vm16910_vm1, %v16909_v10 }
0x6204   :  { %16123 = vmatprep.subr.mxu0 %v16909_v10 }
0x6206   :  { %16116 = vmatmul.mubr.msk.f32.vlgmr.msra.gmra.mxu0 %vm532_vm2, %v12550_v24 }
0x6207   :  { %16125 = vmatprep.mubr.msk.f32.mxu0 %vm16910_vm1, %v16909_v10  ;;  %16124 = vmatpush3.msra.mxu0 %v18616_v48 }
0x6208   :  { %16133 = vmatprep.subr.mxu0 %v16909_v10 }
0x62b7   :  { %v12545_v28 = vpop.f32.mrf.mxu1 }
0x62b9   :  { %v16112_v19 = vpop.f32.mrf.mxu1 }
0x62c2   :  { %v12472_v54 = vpop.f32.mrf.mxu0 }
0x62c3   :  { %v12546_v57 = vadd.f32 %v12545_v28, %v12472_v54 }
0x62c4   :  { %v16107_v49 = vpop.f32.mrf.mxu0 }
0x62c6   :  { %v12623_v45 = vpop.f32.mrf.mxu0 }
0x62c7   :  { %v12627_v46 = vmul.f32 0.35355338, %v12623_v45 }
0x62c8   :  { %v16117_v25 = vpop.f32.mrf.mxu0 }
0x62c9   :  { %v12628_v53 = vadd.f32 %v18549_v9, %v12627_v46 }
0x62cb   :  { %v12629_v29 = vsel %vm532_vm2, %v12628_v53, -inf }
0x62cc   :  { %12630 = vmax.xlane.f32.xlu0 %v12629_v29 }
0x62e2   :  { %12642 = vrot.lane.b32.xlu0 %v18511_v7, %s16915_s10 }
0x62e6   :  { %12792 = vrot.lane.b32.xlu0 %v18535_v31, %s16916_s15 }
0x6355   :  { %v12631_v47 = vpop.xlane.xlu0 %12630 }
0x6356   :  { %v12632_v33 = vsub.f32 %v12628_v53, %v12631_v47 }
0x6358   :  { %v12633_v34 = vmul.f32 1.442695, %v12632_v33 }
0x6359   :  { %v12643_v35 = vpop.permute.xlu0 %12642 }
0x635a   :  { %16515 = vpow2.f32 %v12633_v34  ;;  %16119 = vmatpush3.msra.mxu1 %v12643_v35 }
0x635b   :  { %16128 = vmatprep.subr.mxu1 %v16909_v10 }
0x635d   :  { %v12793_v38 = vpop.permute.xlu0 %12792 }
0x6367   :  { %v16516_v4 = vpop.eup %16515 }
0x6368   :  { %v12635_v20 = vsel %vm532_vm2, %v16516_v4, 0.0 }
0x6369   :  { %12636 = vadd.xlane.f32.xlu1 %v12635_v20 }
0x637a   :  { %12794 = vrot.lane.b32.xlu1 %v18511_v7, %s16916_s15 }
0x63f2   :  { %v12637_v18 = vpop.xlane.xlu1 %12636 }
0x63f3   :  { %16517 = vrcp.f32 %v12637_v18 }
0x63f6   :  { %v12795_v2 = vpop.permute.xlu1 %12794 }
0x6400   :  { %v16518_v12 = vpop.eup %16517 }
0x6401   :  { %v12639_v31 = vmul.f32 %v16518_v12, %v16516_v4 }
0x6403   :  { %12641 = vst.msk [vmem:[#allocation23 + $0x10] sm:$0xff] %vm532_vm2, %v12639_v31  ;;  %16121 = vmatmul.mubr.msk.f32.vlgmr.msra.gmra.mxu1 %vm532_vm2, %v12639_v31 }
0x6404   :  { %16129 = vmatpush3.xpose.msk.msra.mxu1 %vm532_vm2, %v12795_v2  ;;  %16130 = vmatprep.mubr.msk.f32.mxu1 %vm16910_vm1, %v16909_v10 }
0x6405   :  { %16138 = vmatprep.subr.mxu1 %v16909_v10 }
0x6407   :  { %16131 = vmatmul.mubr.msk.f32.vlgmr.msra.gmra.mxu1 %vm532_vm2, %v12793_v38 }
0x6408   :  { %16140 = vmatprep.mubr.msk.f32.mxu1 %vm16910_vm1, %v16909_v10  ;;  %16139 = vmatpush3.msra.mxu1 %v18654_v42 }
0x6409   :  { %16148 = vmatprep.subr.mxu1 %v16909_v10 }
0x64c3   :  { %v12714_v40 = vpop.f32.mrf.mxu1 }
0x64c4   :  { %16126 = vmatmul.mubr.msk.f32.vlgmr.msra.gmra.mxu0 %vm532_vm2, %v12714_v40 }
0x64c5   :  { %v16122_v21 = vpop.f32.mrf.mxu1  ;;  %16135 = vmatprep.mubr.msk.f32.mxu0 %vm16910_vm1, %v16909_v10 }
0x64c7   :  { %v12866_v15 = vpop.f32.mrf.mxu1 }
0x64c8   :  { %v12870_v41 = vmul.f32 0.35355338, %v12866_v15 }
0x64c9   :  { %v16132_v44 = vpop.f32.mrf.mxu1 }
0x64ca   :  { %v12871_v60 = vadd.f32 %v18549_v9, %v12870_v41 }
0x64cc   :  { %v12872_v61 = vsel %vm532_vm2, %v12871_v60, -inf }
0x64cd   :  { %12873 = vmax.xlane.f32.xlu1 %v12872_v61 }
0x64de   :  { %13211 = vrot.lane.b32.xlu1 %v18507_v27, %s16911_s0 }
0x64e2   :  { %13209 = vrot.lane.b32.xlu1 %v18533_v37, %s16911_s0 }
0x6556   :  { %v12874_v52 = vpop.xlane.xlu1 %12873 }
0x6557   :  { %v12875_v59 = vsub.f32 %v12871_v60, %v12874_v52 }
0x6559   :  { %v12876_v32 = vmul.f32 1.442695, %v12875_v59 }
0x655a   :  { %v13212_v1 = vpop.permute.xlu1 %13211 }
0x655b   :  { %16519 = vpow2.f32 %v12876_v32 }
0x6568   :  { %v16520_v13 = vpop.eup %16519 }
0x6569   :  { %v12878_v26 = vsel %vm532_vm2, %v16520_v13, 0.0 }
0x656a   :  { %12879 = vadd.xlane.f32.xlu0 %v12878_v26 }
0x6580   :  { %12885 = vrot.lane.b32.xlu0 %v18511_v7, %s16917_s16  ;;  %v13210_v7 = vpop.permute.xlu1 %13209 }
0x6584   :  { %v12787_v9 = vpop.f32.mrf.mxu0 }
0x6585   :  { %v18632_v23 = vadd.f32 %v12787_v9, %v12546_v57 }
0x6586   :  { %v16127_v56 = vpop.f32.mrf.mxu0 }
0x65f3   :  { %v12880_v51 = vpop.xlane.xlu0 %12879 }
0x65f4   :  { %16521 = vrcp.f32 %v12880_v51 }
0x65f7   :  { %v12886_v58 = vpop.permute.xlu0 %12885 }
0x65f8   :  { %16134 = vmatpush3.msra.mxu0 %v12886_v58 }
0x65f9   :  { %16143 = vmatprep.subr.mxu0 %v16909_v10 }
0x6601   :  { %v16522_v62 = vpop.eup %16521 }
0x6602   :  { %v12882_v0 = vmul.f32 %v16522_v62, %v16520_v13 }
0x6604   :  { %12884 = vst.msk [vmem:[#allocation23 + $0x18] sm:$0xff] %vm532_vm2, %v12882_v0  ;;  %16136 = vmatmul.mubr.msk.f32.vlgmr.msra.gmra.mxu0 %vm532_vm2, %v12882_v0 }
0x6605   :  { %16144 = vmatpush3.xpose.msk.msra.mxu0 %vm532_vm2, %v18507_v27  ;;  %16145 = vmatprep.mubr.msk.f32.mxu0 %vm16910_vm1, %v16909_v10 }
0x6606   :  { %16153 = vmatprep.subr.mxu0 %v16909_v10 }
0x6608   :  { %16146 = vmatmul.mubr.msk.f32.vlgmr.msra.gmra.mxu0 %vm532_vm2, %v18533_v37 }
0x6609   :  { %16154 = vmatpush3.xpose.msk.msra.mxu0 %vm532_vm2, %v13212_v1  ;;  %16155 = vmatprep.mubr.msk.f32.mxu0 %vm16910_vm1, %v16909_v10 }
0x660a   :  { %16163 = vmatprep.subr.mxu0 %v16909_v10 }
0x660c   :  { %16156 = vmatmul.mubr.msk.f32.vlgmr.msra.gmra.mxu0 %vm532_vm2, %v13210_v7 }
0x660d   :  { %16164 = vmatpush3.msra.mxu0 %v18580_v30  ;;  %16165 = vmatprep.mubr.msk.f32.mxu0 %vm16910_vm1, %v16909_v10 }
0x660e   :  { %16173 = vmatprep.subr.mxu0 %v16909_v10 }
0x66c4   :  { %v12957_v43 = vpop.f32.mrf.mxu0 }
0x66c5   :  { %16141 = vmatmul.mubr.msk.f32.vlgmr.msra.gmra.mxu1 %vm532_vm2, %v12957_v43 }
0x66c6   :  { %v16137_v3 = vpop.f32.mrf.mxu0  ;;  %16150 = vmatprep.mubr.msk.f32.mxu1 %vm16910_vm1, %v16909_v10 }
0x66c8   :  { %v13114_v14 = vpop.f32.mrf.mxu0 }
0x66c9   :  { %v13118_v17 = vmul.f32 0.35355338, %v13114_v14 }
0x66ca   :  { %v16147_v5 = vpop.f32.mrf.mxu0 }
0x66cb   :  { %v13119_v6 = vadd.f32 %v18662_v63, %v13118_v17  ;;  %v14789_v17 = vld [vmem:[#allocation7 + $0x1] ss:$0 sm:$0xff] }
0x66cc   :  { %v13283_v30 = vpop.f32.mrf.mxu0 }
0x66cd   :  { %v13287_v11 = vmul.f32 0.35355338, %v13283_v30  ;;  %v13120_v50 = vsel %vm532_vm2, %v13119_v6, -inf }
0x66ce   :  { %13121 = vmax.xlane.f32.xlu0 %v13120_v50  ;;  %v16157_v16 = vpop.f32.mrf.mxu0 }
0x66cf   :  { %v13288_v55 = vadd.f32 %v18662_v63, %v13287_v11 }
0x66d1   :  { %v13289_v39 = vsel %vm532_vm2, %v13288_v55, -inf }
0x66d2   :  { %13290 = vmax.xlane.f32.xlu1 %v13289_v39 }
0x66e3   :  { %13133 = vrot.lane.b32.xlu1 %v18507_v27, %s16912_s11 }
0x66e7   :  { %13526 = vrot.lane.b32.xlu1 %v18507_v27, %s16914_s6 }
0x66eb   :  { %13524 = vrot.lane.b32.xlu1 %v18533_v37, %s16914_s6 }
0x6757   :  { %v13122_v24 = vpop.xlane.xlu0 %13121 }
0x6758   :  { %v13123_v28 = vsub.f32 %v13119_v6, %v13122_v24 }
0x675a   :  { %v13124_v19 = vmul.f32 1.442695, %v13123_v28 }
0x675b   :  { %v13291_v54 = vpop.xlane.xlu1 %13290 }
0x675c   :  { %16523 = vpow2.f32 %v13124_v19  ;;  %v13292_v57 = vsub.f32 %v13288_v55, %v13291_v54 }
0x675e   :  { %v13293_v49 = vmul.f32 1.442695, %v13292_v57 }
0x675f   :  { %v13134_v45 = vpop.permute.xlu1 %13133 }
0x6760   :  { %16525 = vpow2.f32 %v13293_v49  ;;  %16149 = vmatpush3.msra.mxu1 %v13134_v45 }
0x6761   :  { %16158 = vmatprep.subr.mxu1 %v16909_v10 }
0x6763   :  { %v13527_v40 = vpop.permute.xlu1 %13526 }
0x6769   :  { %v16524_v46 = vpop.eup %16523 }
0x676a   :  { %v13126_v25 = vsel %vm532_vm2, %v16524_v46, 0.0 }
0x676b   :  { %13127 = vadd.xlane.f32.xlu0 %v13126_v25 }
0x676d   :  { %v16526_v53 = vpop.eup %16525 }
0x676e   :  { %v13295_v29 = vsel %vm532_vm2, %v16526_v53, 0.0 }
0x676f   :  { %13296 = vadd.xlane.f32.xlu0 %v13295_v29 }
0x6785   :  { %v13030_v47 = vpop.f32.mrf.mxu1  ;;  %13302 = vrot.lane.b32.xlu0 %v18507_v27, %s16913_s4 }
0x6786   :  { %v18680_v33 = vadd.f32 %v13030_v47, %v18632_v23 }
0x6787   :  { %v16142_v34 = vpop.f32.mrf.mxu1 }
0x6788   :  { %v13041_v30 = vadd.f32 %v14789_v17, %v18680_v33 }
0x678a   :  { %v14011_v55 = vadd.f32 %v13041_v30, %v18515_v22  ;;  %v14812_v30 = vld [vmem:[%s18855_s19 + $0x40] sm:$0xff] }
0x678c   :  { %v14017_v39 = vsel %vm369_vm0, %v14011_v55, 0.0 }
0x67f4   :  { %v13128_v35 = vpop.xlane.xlu0 %13127 }
0x67f5   :  { %16527 = vrcp.f32 %v13128_v35 }
0x67f8   :  { %v13297_v4 = vpop.xlane.xlu0 %13296 }
0x67f9   :  { %16529 = vrcp.f32 %v13297_v4 }
0x67fc   :  { %v13303_v12 = vpop.permute.xlu0 %13302 }
0x6802   :  { %v16528_v20 = vpop.eup %16527 }
0x6803   :  { %v13130_v18 = vmul.f32 %v16528_v20, %v16524_v46 }
0x6805   :  { %13132 = vst.msk [vmem:[#allocation23 + $0x20] sm:$0xff] %vm532_vm2, %v13130_v18  ;;  %16151 = vmatmul.mubr.msk.f32.vlgmr.msra.gmra.mxu1 %vm532_vm2, %v13130_v18 }
0x6806   :  { %v16530_v31 = vpop.eup %16529  ;;  %16159 = vmatpush3.msra.mxu1 %v13303_v12  ;;  %16160 = vmatprep.mubr.msk.f32.mxu1 %vm16910_vm1, %v16909_v10 }
0x6807   :  { %v13299_v2 = vmul.f32 %v16530_v31, %v16526_v53  ;;  %16168 = vmatprep.subr.mxu1 %v16909_v10 }
0x6809   :  { %13301 = vst.msk [vmem:[#allocation23 + $0x28] sm:$0xff] %vm532_vm2, %v13299_v2  ;;  %16161 = vmatmul.mubr.msk.f32.vlgmr.msra.gmra.mxu1 %vm532_vm2, %v13299_v2 }
0x680a   :  { %16169 = vmatpush3.msra.mxu1 %v18576_v8  ;;  %16170 = vmatprep.mubr.msk.f32.mxu1 %vm16910_vm1, %v16909_v10  ;;  %v13525_v8 = vpop.permute.xlu1 %13524 }
0x680b   :  { %16178 = vmatprep.subr.mxu1 %v16909_v10 }
0x68c5   :  { %v13205_v38 = vpop.f32.mrf.mxu1 }
0x68c6   :  { %16171 = vmatmul.mubr.msk.f32.vlgmr.msra.gmra.mxu1 %vm532_vm2, %v13205_v38 }
0x68c7   :  { %v16152_v21 = vpop.f32.mrf.mxu1  ;;  %16180 = vmatprep.mubr.msk.f32.mxu1 %vm16910_vm1, %v16909_v10 }
0x68c9   :  { %v13374_v15 = vpop.f32.mrf.mxu1 }
0x68ca   :  { %16166 = vmatmul.mubr.msk.f32.vlgmr.msra.gmra.mxu0 %vm532_vm2, %v13374_v15 }
0x68cb   :  { %16174 = vmatpush3.xpose.msk.msra.mxu0 %vm532_vm2, %v13527_v40  ;;  %v16162_v41 = vpop.f32.mrf.mxu1  ;;  %16175 = vmatprep.mubr.msk.f32.mxu0 %vm16910_vm1, %v16909_v10 }
0x68cc   :  { %16183 = vmatprep.subr.mxu0 %v16909_v10 }
0x68ce   :  { %16176 = vmatmul.mubr.msk.f32.vlgmr.msra.gmra.mxu0 %vm532_vm2, %v13525_v8 }
0x68cf   :  { %16184 = vmatpush3.msra.mxu0 %v18616_v48  ;;  %16185 = vmatprep.mubr.msk.f32.mxu0 %vm16910_vm1, %v16909_v10 }
0x68d0   :  { %16193 = vmatprep.subr.mxu0 %v16909_v10 }
0x6986   :  { %v13520_v44 = vpop.f32.mrf.mxu1 }
0x6988   :  { %v16172_v60 = vpop.f32.mrf.mxu1 }
0x698a   :  { %v13447_v61 = vpop.f32.mrf.mxu0 }
0x698b   :  { %v13521_v52 = vadd.f32 %v13520_v44, %v13447_v61  ;;  %v14806_v61 = vld [vmem:[#allocation11 + $0x1] ss:$0 sm:$0xff] }
0x698c   :  { %v16167_v59 = vpop.f32.mrf.mxu0 }
0x698d   :  { %v14807_v59 = vld [vmem:[#allocation13 + $0x1] ss:$0 sm:$0xff] }
0x698e   :  { %v13598_v32 = vpop.f32.mrf.mxu0 }
0x698f   :  { %v13602_v13 = vmul.f32 0.35355338, %v13598_v32 }
0x6990   :  { %v16177_v26 = vpop.f32.mrf.mxu0 }
0x6991   :  { %v13603_v9 = vadd.f32 %v18662_v63, %v13602_v13  ;;  %v14811_v26 = vld [vmem:[%s18854_s18 + $0x38] sm:$0xff] }
0x6993   :  { %v13604_v23 = vsel %vm532_vm2, %v13603_v9, -inf }
0x6994   :  { %13605 = vmax.xlane.f32.xlu0 %v13604_v23  ;;  %v14809_v23 = vld [vmem:[%s18854_s18 + $0x28] sm:$0xff] }
0x69aa   :  { %13617 = vrot.lane.b32.xlu0 %v18507_v27, %s16915_s10 }
0x69ae   :  { %13767 = vrot.lane.b32.xlu0 %v18533_v37, %s16916_s15 }
0x6a1d   :  { %v13606_v48 = vpop.xlane.xlu0 %13605 }
0x6a1e   :  { %v13607_v56 = vsub.f32 %v13603_v9, %v13606_v48  ;;  %v14810_v9 = vld [vmem:[%s18854_s18 + $0x30] sm:$0xff]  ;;  %v14808_v48 = vld [vmem:[%s18854_s18 + $0x20] sm:$0xff] }
0x6a20   :  { %v13608_v51 = vmul.f32 1.442695, %v13607_v56  ;;  %v14819_v56 = vld [vmem:[%s18855_s19 + $0x78] sm:$0xff] }
0x6a21   :  { %v13618_v58 = vpop.permute.xlu0 %13617 }
0x6a22   :  { %16531 = vpow2.f32 %v13608_v51  ;;  %16179 = vmatpush3.msra.mxu1 %v13618_v58  ;;  %v14818_v51 = vld [vmem:[%s18855_s19 + $0x70] sm:$0xff]  ;;  %v14817_v58 = vld [vmem:[%s18855_s19 + $0x68] sm:$0xff] }
0x6a23   :  { %16188 = vmatprep.subr.mxu1 %v16909_v10 }
0x6a25   :  { %v13768_v3 = vpop.permute.xlu0 %13767 }
0x6a2f   :  { %v16532_v62 = vpop.eup %16531 }
0x6a30   :  { %v13610_v0 = vsel %vm532_vm2, %v16532_v62, 0.0 }
0x6a31   :  { %13611 = vadd.xlane.f32.xlu1 %v13610_v0 }
0x6a42   :  { %13769 = vrot.lane.b32.xlu1 %v18507_v27, %s16916_s15 }
0x6aba   :  { %v13612_v1 = vpop.xlane.xlu1 %13611 }
0x6abb   :  { %16533 = vrcp.f32 %v13612_v1 }
0x6abe   :  { %v13770_v37 = vpop.permute.xlu1 %13769 }
0x6ac8   :  { %v16534_v7 = vpop.eup %16533 }
0x6ac9   :  { %v13614_v43 = vmul.f32 %v16534_v7, %v16532_v62  ;;  %v14816_v62 = vld [vmem:[%s18855_s19 + $0x60] sm:$0xff] }
0x6acb   :  { %13616 = vst.msk [vmem:[#allocation23 + $0x30] sm:$0xff] %vm532_vm2, %v13614_v43  ;;  %16181 = vmatmul.mubr.msk.f32.vlgmr.msra.gmra.mxu1 %vm532_vm2, %v13614_v43 }
0x6acc   :  { %16189 = vmatpush3.xpose.msk.msra.mxu1 %vm532_vm2, %v13770_v37  ;;  %16190 = vmatprep.mubr.msk.f32.mxu1 %vm16910_vm1, %v16909_v10 }
0x6acd   :  { %16198 = vmatprep.subr.mxu1 %v16909_v10 }
0x6acf   :  { %16191 = vmatmul.mubr.msk.f32.vlgmr.msra.gmra.mxu1 %vm532_vm2, %v13768_v3 }
0x6ad0   :  { %16199 = vmatpush3.msra.mxu1 %v18654_v42  ;;  %16200 = vmatprep.mubr.msk.f32.mxu1 %vm16910_vm1, %v16909_v10 }
0x6ad1   :  { %16214 = vmatprep.subr.mxu1 %v14819_v56 }
0x6b8b   :  { %v13689_v14 = vpop.f32.mrf.mxu1 }
0x6b8c   :  { %16186 = vmatmul.mubr.msk.f32.vlgmr.msra.gmra.mxu0 %vm532_vm2, %v13689_v14 }
0x6b8d   :  { %v16182_v5 = vpop.f32.mrf.mxu1  ;;  %16195 = vmatprep.mubr.msk.f32.mxu0 %vm16910_vm1, %v16909_v10 }
0x6b8e   :  { %v14814_v5 = vld [vmem:[%s18855_s19 + $0x50] sm:$0xff] }
0x6b8f   :  { %v13841_v6 = vpop.f32.mrf.mxu1 }
0x6b90   :  { %v13845_v11 = vmul.f32 0.35355338, %v13841_v6  ;;  %v14813_v6 = vld [vmem:[%s18855_s19 + $0x48] sm:$0xff] }
0x6b91   :  { %v16192_v50 = vpop.f32.mrf.mxu1 }
0x6b92   :  { %v13846_v16 = vadd.f32 %v18662_v63, %v13845_v11  ;;  %v14820_v11 = vld [vmem:[#allocation17 + $0x1] ss:$0 sm:$0xff] }
0x6b94   :  { %v13847_v42 = vsel %vm532_vm2, %v13846_v16, -inf }
0x6b95   :  { %13848 = vmax.xlane.f32.xlu1 %v13847_v42 }
0x6b99   :  { %14018 = vadd.xlane.f32.xlu1 %v14017_v39 }
0x6c1e   :  { %v13849_v24 = vpop.xlane.xlu1 %13848 }
0x6c1f   :  { %v13850_v28 = vsub.f32 %v13846_v16, %v13849_v24 }
0x6c21   :  { %v13851_v19 = vmul.f32 1.442695, %v13850_v28 }
0x6c22   :  { %v14019_v47 = vpop.xlane.xlu1 %14018 }
0x6c23   :  { %16535 = vpow2.f32 %v13851_v19  ;;  %v14023_v33 = vmul.f32 0.03125, %v14019_v47  ;;  %v14823_v19 = vld [vmem:[#allocation19 + $0x1] ss:$0 sm:$0xff] }
0x6c25   :  { %v14025_v4 = vsub.f32 %v14011_v55, %v14023_v33 }
0x6c27   :  { %v14027_v31 = vmul.f32 %v14025_v4, %v14025_v4 }
0x6c29   :  { %v14029_v2 = vsel %vm369_vm0, %v14027_v31, 0.0  ;;  %v14301_v31 = vld [vmem:[%s17135_s24] sm:$0xff] }
0x6c30   :  { %v16536_v10 = vpop.eup %16535 }
0x6c31   :  { %v13853_v54 = vsel %vm532_vm2, %v16536_v10, 0.0 }
0x6c32   :  { %13854 = vadd.xlane.f32.xlu0 %v13853_v54 }
0x6c48   :  { %13860 = vrot.lane.b32.xlu0 %v18507_v27, %s16917_s16 }
0x6c4c   :  { %v13762_v63 = vpop.f32.mrf.mxu0 }
0x6c4d   :  { %v13766_v57 = vadd.f32 %v13762_v63, %v13521_v52 }
0x6c4e   :  { %v16187_v49 = vpop.f32.mrf.mxu0 }
0x6cbb   :  { %v13855_v45 = vpop.xlane.xlu0 %13854 }
0x6cbc   :  { %16537 = vrcp.f32 %v13855_v45 }
0x6cbf   :  { %v13861_v22 = vpop.permute.xlu0 %13860 }
0x6cc0   :  { %16194 = vmatpush3.msra.mxu0 %v13861_v22 }
0x6cc1   :  { %16203 = vmatprep.subr.mxu0 %v14811_v26 }
0x6cc9   :  { %v16538_v46 = vpop.eup %16537 }
0x6cca   :  { %v13857_v25 = vmul.f32 %v16538_v46, %v16536_v10 }
0x6ccc   :  { %13859 = vst.msk [vmem:[#allocation23 + $0x38] sm:$0xff] %vm532_vm2, %v13857_v25  ;;  %16196 = vmatmul.mubr.msk.f32.vlgmr.msra.gmra.mxu0 %vm532_vm2, %v13857_v25 }
0x6ccd   :  { %16204 = vmatpush3.msra.mxu0 %v14811_v26 }
0x6cce   :  { %16205 = vmatprep.subr.mxu0 %v14810_v9 }
0x6ccf   :  { %16206 = vmatpush3.msra.mxu0 %v14810_v9 }
0x6cd0   :  { %16207 = vmatprep.subr.mxu0 %v14809_v23 }
0x6cd1   :  { %16208 = vmatpush3.msra.mxu0 %v14809_v23 }
0x6cd2   :  { %16209 = vmatprep.subr.mxu0 %v14808_v48 }
0x6cd3   :  { %16210 = vmatpush3.msra.mxu0 %v14808_v48 }
0x6d8c   :  { %v13932_v53 = vpop.f32.mrf.mxu0 }
0x6d8d   :  { %16201 = vmatmul.mubr.msk.f32.vlgmr.msra.gmra.mxu1 %vm532_vm2, %v13932_v53 }
0x6d8e   :  { %v16197_v29 = vpop.f32.mrf.mxu0  ;;  %16215 = vmatpush3.msra.mxu1 %v14819_v56 }
0x6d8f   :  { %16216 = vmatprep.subr.mxu1 %v14818_v51 }
0x6d90   :  { %16217 = vmatpush3.msra.mxu1 %v14818_v51 }
0x6d91   :  { %16218 = vmatprep.subr.mxu1 %v14817_v58 }
0x6d92   :  { %16219 = vmatpush3.msra.mxu1 %v14817_v58 }
0x6d93   :  { %16220 = vmatprep.subr.mxu1 %v14816_v62 }
0x6d94   :  { %16221 = vmatpush3.msra.mxu1 %v14816_v62 }
0x6e4d   :  { %v14005_v27 = vpop.f32.mrf.mxu1 }
0x6e4e   :  { %v14009_v34 = vadd.f32 %v14005_v27, %v13766_v57 }
0x6e4f   :  { %v16202_v35 = vpop.f32.mrf.mxu1 }
0x6e50   :  { %v14010_v20 = vadd.f32 %v14789_v17, %v14009_v34  ;;  %v14815_v17 = vld [vmem:[%s18855_s19 + $0x58] sm:$0xff] }
0x6e51   :  { %16222 = vmatprep.subr.mxu1 %v14815_v17 }
0x6e52   :  { %v14012_v18 = vadd.f32 %v14010_v20, %v18524_v36  ;;  %16223 = vmatpush3.msra.mxu1 %v14815_v17  ;;  %v14304_v20 = vld [vmem:[%s17135_s24 + $0x18] sm:$0xff] }
0x6e53   :  { %16224 = vmatprep.subr.mxu1 %v14814_v5  ;;  %16233 = vmatprep.subr.mxu0 %v14304_v20 }
0x6e54   :  { %v14020_v12 = vsel %vm369_vm0, %v14012_v18, 0.0  ;;  %16225 = vmatpush3.msra.mxu1 %v14814_v5 }
0x6e55   :  { %14021 = vadd.xlane.f32.xlu1 %v14020_v12  ;;  %16226 = vmatprep.subr.mxu1 %v14813_v6  ;;  %v14302_v12 = vld [vmem:[%s17135_s24 + $0x8] sm:$0xff] }
0x6e56   :  { %16227 = vmatpush3.msra.mxu1 %v14813_v6 }
0x6e57   :  { %16228 = vmatprep.subr.mxu1 %v14812_v30 }
0x6e58   :  { %16229 = vmatpush3.msra.mxu1 %v14812_v30 }
0x6e59   :  { %14030 = vadd.xlane.f32.xlu1 %v14029_v2 }
0x6ede   :  { %v14022_v38 = vpop.xlane.xlu1 %14021 }
0x6edf   :  { %v14024_v40 = vmul.f32 0.03125, %v14022_v38 }
0x6ee1   :  { %v14026_v21 = vsub.f32 %v14012_v18, %v14024_v40  ;;  %v14303_v18 = vld [vmem:[%s17135_s24 + $0x10] sm:$0xff]  ;;  %s16918_s24 = smov [#allocation23]  }
0x6ee2   :  { %v14031_v15 = vpop.xlane.xlu1 %14030  ;;  %s14412_s0 = sshll.u32 %s16918_s24, 4  ;;  %s14413_s0 = int_to_ptr.vmem [resolvable:$true] %s14412_s0 }
0x6ee3   :  { %v14035_v41 = vmul.f32 0.03125, %v14031_v15  ;;  %v14028_v8 = vmul.f32 %v14026_v21, %v14026_v21  ;;  %s16793_s11 = scalar_lea.vmem %s14413_s0, 1024  ;;  %p16798_p5 = scmp.lt.s32.totalorder %s14413_s0, %s14413_s0 }
0x6ee4   :  { %p16794_p4 = scmp.ne.s32.totalorder %s14413_s0, %s16793_s11  ;;  %p16799_p6 = scmp.lt.s32.totalorder %s16793_s11, %s16793_s11 }
0x6ee5   :  { %v14037_v44 = vadd.f32 1e-05, %v14035_v41  ;;  %v14032_v60 = vsel %vm369_vm0, %v14028_v8, 0.0 }
0x6ee6   :  { %14033 = vadd.xlane.f32.xlu1 %v14032_v60  ;;  %p16800_p7 = por %p16799_p6, %p16798_p5 }
0x6ee7   :  { %16539 = vrsqrt.f32 %v14037_v44  ;;  %v14826_v44 = vld [vmem:[#allocation14 + $0x1] ss:$0 sm:$0xff] }
0x6ee8   :  { %p16801_p8 = pnand %p16800_p7, %p16794_p4 }
0x6ef4   :  { %v16540_v36 = vpop.eup %16539 }
0x6ef5   :  { %v14041_v52 = vmul.f32 %v16540_v36, %v14025_v4  ;;  %v14827_v36 = vld [vmem:[#allocation16 + $0x1] ss:$0 sm:$0xff] }
0x6ef7   :  { %v14049_v32 = vmul.f32 %v14806_v61, %v14041_v52 }
0x6ef9   :  { %v14057_v13 = vadd.f32 %v14807_v59, %v14049_v32 }
0x6efb   :  { %16211 = vmatprep.mubr.msk.f32.mxu0 %vm369_vm0, %v14057_v13 }
0x6f6f   :  { %v14034_v0 = vpop.xlane.xlu1 %14033 }
0x6f70   :  { %v14036_v1 = vmul.f32 0.03125, %v14034_v0 }
0x6f72   :  { %v14038_v7 = vadd.f32 1e-05, %v14036_v1 }
0x6f74   :  { %16541 = vrsqrt.f32 %v14038_v7 }
0x6f81   :  { %v16542_v43 = vpop.eup %16541 }
0x6f82   :  { %v14042_v37 = vmul.f32 %v16542_v43, %v14026_v21 }
0x6f84   :  { %v14050_v3 = vmul.f32 %v14806_v61, %v14042_v37 }
0x6f86   :  { %v14058_v14 = vadd.f32 %v14807_v59, %v14050_v3 }
0x6f88   :  { %16212 = vmatmul.mubr.msk.f32.vlgmr.msra.gmra.mxu0 %vm369_vm0, %v14058_v14 }
0x6f89   :  { %16234 = vmatpush3.msra.mxu0 %v14304_v20 }
0x6f8a   :  { %16235 = vmatprep.subr.mxu0 %v14303_v18 }
0x6f8b   :  { %16236 = vmatpush3.msra.mxu0 %v14303_v18 }
0x6f8c   :  { %16237 = vmatprep.subr.mxu0 %v14302_v12 }
0x6f8d   :  { %16238 = vmatpush3.msra.mxu0 %v14302_v12 }
0x6f8e   :  { %16239 = vmatprep.subr.mxu0 %v14301_v31 }
0x6f8f   :  { %16240 = vmatpush3.msra.mxu0 %v14301_v31 }
0x7048   :  { %v16213_v50 = vpop.f32.mrf.mxu0 }
0x7049   :  { %v14161_v16 = vadd.f32 %v16213_v50, %v14820_v11 }
0x704a   :  { %v14155_v42 = vpop.f32.mrf.mxu0 }
0x704b   :  { %v14156_v55 = vadd.f32 %v14820_v11, %v14155_v42  ;;  %v14165_v24 = vmax.f32 %v14161_v16, 0.0 }
0x704d   :  { %v14164_v39 = vmax.f32 %v14156_v55, 0.0 }
0x704f   :  { %16230 = vmatprep.mubr.msk.f32.mxu1 %vm2617_vm3, %v14164_v39 }
0x7050   :  { %16231 = vmatmul.mubr.msk.f32.vlgmr.msra.gmra.mxu1 %vm2617_vm3, %v14165_v24 }
0x7110   :  { %v16232_v28 = vpop.f32.mrf.mxu1 }
0x7111   :  { %v14250_v54 = vadd.f32 %v16232_v28, %v14823_v19 }
0x7112   :  { %v14244_v10 = vpop.f32.mrf.mxu1 }
0x7113   :  { %v14245_v63 = vadd.f32 %v14823_v19, %v14244_v10  ;;  %v14254_v49 = vadd.f32 %v14250_v54, %v14058_v14 }
0x7115   :  { %v14253_v57 = vadd.f32 %v14245_v63, %v14057_v13  ;;  %v14262_v22 = vsel %vm369_vm0, %v14254_v49, 0.0 }
0x7117   :  { %v14259_v45 = vsel %vm369_vm0, %v14253_v57, 0.0 }
0x7118   :  { %14260 = vadd.xlane.f32.xlu1 %v14259_v45 }
0x711c   :  { %14263 = vadd.xlane.f32.xlu1 %v14262_v22 }
0x71a1   :  { %v14261_v46 = vpop.xlane.xlu1 %14260 }
0x71a2   :  { %v14265_v25 = vmul.f32 0.03125, %v14261_v46 }
0x71a4   :  { %v14267_v53 = vsub.f32 %v14253_v57, %v14265_v25 }
0x71a5   :  { %v14264_v29 = vpop.xlane.xlu1 %14263 }
0x71a6   :  { %v14266_v47 = vmul.f32 0.03125, %v14264_v29  ;;  %v14269_v33 = vmul.f32 %v14267_v53, %v14267_v53 }
0x71a8   :  { %v14268_v27 = vsub.f32 %v14254_v49, %v14266_v47  ;;  %v14271_v34 = vsel %vm369_vm0, %v14269_v33, 0.0 }
0x71a9   :  { %14272 = vadd.xlane.f32.xlu0 %v14271_v34 }
0x71aa   :  { %v14270_v35 = vmul.f32 %v14268_v27, %v14268_v27 }
0x71ac   :  { %v14274_v4 = vsel %vm369_vm0, %v14270_v35, 0.0 }
0x71ad   :  { %14275 = vadd.xlane.f32.xlu1 %v14274_v4 }
0x7232   :  { %v14273_v2 = vpop.xlane.xlu0 %14272 }
0x7233   :  { %v14277_v38 = vmul.f32 0.03125, %v14273_v2 }
0x7235   :  { %v14279_v40 = vadd.f32 1e-05, %v14277_v38 }
0x7236   :  { %v14276_v21 = vpop.xlane.xlu1 %14275 }
0x7237   :  { %16543 = vrsqrt.f32 %v14279_v40  ;;  %v14278_v15 = vmul.f32 0.03125, %v14276_v21 }
0x7239   :  { %v14280_v41 = vadd.f32 1e-05, %v14278_v15 }
0x723b   :  { %16545 = vrsqrt.f32 %v14280_v41 }
0x7244   :  { %v16544_v8 = vpop.eup %16543 }
0x7245   :  { %v14283_v60 = vmul.f32 %v16544_v8, %v14267_v53 }
0x7247   :  { %v14291_v61 = vmul.f32 %v14826_v44, %v14283_v60 }
0x7248   :  { %v16546_v52 = vpop.eup %16545 }
0x7249   :  { %v14284_v59 = vmul.f32 %v16546_v52, %v14268_v27  ;;  %v14299_v32 = vadd.f32 %v14827_v36, %v14291_v61 }
0x724b   :  { %v14292_v13 = vmul.f32 %v14826_v44, %v14284_v59  ;;  %16241 = vmatprep.mubr.msk.f32.mxu0 %vm369_vm0, %v14299_v32 }
0x724d   :  { %v14300_v26 = vadd.f32 %v14827_v36, %v14292_v13 }
0x724f   :  { %16242 = vmatmul.mubr.msk.f32.vlgmr.msra.gmra.mxu0 %vm369_vm0, %v14300_v26 }
0x7250   :  { %16804 = shalt.err (!%p16801_p8)
}
0x7251   :  { %s16919_s4 = smov 128   ;;  %s16920_s6 = smov 8   ;;  %v14828_v9 = vld [vmem:[#allocation20] ss:$0 sm:$0xff] }
0x7252   :  { %14418 = dma.vmem_to_hbm [thread:$0]  %s14413_s0, 1024, %s17150_s8, [#allocation24], %s16919_s4, %s16919_s4, %s16920_s6  }
0x7253   :  { %s16921_s10 = smov [#allocation22]  }
0x7254   :  { %s14400_s15 = sshll.u32 %s16921_s10, 4  ;;  %s14401_s15 = int_to_ptr.vmem [resolvable:$true] %s14400_s15 }
0x7255   :  { %s16813_s16 = scalar_lea.vmem %s14401_s15, 256  ;;  %p16818_p10 = scmp.lt.s32.totalorder %s14401_s15, %s14401_s15 }
0x7256   :  { %p16814_p9 = scmp.ne.s32.totalorder %s14401_s15, %s16813_s16  ;;  %p16819_p11 = scmp.lt.s32.totalorder %s16813_s16, %s16813_s16 }
0x7258   :  { %p16820_p12 = por %p16819_p11, %p16818_p10 }
0x725a   :  { %p16821_p13 = pnand %p16820_p12, %p16814_p9 }
0x730f   :  { %v16243_v23 = vpop.f32.mrf.mxu0 }
0x7310   :  { %v14390_v48 = vadd.f32 %v16243_v23, %v14828_v9 }
0x7311   :  { %v14384_v56 = vpop.f32.mrf.mxu0 }
0x7312   :  { %14394 = vst.msk [vmem:[#allocation22 + $0x8] sm:$0xff] %vm369_vm0, %v14390_v48  ;;  %v14385_v51 = vadd.f32 %v14828_v9, %v14384_v56 }
0x7314   :  { %14393 = vst.msk [vmem:[#allocation22] sm:$0xff] %vm369_vm0, %v14385_v51 }
0x7315   :  { %16824 = shalt.err (!%p16821_p13)
}
0x7316   :  { %14406 = dma.vmem_to_hbm [thread:$0]  %s14401_s15, 256, %s17145_s14, [#allocation4], %s16919_s4, %s16919_s4, %s16920_s6  }
0x7317   :  { %16847 = dma.done.wait [#allocation4], 256  }
0x7318   :  { %16848 = vsyncadd [#allocation4], 4294967040 }
0x7319   :  { %16849 = dma.done.wait [#allocation24], 1024  }
0x731a   :  { %16850 = vsyncadd [#allocation24], 4294966272 }
0x731b   :  { %14425 = vsyncpa [#allocation3], 1 }
0x731c   :  { %14426 = vsyncpa [#allocation6], 1 }
0x731d   :  { %14427 = vsyncpa [#allocation9], 1 }
0x731e   :  { %14428 = vsyncpa [#allocation12], 1 }
0x731f   :  { %14429 = vsyncpa [#allocation15], 1 }
0x7320   :  { %14430 = vsyncpa [#allocation18], 1 }
0x7321   :  { %14431 = vsyncpa [#allocation21], 1 }
0x7322   :  { %14432 = vsyncpa [#allocation4], 1 }
0x7323   :  { %14433 = vsyncpa [#allocation24], 1 }

</bundles_post_ra>
